<compile_context>
chip_gen: v7x
topology: tpu7x:2x2x1
jax: 0.10.0
libtpu: 0.0.40
codegen_flags: <defaults>
</compile_context>

<pallas_src>
import functools

import jax
import jax.numpy as jnp
import numpy as np
from jax import lax
from jax.experimental import pallas as pl
from jax.experimental.pallas import tpu as pltpu

DROPCONNECT = 0.1   # PfnUnit default
NEG_BIG = -1e30     # "minus infinity" for padded cumsoftmax lanes
LANE = 128
SUBLANE = 8


def _round_up(x, m):
    return (x + m - 1) // m * m


# ---------------------------------------------------------------------------
# Pallas kernel: one grid step == TT time steps of the recurrence for one
# batch block.  Grid = (batch_blocks [parallel], time_blocks [arbitrary]).
# ---------------------------------------------------------------------------
def _pfn_block_kernel(x_ref, win_ref, bfold_ref, wh_ref, wt_ref, bt_ref,
                      triu_ref, out_ref, h_st, c_st, *, tt, hp):
    t = pl.program_id(1)   # time-block index (batch-block index is axis 0)

    # hidden_init: zero state at the first time block of each batch block.
    @pl.when(t == 0)
    def _():
        h_st[...] = jnp.zeros_like(h_st)
        c_st[...] = jnp.zeros_like(c_st)

    bp = h_st.shape[0]
    win = win_ref[...]      # (Dp, 5Hp)  input transform
    wh = wh_ref[...]        # (Hp, 5Hp)  eval-scaled hidden transform
    wt = wt_ref[...]        # (3Hp, Hp)  output transform, rows in [ner,re,share] order
    triu = triu_ref[...]    # (Hp, Hp)   shared upper-triangular cumsum matrix

    # Hoist loop-invariant bias broadcasts out of the unrolled step loop.
    bfold = jnp.broadcast_to(bfold_ref[...], (bp, 5 * hp))   # b_in + b_h (folded)
    bt = jnp.broadcast_to(bt_ref[...], (bp, hp))

    def step(s, carry):
        h_in, c_in = carry
        # gates = x @ W_in^T + (b_in + b_h) + h @ (0.9 * W_h)^T
        gates = (jnp.dot(x_ref[s], win, preferred_element_type=jnp.float32)
                 + bfold
                 + jnp.dot(h_in, wh, preferred_element_type=jnp.float32))

        c = jnp.tanh(gates[:, :hp])

        # Four cumsoftmax gates, each via the shared (Hp,Hp) triu matmul.
        # The softmax denominator is the last lane of the inclusive cumsum.
        cs = []
        for g in range(4):
            zg = gates[:, (1 + g) * hp:(2 + g) * hp]
            zg = zg - jnp.max(zg, axis=-1, keepdims=True)   # per-group stabilizer
            eg = jnp.exp(zg)
            csum = jnp.dot(eg, triu, preferred_element_type=jnp.float32)
            denom = csum[:, hp - 1:hp]                       # (Bp, 1) total sum
            r = pl.reciprocal(denom, approx=True)
            r = r * (2.0 - denom * r)                        # one Newton step
            cs.append(csum * r)                              # cumsoftmax

        eg_cin = 1.0 - cs[0]
        rg_cin = cs[1]
        eg_c = 1.0 - cs[2]
        rg_c = cs[3]

        overlap_c = rg_c * eg_c
        upper_c = rg_c - overlap_c
        downer_c = eg_c - overlap_c
        overlap_cin = rg_cin * eg_cin
        upper_cin = rg_cin - overlap_cin
        downer_cin = eg_cin - overlap_cin

        share = overlap_cin * c_in + overlap_c * c
        c_re = upper_cin * c_in + upper_c * c + share
        c_ner = downer_cin * c_in + downer_c * c + share
        c_share = share

        # Lane-dense [h_ner | h_re | h_share] slab: one tanh, one store.
        c_cat = jnp.concatenate([c_ner, c_re, c_share], axis=-1)   # (Bp, 3Hp)
        out_ref[s] = jnp.tanh(c_cat)

        # Single fused output-transform matmul (W_t rows pre-permuted to match
        # the [ner, re, share] concatenation order).
        c_out = jnp.dot(c_cat, wt, preferred_element_type=jnp.float32) + bt
        h_out = jnp.tanh(c_out)
        return h_out, c_out

    h_fin, c_fin = lax.fori_loop(0, tt, step, (h_st[...], c_st[...]),
                                 unroll=min(tt, 8))

    # carry recurrent state to the next time block
    h_st[...] = h_fin
    c_st[...] = c_fin


# ---------------------------------------------------------------------------
# Wrapper
# ---------------------------------------------------------------------------
@functools.partial(jax.jit, static_argnames=("time_block",))
def pfn_encoder_pallas(features, w_in, b_in, w_h, b_h, w_t, b_t, *, time_block=16):
    """features: (T, B, D) float32.
    w_in: (5H, D), b_in: (5H,), w_h: (5H, H), b_h: (5H,),
    w_t: (H, 3H), b_t: (H,)  -- PyTorch nn.Linear layout (out, in).
    """
    T, B, D = features.shape
    H = w_h.shape[1]
    Hp = _round_up(H, LANE)        # lane-aligned hidden size (per gate group)
    Dp = _round_up(D, SUBLANE)     # sublane-aligned input size
    TT = max(1, min(time_block, T))
    Tp = _round_up(T, TT)

    # Batch blocking: two blocks when batch is large enough so the "parallel"
    # grid axis can be sharded across the 2 TensorCores of a v7x chip; a
    # single block on 1-TC chips / small batch.
    n_b = 2 if B >= 2 * SUBLANE else 1
    Bblk = _round_up(-(-B // n_b), SUBLANE)
    Bp = n_b * Bblk

    f32 = jnp.float32
    w_in = w_in.astype(f32)
    b_in = b_in.astype(f32)
    w_h = w_h.astype(f32)
    b_h = b_h.astype(f32)
    w_t = w_t.astype(f32)
    b_t = b_t.astype(f32)

    # --- padded, gate-blocked weight layouts --------------------------------
    # Input transform (Dp, 5Hp); per-gate column blocks padded to Hp with zeros.
    win_g = w_in.reshape(5, H, D)
    win_T = jnp.concatenate(
        [jnp.pad(win_g[g].T, ((0, Dp - D), (0, Hp - H))) for g in range(5)], axis=1)

    # Folded bias (b_in + b_h).  Cumsoftmax gate groups get NEG_BIG on padded
    # lanes so exp(pad) == 0 and padding never perturbs the softmax/cumsum.
    b_g = (b_in + b_h).reshape(5, H)
    pad_vals = (0.0, NEG_BIG, NEG_BIG, NEG_BIG, NEG_BIG)
    b_fold = jnp.concatenate(
        [jnp.pad(b_g[g], (0, Hp - H), constant_values=pad_vals[g]) for g in range(5)]
    ).reshape(1, 5 * Hp)

    # Hidden transform with eval-mode DropConnect scaling, (Hp, 5Hp).
    wh_g = (w_h * (1.0 - DROPCONNECT)).reshape(5, H, H)
    wh_T = jnp.concatenate(
        [jnp.pad(wh_g[g].T, ((0, Hp - H), (0, Hp - H))) for g in range(5)], axis=1)

    # Output transform (3Hp, Hp) with row blocks permuted to [ner, re, share]
    # so one matmul consumes the same slab that is stored as the output.
    wt_re = w_t[:, 0 * H:1 * H].T
    wt_ner = w_t[:, 1 * H:2 * H].T
    wt_sh = w_t[:, 2 * H:3 * H].T
    wt_perm = jnp.concatenate(
        [jnp.pad(w, ((0, Hp - H), (0, Hp - H))) for w in (wt_ner, wt_re, wt_sh)],
        axis=0)
    bt_pad = jnp.pad(b_t, (0, Hp - H)).reshape(1, Hp)

    # Single shared upper-triangular cumsum matrix, reused by all 4 gates.
    triu_mat = jnp.triu(jnp.ones((Hp, Hp), f32))

    # Features padded to block multiples; input transform is done in-kernel.
    feat = jnp.pad(features.astype(f32),
                   ((0, Tp - T), (0, Bp - B), (0, Dp - D)))

    kernel = functools.partial(_pfn_block_kernel, tt=TT, hp=Hp)

    # --- explicit VMEM budget (streams x2 buffers, weights x2, scratch) -----
    def nbytes(*shape):
        return int(np.prod(shape)) * 4

    stream_bytes = 2 * (nbytes(TT, Bblk, Dp) + nbytes(TT, Bblk, 3 * Hp))
    weight_bytes = 2 * (nbytes(Dp, 5 * Hp) + nbytes(1, 5 * Hp)
                        + nbytes(Hp, 5 * Hp) + nbytes(3 * Hp, Hp)
                        + nbytes(1, Hp) + nbytes(Hp, Hp))
    scratch_bytes = 2 * nbytes(Bblk, Hp)
    vmem_limit = int(1.4 * (stream_bytes + weight_bytes + scratch_bytes)) + (4 << 20)
    vmem_limit = min(max(vmem_limit, 16 << 20), 128 << 20)

    grid_spec = pltpu.PrefetchScalarGridSpec(
        num_scalar_prefetch=0,
        grid=(n_b, Tp // TT),
        in_specs=[
            pl.BlockSpec((TT, Bblk, Dp), lambda b, t: (t, b, 0)),    # features block
            pl.BlockSpec((Dp, 5 * Hp), lambda b, t: (0, 0)),         # win_T
            pl.BlockSpec((1, 5 * Hp), lambda b, t: (0, 0)),          # folded bias
            pl.BlockSpec((Hp, 5 * Hp), lambda b, t: (0, 0)),         # wh_T
            pl.BlockSpec((3 * Hp, Hp), lambda b, t: (0, 0)),         # wt_perm
            pl.BlockSpec((1, Hp), lambda b, t: (0, 0)),              # b_t
            pl.BlockSpec((Hp, Hp), lambda b, t: (0, 0)),             # shared triu
        ],
        out_specs=pl.BlockSpec((TT, Bblk, 3 * Hp), lambda b, t: (t, b, 0)),
        scratch_shapes=[
            pltpu.VMEM((Bblk, Hp), f32),   # h state (carried across time blocks)
            pltpu.VMEM((Bblk, Hp), f32),   # c state
        ],
    )

    out = pl.pallas_call(
        kernel,
        out_shape=jax.ShapeDtypeStruct((Tp, Bp, 3 * Hp), f32),
        grid_spec=grid_spec,
        compiler_params=pltpu.CompilerParams(
            dimension_semantics=("parallel", "arbitrary"),   # batch || , time sequential
            vmem_limit_bytes=vmem_limit),
    )(feat, win_T, b_fold, wh_T, wt_perm, bt_pad, triu_mat)

    h_ner = out[:T, :B, 0 * Hp:0 * Hp + H]
    h_re = out[:T, :B, 1 * Hp:1 * Hp + H]
    h_share = out[:T, :B, 2 * Hp:2 * Hp + H]
    return h_ner, h_re, h_share


# ---------------------------------------------------------------------------
# Pure-JAX reference (mirrors the PyTorch forward, eval mode)
# ---------------------------------------------------------------------------
def pfn_encoder_reference(features, w_in, b_in, w_h, b_h, w_t, b_t):
    T, B, D = features.shape
    H = w_h.shape[1]
    wh_eff = w_h * (1.0 - DROPCONNECT)

    def cumsoftmax(z):
        return jnp.cumsum(jax.nn.softmax(z, axis=-1), axis=-1)

    def step(carry, x):
        h_in, c_in = carry
        gates = x @ w_in.T + b_in + h_in @ wh_eff.T + b_h
        c_g, eg_cin, rg_cin, eg_c, rg_c = jnp.split(gates, 5, axis=1)
        eg_cin = 1.0 - cumsoftmax(eg_cin)
        rg_cin = cumsoftmax(rg_cin)
        eg_c = 1.0 - cumsoftmax(eg_c)
        rg_c = cumsoftmax(rg_c)
        c = jnp.tanh(c_g)
        overlap_c = rg_c * eg_c
        upper_c = rg_c - overlap_c
        downer_c = eg_c - overlap_c
        overlap_cin = rg_cin * eg_cin
        upper_cin = rg_cin - overlap_cin
        downer_cin = eg_cin - overlap_cin
        share = overlap_cin * c_in + overlap_c * c
        c_re = upper_cin * c_in + upper_c * c + share
        c_ner = downer_cin * c_in + downer_c * c + share
        c_share = share
        h_re = jnp.tanh(c_re)
        h_ner = jnp.tanh(c_ner)
        h_share = jnp.tanh(c_share)
        c_out = jnp.concatenate([c_re, c_ner, c_share], axis=-1) @ w_t.T + b_t
        h_out = jnp.tanh(c_out)
        return (h_out, c_out), (h_ner, h_re, h_share)

    init = (jnp.zeros((B, H), jnp.float32), jnp.zeros((B, H), jnp.float32))
    _, (h_ner, h_re, h_share) = lax.scan(step, init, features)
    return h_ner, h_re, h_share


# ---------------------------------------------------------------------------
if __name__ == "__main__":
    T, B, D, H = 8, 4, 16, 32

    key = jax.random.PRNGKey(0)
    ks = jax.random.split(key, 7)

    # Deterministic synthetic parameters (PyTorch Linear shapes: (out, in)).
    def uinit(k, shape, fan_in):
        bound = 1.0 / np.sqrt(fan_in)
        return jax.random.uniform(k, shape, jnp.float32, -bound, bound)

    w_in = uinit(ks[0], (5 * H, D), D)
    b_in = uinit(ks[1], (5 * H,), D)
    w_h = uinit(ks[2], (5 * H, H), H)
    b_h = uinit(ks[3], (5 * H,), H)
    w_t = uinit(ks[4], (H, 3 * H), 3 * H)
    b_t = uinit(ks[5], (H,), 3 * H)

    features = jax.random.normal(ks[6], (T, B, D), jnp.float32)

    h_ner, h_re, h_share = pfn_encoder_pallas(features, w_in, b_in, w_h, b_h, w_t, b_t)
    jax.block_until_ready((h_ner, h_re, h_share))

    rn, rr, rs = pfn_encoder_reference(features, w_in, b_in, w_h, b_h, w_t, b_t)
    np.testing.assert_allclose(np.asarray(h_ner), np.asarray(rn), atol=5e-5, rtol=5e-5)
    np.testing.assert_allclose(np.asarray(h_re), np.asarray(rr), atol=5e-5, rtol=5e-5)
    np.testing.assert_allclose(np.asarray(h_share), np.asarray(rs), atol=5e-5, rtol=5e-5)

    print("KERNEL_OK")
</pallas_src>

<mosaic_0001>
module attributes {stable_mosaic.version = 11 : i64} {
  func.func @_pfn_block_kernel(%arg0: i32, %arg1: i32, %arg2: memref<8x8x16xf32, #tpu.memory_space<vmem>>, %arg3: memref<16x640xf32, #tpu.memory_space<vmem>>, %arg4: memref<1x640xf32, #tpu.memory_space<vmem>>, %arg5: memref<128x640xf32, #tpu.memory_space<vmem>>, %arg6: memref<384x128xf32, #tpu.memory_space<vmem>>, %arg7: memref<1x128xf32, #tpu.memory_space<vmem>>, %arg8: memref<128x128xf32, #tpu.memory_space<vmem>>, %arg9: memref<8x8x384xf32, #tpu.memory_space<vmem>>, %arg10: memref<8x128xf32, #tpu.memory_space<vmem>>, %arg11: memref<8x128xf32, #tpu.memory_space<vmem>>) attributes {dimension_semantics = [#tpu.dimension_semantics<parallel>, #tpu.dimension_semantics<arbitrary>], iteration_bounds = array<i64: 1, 1>, scalar_prefetch = 0 : i64, scratch_operands = 2 : i64, tpu.core_type = #tpu.core_type<tc>, window_params = [{transform_indices = @transform_0, window_bounds = array<i64: 8, 8, 16>}, {pipeline_mode = #tpu.pipeline_mode<synchronous>, transform_indices = @transform_1, window_bounds = array<i64: 16, 640>}, {pipeline_mode = #tpu.pipeline_mode<synchronous>, transform_indices = @transform_2, window_bounds = array<i64: 1, 640>}, {pipeline_mode = #tpu.pipeline_mode<synchronous>, transform_indices = @transform_3, window_bounds = array<i64: 128, 640>}, {pipeline_mode = #tpu.pipeline_mode<synchronous>, transform_indices = @transform_4, window_bounds = array<i64: 384, 128>}, {pipeline_mode = #tpu.pipeline_mode<synchronous>, transform_indices = @transform_5, window_bounds = array<i64: 1, 128>}, {pipeline_mode = #tpu.pipeline_mode<synchronous>, transform_indices = @transform_6, window_bounds = array<i64: 128, 128>}, {transform_indices = @transform_7, window_bounds = array<i64: 8, 8, 384>}]} {
    %c0_i32 = arith.constant 0 : i32
    %0 = arith.cmpi eq, %arg1, %c0_i32 : i32
    %1 = arith.extui %0 : i1 to i32
    %c0_i32_0 = arith.constant 0 : i32
    %2 = arith.cmpi ne, %1, %c0_i32_0 : i32
    scf.if %2 {
      %cst_188 = arith.constant 0.000000e+00 : f32
      %809 = vector.broadcast %cst_188 : f32 to vector<8x128xf32>
      %c0_189 = arith.constant 0 : index
      %c0_190 = arith.constant 0 : index
      %810 = vector.load %arg10[%c0_189, %c0_190] : memref<8x128xf32, #tpu.memory_space<vmem>>, vector<8x128xf32>
      tpu.vector_store %arg10[%c0_189, %c0_190], %809 {strides = array<i32>} : memref<8x128xf32, #tpu.memory_space<vmem>>, vector<8x128xf32>,
      %cst_191 = arith.constant 0.000000e+00 : f32
      %811 = vector.broadcast %cst_191 : f32 to vector<8x128xf32>
      %c0_192 = arith.constant 0 : index
      %c0_193 = arith.constant 0 : index
      %812 = vector.load %arg11[%c0_192, %c0_193] : memref<8x128xf32, #tpu.memory_space<vmem>>, vector<8x128xf32>
      tpu.vector_store %arg11[%c0_192, %c0_193], %811 {strides = array<i32>} : memref<8x128xf32, #tpu.memory_space<vmem>>, vector<8x128xf32>,
    } else {
    }
    %c0 = arith.constant 0 : index
    %c0_1 = arith.constant 0 : index
    %3 = vector.load %arg3[%c0, %c0_1] : memref<16x640xf32, #tpu.memory_space<vmem>>, vector<16x640xf32>
    %c0_2 = arith.constant 0 : index
    %c0_3 = arith.constant 0 : index
    %4 = vector.load %arg5[%c0_2, %c0_3] : memref<128x640xf32, #tpu.memory_space<vmem>>, vector<128x640xf32>
    %c0_4 = arith.constant 0 : index
    %c0_5 = arith.constant 0 : index
    %5 = vector.load %arg6[%c0_4, %c0_5] : memref<384x128xf32, #tpu.memory_space<vmem>>, vector<384x128xf32>
    %c0_6 = arith.constant 0 : index
    %c0_7 = arith.constant 0 : index
    %6 = vector.load %arg8[%c0_6, %c0_7] : memref<128x128xf32, #tpu.memory_space<vmem>>, vector<128x128xf32>
    %c0_8 = arith.constant 0 : index
    %c0_9 = arith.constant 0 : index
    %7 = vector.load %arg4[%c0_8, %c0_9] : memref<1x640xf32, #tpu.memory_space<vmem>>, vector<1x640xf32>
    %8 = vector.shape_cast %7 : vector<1x640xf32> to vector<1x640xf32>
    %9 = vector.broadcast %8 : vector<1x640xf32> to vector<8x640xf32>
    %c0_10 = arith.constant 0 : index
    %c0_11 = arith.constant 0 : index
    %10 = vector.load %arg7[%c0_10, %c0_11] : memref<1x128xf32, #tpu.memory_space<vmem>>, vector<1x128xf32>
    %11 = vector.shape_cast %10 : vector<1x128xf32> to vector<1x128xf32>
    %12 = vector.broadcast %11 : vector<1x128xf32> to vector<8x128xf32>
    %c0_12 = arith.constant 0 : index
    %c0_13 = arith.constant 0 : index
    %13 = vector.load %arg10[%c0_12, %c0_13] : memref<8x128xf32, #tpu.memory_space<vmem>>, vector<8x128xf32>
    %c0_14 = arith.constant 0 : index
    %c0_15 = arith.constant 0 : index
    %14 = vector.load %arg11[%c0_14, %c0_15] : memref<8x128xf32, #tpu.memory_space<vmem>>, vector<8x128xf32>
    %c0_i32_16 = arith.constant 0 : i32
    %15 = arith.index_cast %c0_i32_16 : i32 to index
    %c0_17 = arith.constant 0 : index
    %c0_18 = arith.constant 0 : index
    %16 = vector.load %arg2[%15, %c0_17, %c0_18] : memref<8x8x16xf32, #tpu.memory_space<vmem>>, vector<1x8x16xf32>
    %17 = vector.shape_cast %16 : vector<1x8x16xf32> to vector<8x16xf32>
    %cst = arith.constant dense<0.000000e+00> : vector<8x640xf32>
    %18 = tpu.matmul %17, %3, %cst {dimension_numbers = #tpu.dot_dimension_numbers<[1], [0], [0], [1], [0, 0, 1, 1], [], []>} : vector<8x16xf32>, vector<16x640xf32>, vector<8x640xf32> -> vector<8x640xf32>
    %19 = arith.addf %18, %9 : vector<8x640xf32>
    %cst_19 = arith.constant dense<0.000000e+00> : vector<8x640xf32>
    %20 = tpu.matmul %13, %4, %cst_19 {dimension_numbers = #tpu.dot_dimension_numbers<[1], [0], [0], [1], [0, 0, 1, 1], [], []>} : vector<8x128xf32>, vector<128x640xf32>, vector<8x640xf32> -> vector<8x640xf32>
    %21 = arith.addf %19, %20 : vector<8x640xf32>
    %22 = vector.extract_strided_slice %21 {offsets = [0, 0], sizes = [8, 128], strides = [1, 1]} : vector<8x640xf32> to vector<8x128xf32>
    %23 = math.tanh %22 : vector<8x128xf32>
    %24 = vector.extract_strided_slice %21 {offsets = [0, 128], sizes = [8, 128], strides = [1, 1]} : vector<8x640xf32> to vector<8x128xf32>
    %cst_20 = arith.constant dense<0xFF800000> : vector<8xf32>
    %25 = vector.multi_reduction <maximumf>, %24, %cst_20 [1] : vector<8x128xf32> to vector<8xf32>
    %26 = vector.shape_cast %25 : vector<8xf32> to vector<8x1xf32>
    %27 = vector.broadcast %26 : vector<8x1xf32> to vector<8x128xf32>
    %28 = arith.subf %24, %27 : vector<8x128xf32>
    %29 = math.exp %28 : vector<8x128xf32>
    %cst_21 = arith.constant dense<0.000000e+00> : vector<8x128xf32>
    %30 = tpu.matmul %29, %6, %cst_21 {dimension_numbers = #tpu.dot_dimension_numbers<[1], [0], [0], [1], [0, 0, 1, 1], [], []>} : vector<8x128xf32>, vector<128x128xf32>, vector<8x128xf32> -> vector<8x128xf32>
    %31 = vector.extract_strided_slice %30 {offsets = [0, 127], sizes = [8, 1], strides = [1, 1]} : vector<8x128xf32> to vector<8x1xf32>
    %32 = tpu.reciprocal %31 {approx = true} : vector<8x1xf32> -> vector<8x1xf32>
    %33 = arith.mulf %31, %32 : vector<8x1xf32>
    %cst_22 = arith.constant 2.000000e+00 : f32
    %34 = vector.broadcast %cst_22 : f32 to vector<8x1xf32>
    %35 = arith.subf %34, %33 : vector<8x1xf32>
    %36 = arith.mulf %32, %35 : vector<8x1xf32>
    %37 = vector.broadcast %36 : vector<8x1xf32> to vector<8x128xf32>
    %38 = arith.mulf %30, %37 : vector<8x128xf32>
    %39 = vector.extract_strided_slice %21 {offsets = [0, 256], sizes = [8, 128], strides = [1, 1]} : vector<8x640xf32> to vector<8x128xf32>
    %cst_23 = arith.constant dense<0xFF800000> : vector<8xf32>
    %40 = vector.multi_reduction <maximumf>, %39, %cst_23 [1] : vector<8x128xf32> to vector<8xf32>
    %41 = vector.shape_cast %40 : vector<8xf32> to vector<8x1xf32>
    %42 = vector.broadcast %41 : vector<8x1xf32> to vector<8x128xf32>
    %43 = arith.subf %39, %42 : vector<8x128xf32>
    %44 = math.exp %43 : vector<8x128xf32>
    %cst_24 = arith.constant dense<0.000000e+00> : vector<8x128xf32>
    %45 = tpu.matmul %44, %6, %cst_24 {dimension_numbers = #tpu.dot_dimension_numbers<[1], [0], [0], [1], [0, 0, 1, 1], [], []>} : vector<8x128xf32>, vector<128x128xf32>, vector<8x128xf32> -> vector<8x128xf32>
    %46 = vector.extract_strided_slice %45 {offsets = [0, 127], sizes = [8, 1], strides = [1, 1]} : vector<8x128xf32> to vector<8x1xf32>
    %47 = tpu.reciprocal %46 {approx = true} : vector<8x1xf32> -> vector<8x1xf32>
    %48 = arith.mulf %46, %47 : vector<8x1xf32>
    %cst_25 = arith.constant 2.000000e+00 : f32
    %49 = vector.broadcast %cst_25 : f32 to vector<8x1xf32>
    %50 = arith.subf %49, %48 : vector<8x1xf32>
    %51 = arith.mulf %47, %50 : vector<8x1xf32>
    %52 = vector.broadcast %51 : vector<8x1xf32> to vector<8x128xf32>
    %53 = arith.mulf %45, %52 : vector<8x128xf32>
    %54 = vector.extract_strided_slice %21 {offsets = [0, 384], sizes = [8, 128], strides = [1, 1]} : vector<8x640xf32> to vector<8x128xf32>
    %cst_26 = arith.constant dense<0xFF800000> : vector<8xf32>
    %55 = vector.multi_reduction <maximumf>, %54, %cst_26 [1] : vector<8x128xf32> to vector<8xf32>
    %56 = vector.shape_cast %55 : vector<8xf32> to vector<8x1xf32>
    %57 = vector.broadcast %56 : vector<8x1xf32> to vector<8x128xf32>
    %58 = arith.subf %54, %57 : vector<8x128xf32>
    %59 = math.exp %58 : vector<8x128xf32>
    %cst_27 = arith.constant dense<0.000000e+00> : vector<8x128xf32>
    %60 = tpu.matmul %59, %6, %cst_27 {dimension_numbers = #tpu.dot_dimension_numbers<[1], [0], [0], [1], [0, 0, 1, 1], [], []>} : vector<8x128xf32>, vector<128x128xf32>, vector<8x128xf32> -> vector<8x128xf32>
    %61 = vector.extract_strided_slice %60 {offsets = [0, 127], sizes = [8, 1], strides = [1, 1]} : vector<8x128xf32> to vector<8x1xf32>
    %62 = tpu.reciprocal %61 {approx = true} : vector<8x1xf32> -> vector<8x1xf32>
    %63 = arith.mulf %61, %62 : vector<8x1xf32>
    %cst_28 = arith.constant 2.000000e+00 : f32
    %64 = vector.broadcast %cst_28 : f32 to vector<8x1xf32>
    %65 = arith.subf %64, %63 : vector<8x1xf32>
    %66 = arith.mulf %62, %65 : vector<8x1xf32>
    %67 = vector.broadcast %66 : vector<8x1xf32> to vector<8x128xf32>
    %68 = arith.mulf %60, %67 : vector<8x128xf32>
    %69 = vector.extract_strided_slice %21 {offsets = [0, 512], sizes = [8, 128], strides = [1, 1]} : vector<8x640xf32> to vector<8x128xf32>
    %cst_29 = arith.constant dense<0xFF800000> : vector<8xf32>
    %70 = vector.multi_reduction <maximumf>, %69, %cst_29 [1] : vector<8x128xf32> to vector<8xf32>
    %71 = vector.shape_cast %70 : vector<8xf32> to vector<8x1xf32>
    %72 = vector.broadcast %71 : vector<8x1xf32> to vector<8x128xf32>
    %73 = arith.subf %69, %72 : vector<8x128xf32>
    %74 = math.exp %73 : vector<8x128xf32>
    %cst_30 = arith.constant dense<0.000000e+00> : vector<8x128xf32>
    %75 = tpu.matmul %74, %6, %cst_30 {dimension_numbers = #tpu.dot_dimension_numbers<[1], [0], [0], [1], [0, 0, 1, 1], [], []>} : vector<8x128xf32>, vector<128x128xf32>, vector<8x128xf32> -> vector<8x128xf32>
    %76 = vector.extract_strided_slice %75 {offsets = [0, 127], sizes = [8, 1], strides = [1, 1]} : vector<8x128xf32> to vector<8x1xf32>
    %77 = tpu.reciprocal %76 {approx = true} : vector<8x1xf32> -> vector<8x1xf32>
    %78 = arith.mulf %76, %77 : vector<8x1xf32>
    %cst_31 = arith.constant 2.000000e+00 : f32
    %79 = vector.broadcast %cst_31 : f32 to vector<8x1xf32>
    %80 = arith.subf %79, %78 : vector<8x1xf32>
    %81 = arith.mulf %77, %80 : vector<8x1xf32>
    %82 = vector.broadcast %81 : vector<8x1xf32> to vector<8x128xf32>
    %83 = arith.mulf %75, %82 : vector<8x128xf32>
    %cst_32 = arith.constant 1.000000e+00 : f32
    %84 = vector.broadcast %cst_32 : f32 to vector<8x128xf32>
    %85 = arith.subf %84, %38 : vector<8x128xf32>
    %cst_33 = arith.constant 1.000000e+00 : f32
    %86 = vector.broadcast %cst_33 : f32 to vector<8x128xf32>
    %87 = arith.subf %86, %68 : vector<8x128xf32>
    %88 = arith.mulf %83, %87 : vector<8x128xf32>
    %89 = arith.subf %83, %88 : vector<8x128xf32>
    %90 = arith.subf %87, %88 : vector<8x128xf32>
    %91 = arith.mulf %53, %85 : vector<8x128xf32>
    %92 = arith.subf %53, %91 : vector<8x128xf32>
    %93 = arith.subf %85, %91 : vector<8x128xf32>
    %94 = arith.mulf %91, %14 : vector<8x128xf32>
    %95 = arith.mulf %88, %23 : vector<8x128xf32>
    %96 = arith.addf %94, %95 : vector<8x128xf32>
    %97 = arith.mulf %92, %14 : vector<8x128xf32>
    %98 = arith.mulf %89, %23 : vector<8x128xf32>
    %99 = arith.addf %97, %98 : vector<8x128xf32>
    %100 = arith.addf %99, %96 : vector<8x128xf32>
    %101 = arith.mulf %93, %14 : vector<8x128xf32>
    %102 = arith.mulf %90, %23 : vector<8x128xf32>
    %103 = arith.addf %101, %102 : vector<8x128xf32>
    %104 = arith.addf %103, %96 : vector<8x128xf32>
    %105 = tpu.concatenate %104, %100, %96 in 1 : vector<8x128xf32>, vector<8x128xf32>, vector<8x128xf32> -> vector<8x384xf32>
    %106 = math.tanh %105 : vector<8x384xf32>
    %107 = arith.index_cast %c0_i32_16 : i32 to index
    %c0_34 = arith.constant 0 : index
    %c0_35 = arith.constant 0 : index
    %108 = vector.load %arg9[%107, %c0_34, %c0_35] : memref<8x8x384xf32, #tpu.memory_space<vmem>>, vector<1x8x384xf32>
    %109 = vector.shape_cast %108 : vector<1x8x384xf32> to vector<8x384xf32>
    %110 = vector.shape_cast %106 : vector<8x384xf32> to vector<1x8x384xf32>
    tpu.vector_store %arg9[%107, %c0_34, %c0_35], %110 {strides = array<i32>} : memref<8x8x384xf32, #tpu.memory_space<vmem>>, vector<1x8x384xf32>,
    %cst_36 = arith.constant dense<0.000000e+00> : vector<8x128xf32>
    %111 = tpu.matmul %105, %5, %cst_36 {dimension_numbers = #tpu.dot_dimension_numbers<[1], [0], [0], [1], [0, 0, 1, 1], [], []>} : vector<8x384xf32>, vector<384x128xf32>, vector<8x128xf32> -> vector<8x128xf32>
    %112 = arith.addf %111, %12 : vector<8x128xf32>
    %113 = math.tanh %112 : vector<8x128xf32>
    %c1_i32 = arith.constant 1 : i32
    %114 = arith.index_cast %c1_i32 : i32 to index
    %c0_37 = arith.constant 0 : index
    %c0_38 = arith.constant 0 : index
    %115 = vector.load %arg2[%114, %c0_37, %c0_38] : memref<8x8x16xf32, #tpu.memory_space<vmem>>, vector<1x8x16xf32>
    %116 = vector.shape_cast %115 : vector<1x8x16xf32> to vector<8x16xf32>
    %cst_39 = arith.constant dense<0.000000e+00> : vector<8x640xf32>
    %117 = tpu.matmul %116, %3, %cst_39 {dimension_numbers = #tpu.dot_dimension_numbers<[1], [0], [0], [1], [0, 0, 1, 1], [], []>} : vector<8x16xf32>, vector<16x640xf32>, vector<8x640xf32> -> vector<8x640xf32>
    %118 = arith.addf %117, %9 : vector<8x640xf32>
    %cst_40 = arith.constant dense<0.000000e+00> : vector<8x640xf32>
    %119 = tpu.matmul %113, %4, %cst_40 {dimension_numbers = #tpu.dot_dimension_numbers<[1], [0], [0], [1], [0, 0, 1, 1], [], []>} : vector<8x128xf32>, vector<128x640xf32>, vector<8x640xf32> -> vector<8x640xf32>
    %120 = arith.addf %118, %119 : vector<8x640xf32>
    %121 = vector.extract_strided_slice %120 {offsets = [0, 0], sizes = [8, 128], strides = [1, 1]} : vector<8x640xf32> to vector<8x128xf32>
    %122 = math.tanh %121 : vector<8x128xf32>
    %123 = vector.extract_strided_slice %120 {offsets = [0, 128], sizes = [8, 128], strides = [1, 1]} : vector<8x640xf32> to vector<8x128xf32>
    %cst_41 = arith.constant dense<0xFF800000> : vector<8xf32>
    %124 = vector.multi_reduction <maximumf>, %123, %cst_41 [1] : vector<8x128xf32> to vector<8xf32>
    %125 = vector.shape_cast %124 : vector<8xf32> to vector<8x1xf32>
    %126 = vector.broadcast %125 : vector<8x1xf32> to vector<8x128xf32>
    %127 = arith.subf %123, %126 : vector<8x128xf32>
    %128 = math.exp %127 : vector<8x128xf32>
    %cst_42 = arith.constant dense<0.000000e+00> : vector<8x128xf32>
    %129 = tpu.matmul %128, %6, %cst_42 {dimension_numbers = #tpu.dot_dimension_numbers<[1], [0], [0], [1], [0, 0, 1, 1], [], []>} : vector<8x128xf32>, vector<128x128xf32>, vector<8x128xf32> -> vector<8x128xf32>
    %130 = vector.extract_strided_slice %129 {offsets = [0, 127], sizes = [8, 1], strides = [1, 1]} : vector<8x128xf32> to vector<8x1xf32>
    %131 = tpu.reciprocal %130 {approx = true} : vector<8x1xf32> -> vector<8x1xf32>
    %132 = arith.mulf %130, %131 : vector<8x1xf32>
    %cst_43 = arith.constant 2.000000e+00 : f32
    %133 = vector.broadcast %cst_43 : f32 to vector<8x1xf32>
    %134 = arith.subf %133, %132 : vector<8x1xf32>
    %135 = arith.mulf %131, %134 : vector<8x1xf32>
    %136 = vector.broadcast %135 : vector<8x1xf32> to vector<8x128xf32>
    %137 = arith.mulf %129, %136 : vector<8x128xf32>
    %138 = vector.extract_strided_slice %120 {offsets = [0, 256], sizes = [8, 128], strides = [1, 1]} : vector<8x640xf32> to vector<8x128xf32>
    %cst_44 = arith.constant dense<0xFF800000> : vector<8xf32>
    %139 = vector.multi_reduction <maximumf>, %138, %cst_44 [1] : vector<8x128xf32> to vector<8xf32>
    %140 = vector.shape_cast %139 : vector<8xf32> to vector<8x1xf32>
    %141 = vector.broadcast %140 : vector<8x1xf32> to vector<8x128xf32>
    %142 = arith.subf %138, %141 : vector<8x128xf32>
    %143 = math.exp %142 : vector<8x128xf32>
    %cst_45 = arith.constant dense<0.000000e+00> : vector<8x128xf32>
    %144 = tpu.matmul %143, %6, %cst_45 {dimension_numbers = #tpu.dot_dimension_numbers<[1], [0], [0], [1], [0, 0, 1, 1], [], []>} : vector<8x128xf32>, vector<128x128xf32>, vector<8x128xf32> -> vector<8x128xf32>
    %145 = vector.extract_strided_slice %144 {offsets = [0, 127], sizes = [8, 1], strides = [1, 1]} : vector<8x128xf32> to vector<8x1xf32>
    %146 = tpu.reciprocal %145 {approx = true} : vector<8x1xf32> -> vector<8x1xf32>
    %147 = arith.mulf %145, %146 : vector<8x1xf32>
    %cst_46 = arith.constant 2.000000e+00 : f32
    %148 = vector.broadcast %cst_46 : f32 to vector<8x1xf32>
    %149 = arith.subf %148, %147 : vector<8x1xf32>
    %150 = arith.mulf %146, %149 : vector<8x1xf32>
    %151 = vector.broadcast %150 : vector<8x1xf32> to vector<8x128xf32>
    %152 = arith.mulf %144, %151 : vector<8x128xf32>
    %153 = vector.extract_strided_slice %120 {offsets = [0, 384], sizes = [8, 128], strides = [1, 1]} : vector<8x640xf32> to vector<8x128xf32>
    %cst_47 = arith.constant dense<0xFF800000> : vector<8xf32>
    %154 = vector.multi_reduction <maximumf>, %153, %cst_47 [1] : vector<8x128xf32> to vector<8xf32>
    %155 = vector.shape_cast %154 : vector<8xf32> to vector<8x1xf32>
    %156 = vector.broadcast %155 : vector<8x1xf32> to vector<8x128xf32>
    %157 = arith.subf %153, %156 : vector<8x128xf32>
    %158 = math.exp %157 : vector<8x128xf32>
    %cst_48 = arith.constant dense<0.000000e+00> : vector<8x128xf32>
    %159 = tpu.matmul %158, %6, %cst_48 {dimension_numbers = #tpu.dot_dimension_numbers<[1], [0], [0], [1], [0, 0, 1, 1], [], []>} : vector<8x128xf32>, vector<128x128xf32>, vector<8x128xf32> -> vector<8x128xf32>
    %160 = vector.extract_strided_slice %159 {offsets = [0, 127], sizes = [8, 1], strides = [1, 1]} : vector<8x128xf32> to vector<8x1xf32>
    %161 = tpu.reciprocal %160 {approx = true} : vector<8x1xf32> -> vector<8x1xf32>
    %162 = arith.mulf %160, %161 : vector<8x1xf32>
    %cst_49 = arith.constant 2.000000e+00 : f32
    %163 = vector.broadcast %cst_49 : f32 to vector<8x1xf32>
    %164 = arith.subf %163, %162 : vector<8x1xf32>
    %165 = arith.mulf %161, %164 : vector<8x1xf32>
    %166 = vector.broadcast %165 : vector<8x1xf32> to vector<8x128xf32>
    %167 = arith.mulf %159, %166 : vector<8x128xf32>
    %168 = vector.extract_strided_slice %120 {offsets = [0, 512], sizes = [8, 128], strides = [1, 1]} : vector<8x640xf32> to vector<8x128xf32>
    %cst_50 = arith.constant dense<0xFF800000> : vector<8xf32>
    %169 = vector.multi_reduction <maximumf>, %168, %cst_50 [1] : vector<8x128xf32> to vector<8xf32>
    %170 = vector.shape_cast %169 : vector<8xf32> to vector<8x1xf32>
    %171 = vector.broadcast %170 : vector<8x1xf32> to vector<8x128xf32>
    %172 = arith.subf %168, %171 : vector<8x128xf32>
    %173 = math.exp %172 : vector<8x128xf32>
    %cst_51 = arith.constant dense<0.000000e+00> : vector<8x128xf32>
    %174 = tpu.matmul %173, %6, %cst_51 {dimension_numbers = #tpu.dot_dimension_numbers<[1], [0], [0], [1], [0, 0, 1, 1], [], []>} : vector<8x128xf32>, vector<128x128xf32>, vector<8x128xf32> -> vector<8x128xf32>
    %175 = vector.extract_strided_slice %174 {offsets = [0, 127], sizes = [8, 1], strides = [1, 1]} : vector<8x128xf32> to vector<8x1xf32>
    %176 = tpu.reciprocal %175 {approx = true} : vector<8x1xf32> -> vector<8x1xf32>
    %177 = arith.mulf %175, %176 : vector<8x1xf32>
    %cst_52 = arith.constant 2.000000e+00 : f32
    %178 = vector.broadcast %cst_52 : f32 to vector<8x1xf32>
    %179 = arith.subf %178, %177 : vector<8x1xf32>
    %180 = arith.mulf %176, %179 : vector<8x1xf32>
    %181 = vector.broadcast %180 : vector<8x1xf32> to vector<8x128xf32>
    %182 = arith.mulf %174, %181 : vector<8x128xf32>
    %cst_53 = arith.constant 1.000000e+00 : f32
    %183 = vector.broadcast %cst_53 : f32 to vector<8x128xf32>
    %184 = arith.subf %183, %137 : vector<8x128xf32>
    %cst_54 = arith.constant 1.000000e+00 : f32
    %185 = vector.broadcast %cst_54 : f32 to vector<8x128xf32>
    %186 = arith.subf %185, %167 : vector<8x128xf32>
    %187 = arith.mulf %182, %186 : vector<8x128xf32>
    %188 = arith.subf %182, %187 : vector<8x128xf32>
    %189 = arith.subf %186, %187 : vector<8x128xf32>
    %190 = arith.mulf %152, %184 : vector<8x128xf32>
    %191 = arith.subf %152, %190 : vector<8x128xf32>
    %192 = arith.subf %184, %190 : vector<8x128xf32>
    %193 = arith.mulf %190, %112 : vector<8x128xf32>
    %194 = arith.mulf %187, %122 : vector<8x128xf32>
    %195 = arith.addf %193, %194 : vector<8x128xf32>
    %196 = arith.mulf %191, %112 : vector<8x128xf32>
    %197 = arith.mulf %188, %122 : vector<8x128xf32>
    %198 = arith.addf %196, %197 : vector<8x128xf32>
    %199 = arith.addf %198, %195 : vector<8x128xf32>
    %200 = arith.mulf %192, %112 : vector<8x128xf32>
    %201 = arith.mulf %189, %122 : vector<8x128xf32>
    %202 = arith.addf %200, %201 : vector<8x128xf32>
    %203 = arith.addf %202, %195 : vector<8x128xf32>
    %204 = tpu.concatenate %203, %199, %195 in 1 : vector<8x128xf32>, vector<8x128xf32>, vector<8x128xf32> -> vector<8x384xf32>
    %205 = math.tanh %204 : vector<8x384xf32>
    %206 = arith.index_cast %c1_i32 : i32 to index
    %c0_55 = arith.constant 0 : index
    %c0_56 = arith.constant 0 : index
    %207 = vector.load %arg9[%206, %c0_55, %c0_56] : memref<8x8x384xf32, #tpu.memory_space<vmem>>, vector<1x8x384xf32>
    %208 = vector.shape_cast %207 : vector<1x8x384xf32> to vector<8x384xf32>
    %209 = vector.shape_cast %205 : vector<8x384xf32> to vector<1x8x384xf32>
    tpu.vector_store %arg9[%206, %c0_55, %c0_56], %209 {strides = array<i32>} : memref<8x8x384xf32, #tpu.memory_space<vmem>>, vector<1x8x384xf32>,
    %cst_57 = arith.constant dense<0.000000e+00> : vector<8x128xf32>
    %210 = tpu.matmul %204, %5, %cst_57 {dimension_numbers = #tpu.dot_dimension_numbers<[1], [0], [0], [1], [0, 0, 1, 1], [], []>} : vector<8x384xf32>, vector<384x128xf32>, vector<8x128xf32> -> vector<8x128xf32>
    %211 = arith.addf %210, %12 : vector<8x128xf32>
    %212 = math.tanh %211 : vector<8x128xf32>
    %c2_i32 = arith.constant 2 : i32
    %213 = arith.index_cast %c2_i32 : i32 to index
    %c0_58 = arith.constant 0 : index
    %c0_59 = arith.constant 0 : index
    %214 = vector.load %arg2[%213, %c0_58, %c0_59] : memref<8x8x16xf32, #tpu.memory_space<vmem>>, vector<1x8x16xf32>
    %215 = vector.shape_cast %214 : vector<1x8x16xf32> to vector<8x16xf32>
    %cst_60 = arith.constant dense<0.000000e+00> : vector<8x640xf32>
    %216 = tpu.matmul %215, %3, %cst_60 {dimension_numbers = #tpu.dot_dimension_numbers<[1], [0], [0], [1], [0, 0, 1, 1], [], []>} : vector<8x16xf32>, vector<16x640xf32>, vector<8x640xf32> -> vector<8x640xf32>
    %217 = arith.addf %216, %9 : vector<8x640xf32>
    %cst_61 = arith.constant dense<0.000000e+00> : vector<8x640xf32>
    %218 = tpu.matmul %212, %4, %cst_61 {dimension_numbers = #tpu.dot_dimension_numbers<[1], [0], [0], [1], [0, 0, 1, 1], [], []>} : vector<8x128xf32>, vector<128x640xf32>, vector<8x640xf32> -> vector<8x640xf32>
    %219 = arith.addf %217, %218 : vector<8x640xf32>
    %220 = vector.extract_strided_slice %219 {offsets = [0, 0], sizes = [8, 128], strides = [1, 1]} : vector<8x640xf32> to vector<8x128xf32>
    %221 = math.tanh %220 : vector<8x128xf32>
    %222 = vector.extract_strided_slice %219 {offsets = [0, 128], sizes = [8, 128], strides = [1, 1]} : vector<8x640xf32> to vector<8x128xf32>
    %cst_62 = arith.constant dense<0xFF800000> : vector<8xf32>
    %223 = vector.multi_reduction <maximumf>, %222, %cst_62 [1] : vector<8x128xf32> to vector<8xf32>
    %224 = vector.shape_cast %223 : vector<8xf32> to vector<8x1xf32>
    %225 = vector.broadcast %224 : vector<8x1xf32> to vector<8x128xf32>
    %226 = arith.subf %222, %225 : vector<8x128xf32>
    %227 = math.exp %226 : vector<8x128xf32>
    %cst_63 = arith.constant dense<0.000000e+00> : vector<8x128xf32>
    %228 = tpu.matmul %227, %6, %cst_63 {dimension_numbers = #tpu.dot_dimension_numbers<[1], [0], [0], [1], [0, 0, 1, 1], [], []>} : vector<8x128xf32>, vector<128x128xf32>, vector<8x128xf32> -> vector<8x128xf32>
    %229 = vector.extract_strided_slice %228 {offsets = [0, 127], sizes = [8, 1], strides = [1, 1]} : vector<8x128xf32> to vector<8x1xf32>
    %230 = tpu.reciprocal %229 {approx = true} : vector<8x1xf32> -> vector<8x1xf32>
    %231 = arith.mulf %229, %230 : vector<8x1xf32>
    %cst_64 = arith.constant 2.000000e+00 : f32
    %232 = vector.broadcast %cst_64 : f32 to vector<8x1xf32>
    %233 = arith.subf %232, %231 : vector<8x1xf32>
    %234 = arith.mulf %230, %233 : vector<8x1xf32>
    %235 = vector.broadcast %234 : vector<8x1xf32> to vector<8x128xf32>
    %236 = arith.mulf %228, %235 : vector<8x128xf32>
    %237 = vector.extract_strided_slice %219 {offsets = [0, 256], sizes = [8, 128], strides = [1, 1]} : vector<8x640xf32> to vector<8x128xf32>
    %cst_65 = arith.constant dense<0xFF800000> : vector<8xf32>
    %238 = vector.multi_reduction <maximumf>, %237, %cst_65 [1] : vector<8x128xf32> to vector<8xf32>
    %239 = vector.shape_cast %238 : vector<8xf32> to vector<8x1xf32>
    %240 = vector.broadcast %239 : vector<8x1xf32> to vector<8x128xf32>
    %241 = arith.subf %237, %240 : vector<8x128xf32>
    %242 = math.exp %241 : vector<8x128xf32>
    %cst_66 = arith.constant dense<0.000000e+00> : vector<8x128xf32>
    %243 = tpu.matmul %242, %6, %cst_66 {dimension_numbers = #tpu.dot_dimension_numbers<[1], [0], [0], [1], [0, 0, 1, 1], [], []>} : vector<8x128xf32>, vector<128x128xf32>, vector<8x128xf32> -> vector<8x128xf32>
    %244 = vector.extract_strided_slice %243 {offsets = [0, 127], sizes = [8, 1], strides = [1, 1]} : vector<8x128xf32> to vector<8x1xf32>
    %245 = tpu.reciprocal %244 {approx = true} : vector<8x1xf32> -> vector<8x1xf32>
    %246 = arith.mulf %244, %245 : vector<8x1xf32>
    %cst_67 = arith.constant 2.000000e+00 : f32
    %247 = vector.broadcast %cst_67 : f32 to vector<8x1xf32>
    %248 = arith.subf %247, %246 : vector<8x1xf32>
    %249 = arith.mulf %245, %248 : vector<8x1xf32>
    %250 = vector.broadcast %249 : vector<8x1xf32> to vector<8x128xf32>
    %251 = arith.mulf %243, %250 : vector<8x128xf32>
    %252 = vector.extract_strided_slice %219 {offsets = [0, 384], sizes = [8, 128], strides = [1, 1]} : vector<8x640xf32> to vector<8x128xf32>
    %cst_68 = arith.constant dense<0xFF800000> : vector<8xf32>
    %253 = vector.multi_reduction <maximumf>, %252, %cst_68 [1] : vector<8x128xf32> to vector<8xf32>
    %254 = vector.shape_cast %253 : vector<8xf32> to vector<8x1xf32>
    %255 = vector.broadcast %254 : vector<8x1xf32> to vector<8x128xf32>
    %256 = arith.subf %252, %255 : vector<8x128xf32>
    %257 = math.exp %256 : vector<8x128xf32>
    %cst_69 = arith.constant dense<0.000000e+00> : vector<8x128xf32>
    %258 = tpu.matmul %257, %6, %cst_69 {dimension_numbers = #tpu.dot_dimension_numbers<[1], [0], [0], [1], [0, 0, 1, 1], [], []>} : vector<8x128xf32>, vector<128x128xf32>, vector<8x128xf32> -> vector<8x128xf32>
    %259 = vector.extract_strided_slice %258 {offsets = [0, 127], sizes = [8, 1], strides = [1, 1]} : vector<8x128xf32> to vector<8x1xf32>
    %260 = tpu.reciprocal %259 {approx = true} : vector<8x1xf32> -> vector<8x1xf32>
    %261 = arith.mulf %259, %260 : vector<8x1xf32>
    %cst_70 = arith.constant 2.000000e+00 : f32
    %262 = vector.broadcast %cst_70 : f32 to vector<8x1xf32>
    %263 = arith.subf %262, %261 : vector<8x1xf32>
    %264 = arith.mulf %260, %263 : vector<8x1xf32>
    %265 = vector.broadcast %264 : vector<8x1xf32> to vector<8x128xf32>
    %266 = arith.mulf %258, %265 : vector<8x128xf32>
    %267 = vector.extract_strided_slice %219 {offsets = [0, 512], sizes = [8, 128], strides = [1, 1]} : vector<8x640xf32> to vector<8x128xf32>
    %cst_71 = arith.constant dense<0xFF800000> : vector<8xf32>
    %268 = vector.multi_reduction <maximumf>, %267, %cst_71 [1] : vector<8x128xf32> to vector<8xf32>
    %269 = vector.shape_cast %268 : vector<8xf32> to vector<8x1xf32>
    %270 = vector.broadcast %269 : vector<8x1xf32> to vector<8x128xf32>
    %271 = arith.subf %267, %270 : vector<8x128xf32>
    %272 = math.exp %271 : vector<8x128xf32>
    %cst_72 = arith.constant dense<0.000000e+00> : vector<8x128xf32>
    %273 = tpu.matmul %272, %6, %cst_72 {dimension_numbers = #tpu.dot_dimension_numbers<[1], [0], [0], [1], [0, 0, 1, 1], [], []>} : vector<8x128xf32>, vector<128x128xf32>, vector<8x128xf32> -> vector<8x128xf32>
    %274 = vector.extract_strided_slice %273 {offsets = [0, 127], sizes = [8, 1], strides = [1, 1]} : vector<8x128xf32> to vector<8x1xf32>
    %275 = tpu.reciprocal %274 {approx = true} : vector<8x1xf32> -> vector<8x1xf32>
    %276 = arith.mulf %274, %275 : vector<8x1xf32>
    %cst_73 = arith.constant 2.000000e+00 : f32
    %277 = vector.broadcast %cst_73 : f32 to vector<8x1xf32>
    %278 = arith.subf %277, %276 : vector<8x1xf32>
    %279 = arith.mulf %275, %278 : vector<8x1xf32>
    %280 = vector.broadcast %279 : vector<8x1xf32> to vector<8x128xf32>
    %281 = arith.mulf %273, %280 : vector<8x128xf32>
    %cst_74 = arith.constant 1.000000e+00 : f32
    %282 = vector.broadcast %cst_74 : f32 to vector<8x128xf32>
    %283 = arith.subf %282, %236 : vector<8x128xf32>
    %cst_75 = arith.constant 1.000000e+00 : f32
    %284 = vector.broadcast %cst_75 : f32 to vector<8x128xf32>
    %285 = arith.subf %284, %266 : vector<8x128xf32>
    %286 = arith.mulf %281, %285 : vector<8x128xf32>
    %287 = arith.subf %281, %286 : vector<8x128xf32>
    %288 = arith.subf %285, %286 : vector<8x128xf32>
    %289 = arith.mulf %251, %283 : vector<8x128xf32>
    %290 = arith.subf %251, %289 : vector<8x128xf32>
    %291 = arith.subf %283, %289 : vector<8x128xf32>
    %292 = arith.mulf %289, %211 : vector<8x128xf32>
    %293 = arith.mulf %286, %221 : vector<8x128xf32>
    %294 = arith.addf %292, %293 : vector<8x128xf32>
    %295 = arith.mulf %290, %211 : vector<8x128xf32>
    %296 = arith.mulf %287, %221 : vector<8x128xf32>
    %297 = arith.addf %295, %296 : vector<8x128xf32>
    %298 = arith.addf %297, %294 : vector<8x128xf32>
    %299 = arith.mulf %291, %211 : vector<8x128xf32>
    %300 = arith.mulf %288, %221 : vector<8x128xf32>
    %301 = arith.addf %299, %300 : vector<8x128xf32>
    %302 = arith.addf %301, %294 : vector<8x128xf32>
    %303 = tpu.concatenate %302, %298, %294 in 1 : vector<8x128xf32>, vector<8x128xf32>, vector<8x128xf32> -> vector<8x384xf32>
    %304 = math.tanh %303 : vector<8x384xf32>
    %305 = arith.index_cast %c2_i32 : i32 to index
    %c0_76 = arith.constant 0 : index
    %c0_77 = arith.constant 0 : index
    %306 = vector.load %arg9[%305, %c0_76, %c0_77] : memref<8x8x384xf32, #tpu.memory_space<vmem>>, vector<1x8x384xf32>
    %307 = vector.shape_cast %306 : vector<1x8x384xf32> to vector<8x384xf32>
    %308 = vector.shape_cast %304 : vector<8x384xf32> to vector<1x8x384xf32>
    tpu.vector_store %arg9[%305, %c0_76, %c0_77], %308 {strides = array<i32>} : memref<8x8x384xf32, #tpu.memory_space<vmem>>, vector<1x8x384xf32>,
    %cst_78 = arith.constant dense<0.000000e+00> : vector<8x128xf32>
    %309 = tpu.matmul %303, %5, %cst_78 {dimension_numbers = #tpu.dot_dimension_numbers<[1], [0], [0], [1], [0, 0, 1, 1], [], []>} : vector<8x384xf32>, vector<384x128xf32>, vector<8x128xf32> -> vector<8x128xf32>
    %310 = arith.addf %309, %12 : vector<8x128xf32>
    %311 = math.tanh %310 : vector<8x128xf32>
    %c3_i32 = arith.constant 3 : i32
    %312 = arith.index_cast %c3_i32 : i32 to index
    %c0_79 = arith.constant 0 : index
    %c0_80 = arith.constant 0 : index
    %313 = vector.load %arg2[%312, %c0_79, %c0_80] : memref<8x8x16xf32, #tpu.memory_space<vmem>>, vector<1x8x16xf32>
    %314 = vector.shape_cast %313 : vector<1x8x16xf32> to vector<8x16xf32>
    %cst_81 = arith.constant dense<0.000000e+00> : vector<8x640xf32>
    %315 = tpu.matmul %314, %3, %cst_81 {dimension_numbers = #tpu.dot_dimension_numbers<[1], [0], [0], [1], [0, 0, 1, 1], [], []>} : vector<8x16xf32>, vector<16x640xf32>, vector<8x640xf32> -> vector<8x640xf32>
    %316 = arith.addf %315, %9 : vector<8x640xf32>
    %cst_82 = arith.constant dense<0.000000e+00> : vector<8x640xf32>
    %317 = tpu.matmul %311, %4, %cst_82 {dimension_numbers = #tpu.dot_dimension_numbers<[1], [0], [0], [1], [0, 0, 1, 1], [], []>} : vector<8x128xf32>, vector<128x640xf32>, vector<8x640xf32> -> vector<8x640xf32>
    %318 = arith.addf %316, %317 : vector<8x640xf32>
    %319 = vector.extract_strided_slice %318 {offsets = [0, 0], sizes = [8, 128], strides = [1, 1]} : vector<8x640xf32> to vector<8x128xf32>
    %320 = math.tanh %319 : vector<8x128xf32>
    %321 = vector.extract_strided_slice %318 {offsets = [0, 128], sizes = [8, 128], strides = [1, 1]} : vector<8x640xf32> to vector<8x128xf32>
    %cst_83 = arith.constant dense<0xFF800000> : vector<8xf32>
    %322 = vector.multi_reduction <maximumf>, %321, %cst_83 [1] : vector<8x128xf32> to vector<8xf32>
    %323 = vector.shape_cast %322 : vector<8xf32> to vector<8x1xf32>
    %324 = vector.broadcast %323 : vector<8x1xf32> to vector<8x128xf32>
    %325 = arith.subf %321, %324 : vector<8x128xf32>
    %326 = math.exp %325 : vector<8x128xf32>
    %cst_84 = arith.constant dense<0.000000e+00> : vector<8x128xf32>
    %327 = tpu.matmul %326, %6, %cst_84 {dimension_numbers = #tpu.dot_dimension_numbers<[1], [0], [0], [1], [0, 0, 1, 1], [], []>} : vector<8x128xf32>, vector<128x128xf32>, vector<8x128xf32> -> vector<8x128xf32>
    %328 = vector.extract_strided_slice %327 {offsets = [0, 127], sizes = [8, 1], strides = [1, 1]} : vector<8x128xf32> to vector<8x1xf32>
    %329 = tpu.reciprocal %328 {approx = true} : vector<8x1xf32> -> vector<8x1xf32>
    %330 = arith.mulf %328, %329 : vector<8x1xf32>
    %cst_85 = arith.constant 2.000000e+00 : f32
    %331 = vector.broadcast %cst_85 : f32 to vector<8x1xf32>
    %332 = arith.subf %331, %330 : vector<8x1xf32>
    %333 = arith.mulf %329, %332 : vector<8x1xf32>
    %334 = vector.broadcast %333 : vector<8x1xf32> to vector<8x128xf32>
    %335 = arith.mulf %327, %334 : vector<8x128xf32>
    %336 = vector.extract_strided_slice %318 {offsets = [0, 256], sizes = [8, 128], strides = [1, 1]} : vector<8x640xf32> to vector<8x128xf32>
    %cst_86 = arith.constant dense<0xFF800000> : vector<8xf32>
    %337 = vector.multi_reduction <maximumf>, %336, %cst_86 [1] : vector<8x128xf32> to vector<8xf32>
    %338 = vector.shape_cast %337 : vector<8xf32> to vector<8x1xf32>
    %339 = vector.broadcast %338 : vector<8x1xf32> to vector<8x128xf32>
    %340 = arith.subf %336, %339 : vector<8x128xf32>
    %341 = math.exp %340 : vector<8x128xf32>
    %cst_87 = arith.constant dense<0.000000e+00> : vector<8x128xf32>
    %342 = tpu.matmul %341, %6, %cst_87 {dimension_numbers = #tpu.dot_dimension_numbers<[1], [0], [0], [1], [0, 0, 1, 1], [], []>} : vector<8x128xf32>, vector<128x128xf32>, vector<8x128xf32> -> vector<8x128xf32>
    %343 = vector.extract_strided_slice %342 {offsets = [0, 127], sizes = [8, 1], strides = [1, 1]} : vector<8x128xf32> to vector<8x1xf32>
    %344 = tpu.reciprocal %343 {approx = true} : vector<8x1xf32> -> vector<8x1xf32>
    %345 = arith.mulf %343, %344 : vector<8x1xf32>
    %cst_88 = arith.constant 2.000000e+00 : f32
    %346 = vector.broadcast %cst_88 : f32 to vector<8x1xf32>
    %347 = arith.subf %346, %345 : vector<8x1xf32>
    %348 = arith.mulf %344, %347 : vector<8x1xf32>
    %349 = vector.broadcast %348 : vector<8x1xf32> to vector<8x128xf32>
    %350 = arith.mulf %342, %349 : vector<8x128xf32>
    %351 = vector.extract_strided_slice %318 {offsets = [0, 384], sizes = [8, 128], strides = [1, 1]} : vector<8x640xf32> to vector<8x128xf32>
    %cst_89 = arith.constant dense<0xFF800000> : vector<8xf32>
    %352 = vector.multi_reduction <maximumf>, %351, %cst_89 [1] : vector<8x128xf32> to vector<8xf32>
    %353 = vector.shape_cast %352 : vector<8xf32> to vector<8x1xf32>
    %354 = vector.broadcast %353 : vector<8x1xf32> to vector<8x128xf32>
    %355 = arith.subf %351, %354 : vector<8x128xf32>
    %356 = math.exp %355 : vector<8x128xf32>
    %cst_90 = arith.constant dense<0.000000e+00> : vector<8x128xf32>
    %357 = tpu.matmul %356, %6, %cst_90 {dimension_numbers = #tpu.dot_dimension_numbers<[1], [0], [0], [1], [0, 0, 1, 1], [], []>} : vector<8x128xf32>, vector<128x128xf32>, vector<8x128xf32> -> vector<8x128xf32>
    %358 = vector.extract_strided_slice %357 {offsets = [0, 127], sizes = [8, 1], strides = [1, 1]} : vector<8x128xf32> to vector<8x1xf32>
    %359 = tpu.reciprocal %358 {approx = true} : vector<8x1xf32> -> vector<8x1xf32>
    %360 = arith.mulf %358, %359 : vector<8x1xf32>
    %cst_91 = arith.constant 2.000000e+00 : f32
    %361 = vector.broadcast %cst_91 : f32 to vector<8x1xf32>
    %362 = arith.subf %361, %360 : vector<8x1xf32>
    %363 = arith.mulf %359, %362 : vector<8x1xf32>
    %364 = vector.broadcast %363 : vector<8x1xf32> to vector<8x128xf32>
    %365 = arith.mulf %357, %364 : vector<8x128xf32>
    %366 = vector.extract_strided_slice %318 {offsets = [0, 512], sizes = [8, 128], strides = [1, 1]} : vector<8x640xf32> to vector<8x128xf32>
    %cst_92 = arith.constant dense<0xFF800000> : vector<8xf32>
    %367 = vector.multi_reduction <maximumf>, %366, %cst_92 [1] : vector<8x128xf32> to vector<8xf32>
    %368 = vector.shape_cast %367 : vector<8xf32> to vector<8x1xf32>
    %369 = vector.broadcast %368 : vector<8x1xf32> to vector<8x128xf32>
    %370 = arith.subf %366, %369 : vector<8x128xf32>
    %371 = math.exp %370 : vector<8x128xf32>
    %cst_93 = arith.constant dense<0.000000e+00> : vector<8x128xf32>
    %372 = tpu.matmul %371, %6, %cst_93 {dimension_numbers = #tpu.dot_dimension_numbers<[1], [0], [0], [1], [0, 0, 1, 1], [], []>} : vector<8x128xf32>, vector<128x128xf32>, vector<8x128xf32> -> vector<8x128xf32>
    %373 = vector.extract_strided_slice %372 {offsets = [0, 127], sizes = [8, 1], strides = [1, 1]} : vector<8x128xf32> to vector<8x1xf32>
    %374 = tpu.reciprocal %373 {approx = true} : vector<8x1xf32> -> vector<8x1xf32>
    %375 = arith.mulf %373, %374 : vector<8x1xf32>
    %cst_94 = arith.constant 2.000000e+00 : f32
    %376 = vector.broadcast %cst_94 : f32 to vector<8x1xf32>
    %377 = arith.subf %376, %375 : vector<8x1xf32>
    %378 = arith.mulf %374, %377 : vector<8x1xf32>
    %379 = vector.broadcast %378 : vector<8x1xf32> to vector<8x128xf32>
    %380 = arith.mulf %372, %379 : vector<8x128xf32>
    %cst_95 = arith.constant 1.000000e+00 : f32
    %381 = vector.broadcast %cst_95 : f32 to vector<8x128xf32>
    %382 = arith.subf %381, %335 : vector<8x128xf32>
    %cst_96 = arith.constant 1.000000e+00 : f32
    %383 = vector.broadcast %cst_96 : f32 to vector<8x128xf32>
    %384 = arith.subf %383, %365 : vector<8x128xf32>
    %385 = arith.mulf %380, %384 : vector<8x128xf32>
    %386 = arith.subf %380, %385 : vector<8x128xf32>
    %387 = arith.subf %384, %385 : vector<8x128xf32>
    %388 = arith.mulf %350, %382 : vector<8x128xf32>
    %389 = arith.subf %350, %388 : vector<8x128xf32>
    %390 = arith.subf %382, %388 : vector<8x128xf32>
    %391 = arith.mulf %388, %310 : vector<8x128xf32>
    %392 = arith.mulf %385, %320 : vector<8x128xf32>
    %393 = arith.addf %391, %392 : vector<8x128xf32>
    %394 = arith.mulf %389, %310 : vector<8x128xf32>
    %395 = arith.mulf %386, %320 : vector<8x128xf32>
    %396 = arith.addf %394, %395 : vector<8x128xf32>
    %397 = arith.addf %396, %393 : vector<8x128xf32>
    %398 = arith.mulf %390, %310 : vector<8x128xf32>
    %399 = arith.mulf %387, %320 : vector<8x128xf32>
    %400 = arith.addf %398, %399 : vector<8x128xf32>
    %401 = arith.addf %400, %393 : vector<8x128xf32>
    %402 = tpu.concatenate %401, %397, %393 in 1 : vector<8x128xf32>, vector<8x128xf32>, vector<8x128xf32> -> vector<8x384xf32>
    %403 = math.tanh %402 : vector<8x384xf32>
    %404 = arith.index_cast %c3_i32 : i32 to index
    %c0_97 = arith.constant 0 : index
    %c0_98 = arith.constant 0 : index
    %405 = vector.load %arg9[%404, %c0_97, %c0_98] : memref<8x8x384xf32, #tpu.memory_space<vmem>>, vector<1x8x384xf32>
    %406 = vector.shape_cast %405 : vector<1x8x384xf32> to vector<8x384xf32>
    %407 = vector.shape_cast %403 : vector<8x384xf32> to vector<1x8x384xf32>
    tpu.vector_store %arg9[%404, %c0_97, %c0_98], %407 {strides = array<i32>} : memref<8x8x384xf32, #tpu.memory_space<vmem>>, vector<1x8x384xf32>,
    %cst_99 = arith.constant dense<0.000000e+00> : vector<8x128xf32>
    %408 = tpu.matmul %402, %5, %cst_99 {dimension_numbers = #tpu.dot_dimension_numbers<[1], [0], [0], [1], [0, 0, 1, 1], [], []>} : vector<8x384xf32>, vector<384x128xf32>, vector<8x128xf32> -> vector<8x128xf32>
    %409 = arith.addf %408, %12 : vector<8x128xf32>
    %410 = math.tanh %409 : vector<8x128xf32>
    %c4_i32 = arith.constant 4 : i32
    %411 = arith.index_cast %c4_i32 : i32 to index
    %c0_100 = arith.constant 0 : index
    %c0_101 = arith.constant 0 : index
    %412 = vector.load %arg2[%411, %c0_100, %c0_101] : memref<8x8x16xf32, #tpu.memory_space<vmem>>, vector<1x8x16xf32>
    %413 = vector.shape_cast %412 : vector<1x8x16xf32> to vector<8x16xf32>
    %cst_102 = arith.constant dense<0.000000e+00> : vector<8x640xf32>
    %414 = tpu.matmul %413, %3, %cst_102 {dimension_numbers = #tpu.dot_dimension_numbers<[1], [0], [0], [1], [0, 0, 1, 1], [], []>} : vector<8x16xf32>, vector<16x640xf32>, vector<8x640xf32> -> vector<8x640xf32>
    %415 = arith.addf %414, %9 : vector<8x640xf32>
    %cst_103 = arith.constant dense<0.000000e+00> : vector<8x640xf32>
    %416 = tpu.matmul %410, %4, %cst_103 {dimension_numbers = #tpu.dot_dimension_numbers<[1], [0], [0], [1], [0, 0, 1, 1], [], []>} : vector<8x128xf32>, vector<128x640xf32>, vector<8x640xf32> -> vector<8x640xf32>
    %417 = arith.addf %415, %416 : vector<8x640xf32>
    %418 = vector.extract_strided_slice %417 {offsets = [0, 0], sizes = [8, 128], strides = [1, 1]} : vector<8x640xf32> to vector<8x128xf32>
    %419 = math.tanh %418 : vector<8x128xf32>
    %420 = vector.extract_strided_slice %417 {offsets = [0, 128], sizes = [8, 128], strides = [1, 1]} : vector<8x640xf32> to vector<8x128xf32>
    %cst_104 = arith.constant dense<0xFF800000> : vector<8xf32>
    %421 = vector.multi_reduction <maximumf>, %420, %cst_104 [1] : vector<8x128xf32> to vector<8xf32>
    %422 = vector.shape_cast %421 : vector<8xf32> to vector<8x1xf32>
    %423 = vector.broadcast %422 : vector<8x1xf32> to vector<8x128xf32>
    %424 = arith.subf %420, %423 : vector<8x128xf32>
    %425 = math.exp %424 : vector<8x128xf32>
    %cst_105 = arith.constant dense<0.000000e+00> : vector<8x128xf32>
    %426 = tpu.matmul %425, %6, %cst_105 {dimension_numbers = #tpu.dot_dimension_numbers<[1], [0], [0], [1], [0, 0, 1, 1], [], []>} : vector<8x128xf32>, vector<128x128xf32>, vector<8x128xf32> -> vector<8x128xf32>
    %427 = vector.extract_strided_slice %426 {offsets = [0, 127], sizes = [8, 1], strides = [1, 1]} : vector<8x128xf32> to vector<8x1xf32>
    %428 = tpu.reciprocal %427 {approx = true} : vector<8x1xf32> -> vector<8x1xf32>
    %429 = arith.mulf %427, %428 : vector<8x1xf32>
    %cst_106 = arith.constant 2.000000e+00 : f32
    %430 = vector.broadcast %cst_106 : f32 to vector<8x1xf32>
    %431 = arith.subf %430, %429 : vector<8x1xf32>
    %432 = arith.mulf %428, %431 : vector<8x1xf32>
    %433 = vector.broadcast %432 : vector<8x1xf32> to vector<8x128xf32>
    %434 = arith.mulf %426, %433 : vector<8x128xf32>
    %435 = vector.extract_strided_slice %417 {offsets = [0, 256], sizes = [8, 128], strides = [1, 1]} : vector<8x640xf32> to vector<8x128xf32>
    %cst_107 = arith.constant dense<0xFF800000> : vector<8xf32>
    %436 = vector.multi_reduction <maximumf>, %435, %cst_107 [1] : vector<8x128xf32> to vector<8xf32>
    %437 = vector.shape_cast %436 : vector<8xf32> to vector<8x1xf32>
    %438 = vector.broadcast %437 : vector<8x1xf32> to vector<8x128xf32>
    %439 = arith.subf %435, %438 : vector<8x128xf32>
    %440 = math.exp %439 : vector<8x128xf32>
    %cst_108 = arith.constant dense<0.000000e+00> : vector<8x128xf32>
    %441 = tpu.matmul %440, %6, %cst_108 {dimension_numbers = #tpu.dot_dimension_numbers<[1], [0], [0], [1], [0, 0, 1, 1], [], []>} : vector<8x128xf32>, vector<128x128xf32>, vector<8x128xf32> -> vector<8x128xf32>
    %442 = vector.extract_strided_slice %441 {offsets = [0, 127], sizes = [8, 1], strides = [1, 1]} : vector<8x128xf32> to vector<8x1xf32>
    %443 = tpu.reciprocal %442 {approx = true} : vector<8x1xf32> -> vector<8x1xf32>
    %444 = arith.mulf %442, %443 : vector<8x1xf32>
    %cst_109 = arith.constant 2.000000e+00 : f32
    %445 = vector.broadcast %cst_109 : f32 to vector<8x1xf32>
    %446 = arith.subf %445, %444 : vector<8x1xf32>
    %447 = arith.mulf %443, %446 : vector<8x1xf32>
    %448 = vector.broadcast %447 : vector<8x1xf32> to vector<8x128xf32>
    %449 = arith.mulf %441, %448 : vector<8x128xf32>
    %450 = vector.extract_strided_slice %417 {offsets = [0, 384], sizes = [8, 128], strides = [1, 1]} : vector<8x640xf32> to vector<8x128xf32>
    %cst_110 = arith.constant dense<0xFF800000> : vector<8xf32>
    %451 = vector.multi_reduction <maximumf>, %450, %cst_110 [1] : vector<8x128xf32> to vector<8xf32>
    %452 = vector.shape_cast %451 : vector<8xf32> to vector<8x1xf32>
    %453 = vector.broadcast %452 : vector<8x1xf32> to vector<8x128xf32>
    %454 = arith.subf %450, %453 : vector<8x128xf32>
    %455 = math.exp %454 : vector<8x128xf32>
    %cst_111 = arith.constant dense<0.000000e+00> : vector<8x128xf32>
    %456 = tpu.matmul %455, %6, %cst_111 {dimension_numbers = #tpu.dot_dimension_numbers<[1], [0], [0], [1], [0, 0, 1, 1], [], []>} : vector<8x128xf32>, vector<128x128xf32>, vector<8x128xf32> -> vector<8x128xf32>
    %457 = vector.extract_strided_slice %456 {offsets = [0, 127], sizes = [8, 1], strides = [1, 1]} : vector<8x128xf32> to vector<8x1xf32>
    %458 = tpu.reciprocal %457 {approx = true} : vector<8x1xf32> -> vector<8x1xf32>
    %459 = arith.mulf %457, %458 : vector<8x1xf32>
    %cst_112 = arith.constant 2.000000e+00 : f32
    %460 = vector.broadcast %cst_112 : f32 to vector<8x1xf32>
    %461 = arith.subf %460, %459 : vector<8x1xf32>
    %462 = arith.mulf %458, %461 : vector<8x1xf32>
    %463 = vector.broadcast %462 : vector<8x1xf32> to vector<8x128xf32>
    %464 = arith.mulf %456, %463 : vector<8x128xf32>
    %465 = vector.extract_strided_slice %417 {offsets = [0, 512], sizes = [8, 128], strides = [1, 1]} : vector<8x640xf32> to vector<8x128xf32>
    %cst_113 = arith.constant dense<0xFF800000> : vector<8xf32>
    %466 = vector.multi_reduction <maximumf>, %465, %cst_113 [1] : vector<8x128xf32> to vector<8xf32>
    %467 = vector.shape_cast %466 : vector<8xf32> to vector<8x1xf32>
    %468 = vector.broadcast %467 : vector<8x1xf32> to vector<8x128xf32>
    %469 = arith.subf %465, %468 : vector<8x128xf32>
    %470 = math.exp %469 : vector<8x128xf32>
    %cst_114 = arith.constant dense<0.000000e+00> : vector<8x128xf32>
    %471 = tpu.matmul %470, %6, %cst_114 {dimension_numbers = #tpu.dot_dimension_numbers<[1], [0], [0], [1], [0, 0, 1, 1], [], []>} : vector<8x128xf32>, vector<128x128xf32>, vector<8x128xf32> -> vector<8x128xf32>
    %472 = vector.extract_strided_slice %471 {offsets = [0, 127], sizes = [8, 1], strides = [1, 1]} : vector<8x128xf32> to vector<8x1xf32>
    %473 = tpu.reciprocal %472 {approx = true} : vector<8x1xf32> -> vector<8x1xf32>
    %474 = arith.mulf %472, %473 : vector<8x1xf32>
    %cst_115 = arith.constant 2.000000e+00 : f32
    %475 = vector.broadcast %cst_115 : f32 to vector<8x1xf32>
    %476 = arith.subf %475, %474 : vector<8x1xf32>
    %477 = arith.mulf %473, %476 : vector<8x1xf32>
    %478 = vector.broadcast %477 : vector<8x1xf32> to vector<8x128xf32>
    %479 = arith.mulf %471, %478 : vector<8x128xf32>
    %cst_116 = arith.constant 1.000000e+00 : f32
    %480 = vector.broadcast %cst_116 : f32 to vector<8x128xf32>
    %481 = arith.subf %480, %434 : vector<8x128xf32>
    %cst_117 = arith.constant 1.000000e+00 : f32
    %482 = vector.broadcast %cst_117 : f32 to vector<8x128xf32>
    %483 = arith.subf %482, %464 : vector<8x128xf32>
    %484 = arith.mulf %479, %483 : vector<8x128xf32>
    %485 = arith.subf %479, %484 : vector<8x128xf32>
    %486 = arith.subf %483, %484 : vector<8x128xf32>
    %487 = arith.mulf %449, %481 : vector<8x128xf32>
    %488 = arith.subf %449, %487 : vector<8x128xf32>
    %489 = arith.subf %481, %487 : vector<8x128xf32>
    %490 = arith.mulf %487, %409 : vector<8x128xf32>
    %491 = arith.mulf %484, %419 : vector<8x128xf32>
    %492 = arith.addf %490, %491 : vector<8x128xf32>
    %493 = arith.mulf %488, %409 : vector<8x128xf32>
    %494 = arith.mulf %485, %419 : vector<8x128xf32>
    %495 = arith.addf %493, %494 : vector<8x128xf32>
    %496 = arith.addf %495, %492 : vector<8x128xf32>
    %497 = arith.mulf %489, %409 : vector<8x128xf32>
    %498 = arith.mulf %486, %419 : vector<8x128xf32>
    %499 = arith.addf %497, %498 : vector<8x128xf32>
    %500 = arith.addf %499, %492 : vector<8x128xf32>
    %501 = tpu.concatenate %500, %496, %492 in 1 : vector<8x128xf32>, vector<8x128xf32>, vector<8x128xf32> -> vector<8x384xf32>
    %502 = math.tanh %501 : vector<8x384xf32>
    %503 = arith.index_cast %c4_i32 : i32 to index
    %c0_118 = arith.constant 0 : index
    %c0_119 = arith.constant 0 : index
    %504 = vector.load %arg9[%503, %c0_118, %c0_119] : memref<8x8x384xf32, #tpu.memory_space<vmem>>, vector<1x8x384xf32>
    %505 = vector.shape_cast %504 : vector<1x8x384xf32> to vector<8x384xf32>
    %506 = vector.shape_cast %502 : vector<8x384xf32> to vector<1x8x384xf32>
    tpu.vector_store %arg9[%503, %c0_118, %c0_119], %506 {strides = array<i32>} : memref<8x8x384xf32, #tpu.memory_space<vmem>>, vector<1x8x384xf32>,
    %cst_120 = arith.constant dense<0.000000e+00> : vector<8x128xf32>
    %507 = tpu.matmul %501, %5, %cst_120 {dimension_numbers = #tpu.dot_dimension_numbers<[1], [0], [0], [1], [0, 0, 1, 1], [], []>} : vector<8x384xf32>, vector<384x128xf32>, vector<8x128xf32> -> vector<8x128xf32>
    %508 = arith.addf %507, %12 : vector<8x128xf32>
    %509 = math.tanh %508 : vector<8x128xf32>
    %c5_i32 = arith.constant 5 : i32
    %510 = arith.index_cast %c5_i32 : i32 to index
    %c0_121 = arith.constant 0 : index
    %c0_122 = arith.constant 0 : index
    %511 = vector.load %arg2[%510, %c0_121, %c0_122] : memref<8x8x16xf32, #tpu.memory_space<vmem>>, vector<1x8x16xf32>
    %512 = vector.shape_cast %511 : vector<1x8x16xf32> to vector<8x16xf32>
    %cst_123 = arith.constant dense<0.000000e+00> : vector<8x640xf32>
    %513 = tpu.matmul %512, %3, %cst_123 {dimension_numbers = #tpu.dot_dimension_numbers<[1], [0], [0], [1], [0, 0, 1, 1], [], []>} : vector<8x16xf32>, vector<16x640xf32>, vector<8x640xf32> -> vector<8x640xf32>
    %514 = arith.addf %513, %9 : vector<8x640xf32>
    %cst_124 = arith.constant dense<0.000000e+00> : vector<8x640xf32>
    %515 = tpu.matmul %509, %4, %cst_124 {dimension_numbers = #tpu.dot_dimension_numbers<[1], [0], [0], [1], [0, 0, 1, 1], [], []>} : vector<8x128xf32>, vector<128x640xf32>, vector<8x640xf32> -> vector<8x640xf32>
    %516 = arith.addf %514, %515 : vector<8x640xf32>
    %517 = vector.extract_strided_slice %516 {offsets = [0, 0], sizes = [8, 128], strides = [1, 1]} : vector<8x640xf32> to vector<8x128xf32>
    %518 = math.tanh %517 : vector<8x128xf32>
    %519 = vector.extract_strided_slice %516 {offsets = [0, 128], sizes = [8, 128], strides = [1, 1]} : vector<8x640xf32> to vector<8x128xf32>
    %cst_125 = arith.constant dense<0xFF800000> : vector<8xf32>
    %520 = vector.multi_reduction <maximumf>, %519, %cst_125 [1] : vector<8x128xf32> to vector<8xf32>
    %521 = vector.shape_cast %520 : vector<8xf32> to vector<8x1xf32>
    %522 = vector.broadcast %521 : vector<8x1xf32> to vector<8x128xf32>
    %523 = arith.subf %519, %522 : vector<8x128xf32>
    %524 = math.exp %523 : vector<8x128xf32>
    %cst_126 = arith.constant dense<0.000000e+00> : vector<8x128xf32>
    %525 = tpu.matmul %524, %6, %cst_126 {dimension_numbers = #tpu.dot_dimension_numbers<[1], [0], [0], [1], [0, 0, 1, 1], [], []>} : vector<8x128xf32>, vector<128x128xf32>, vector<8x128xf32> -> vector<8x128xf32>
    %526 = vector.extract_strided_slice %525 {offsets = [0, 127], sizes = [8, 1], strides = [1, 1]} : vector<8x128xf32> to vector<8x1xf32>
    %527 = tpu.reciprocal %526 {approx = true} : vector<8x1xf32> -> vector<8x1xf32>
    %528 = arith.mulf %526, %527 : vector<8x1xf32>
    %cst_127 = arith.constant 2.000000e+00 : f32
    %529 = vector.broadcast %cst_127 : f32 to vector<8x1xf32>
    %530 = arith.subf %529, %528 : vector<8x1xf32>
    %531 = arith.mulf %527, %530 : vector<8x1xf32>
    %532 = vector.broadcast %531 : vector<8x1xf32> to vector<8x128xf32>
    %533 = arith.mulf %525, %532 : vector<8x128xf32>
    %534 = vector.extract_strided_slice %516 {offsets = [0, 256], sizes = [8, 128], strides = [1, 1]} : vector<8x640xf32> to vector<8x128xf32>
    %cst_128 = arith.constant dense<0xFF800000> : vector<8xf32>
    %535 = vector.multi_reduction <maximumf>, %534, %cst_128 [1] : vector<8x128xf32> to vector<8xf32>
    %536 = vector.shape_cast %535 : vector<8xf32> to vector<8x1xf32>
    %537 = vector.broadcast %536 : vector<8x1xf32> to vector<8x128xf32>
    %538 = arith.subf %534, %537 : vector<8x128xf32>
    %539 = math.exp %538 : vector<8x128xf32>
    %cst_129 = arith.constant dense<0.000000e+00> : vector<8x128xf32>
    %540 = tpu.matmul %539, %6, %cst_129 {dimension_numbers = #tpu.dot_dimension_numbers<[1], [0], [0], [1], [0, 0, 1, 1], [], []>} : vector<8x128xf32>, vector<128x128xf32>, vector<8x128xf32> -> vector<8x128xf32>
    %541 = vector.extract_strided_slice %540 {offsets = [0, 127], sizes = [8, 1], strides = [1, 1]} : vector<8x128xf32> to vector<8x1xf32>
    %542 = tpu.reciprocal %541 {approx = true} : vector<8x1xf32> -> vector<8x1xf32>
    %543 = arith.mulf %541, %542 : vector<8x1xf32>
    %cst_130 = arith.constant 2.000000e+00 : f32
    %544 = vector.broadcast %cst_130 : f32 to vector<8x1xf32>
    %545 = arith.subf %544, %543 : vector<8x1xf32>
    %546 = arith.mulf %542, %545 : vector<8x1xf32>
    %547 = vector.broadcast %546 : vector<8x1xf32> to vector<8x128xf32>
    %548 = arith.mulf %540, %547 : vector<8x128xf32>
    %549 = vector.extract_strided_slice %516 {offsets = [0, 384], sizes = [8, 128], strides = [1, 1]} : vector<8x640xf32> to vector<8x128xf32>
    %cst_131 = arith.constant dense<0xFF800000> : vector<8xf32>
    %550 = vector.multi_reduction <maximumf>, %549, %cst_131 [1] : vector<8x128xf32> to vector<8xf32>
    %551 = vector.shape_cast %550 : vector<8xf32> to vector<8x1xf32>
    %552 = vector.broadcast %551 : vector<8x1xf32> to vector<8x128xf32>
    %553 = arith.subf %549, %552 : vector<8x128xf32>
    %554 = math.exp %553 : vector<8x128xf32>
    %cst_132 = arith.constant dense<0.000000e+00> : vector<8x128xf32>
    %555 = tpu.matmul %554, %6, %cst_132 {dimension_numbers = #tpu.dot_dimension_numbers<[1], [0], [0], [1], [0, 0, 1, 1], [], []>} : vector<8x128xf32>, vector<128x128xf32>, vector<8x128xf32> -> vector<8x128xf32>
    %556 = vector.extract_strided_slice %555 {offsets = [0, 127], sizes = [8, 1], strides = [1, 1]} : vector<8x128xf32> to vector<8x1xf32>
    %557 = tpu.reciprocal %556 {approx = true} : vector<8x1xf32> -> vector<8x1xf32>
    %558 = arith.mulf %556, %557 : vector<8x1xf32>
    %cst_133 = arith.constant 2.000000e+00 : f32
    %559 = vector.broadcast %cst_133 : f32 to vector<8x1xf32>
    %560 = arith.subf %559, %558 : vector<8x1xf32>
    %561 = arith.mulf %557, %560 : vector<8x1xf32>
    %562 = vector.broadcast %561 : vector<8x1xf32> to vector<8x128xf32>
    %563 = arith.mulf %555, %562 : vector<8x128xf32>
    %564 = vector.extract_strided_slice %516 {offsets = [0, 512], sizes = [8, 128], strides = [1, 1]} : vector<8x640xf32> to vector<8x128xf32>
    %cst_134 = arith.constant dense<0xFF800000> : vector<8xf32>
    %565 = vector.multi_reduction <maximumf>, %564, %cst_134 [1] : vector<8x128xf32> to vector<8xf32>
    %566 = vector.shape_cast %565 : vector<8xf32> to vector<8x1xf32>
    %567 = vector.broadcast %566 : vector<8x1xf32> to vector<8x128xf32>
    %568 = arith.subf %564, %567 : vector<8x128xf32>
    %569 = math.exp %568 : vector<8x128xf32>
    %cst_135 = arith.constant dense<0.000000e+00> : vector<8x128xf32>
    %570 = tpu.matmul %569, %6, %cst_135 {dimension_numbers = #tpu.dot_dimension_numbers<[1], [0], [0], [1], [0, 0, 1, 1], [], []>} : vector<8x128xf32>, vector<128x128xf32>, vector<8x128xf32> -> vector<8x128xf32>
    %571 = vector.extract_strided_slice %570 {offsets = [0, 127], sizes = [8, 1], strides = [1, 1]} : vector<8x128xf32> to vector<8x1xf32>
    %572 = tpu.reciprocal %571 {approx = true} : vector<8x1xf32> -> vector<8x1xf32>
    %573 = arith.mulf %571, %572 : vector<8x1xf32>
    %cst_136 = arith.constant 2.000000e+00 : f32
    %574 = vector.broadcast %cst_136 : f32 to vector<8x1xf32>
    %575 = arith.subf %574, %573 : vector<8x1xf32>
    %576 = arith.mulf %572, %575 : vector<8x1xf32>
    %577 = vector.broadcast %576 : vector<8x1xf32> to vector<8x128xf32>
    %578 = arith.mulf %570, %577 : vector<8x128xf32>
    %cst_137 = arith.constant 1.000000e+00 : f32
    %579 = vector.broadcast %cst_137 : f32 to vector<8x128xf32>
    %580 = arith.subf %579, %533 : vector<8x128xf32>
    %cst_138 = arith.constant 1.000000e+00 : f32
    %581 = vector.broadcast %cst_138 : f32 to vector<8x128xf32>
    %582 = arith.subf %581, %563 : vector<8x128xf32>
    %583 = arith.mulf %578, %582 : vector<8x128xf32>
    %584 = arith.subf %578, %583 : vector<8x128xf32>
    %585 = arith.subf %582, %583 : vector<8x128xf32>
    %586 = arith.mulf %548, %580 : vector<8x128xf32>
    %587 = arith.subf %548, %586 : vector<8x128xf32>
    %588 = arith.subf %580, %586 : vector<8x128xf32>
    %589 = arith.mulf %586, %508 : vector<8x128xf32>
    %590 = arith.mulf %583, %518 : vector<8x128xf32>
    %591 = arith.addf %589, %590 : vector<8x128xf32>
    %592 = arith.mulf %587, %508 : vector<8x128xf32>
    %593 = arith.mulf %584, %518 : vector<8x128xf32>
    %594 = arith.addf %592, %593 : vector<8x128xf32>
    %595 = arith.addf %594, %591 : vector<8x128xf32>
    %596 = arith.mulf %588, %508 : vector<8x128xf32>
    %597 = arith.mulf %585, %518 : vector<8x128xf32>
    %598 = arith.addf %596, %597 : vector<8x128xf32>
    %599 = arith.addf %598, %591 : vector<8x128xf32>
    %600 = tpu.concatenate %599, %595, %591 in 1 : vector<8x128xf32>, vector<8x128xf32>, vector<8x128xf32> -> vector<8x384xf32>
    %601 = math.tanh %600 : vector<8x384xf32>
    %602 = arith.index_cast %c5_i32 : i32 to index
    %c0_139 = arith.constant 0 : index
    %c0_140 = arith.constant 0 : index
    %603 = vector.load %arg9[%602, %c0_139, %c0_140] : memref<8x8x384xf32, #tpu.memory_space<vmem>>, vector<1x8x384xf32>
    %604 = vector.shape_cast %603 : vector<1x8x384xf32> to vector<8x384xf32>
    %605 = vector.shape_cast %601 : vector<8x384xf32> to vector<1x8x384xf32>
    tpu.vector_store %arg9[%602, %c0_139, %c0_140], %605 {strides = array<i32>} : memref<8x8x384xf32, #tpu.memory_space<vmem>>, vector<1x8x384xf32>,
    %cst_141 = arith.constant dense<0.000000e+00> : vector<8x128xf32>
    %606 = tpu.matmul %600, %5, %cst_141 {dimension_numbers = #tpu.dot_dimension_numbers<[1], [0], [0], [1], [0, 0, 1, 1], [], []>} : vector<8x384xf32>, vector<384x128xf32>, vector<8x128xf32> -> vector<8x128xf32>
    %607 = arith.addf %606, %12 : vector<8x128xf32>
    %608 = math.tanh %607 : vector<8x128xf32>
    %c6_i32 = arith.constant 6 : i32
    %609 = arith.index_cast %c6_i32 : i32 to index
    %c0_142 = arith.constant 0 : index
    %c0_143 = arith.constant 0 : index
    %610 = vector.load %arg2[%609, %c0_142, %c0_143] : memref<8x8x16xf32, #tpu.memory_space<vmem>>, vector<1x8x16xf32>
    %611 = vector.shape_cast %610 : vector<1x8x16xf32> to vector<8x16xf32>
    %cst_144 = arith.constant dense<0.000000e+00> : vector<8x640xf32>
    %612 = tpu.matmul %611, %3, %cst_144 {dimension_numbers = #tpu.dot_dimension_numbers<[1], [0], [0], [1], [0, 0, 1, 1], [], []>} : vector<8x16xf32>, vector<16x640xf32>, vector<8x640xf32> -> vector<8x640xf32>
    %613 = arith.addf %612, %9 : vector<8x640xf32>
    %cst_145 = arith.constant dense<0.000000e+00> : vector<8x640xf32>
    %614 = tpu.matmul %608, %4, %cst_145 {dimension_numbers = #tpu.dot_dimension_numbers<[1], [0], [0], [1], [0, 0, 1, 1], [], []>} : vector<8x128xf32>, vector<128x640xf32>, vector<8x640xf32> -> vector<8x640xf32>
    %615 = arith.addf %613, %614 : vector<8x640xf32>
    %616 = vector.extract_strided_slice %615 {offsets = [0, 0], sizes = [8, 128], strides = [1, 1]} : vector<8x640xf32> to vector<8x128xf32>
    %617 = math.tanh %616 : vector<8x128xf32>
    %618 = vector.extract_strided_slice %615 {offsets = [0, 128], sizes = [8, 128], strides = [1, 1]} : vector<8x640xf32> to vector<8x128xf32>
    %cst_146 = arith.constant dense<0xFF800000> : vector<8xf32>
    %619 = vector.multi_reduction <maximumf>, %618, %cst_146 [1] : vector<8x128xf32> to vector<8xf32>
    %620 = vector.shape_cast %619 : vector<8xf32> to vector<8x1xf32>
    %621 = vector.broadcast %620 : vector<8x1xf32> to vector<8x128xf32>
    %622 = arith.subf %618, %621 : vector<8x128xf32>
    %623 = math.exp %622 : vector<8x128xf32>
    %cst_147 = arith.constant dense<0.000000e+00> : vector<8x128xf32>
    %624 = tpu.matmul %623, %6, %cst_147 {dimension_numbers = #tpu.dot_dimension_numbers<[1], [0], [0], [1], [0, 0, 1, 1], [], []>} : vector<8x128xf32>, vector<128x128xf32>, vector<8x128xf32> -> vector<8x128xf32>
    %625 = vector.extract_strided_slice %624 {offsets = [0, 127], sizes = [8, 1], strides = [1, 1]} : vector<8x128xf32> to vector<8x1xf32>
    %626 = tpu.reciprocal %625 {approx = true} : vector<8x1xf32> -> vector<8x1xf32>
    %627 = arith.mulf %625, %626 : vector<8x1xf32>
    %cst_148 = arith.constant 2.000000e+00 : f32
    %628 = vector.broadcast %cst_148 : f32 to vector<8x1xf32>
    %629 = arith.subf %628, %627 : vector<8x1xf32>
    %630 = arith.mulf %626, %629 : vector<8x1xf32>
    %631 = vector.broadcast %630 : vector<8x1xf32> to vector<8x128xf32>
    %632 = arith.mulf %624, %631 : vector<8x128xf32>
    %633 = vector.extract_strided_slice %615 {offsets = [0, 256], sizes = [8, 128], strides = [1, 1]} : vector<8x640xf32> to vector<8x128xf32>
    %cst_149 = arith.constant dense<0xFF800000> : vector<8xf32>
    %634 = vector.multi_reduction <maximumf>, %633, %cst_149 [1] : vector<8x128xf32> to vector<8xf32>
    %635 = vector.shape_cast %634 : vector<8xf32> to vector<8x1xf32>
    %636 = vector.broadcast %635 : vector<8x1xf32> to vector<8x128xf32>
    %637 = arith.subf %633, %636 : vector<8x128xf32>
    %638 = math.exp %637 : vector<8x128xf32>
    %cst_150 = arith.constant dense<0.000000e+00> : vector<8x128xf32>
    %639 = tpu.matmul %638, %6, %cst_150 {dimension_numbers = #tpu.dot_dimension_numbers<[1], [0], [0], [1], [0, 0, 1, 1], [], []>} : vector<8x128xf32>, vector<128x128xf32>, vector<8x128xf32> -> vector<8x128xf32>
    %640 = vector.extract_strided_slice %639 {offsets = [0, 127], sizes = [8, 1], strides = [1, 1]} : vector<8x128xf32> to vector<8x1xf32>
    %641 = tpu.reciprocal %640 {approx = true} : vector<8x1xf32> -> vector<8x1xf32>
    %642 = arith.mulf %640, %641 : vector<8x1xf32>
    %cst_151 = arith.constant 2.000000e+00 : f32
    %643 = vector.broadcast %cst_151 : f32 to vector<8x1xf32>
    %644 = arith.subf %643, %642 : vector<8x1xf32>
    %645 = arith.mulf %641, %644 : vector<8x1xf32>
    %646 = vector.broadcast %645 : vector<8x1xf32> to vector<8x128xf32>
    %647 = arith.mulf %639, %646 : vector<8x128xf32>
    %648 = vector.extract_strided_slice %615 {offsets = [0, 384], sizes = [8, 128], strides = [1, 1]} : vector<8x640xf32> to vector<8x128xf32>
    %cst_152 = arith.constant dense<0xFF800000> : vector<8xf32>
    %649 = vector.multi_reduction <maximumf>, %648, %cst_152 [1] : vector<8x128xf32> to vector<8xf32>
    %650 = vector.shape_cast %649 : vector<8xf32> to vector<8x1xf32>
    %651 = vector.broadcast %650 : vector<8x1xf32> to vector<8x128xf32>
    %652 = arith.subf %648, %651 : vector<8x128xf32>
    %653 = math.exp %652 : vector<8x128xf32>
    %cst_153 = arith.constant dense<0.000000e+00> : vector<8x128xf32>
    %654 = tpu.matmul %653, %6, %cst_153 {dimension_numbers = #tpu.dot_dimension_numbers<[1], [0], [0], [1], [0, 0, 1, 1], [], []>} : vector<8x128xf32>, vector<128x128xf32>, vector<8x128xf32> -> vector<8x128xf32>
    %655 = vector.extract_strided_slice %654 {offsets = [0, 127], sizes = [8, 1], strides = [1, 1]} : vector<8x128xf32> to vector<8x1xf32>
    %656 = tpu.reciprocal %655 {approx = true} : vector<8x1xf32> -> vector<8x1xf32>
    %657 = arith.mulf %655, %656 : vector<8x1xf32>
    %cst_154 = arith.constant 2.000000e+00 : f32
    %658 = vector.broadcast %cst_154 : f32 to vector<8x1xf32>
    %659 = arith.subf %658, %657 : vector<8x1xf32>
    %660 = arith.mulf %656, %659 : vector<8x1xf32>
    %661 = vector.broadcast %660 : vector<8x1xf32> to vector<8x128xf32>
    %662 = arith.mulf %654, %661 : vector<8x128xf32>
    %663 = vector.extract_strided_slice %615 {offsets = [0, 512], sizes = [8, 128], strides = [1, 1]} : vector<8x640xf32> to vector<8x128xf32>
    %cst_155 = arith.constant dense<0xFF800000> : vector<8xf32>
    %664 = vector.multi_reduction <maximumf>, %663, %cst_155 [1] : vector<8x128xf32> to vector<8xf32>
    %665 = vector.shape_cast %664 : vector<8xf32> to vector<8x1xf32>
    %666 = vector.broadcast %665 : vector<8x1xf32> to vector<8x128xf32>
    %667 = arith.subf %663, %666 : vector<8x128xf32>
    %668 = math.exp %667 : vector<8x128xf32>
    %cst_156 = arith.constant dense<0.000000e+00> : vector<8x128xf32>
    %669 = tpu.matmul %668, %6, %cst_156 {dimension_numbers = #tpu.dot_dimension_numbers<[1], [0], [0], [1], [0, 0, 1, 1], [], []>} : vector<8x128xf32>, vector<128x128xf32>, vector<8x128xf32> -> vector<8x128xf32>
    %670 = vector.extract_strided_slice %669 {offsets = [0, 127], sizes = [8, 1], strides = [1, 1]} : vector<8x128xf32> to vector<8x1xf32>
    %671 = tpu.reciprocal %670 {approx = true} : vector<8x1xf32> -> vector<8x1xf32>
    %672 = arith.mulf %670, %671 : vector<8x1xf32>
    %cst_157 = arith.constant 2.000000e+00 : f32
    %673 = vector.broadcast %cst_157 : f32 to vector<8x1xf32>
    %674 = arith.subf %673, %672 : vector<8x1xf32>
    %675 = arith.mulf %671, %674 : vector<8x1xf32>
    %676 = vector.broadcast %675 : vector<8x1xf32> to vector<8x128xf32>
    %677 = arith.mulf %669, %676 : vector<8x128xf32>
    %cst_158 = arith.constant 1.000000e+00 : f32
    %678 = vector.broadcast %cst_158 : f32 to vector<8x128xf32>
    %679 = arith.subf %678, %632 : vector<8x128xf32>
    %cst_159 = arith.constant 1.000000e+00 : f32
    %680 = vector.broadcast %cst_159 : f32 to vector<8x128xf32>
    %681 = arith.subf %680, %662 : vector<8x128xf32>
    %682 = arith.mulf %677, %681 : vector<8x128xf32>
    %683 = arith.subf %677, %682 : vector<8x128xf32>
    %684 = arith.subf %681, %682 : vector<8x128xf32>
    %685 = arith.mulf %647, %679 : vector<8x128xf32>
    %686 = arith.subf %647, %685 : vector<8x128xf32>
    %687 = arith.subf %679, %685 : vector<8x128xf32>
    %688 = arith.mulf %685, %607 : vector<8x128xf32>
    %689 = arith.mulf %682, %617 : vector<8x128xf32>
    %690 = arith.addf %688, %689 : vector<8x128xf32>
    %691 = arith.mulf %686, %607 : vector<8x128xf32>
    %692 = arith.mulf %683, %617 : vector<8x128xf32>
    %693 = arith.addf %691, %692 : vector<8x128xf32>
    %694 = arith.addf %693, %690 : vector<8x128xf32>
    %695 = arith.mulf %687, %607 : vector<8x128xf32>
    %696 = arith.mulf %684, %617 : vector<8x128xf32>
    %697 = arith.addf %695, %696 : vector<8x128xf32>
    %698 = arith.addf %697, %690 : vector<8x128xf32>
    %699 = tpu.concatenate %698, %694, %690 in 1 : vector<8x128xf32>, vector<8x128xf32>, vector<8x128xf32> -> vector<8x384xf32>
    %700 = math.tanh %699 : vector<8x384xf32>
    %701 = arith.index_cast %c6_i32 : i32 to index
    %c0_160 = arith.constant 0 : index
    %c0_161 = arith.constant 0 : index
    %702 = vector.load %arg9[%701, %c0_160, %c0_161] : memref<8x8x384xf32, #tpu.memory_space<vmem>>, vector<1x8x384xf32>
    %703 = vector.shape_cast %702 : vector<1x8x384xf32> to vector<8x384xf32>
    %704 = vector.shape_cast %700 : vector<8x384xf32> to vector<1x8x384xf32>
    tpu.vector_store %arg9[%701, %c0_160, %c0_161], %704 {strides = array<i32>} : memref<8x8x384xf32, #tpu.memory_space<vmem>>, vector<1x8x384xf32>,
    %cst_162 = arith.constant dense<0.000000e+00> : vector<8x128xf32>
    %705 = tpu.matmul %699, %5, %cst_162 {dimension_numbers = #tpu.dot_dimension_numbers<[1], [0], [0], [1], [0, 0, 1, 1], [], []>} : vector<8x384xf32>, vector<384x128xf32>, vector<8x128xf32> -> vector<8x128xf32>
    %706 = arith.addf %705, %12 : vector<8x128xf32>
    %707 = math.tanh %706 : vector<8x128xf32>
    %c7_i32 = arith.constant 7 : i32
    %708 = arith.index_cast %c7_i32 : i32 to index
    %c0_163 = arith.constant 0 : index
    %c0_164 = arith.constant 0 : index
    %709 = vector.load %arg2[%708, %c0_163, %c0_164] : memref<8x8x16xf32, #tpu.memory_space<vmem>>, vector<1x8x16xf32>
    %710 = vector.shape_cast %709 : vector<1x8x16xf32> to vector<8x16xf32>
    %cst_165 = arith.constant dense<0.000000e+00> : vector<8x640xf32>
    %711 = tpu.matmul %710, %3, %cst_165 {dimension_numbers = #tpu.dot_dimension_numbers<[1], [0], [0], [1], [0, 0, 1, 1], [], []>} : vector<8x16xf32>, vector<16x640xf32>, vector<8x640xf32> -> vector<8x640xf32>
    %712 = arith.addf %711, %9 : vector<8x640xf32>
    %cst_166 = arith.constant dense<0.000000e+00> : vector<8x640xf32>
    %713 = tpu.matmul %707, %4, %cst_166 {dimension_numbers = #tpu.dot_dimension_numbers<[1], [0], [0], [1], [0, 0, 1, 1], [], []>} : vector<8x128xf32>, vector<128x640xf32>, vector<8x640xf32> -> vector<8x640xf32>
    %714 = arith.addf %712, %713 : vector<8x640xf32>
    %715 = vector.extract_strided_slice %714 {offsets = [0, 0], sizes = [8, 128], strides = [1, 1]} : vector<8x640xf32> to vector<8x128xf32>
    %716 = math.tanh %715 : vector<8x128xf32>
    %717 = vector.extract_strided_slice %714 {offsets = [0, 128], sizes = [8, 128], strides = [1, 1]} : vector<8x640xf32> to vector<8x128xf32>
    %cst_167 = arith.constant dense<0xFF800000> : vector<8xf32>
    %718 = vector.multi_reduction <maximumf>, %717, %cst_167 [1] : vector<8x128xf32> to vector<8xf32>
    %719 = vector.shape_cast %718 : vector<8xf32> to vector<8x1xf32>
    %720 = vector.broadcast %719 : vector<8x1xf32> to vector<8x128xf32>
    %721 = arith.subf %717, %720 : vector<8x128xf32>
    %722 = math.exp %721 : vector<8x128xf32>
    %cst_168 = arith.constant dense<0.000000e+00> : vector<8x128xf32>
    %723 = tpu.matmul %722, %6, %cst_168 {dimension_numbers = #tpu.dot_dimension_numbers<[1], [0], [0], [1], [0, 0, 1, 1], [], []>} : vector<8x128xf32>, vector<128x128xf32>, vector<8x128xf32> -> vector<8x128xf32>
    %724 = vector.extract_strided_slice %723 {offsets = [0, 127], sizes = [8, 1], strides = [1, 1]} : vector<8x128xf32> to vector<8x1xf32>
    %725 = tpu.reciprocal %724 {approx = true} : vector<8x1xf32> -> vector<8x1xf32>
    %726 = arith.mulf %724, %725 : vector<8x1xf32>
    %cst_169 = arith.constant 2.000000e+00 : f32
    %727 = vector.broadcast %cst_169 : f32 to vector<8x1xf32>
    %728 = arith.subf %727, %726 : vector<8x1xf32>
    %729 = arith.mulf %725, %728 : vector<8x1xf32>
    %730 = vector.broadcast %729 : vector<8x1xf32> to vector<8x128xf32>
    %731 = arith.mulf %723, %730 : vector<8x128xf32>
    %732 = vector.extract_strided_slice %714 {offsets = [0, 256], sizes = [8, 128], strides = [1, 1]} : vector<8x640xf32> to vector<8x128xf32>
    %cst_170 = arith.constant dense<0xFF800000> : vector<8xf32>
    %733 = vector.multi_reduction <maximumf>, %732, %cst_170 [1] : vector<8x128xf32> to vector<8xf32>
    %734 = vector.shape_cast %733 : vector<8xf32> to vector<8x1xf32>
    %735 = vector.broadcast %734 : vector<8x1xf32> to vector<8x128xf32>
    %736 = arith.subf %732, %735 : vector<8x128xf32>
    %737 = math.exp %736 : vector<8x128xf32>
    %cst_171 = arith.constant dense<0.000000e+00> : vector<8x128xf32>
    %738 = tpu.matmul %737, %6, %cst_171 {dimension_numbers = #tpu.dot_dimension_numbers<[1], [0], [0], [1], [0, 0, 1, 1], [], []>} : vector<8x128xf32>, vector<128x128xf32>, vector<8x128xf32> -> vector<8x128xf32>
    %739 = vector.extract_strided_slice %738 {offsets = [0, 127], sizes = [8, 1], strides = [1, 1]} : vector<8x128xf32> to vector<8x1xf32>
    %740 = tpu.reciprocal %739 {approx = true} : vector<8x1xf32> -> vector<8x1xf32>
    %741 = arith.mulf %739, %740 : vector<8x1xf32>
    %cst_172 = arith.constant 2.000000e+00 : f32
    %742 = vector.broadcast %cst_172 : f32 to vector<8x1xf32>
    %743 = arith.subf %742, %741 : vector<8x1xf32>
    %744 = arith.mulf %740, %743 : vector<8x1xf32>
    %745 = vector.broadcast %744 : vector<8x1xf32> to vector<8x128xf32>
    %746 = arith.mulf %738, %745 : vector<8x128xf32>
    %747 = vector.extract_strided_slice %714 {offsets = [0, 384], sizes = [8, 128], strides = [1, 1]} : vector<8x640xf32> to vector<8x128xf32>
    %cst_173 = arith.constant dense<0xFF800000> : vector<8xf32>
    %748 = vector.multi_reduction <maximumf>, %747, %cst_173 [1] : vector<8x128xf32> to vector<8xf32>
    %749 = vector.shape_cast %748 : vector<8xf32> to vector<8x1xf32>
    %750 = vector.broadcast %749 : vector<8x1xf32> to vector<8x128xf32>
    %751 = arith.subf %747, %750 : vector<8x128xf32>
    %752 = math.exp %751 : vector<8x128xf32>
    %cst_174 = arith.constant dense<0.000000e+00> : vector<8x128xf32>
    %753 = tpu.matmul %752, %6, %cst_174 {dimension_numbers = #tpu.dot_dimension_numbers<[1], [0], [0], [1], [0, 0, 1, 1], [], []>} : vector<8x128xf32>, vector<128x128xf32>, vector<8x128xf32> -> vector<8x128xf32>
    %754 = vector.extract_strided_slice %753 {offsets = [0, 127], sizes = [8, 1], strides = [1, 1]} : vector<8x128xf32> to vector<8x1xf32>
    %755 = tpu.reciprocal %754 {approx = true} : vector<8x1xf32> -> vector<8x1xf32>
    %756 = arith.mulf %754, %755 : vector<8x1xf32>
    %cst_175 = arith.constant 2.000000e+00 : f32
    %757 = vector.broadcast %cst_175 : f32 to vector<8x1xf32>
    %758 = arith.subf %757, %756 : vector<8x1xf32>
    %759 = arith.mulf %755, %758 : vector<8x1xf32>
    %760 = vector.broadcast %759 : vector<8x1xf32> to vector<8x128xf32>
    %761 = arith.mulf %753, %760 : vector<8x128xf32>
    %762 = vector.extract_strided_slice %714 {offsets = [0, 512], sizes = [8, 128], strides = [1, 1]} : vector<8x640xf32> to vector<8x128xf32>
    %cst_176 = arith.constant dense<0xFF800000> : vector<8xf32>
    %763 = vector.multi_reduction <maximumf>, %762, %cst_176 [1] : vector<8x128xf32> to vector<8xf32>
    %764 = vector.shape_cast %763 : vector<8xf32> to vector<8x1xf32>
    %765 = vector.broadcast %764 : vector<8x1xf32> to vector<8x128xf32>
    %766 = arith.subf %762, %765 : vector<8x128xf32>
    %767 = math.exp %766 : vector<8x128xf32>
    %cst_177 = arith.constant dense<0.000000e+00> : vector<8x128xf32>
    %768 = tpu.matmul %767, %6, %cst_177 {dimension_numbers = #tpu.dot_dimension_numbers<[1], [0], [0], [1], [0, 0, 1, 1], [], []>} : vector<8x128xf32>, vector<128x128xf32>, vector<8x128xf32> -> vector<8x128xf32>
    %769 = vector.extract_strided_slice %768 {offsets = [0, 127], sizes = [8, 1], strides = [1, 1]} : vector<8x128xf32> to vector<8x1xf32>
    %770 = tpu.reciprocal %769 {approx = true} : vector<8x1xf32> -> vector<8x1xf32>
    %771 = arith.mulf %769, %770 : vector<8x1xf32>
    %cst_178 = arith.constant 2.000000e+00 : f32
    %772 = vector.broadcast %cst_178 : f32 to vector<8x1xf32>
    %773 = arith.subf %772, %771 : vector<8x1xf32>
    %774 = arith.mulf %770, %773 : vector<8x1xf32>
    %775 = vector.broadcast %774 : vector<8x1xf32> to vector<8x128xf32>
    %776 = arith.mulf %768, %775 : vector<8x128xf32>
    %cst_179 = arith.constant 1.000000e+00 : f32
    %777 = vector.broadcast %cst_179 : f32 to vector<8x128xf32>
    %778 = arith.subf %777, %731 : vector<8x128xf32>
    %cst_180 = arith.constant 1.000000e+00 : f32
    %779 = vector.broadcast %cst_180 : f32 to vector<8x128xf32>
    %780 = arith.subf %779, %761 : vector<8x128xf32>
    %781 = arith.mulf %776, %780 : vector<8x128xf32>
    %782 = arith.subf %776, %781 : vector<8x128xf32>
    %783 = arith.subf %780, %781 : vector<8x128xf32>
    %784 = arith.mulf %746, %778 : vector<8x128xf32>
    %785 = arith.subf %746, %784 : vector<8x128xf32>
    %786 = arith.subf %778, %784 : vector<8x128xf32>
    %787 = arith.mulf %784, %706 : vector<8x128xf32>
    %788 = arith.mulf %781, %716 : vector<8x128xf32>
    %789 = arith.addf %787, %788 : vector<8x128xf32>
    %790 = arith.mulf %785, %706 : vector<8x128xf32>
    %791 = arith.mulf %782, %716 : vector<8x128xf32>
    %792 = arith.addf %790, %791 : vector<8x128xf32>
    %793 = arith.addf %792, %789 : vector<8x128xf32>
    %794 = arith.mulf %786, %706 : vector<8x128xf32>
    %795 = arith.mulf %783, %716 : vector<8x128xf32>
    %796 = arith.addf %794, %795 : vector<8x128xf32>
    %797 = arith.addf %796, %789 : vector<8x128xf32>
    %798 = tpu.concatenate %797, %793, %789 in 1 : vector<8x128xf32>, vector<8x128xf32>, vector<8x128xf32> -> vector<8x384xf32>
    %799 = math.tanh %798 : vector<8x384xf32>
    %800 = arith.index_cast %c7_i32 : i32 to index
    %c0_181 = arith.constant 0 : index
    %c0_182 = arith.constant 0 : index
    %801 = vector.load %arg9[%800, %c0_181, %c0_182] : memref<8x8x384xf32, #tpu.memory_space<vmem>>, vector<1x8x384xf32>
    %802 = vector.shape_cast %801 : vector<1x8x384xf32> to vector<8x384xf32>
    %803 = vector.shape_cast %799 : vector<8x384xf32> to vector<1x8x384xf32>
    tpu.vector_store %arg9[%800, %c0_181, %c0_182], %803 {strides = array<i32>} : memref<8x8x384xf32, #tpu.memory_space<vmem>>, vector<1x8x384xf32>,
    %cst_183 = arith.constant dense<0.000000e+00> : vector<8x128xf32>
    %804 = tpu.matmul %798, %5, %cst_183 {dimension_numbers = #tpu.dot_dimension_numbers<[1], [0], [0], [1], [0, 0, 1, 1], [], []>} : vector<8x384xf32>, vector<384x128xf32>, vector<8x128xf32> -> vector<8x128xf32>
    %805 = arith.addf %804, %12 : vector<8x128xf32>
    %806 = math.tanh %805 : vector<8x128xf32>
    %c8_i32 = arith.constant 8 : i32
    %c0_184 = arith.constant 0 : index
    %c0_185 = arith.constant 0 : index
    %807 = vector.load %arg10[%c0_184, %c0_185] : memref<8x128xf32, #tpu.memory_space<vmem>>, vector<8x128xf32>
    tpu.vector_store %arg10[%c0_184, %c0_185], %806 {strides = array<i32>} : memref<8x128xf32, #tpu.memory_space<vmem>>, vector<8x128xf32>,
    %c0_186 = arith.constant 0 : index
    %c0_187 = arith.constant 0 : index
    %808 = vector.load %arg11[%c0_186, %c0_187] : memref<8x128xf32, #tpu.memory_space<vmem>>, vector<8x128xf32>
    tpu.vector_store %arg11[%c0_186, %c0_187], %805 {strides = array<i32>} : memref<8x128xf32, #tpu.memory_space<vmem>>, vector<8x128xf32>,
    return
  }
  func.func @transform_0(%arg0: i32, %arg1: i32) -> (i32, i32, i32) {
    %c0_i32 = arith.constant 0 : i32
    %c0_i32_0 = arith.constant 0 : i32
    return %arg1, %arg0, %c0_i32 : i32, i32, i32
  }
  func.func @transform_1(%arg0: i32, %arg1: i32) -> (i32, i32) {
    %c0_i32 = arith.constant 0 : i32
    %c0_i32_0 = arith.constant 0 : i32
    %c0_i32_1 = arith.constant 0 : i32
    return %c0_i32, %c0_i32_0 : i32, i32
  }
  func.func @transform_2(%arg0: i32, %arg1: i32) -> (i32, i32) {
    %c0_i32 = arith.constant 0 : i32
    %c0_i32_0 = arith.constant 0 : i32
    %c0_i32_1 = arith.constant 0 : i32
    return %c0_i32, %c0_i32_0 : i32, i32
  }
  func.func @transform_3(%arg0: i32, %arg1: i32) -> (i32, i32) {
    %c0_i32 = arith.constant 0 : i32
    %c0_i32_0 = arith.constant 0 : i32
    %c0_i32_1 = arith.constant 0 : i32
    return %c0_i32, %c0_i32_0 : i32, i32
  }
  func.func @transform_4(%arg0: i32, %arg1: i32) -> (i32, i32) {
    %c0_i32 = arith.constant 0 : i32
    %c0_i32_0 = arith.constant 0 : i32
    %c0_i32_1 = arith.constant 0 : i32
    return %c0_i32, %c0_i32_0 : i32, i32
  }
  func.func @transform_5(%arg0: i32, %arg1: i32) -> (i32, i32) {
    %c0_i32 = arith.constant 0 : i32
    %c0_i32_0 = arith.constant 0 : i32
    %c0_i32_1 = arith.constant 0 : i32
    return %c0_i32, %c0_i32_0 : i32, i32
  }
  func.func @transform_6(%arg0: i32, %arg1: i32) -> (i32, i32) {
    %c0_i32 = arith.constant 0 : i32
    %c0_i32_0 = arith.constant 0 : i32
    %c0_i32_1 = arith.constant 0 : i32
    return %c0_i32, %c0_i32_0 : i32, i32
  }
  func.func @transform_7(%arg0: i32, %arg1: i32) -> (i32, i32, i32) {
    %c0_i32 = arith.constant 0 : i32
    %c0_i32_0 = arith.constant 0 : i32
    return %arg1, %arg0, %c0_i32 : i32, i32, i32
  }
}

</mosaic_0001>

<bundles_post_ra>
// kernel: custom-call.1
= control target key start
LH: loop header
LB: loop body
LE: loop exit
PB: predicated region body
PF: predicated region fallthrough
CT: control target
= control target key end

     0   :  { %s6_s0 = inlined_call_operand.vmem [shape: f32[640], index: 0, kind: output, shape index: {}]  }

// kernel: pfn_encoder_pallas.1
= control target key start
LH: loop header
LB: loop body
LE: loop exit
PB: predicated region body
PF: predicated region fallthrough
CT: control target
= control target key end

     0   :  { %v15283_v3 = vmov 0.0   ;;  %vm223_vm0 = vcmask 130048   ;;  %v15285_v38 = vmov 0.0|0.0   ;;  %vm12984_vm1 = vmmov 0   ;;  %s15275_s1 = inlined_call_operand.vmem [shape: f32[16,640], index: 1, kind: input, shape index: {}]   ;;  %s15276_s3 = inlined_call_operand.vmem [shape: f32[128,640], index: 3, kind: input, shape index: {}]   ;;  %s15277_s0 = inlined_call_operand.vmem [shape: f32[8,8,16], index: 0, kind: input, shape index: {}]   ;;  %s15278_s6 = inlined_call_operand.vmem [shape: f32[128,128], index: 6, kind: input, shape index: {}]   ;;  %s15279_s2 = inlined_call_operand.vmem [shape: f32[1,640], index: 2, kind: input, shape index: {}]   ;;  %s15280_s4 = inlined_call_operand.vmem [shape: f32[384,128], index: 4, kind: input, shape index: {}]   ;;  %s15281_s7 = inlined_call_operand.vmem [shape: f32[8,8,384], index: 7, kind: output, shape index: {}]   ;;  %s15282_s5 = inlined_call_operand.vmem [shape: f32[1,128], index: 5, kind: input, shape index: {}]  }
   0x1   :  { %v33_v0 = vld [vmem:[%s15275_s1 + $0x8] sm:$0xff]  ;;  %v38_v1 = vld [vmem:[%s15275_s1 + $0x30] sm:$0xff]  ;;  %291 = vmatprep.mubr.f32.mxu1 %v15283_v3  ;;  %503 = vmatprep.mubr.f32.mxu0 %v15283_v3  ;;  %v32_v6 = vld [vmem:[%s15275_s1] sm:$0xff] }
   0x2   :  { %v43_v2 = vld [vmem:[%s15276_s3 + $0x8] sm:$0xff]  ;;  %v13037_v4 = vpack.c.bf16 %v38_v1, %v33_v0  ;;  %v48_v5 = vld [vmem:[%s15276_s3 + $0x30] sm:$0xff]  ;;  %v42_v10 = vld [vmem:[%s15276_s3] sm:$0xff] }
   0x3   :  { %v37_v7 = vld [vmem:[%s15275_s1 + $0x28] sm:$0xff]  ;;  %v13048_v8 = vpack.c.bf16 %v48_v5, %v43_v2  ;;  %v35_v12 = vld [vmem:[%s15275_s1 + $0x18] sm:$0xff]  ;;  %v40_v14 = vld [vmem:[%s15275_s1 + $0x40] sm:$0xff] }
   0x4   :  { %15384 = vst [vmem:[#allocation4_spill] sm:$0xff] %v13037_v4  ;;  %v13050_v9 = vpack.c.bf16 %v37_v7, %v32_v6  ;;  %v47_v11 = vld [vmem:[%s15276_s3 + $0x28] sm:$0xff]  ;;  %10673 = vmatprep.subr.bf16.mxu1 %v13037_v4  ;;  %v53_v15 = vld [vmem:[%s15276_s3 + $0x58] sm:$0xff]  ;;  %v58_v16 = vld [vmem:[%s15276_s3 + $0x80] sm:$0xff]  ;;  %v13075_v17 = vpack.c.bf16 %v40_v14, %v35_v12 }
   0x5   :  { %v13062_v13 = vpack.c.bf16 %v47_v11, %v42_v10  ;;  %10684 = vmatprep.subr.bf16.mxu0 %v13048_v8  ;;  %v13077_v18 = vpack.c.bf16 %v58_v16, %v53_v15  ;;  %v222_v19 = vld [vmem:[%s15277_s0] sm:$0xff]  ;;  %v34_v20 = vld [vmem:[%s15275_s1 + $0x10] sm:$0xff]  ;;  %v39_v21 = vld [vmem:[%s15275_s1 + $0x38] sm:$0xff] }
   0x6   :  { %10675 = vmatpush1.bf16.msra.mxu1 %v13050_v9  ;;  %v13089_v22 = vpack.c.bf16 %v39_v21, %v34_v20  ;;  %v52_v23 = vld [vmem:[%s15276_s3 + $0x50] sm:$0xff]  ;;  %v57_v24 = vld [vmem:[%s15276_s3 + $0x78] sm:$0xff]  ;;  %v63_v25 = vld [vmem:[%s15276_s3 + $0xa8] sm:$0xff] }
   0x7   :  { %10686 = vmatpush1.bf16.msra.mxu0 %v13062_v13  ;;  %10677 = vmatprep.subr.bf16.mxu1 %v13075_v17  ;;  %v13102_v26 = vpack.c.bf16 %v57_v24, %v52_v23  ;;  %v68_v27 = vld [vmem:[%s15276_s3 + $0xd0] sm:$0xff]  ;;  %v36_v28 = vld [vmem:[%s15275_s1 + $0x20] sm:$0xff]  ;;  %v41_v29 = vld [vmem:[%s15275_s1 + $0x48] sm:$0xff] }
   0x8   :  { %10688 = vmatprep.subr.bf16.mxu0 %v13077_v18  ;;  %v13114_v30 = vpack.c.bf16 %v68_v27, %v63_v25  ;;  %v62_v31 = vld [vmem:[%s15276_s3 + $0xa0] sm:$0xff]  ;;  %v67_v32 = vld [vmem:[%s15276_s3 + $0xc8] sm:$0xff]  ;;  %v73_v33 = vld [vmem:[%s15276_s3 + $0xf8] sm:$0xff]  ;;  %v13127_v34 = vpack.c.bf16 %v41_v29, %v36_v28 }
   0x9   :  { %7764 = vmatmul.mubr.msk.f32.vlgmr.msra.gmra.mrb[0].mxu1 %vm223_vm0, %v222_v19  ;;  %v78_v35 = vld [vmem:[%s15276_s3 + $0x120] sm:$0xff]  ;;  %v45_v36 = vld [vmem:[%s15276_s3 + $0x18] sm:$0xff]  ;;  %v13140_v39 = vpack.c.bf16 %v67_v32, %v62_v31  ;;  %v72_v41 = vld [vmem:[%s15276_s3 + $0xf0] sm:$0xff] }
   0xa   :  { %10679 = vmatpush1.bf16.msra.mxu1 %v13089_v22  ;;  %362 = vmatprep.mubr.f32.mxu1 %v15283_v3  ;;  %v50_v37 = vld [vmem:[%s15276_s3 + $0x40] sm:$0xff]  ;;  %v44_v42 = vld [vmem:[%s15276_s3 + $0x10] sm:$0xff]  ;;  %v13151_v43 = vpack.c.bf16 %v78_v35, %v73_v33  ;;  %v77_v44 = vld [vmem:[%s15276_s3 + $0x118] sm:$0xff] }
   0xb   :  { %10690 = vmatpush1.bf16.msra.mxu0 %v13102_v26  ;;  %10680 = vmatprep.subr.bf16.mxu1 %v15285_v38  ;;  %v13142_v40 = vpack.c.bf16 %v50_v37, %v45_v36  ;;  %v49_v45 = vld [vmem:[%s15276_s3 + $0x38] sm:$0xff]  ;;  %v83_v46 = vld [vmem:[%s15276_s3 + $0x148] sm:$0xff]  ;;  %v88_v47 = vld [vmem:[%s15276_s3 + $0x170] sm:$0xff]  ;;  %v13179_v51 = vpack.c.bf16 %v77_v44, %v72_v41 }
   0xc   :  { %10692 = vmatprep.subr.bf16.mxu0 %v13114_v30  ;;  %v55_v48 = vld [vmem:[%s15276_s3 + $0x68] sm:$0xff]  ;;  %v60_v49 = vld [vmem:[%s15276_s3 + $0x90] sm:$0xff]  ;;  %v13175_v50 = vpack.c.bf16 %v49_v45, %v44_v42  ;;  %v82_v53 = vld [vmem:[%s15276_s3 + $0x140] sm:$0xff]  ;;  %v13193_v56 = vpack.c.bf16 %v88_v47, %v83_v46 }
   0xd   :  { %7765 = vmatmul.mubr.msk.f32.vlgmr.msra.gmra.mrb[2].mxu1 %vm223_vm0, %v222_v19  ;;  %v13181_v52 = vpack.c.bf16 %v60_v49, %v55_v48  ;;  %v54_v54 = vld [vmem:[%s15276_s3 + $0x60] sm:$0xff]  ;;  %v59_v55 = vld [vmem:[%s15276_s3 + $0x88] sm:$0xff]  ;;  %v65_v58 = vld [vmem:[%s15276_s3 + $0xb8] sm:$0xff] }
   0xe   :  { %10682 = vmatpush3.bf16.msra.mxu1 %v13127_v34  ;;  %8940 = vmatprep.mubr.msk.f32.mxu1 %vm12984_vm1, %v15283_v3  ;;  %v87_v57 = vld [vmem:[%s15276_s3 + $0x168] sm:$0xff]  ;;  %v70_v59 = vld [vmem:[%s15276_s3 + $0xe0] sm:$0xff]  ;;  %v93_v60 = vld [vmem:[%s15276_s3 + $0x198] sm:$0xff]  ;;  %v13212_v62 = vpack.c.bf16 %v59_v55, %v54_v54 }
   0xf   :  { %10694 = vmatpush1.bf16.msra.mxu0 %v13140_v39  ;;  %10716 = vmatprep.subr.bf16.mxu1 %v13142_v40  ;;  %v98_v61 = vld [vmem:[%s15276_s3 + $0x1c0] sm:$0xff]  ;;  %v13217_v63 = vpack.c.bf16 %v87_v57, %v82_v53  ;;  %v13219_v0 = vpack.c.bf16 %v70_v59, %v65_v58  ;;  %v92_v1 = vld [vmem:[%s15276_s3 + $0x190] sm:$0xff]  ;;  %v69_v5 = vld [vmem:[%s15276_s3 + $0xd8] sm:$0xff] }
  0x10   :  { %10696 = vmatprep.subr.bf16.mxu0 %v13151_v43  ;;  %v64_v2 = vld [vmem:[%s15276_s3 + $0xb0] sm:$0xff]  ;;  %v13231_v6 = vpack.c.bf16 %v98_v61, %v93_v60  ;;  %v97_v7 = vld [vmem:[%s15276_s3 + $0x1b8] sm:$0xff]  ;;  %v75_v10 = vld [vmem:[%s15276_s3 + $0x108] sm:$0xff] }
  0x11   :  { %8941 = vmatmul.mubr.msk.f32.vlgmr.msra.gmra.mrb[4].mxu1 %vm223_vm0, %v222_v19  ;;  %v80_v11 = vld [vmem:[%s15276_s3 + $0x130] sm:$0xff]  ;;  %v103_v12 = vld [vmem:[%s15276_s3 + $0x1e8] sm:$0xff]  ;;  %v13249_v15 = vpack.c.bf16 %v69_v5, %v64_v2  ;;  %v13253_v16 = vpack.c.bf16 %v97_v7, %v92_v1  ;;  %v102_v20 = vld [vmem:[%s15276_s3 + $0x1e0] sm:$0xff] }
  0x12   :  { %10718 = vmatpush1.bf16.msra.mxu1 %v13175_v50  ;;  %574 = vmatprep.mubr.f32.mxu1 %v15283_v3  ;;  %v108_v14 = vld [vmem:[%s15276_s3 + $0x210] sm:$0xff]  ;;  %v13255_v19 = vpack.c.bf16 %v80_v11, %v75_v10  ;;  %v74_v21 = vld [vmem:[%s15276_s3 + $0x100] sm:$0xff]  ;;  %v79_v23 = vld [vmem:[%s15276_s3 + $0x128] sm:$0xff] }
  0x13   :  { %10698 = vmatpush1.bf16.msra.mxu0 %v13179_v51  ;;  %10720 = vmatprep.subr.bf16.mxu1 %v13181_v52  ;;  %v13267_v24 = vpack.c.bf16 %v108_v14, %v103_v12  ;;  %v107_v25 = vld [vmem:[%s15276_s3 + $0x208] sm:$0xff]  ;;  %v85_v27 = vld [vmem:[%s15276_s3 + $0x158] sm:$0xff]  ;;  %v90_v28 = vld [vmem:[%s15276_s3 + $0x180] sm:$0xff]  ;;  %v13285_v32 = vpack.c.bf16 %v79_v23, %v74_v21 }
  0x14   :  { %10700 = vmatprep.subr.bf16.mxu0 %v13193_v56  ;;  %15385 = vst [vmem:[#allocation5_spill] sm:$0xff] %v13255_v19  ;;  %v113_v29 = vld [vmem:[%s15276_s3 + $0x238] sm:$0xff]  ;;  %v118_v31 = vld [vmem:[%s15276_s3 + $0x260] sm:$0xff]  ;;  %v13289_v33 = vpack.c.bf16 %v107_v25, %v102_v20  ;;  %v13291_v35 = vpack.c.bf16 %v90_v28, %v85_v27  ;;  %v112_v36 = vld [vmem:[%s15276_s3 + $0x230] sm:$0xff] }
  0x15   :  { %15386 = vst [vmem:[#allocation6_spill] sm:$0xff] %v13285_v32  ;;  %v84_v37 = vld [vmem:[%s15276_s3 + $0x150] sm:$0xff]  ;;  %v89_v41 = vld [vmem:[%s15276_s3 + $0x178] sm:$0xff]  ;;  %v13303_v42 = vpack.c.bf16 %v118_v31, %v113_v29  ;;  %v95_v45 = vld [vmem:[%s15276_s3 + $0x1a8] sm:$0xff] }
  0x16   :  { %10722 = vmatpush1.bf16.msra.mxu1 %v13212_v62  ;;  %15387 = vst [vmem:[#allocation7_spill] sm:$0xff] %v13291_v35  ;;  %v117_v44 = vld [vmem:[%s15276_s3 + $0x258] sm:$0xff]  ;;  %v100_v46 = vld [vmem:[%s15276_s3 + $0x1d0] sm:$0xff]  ;;  %v13315_v47 = vpack.c.bf16 %v89_v41, %v84_v37  ;;  %v94_v53 = vld [vmem:[%s15276_s3 + $0x1a0] sm:$0xff] }
  0x17   :  { %10702 = vmatpush1.bf16.msra.mxu0 %v13217_v63  ;;  %10724 = vmatprep.subr.bf16.mxu1 %v13219_v0  ;;  %v13319_v48 = vpack.c.bf16 %v117_v44, %v112_v36  ;;  %v13321_v49 = vpack.c.bf16 %v100_v46, %v95_v45  ;;  %v99_v54 = vld [vmem:[%s15276_s3 + $0x1c8] sm:$0xff]  ;;  %v46_v55 = vld [vmem:[%s15276_s3 + $0x20] sm:$0xff]  ;;  %v105_v58 = vld [vmem:[%s15276_s3 + $0x1f8] sm:$0xff] }
  0x18   :  { %10704 = vmatprep.subr.bf16.mxu0 %v13231_v6  ;;  %15388 = vst [vmem:[#allocation8_spill] sm:$0xff] %v13315_v47  ;;  %v51_v57 = vld [vmem:[%s15276_s3 + $0x48] sm:$0xff]  ;;  %v110_v59 = vld [vmem:[%s15276_s3 + $0x220] sm:$0xff]  ;;  %v13343_v60 = vpack.c.bf16 %v99_v54, %v94_v53  ;;  %v104_v2 = vld [vmem:[%s15276_s3 + $0x1f0] sm:$0xff] }
  0x19   :  { %15389 = vst [vmem:[#allocation9_spill] sm:$0xff] %v13321_v49  ;;  %v13347_v61 = vpack.c.bf16 %v51_v57, %v46_v55  ;;  %v13349_v1 = vpack.c.bf16 %v110_v59, %v105_v58  ;;  %v109_v5 = vld [vmem:[%s15276_s3 + $0x218] sm:$0xff]  ;;  %v56_v7 = vld [vmem:[%s15276_s3 + $0x70] sm:$0xff]  ;;  %v115_v11 = vld [vmem:[%s15276_s3 + $0x248] sm:$0xff] }
  0x1a   :  { %10726 = vmatpush1.bf16.msra.mxu1 %v13249_v15  ;;  %15390 = vst [vmem:[#allocation10_spill] sm:$0xff] %v13343_v60  ;;  %v61_v10 = vld [vmem:[%s15276_s3 + $0x98] sm:$0xff]  ;;  %v120_v12 = vld [vmem:[%s15276_s3 + $0x270] sm:$0xff]  ;;  %v13372_v14 = vpack.c.bf16 %v109_v5, %v104_v2  ;;  %v114_v23 = vld [vmem:[%s15276_s3 + $0x240] sm:$0xff] }
  0x1b   :  { %10706 = vmatpush1.bf16.msra.mxu0 %v13253_v16  ;;  %10728 = vmatprep.subr.bf16.mxu1 %v13255_v19  ;;  %15391 = vst [vmem:[#allocation11_spill] sm:$0xff] %v13347_v61  ;;  %15392 = vst [vmem:[#allocation12_spill] sm:$0xff] %v13349_v1  ;;  %v13376_v20 = vpack.c.bf16 %v61_v10, %v56_v7  ;;  %v13378_v21 = vpack.c.bf16 %v120_v12, %v115_v11  ;;  %v119_v25 = vld [vmem:[%s15276_s3 + $0x268] sm:$0xff]  ;;  %v66_v27 = vld [vmem:[%s15276_s3 + $0xc0] sm:$0xff] }
  0x1c   :  { %10708 = vmatprep.subr.bf16.mxu0 %v13267_v24  ;;  %15393 = vst [vmem:[#allocation13_spill] sm:$0xff] %v13372_v14  ;;  %v71_v28 = vld [vmem:[%s15276_s3 + $0xe8] sm:$0xff]  ;;  %v13396_v29 = vpack.c.bf16 %v119_v25, %v114_v23  ;;  %v76_v36 = vld [vmem:[%s15276_s3 + $0x110] sm:$0xff]  ;;  %v81_v37 = vld [vmem:[%s15276_s3 + $0x138] sm:$0xff] }
  0x1d   :  { %15394 = vst [vmem:[#allocation14_spill] sm:$0xff] %v13376_v20  ;;  %15395 = vst [vmem:[#allocation15_spill] sm:$0xff] %v13378_v21  ;;  %v13400_v31 = vpack.c.bf16 %v71_v28, %v66_v27  ;;  %v13411_v41 = vpack.c.bf16 %v81_v37, %v76_v36  ;;  %v86_v44 = vld [vmem:[%s15276_s3 + $0x160] sm:$0xff]  ;;  %v91_v45 = vld [vmem:[%s15276_s3 + $0x188] sm:$0xff] }
  0x1e   :  { %10730 = vmatpush1.bf16.msra.mxu1 %v13285_v32  ;;  %15396 = vst [vmem:[#allocation16_spill] sm:$0xff] %v13396_v29  ;;  %v13425_v46 = vpack.c.bf16 %v91_v45, %v86_v44  ;;  %v96_v53 = vld [vmem:[%s15276_s3 + $0x1b0] sm:$0xff]  ;;  %v101_v54 = vld [vmem:[%s15276_s3 + $0x1d8] sm:$0xff]  ;;  %v106_v57 = vld [vmem:[%s15276_s3 + $0x200] sm:$0xff] }
  0x1f   :  { %10710 = vmatpush1.bf16.msra.mxu0 %v13289_v33  ;;  %10732 = vmatprep.subr.bf16.mxu1 %v13291_v35  ;;  %15397 = vst [vmem:[#allocation17_spill] sm:$0xff] %v13400_v31  ;;  %15398 = vst [vmem:[#allocation18_spill] sm:$0xff] %v13411_v41  ;;  %v13435_v55 = vpack.c.bf16 %v101_v54, %v96_v53  ;;  %v111_v58 = vld [vmem:[%s15276_s3 + $0x228] sm:$0xff]  ;;  %v116_v2 = vld [vmem:[%s15276_s3 + $0x250] sm:$0xff] }
  0x20   :  { %10712 = vmatprep.subr.bf16.mxu0 %v13303_v42  ;;  %15399 = vst [vmem:[#allocation19_spill] sm:$0xff] %v13425_v46  ;;  %v13445_v59 = vpack.c.bf16 %v111_v58, %v106_v57  ;;  %v121_v5 = vld [vmem:[%s15276_s3 + $0x278] sm:$0xff]  ;;  %v170_v10 = vld [vmem:[%s15278_s6] sm:$0xff]  ;;  %v171_v11 = vld [vmem:[%s15278_s6 + $0x8] sm:$0xff] }
  0x21   :  { %15400 = vst [vmem:[#allocation20_spill] sm:$0xff] %v13435_v55  ;;  %v13455_v7 = vpack.c.bf16 %v121_v5, %v116_v2  ;;  %v172_v12 = vld [vmem:[%s15278_s6 + $0x10] sm:$0xff]  ;;  %v13472_v23 = vpack.c.bf16 %v171_v11, %v170_v10  ;;  %v173_v25 = vld [vmem:[%s15278_s6 + $0x18] sm:$0xff]  ;;  %v174_v28 = vld [vmem:[%s15278_s6 + $0x20] sm:$0xff] }
  0x22   :  { %10734 = vmatpush1.bf16.msra.mxu1 %v13315_v47  ;;  %15401 = vst [vmem:[#allocation21_spill] sm:$0xff] %v13445_v59  ;;  %v13478_v27 = vpack.c.bf16 %v173_v25, %v172_v12  ;;  %v175_v36 = vld [vmem:[%s15278_s6 + $0x28] sm:$0xff]  ;;  %v176_v44 = vld [vmem:[%s15278_s6 + $0x30] sm:$0xff]  ;;  %v177_v45 = vld [vmem:[%s15278_s6 + $0x38] sm:$0xff]  ;;  %v188_v12 = vlaneseq }
  0x23   :  { %10714 = vmatpush1.bf16.msra.mxu0 %v13319_v48  ;;  %10736 = vmatprep.subr.bf16.mxu1 %v13321_v49  ;;  %15402 = vst [vmem:[#allocation22_spill] sm:$0xff] %v13455_v7  ;;  %v13490_v37 = vpack.c.bf16 %v175_v36, %v174_v28  ;;  %v13502_v53 = vpack.c.bf16 %v177_v45, %v176_v44  ;;  %v178_v54 = vld [vmem:[%s15278_s6 + $0x40] sm:$0xff]  ;;  %v179_v57 = vld [vmem:[%s15278_s6 + $0x48] sm:$0xff] }
  0x24   :  { %10747 = vmatprep.subr.bf16.mxu0 %v15285_v38  ;;  %v13514_v58 = vpack.c.bf16 %v179_v57, %v178_v54  ;;  %v189_v25 = vshrl.u32 %v188_v12, 7  ;;  %v186_v36 = vld [vmem:[%s15279_s2] sm:$0x1f] }
  0x26   :  { %504 = vmatmul.mubr.f32.vlgmr.msra.gmra.mrb[0].mxu0 %v15283_v3  ;;  %10738 = vmatpush1.bf16.msra.mxu1 %v13343_v60  ;;  %v190_v28 = vsub.s32 0, %v189_v25  ;;  %v194_v44 = vsub.s32 1, %v189_v25  ;;  %v198_v12 = vsub.s32 2, %v189_v25 }
  0x27   :  { %10749 = vmatpush3.bf16.msra.mxu0 %v13347_v61  ;;  %10740 = vmatprep.subr.bf16.mxu1 %v13349_v1  ;;  %v15409_v61 = vmov 0.0  }
  0x28   :  { %10750 = vmatprep.subr.bf16.mxu0 %v15285_v38  ;;  %8975 = vmatprep.mubr.msk.f32.mxu0 %vm12984_vm1, %v15283_v3  ;;  %v13526_v45 = vrot.slane %v186_v36, %v190_v28  ;;  %v13528_v54 = vrot.slane %v186_v36, %v194_v44 }
  0x2a   :  { %10742 = vmatpush1.bf16.msra.mxu1 %v13372_v14  ;;  %15403 = vst [vmem:[#allocation23_spill] sm:$0xff] %v13526_v45  ;;  %15404 = vst [vmem:[#allocation24_spill] sm:$0xff] %v13528_v54 }
  0x2b   :  { %10752 = vmatpush3.bf16.msra.mxu0 %v13376_v20  ;;  %10744 = vmatprep.subr.bf16.mxu1 %v13378_v21  ;;  %v129_v21 = vld [vmem:[%s15280_s4 + $0x38] sm:$0xff] }
  0x2c   :  { %10753 = vmatprep.subr.bf16.mxu0 %v15285_v38 }
  0x2e   :  { %10746 = vmatpush1.bf16.msra.mxu1 %v13396_v29 }
  0x2f   :  { %10755 = vmatpush3.bf16.msra.mxu0 %v13400_v31  ;;  %10771 = vmatprep.subr.bf16.mxu1 %v15285_v38 }
  0x30   :  { %10756 = vmatprep.subr.bf16.mxu0 %v15285_v38 }
  0x31   :  { %575 = vmatmul.mubr.f32.vlgmr.msra.gmra.mrb[2].mxu1 %v15283_v3 }
  0x32   :  { %9010 = vmatprep.mubr.msk.f32.mxu1 %vm12984_vm1, %v15283_v3  ;;  %10773 = vmatpush3.bf16.msra.mxu1 %v13472_v23 }
  0x33   :  { %10758 = vmatpush3.bf16.msra.mxu0 %v13411_v41  ;;  %10774 = vmatprep.subr.bf16.mxu1 %v15285_v38 }
  0x34   :  { %10759 = vmatprep.subr.bf16.mxu0 %v15285_v38 }
  0x36   :  { %10776 = vmatpush3.bf16.msra.mxu1 %v13478_v27 }
  0x37   :  { %10761 = vmatpush3.bf16.msra.mxu0 %v13425_v46  ;;  %10777 = vmatprep.subr.bf16.mxu1 %v15285_v38  ;;  %v13534_v46 = vrot.slane %v186_v36, %v198_v12 }
  0x38   :  { %10762 = vmatprep.subr.bf16.mxu0 %v15285_v38 }
  0x39   :  { %15405 = vst [vmem:[#allocation25_spill] sm:$0xff] %v13534_v46 }
  0x3a   :  { %10779 = vmatpush3.bf16.msra.mxu1 %v13490_v37 }
  0x3b   :  { %10764 = vmatpush3.bf16.msra.mxu0 %v13435_v55  ;;  %10780 = vmatprep.subr.bf16.mxu1 %v15285_v38  ;;  %v202_v55 = vsub.s32 3, %v189_v25 }
  0x3c   :  { %10765 = vmatprep.subr.bf16.mxu0 %v15285_v38 }
  0x3d   :  { %v13536_v41 = vrot.slane %v186_v36, %v202_v55  ;;  %v15407_v55 = vmov 0.0|0.0  }
  0x3e   :  { %10782 = vmatpush3.bf16.msra.mxu1 %v13502_v53 }
  0x3f   :  { %10767 = vmatpush3.bf16.msra.mxu0 %v13445_v59  ;;  %10783 = vmatprep.subr.bf16.mxu1 %v15285_v38  ;;  %15406 = vst [vmem:[#allocation26_spill] sm:$0xff] %v13536_v41 }
  0x40   :  { %10768 = vmatprep.subr.bf16.mxu0 %v15285_v38 }
  0x42   :  { %10785 = vmatpush3.bf16.msra.mxu1 %v13514_v58 }
  0x43   :  { %10770 = vmatpush3.bf16.msra.mxu0 %v13455_v7  ;;  %10786 = vmatprep.subr.bf16.mxu1 %v15285_v38 }
  0x44   :  { %10819 = vmatprep.subr.bf16.mxu0 %v15285_v38 }
  0x46   :  { %8976 = vmatmul.mubr.f32.vlgmr.msra.gmra.mrb[2].mxu0 %v15283_v3 }
  0x47   :  { %9080 = vmatprep.mubr.msk.f32.mxu0 %vm12984_vm1, %v15283_v3  ;;  %10821 = vmatpush3.bf16.msra.mxu0 %v13472_v23 }
  0x48   :  { %10822 = vmatprep.subr.bf16.mxu0 %v15285_v38 }
  0x4b   :  { %10824 = vmatpush3.bf16.msra.mxu0 %v13478_v27 }
  0x4c   :  { %10825 = vmatprep.subr.bf16.mxu0 %v15285_v38 }
  0x4f   :  { %10827 = vmatpush3.bf16.msra.mxu0 %v13490_v37 }
  0x50   :  { %10828 = vmatprep.subr.bf16.mxu0 %v15285_v38 }
  0x53   :  { %10830 = vmatpush3.bf16.msra.mxu0 %v13502_v53 }
  0x54   :  { %10831 = vmatprep.subr.bf16.mxu0 %v15285_v38 }
  0x57   :  { %10833 = vmatpush3.bf16.msra.mxu0 %v13514_v58 }
  0x58   :  { %10834 = vmatprep.subr.bf16.mxu0 %v15285_v38 }
  0xdc   :  { %v293_v2 = vpop.f32.mrb[0].mxu1 }
  0xdd   :  { %v295_v5 = vpop.f32.mrb[1].mxu1  ;;  %v294_v57 = vadd.f32 %v293_v2, %v13526_v45 }
  0xde   :  { %v296_v3 = vadd.f32 %v295_v5, %v13528_v54 }
  0xe4   :  { %v435_v10 = vpop.f32.mrb[4].mxu1 }
  0xe5   :  { %v8942_v11 = vpop.f32.mrb[5].mxu1 }
  0xf9   :  { %v505_v38 = vpop.f32.mrb[0].mxu0 }
  0xfa   :  { %v13532_v7 = vadd.f32 %v505_v38, %v294_v57  ;;  %v507_v11 = vpop.f32.mrb[1].mxu0  ;;  %v180_v38 = vld [vmem:[%s15278_s6 + $0x50] sm:$0xff]  ;;  %v183_v57 = vld [vmem:[%s15278_s6 + $0x68] sm:$0xff] }
  0xfb   :  { %v652_v59 = vadd.f32 %v507_v11, %v296_v3  ;;  %v181_v3 = vld [vmem:[%s15278_s6 + $0x58] sm:$0xff]  ;;  %v206_v11 = vsub.s32 4, %v189_v25 }
  0xfc   :  { %v13546_v5 = vpack.c.bf16 %v181_v3, %v180_v38  ;;  %v185_v38 = vld [vmem:[%s15278_s6 + $0x78] sm:$0xff] }
  0xfd   :  { %657 = vmax.xlane.f32.xlu0 %v652_v59  ;;  %v13570_v3 = vrot.slane %v186_v36, %v206_v11 }
  0xfe   :  { %10788 = vmatpush3.bf16.msra.mxu1 %v13546_v5  ;;  %10836 = vmatpush3.bf16.msra.mxu0 %v13546_v5 }
  0xff   :  { %10789 = vmatprep.subr.bf16.mxu1 %v15407_v55  ;;  %10837 = vmatprep.subr.bf16.mxu0 %v15407_v55  ;;  %15408 = vst [vmem:[#allocation27_spill] sm:$0xff] %v13570_v3 }
 0x104   :  { %v576_v28 = vpop.f32.mrb[2].mxu1 }
 0x105   :  { %v12684_v44 = vadd.f32 %v576_v28, %v13534_v46  ;;  %v578_v31 = vpop.f32.mrb[3].mxu1  ;;  %v184_v28 = vld [vmem:[%s15278_s6 + $0x70] sm:$0xff] }
 0x106   :  { %v12685_v2 = vadd.f32 %v578_v31, %v13536_v41  ;;  %v182_v31 = vld [vmem:[%s15278_s6 + $0x60] sm:$0xff]  ;;  %v13572_v25 = vpack.c.bf16 %v185_v38, %v184_v28 }
 0x107   :  { %742 = vmax.xlane.f32.xlu0 %v12684_v44  ;;  %v13558_v12 = vpack.c.bf16 %v183_v57, %v182_v31  ;;  %v436_v31 = vadd.f32 %v435_v10, %v13570_v3 }
 0x108   :  { %827 = vmax.xlane.f32.xlu1 %v12685_v2 }
 0x109   :  { %10791 = vmatpush3.bf16.msra.mxu1 %v13558_v12  ;;  %10839 = vmatpush3.bf16.msra.mxu0 %v13558_v12 }
 0x10a   :  { %10792 = vmatprep.subr.bf16.mxu1 %v15407_v55  ;;  %10840 = vmatprep.subr.bf16.mxu0 %v15407_v55 }
 0x10d   :  { %10794 = vmatpush3.bf16.msra.mxu1 %v13572_v25  ;;  %10842 = vmatpush3.bf16.msra.mxu0 %v13572_v25 }
 0x10e   :  { %10795 = vmatprep.subr.bf16.mxu1 %v15407_v55 }
 0x119   :  { %v647_v57 = vpop.f32.mrb[2].mxu0 }
 0x11a   :  { %v655_v45 = vadd.f32 %v647_v57, %v436_v31  ;;  %v8977_v41 = vpop.f32.mrb[3].mxu0  ;;  %v12985_v31 = vmov 127  }
 0x11b   :  { %12771 = vset.pattern.permute.xlu0 %v12985_v31  ;;  %12772 = vset.pattern.permute.xlu1 %v12985_v31 }
 0x11c   :  { %912 = vmax.xlane.f32.xlu1 %v655_v45 }
 0x18a   :  { %v658_v46 = vpop.xlane.xlu0 %657 }
 0x18b   :  { %v659_v54 = vsub.f32 %v652_v59, %v658_v46 }
 0x18d   :  { %v660_v20 = vmul.f32 1.442695, %v659_v54 }
 0x18f   :  { %12773 = vpow2.f32 %v660_v20 }
 0x194   :  { %v743_v41 = vpop.xlane.xlu0 %742 }
 0x195   :  { %v828_v36 = vpop.xlane.xlu1 %827  ;;  %v744_v46 = vsub.f32 %v12684_v44, %v743_v41 }
 0x196   :  { %v829_v11 = vsub.f32 %v12685_v2, %v828_v36 }
 0x197   :  { %v745_v59 = vmul.f32 1.442695, %v744_v46 }
 0x198   :  { %v830_v28 = vmul.f32 1.442695, %v829_v11 }
 0x199   :  { %v12774_v38 = vpop.eup %12773 }
 0x19a   :  { %12775 = vpow2.f32 %v830_v28  ;;  %9011 = vmatmul.mubr.f32.vlgmr.msra.gmra.mrb[6].mxu1 %v12774_v38 }
 0x19b   :  { %10797 = vmatpush3.bf16.msra.mxu1 %v13472_v23  ;;  %9045 = vmatprep.mubr.msk.f32.mxu1 %vm12984_vm1, %v15409_v61  ;;  %12777 = vpow2.f32 %v745_v59 }
 0x19c   :  { %10798 = vmatprep.subr.bf16.mxu1 %v15407_v55 }
 0x19f   :  { %10800 = vmatpush3.bf16.msra.mxu1 %v13478_v27 }
 0x1a0   :  { %10801 = vmatprep.subr.bf16.mxu1 %v15407_v55 }
 0x1a3   :  { %10803 = vmatpush3.bf16.msra.mxu1 %v13490_v37 }
 0x1a4   :  { %v12776_v20 = vpop.eup %12775  ;;  %10804 = vmatprep.subr.bf16.mxu1 %v15407_v55 }
 0x1a5   :  { %9081 = vmatmul.mubr.f32.vlgmr.msra.gmra.mrb[4].mxu0 %v12776_v20  ;;  %v12778_v10 = vpop.eup %12777 }
 0x1a7   :  { %10806 = vmatpush3.bf16.msra.mxu1 %v13502_v53 }
 0x1a8   :  { %10807 = vmatprep.subr.bf16.mxu1 %v15407_v55 }
 0x1a9   :  { %v913_v54 = vpop.xlane.xlu1 %912 }
 0x1aa   :  { %v914_v44 = vsub.f32 %v655_v45, %v913_v54 }
 0x1ab   :  { %10809 = vmatpush3.bf16.msra.mxu1 %v13514_v58 }
 0x1ac   :  { %10810 = vmatprep.subr.bf16.mxu1 %v15407_v55  ;;  %v915_v2 = vmul.f32 1.442695, %v914_v44 }
 0x1ae   :  { %12779 = vpow2.f32 %v915_v2 }
 0x1af   :  { %10812 = vmatpush3.bf16.msra.mxu1 %v13546_v5 }
 0x1b0   :  { %10813 = vmatprep.subr.bf16.mxu1 %v15407_v55 }
 0x1b3   :  { %10815 = vmatpush3.bf16.msra.mxu1 %v13558_v12 }
 0x1b4   :  { %10816 = vmatprep.subr.bf16.mxu1 %v15407_v55 }
 0x1b7   :  { %10818 = vmatpush3.bf16.msra.mxu1 %v13572_v25 }
 0x1b8   :  { %10843 = vmatprep.subr.bf16.mxu1 %v15407_v55  ;;  %v12780_v45 = vpop.eup %12779 }
 0x1ba   :  { %9046 = vmatmul.mubr.f32.vlgmr.msra.gmra.mrb[8].mxu1 %v12778_v10 }
 0x1bb   :  { %10845 = vmatpush3.bf16.msra.mxu1 %v13472_v23  ;;  %9115 = vmatprep.mubr.msk.f32.mxu1 %vm12984_vm1, %v15409_v61 }
 0x1bc   :  { %10846 = vmatprep.subr.bf16.mxu1 %v15407_v55 }
 0x1bf   :  { %10848 = vmatpush3.bf16.msra.mxu1 %v13478_v27 }
 0x1c0   :  { %10849 = vmatprep.subr.bf16.mxu1 %v15407_v55 }
 0x1c3   :  { %10851 = vmatpush3.bf16.msra.mxu1 %v13490_v37 }
 0x1c4   :  { %10852 = vmatprep.subr.bf16.mxu1 %v15407_v55 }
 0x1c7   :  { %10854 = vmatpush3.bf16.msra.mxu1 %v13502_v53 }
 0x1c8   :  { %10855 = vmatprep.subr.bf16.mxu1 %v15407_v55 }
 0x1cb   :  { %10857 = vmatpush3.bf16.msra.mxu1 %v13514_v58 }
 0x1cc   :  { %10858 = vmatprep.subr.bf16.mxu1 %v15407_v55 }
 0x1cf   :  { %10860 = vmatpush3.bf16.msra.mxu1 %v13546_v5 }
 0x1d0   :  { %10861 = vmatprep.subr.bf16.mxu1 %v15407_v55 }
 0x1d3   :  { %10863 = vmatpush3.bf16.msra.mxu1 %v13558_v12 }
 0x1d4   :  { %10864 = vmatprep.subr.bf16.mxu1 %v15407_v55 }
 0x1d7   :  { %10866 = vmatpush3.bf16.msra.mxu1 %v13572_v25 }
 0x1d8   :  { %10899 = vmatprep.subr.bf16.mxu1 %v15407_v55 }
 0x1da   :  { %9116 = vmatmul.mubr.f32.vlgmr.msra.gmra.mrb[10].mxu1 %v12780_v45 }
 0x1db   :  { %9150 = vmatprep.mubr.msk.f32.mxu1 %vm12984_vm1, %v15409_v61 }
 0x26d   :  { %v13616_v57 = vpop.f32.mrb[6].mxu1 }
 0x26e   :  { %12781 = vrcp.f32 %v13616_v57  ;;  %v9012_v36 = vpop.f32.mrb[7].mxu1 }
 0x278   :  { %v12782_v11 = vpop.eup %12781  ;;  %v13619_v28 = vpop.f32.mrb[4].mxu0 }
 0x279   :  { %v733_v38 = vmul.f32 %v12782_v11, %v13616_v57  ;;  %12783 = vrcp.f32 %v13619_v28  ;;  %v9082_v20 = vpop.f32.mrb[5].mxu0 }
 0x27a   :  { %v138_v20 = vld [vmem:[%s15280_s4 + $0x80] sm:$0xff] }
 0x27b   :  { %v734_v41 = vsub.f32 2.0, %v733_v38  ;;  %v155_v38 = vld [vmem:[%s15280_s4 + $0x108] sm:$0xff] }
 0x27d   :  { %v735_v46 = vmul.f32 %v12782_v11, %v734_v41  ;;  %v154_v11 = vld [vmem:[%s15280_s4 + $0x100] sm:$0xff] }
 0x27e   :  { %v13637_v41 = vpack.c.bf16 %v155_v38, %v154_v11  ;;  %v158_v11 = vld [vmem:[%s15280_s4 + $0x120] sm:$0xff]  ;;  %v159_v38 = vld [vmem:[%s15280_s4 + $0x128] sm:$0xff] }
 0x27f   :  { %738 = vperm.xlu0 %12771, %v735_v46   ;;  %v139_v46 = vld [vmem:[%s15280_s4 + $0x88] sm:$0xff] }
 0x280   :  { %15410 = vst [vmem:[#allocation28_spill] sm:$0xff] %v13637_v41  ;;  %10901 = vmatpush3.bf16.msra.mxu1 %v13637_v41  ;;  %v127_v41 = vld [vmem:[%s15280_s4 + $0x28] sm:$0xff] }
 0x281   :  { %10902 = vmatprep.subr.bf16.mxu1 %v15407_v55 }
 0x283   :  { %v12784_v59 = vpop.eup %12783 }
 0x284   :  { %v903_v10 = vmul.f32 %v12784_v59, %v13619_v28 }
 0x286   :  { %v904_v54 = vsub.f32 2.0, %v903_v10  ;;  %v122_v10 = vld [vmem:[%s15280_s4] sm:$0xff] }
 0x288   :  { %v905_v44 = vmul.f32 %v12784_v59, %v904_v54  ;;  %v13648_v59 = vpack.c.bf16 %v139_v46, %v138_v20  ;;  %v123_v54 = vld [vmem:[%s15280_s4 + $0x8] sm:$0xff]  ;;  %v124_v46 = vld [vmem:[%s15280_s4 + $0x10] sm:$0xff] }
 0x28a   :  { %908 = vperm.xlu1 %12772, %v905_v44   ;;  %15411 = vst [vmem:[#allocation29_spill] sm:$0xff] %v13648_v59  ;;  %v140_v44 = vld [vmem:[%s15280_s4 + $0x90] sm:$0xff]  ;;  %10868 = vmatprep.subr.bf16.mxu0 %v13648_v59 }
 0x28b   :  { %v128_v59 = vld [vmem:[%s15280_s4 + $0x30] sm:$0xff] }
 0x28d   :  { %v13624_v2 = vpop.f32.mrb[8].mxu1 }
 0x28e   :  { %12785 = vrcp.f32 %v13624_v2  ;;  %v9047_v45 = vpop.f32.mrb[9].mxu1 }
 0x298   :  { %v12786_v31 = vpop.eup %12785 }
 0x299   :  { %v818_v36 = vmul.f32 %v12786_v31, %v13624_v2 }
 0x29b   :  { %v819_v3 = vsub.f32 2.0, %v818_v36  ;;  %v141_v36 = vld [vmem:[%s15280_s4 + $0x98] sm:$0xff] }
 0x29c   :  { %v13675_v20 = vpack.c.bf16 %v141_v36, %v140_v44  ;;  %v126_v36 = vld [vmem:[%s15280_s4 + $0x20] sm:$0xff] }
 0x29d   :  { %v820_v29 = vmul.f32 %v12786_v31, %v819_v3  ;;  %v157_v3 = vld [vmem:[%s15280_s4 + $0x118] sm:$0xff]  ;;  %v13662_v31 = vpack.c.bf16 %v123_v54, %v122_v10  ;;  %v143_v54 = vld [vmem:[%s15280_s4 + $0xa8] sm:$0xff] }
 0x29e   :  { %15414 = vst [vmem:[#allocation32_spill] sm:$0xff] %v13675_v20 }
 0x29f   :  { %823 = vperm.xlu1 %12772, %v820_v29   ;;  %v156_v29 = vld [vmem:[%s15280_s4 + $0x110] sm:$0xff]  ;;  %15413 = vst [vmem:[#allocation31_spill] sm:$0xff] %v13662_v31  ;;  %10870 = vmatpush3.bf16.msra.mxu0 %v13662_v31 }
 0x2a0   :  { %v13660_v45 = vpack.c.bf16 %v157_v3, %v156_v29  ;;  %v125_v29 = vld [vmem:[%s15280_s4 + $0x18] sm:$0xff]  ;;  %v142_v3 = vld [vmem:[%s15280_s4 + $0xa0] sm:$0xff]  ;;  %10872 = vmatprep.subr.bf16.mxu0 %v13675_v20  ;;  %v160_v20 = vld [vmem:[%s15280_s4 + $0x130] sm:$0xff] }
 0x2a1   :  { %v13687_v10 = vpack.c.bf16 %v125_v29, %v124_v46  ;;  %v13693_v44 = vpack.c.bf16 %v143_v54, %v142_v3  ;;  %v13702_v46 = vpack.c.bf16 %v159_v38, %v158_v11  ;;  %v144_v29 = vld [vmem:[%s15280_s4 + $0xb0] sm:$0xff]  ;;  %v145_v3 = vld [vmem:[%s15280_s4 + $0xb8] sm:$0xff] }
 0x2a2   :  { %15412 = vst [vmem:[#allocation30_spill] sm:$0xff] %v13660_v45  ;;  %10904 = vmatpush3.bf16.msra.mxu1 %v13660_v45  ;;  %v161_v11 = vld [vmem:[%s15280_s4 + $0x138] sm:$0xff]  ;;  %v13721_v45 = vpack.c.bf16 %v127_v41, %v126_v36  ;;  %v13724_v31 = vpack.c.bf16 %v145_v3, %v144_v29  ;;  %v146_v41 = vld [vmem:[%s15280_s4 + $0xc0] sm:$0xff]  ;;  %v147_v36 = vld [vmem:[%s15280_s4 + $0xc8] sm:$0xff] }
 0x2a3   :  { %15415 = vst [vmem:[#allocation33_spill] sm:$0xff] %v13687_v10  ;;  %15416 = vst [vmem:[#allocation34_spill] sm:$0xff] %v13693_v44  ;;  %10905 = vmatprep.subr.bf16.mxu1 %v15407_v55  ;;  %10874 = vmatpush3.bf16.msra.mxu0 %v13687_v10  ;;  %v13733_v14 = vpack.c.bf16 %v161_v11, %v160_v20  ;;  %v162_v29 = vld [vmem:[%s15280_s4 + $0x140] sm:$0xff]  ;;  %v163_v3 = vld [vmem:[%s15280_s4 + $0x148] sm:$0xff]  ;;  %v13749_v20 = vpack.c.bf16 %v129_v21, %v128_v59 }
 0x2a4   :  { %15417 = vst [vmem:[#allocation35_spill] sm:$0xff] %v13702_v46  ;;  %15418 = vst [vmem:[#allocation36_spill] sm:$0xff] %v13721_v45  ;;  %10876 = vmatprep.subr.bf16.mxu0 %v13693_v44  ;;  %v13752_v11 = vpack.c.bf16 %v147_v36, %v146_v41  ;;  %v13761_v44 = vpack.c.bf16 %v163_v3, %v162_v29  ;;  %v164_v21 = vld [vmem:[%s15280_s4 + $0x150] sm:$0xff]  ;;  %v165_v59 = vld [vmem:[%s15280_s4 + $0x158] sm:$0xff] }
 0x2a5   :  { %15419 = vst [vmem:[#allocation37_spill] sm:$0xff] %v13724_v31  ;;  %15420 = vst [vmem:[#allocation38_spill] sm:$0xff] %v13733_v14  ;;  %v13775_v29 = vpack.c.bf16 %v165_v59, %v164_v21  ;;  %v166_v21 = vld [vmem:[%s15280_s4 + $0x160] sm:$0xff] }
 0x2a6   :  { %10907 = vmatpush3.bf16.msra.mxu1 %v13702_v46  ;;  %15421 = vst [vmem:[#allocation39_spill] sm:$0xff] %v13749_v20  ;;  %15422 = vst [vmem:[#allocation40_spill] sm:$0xff] %v13752_v11  ;;  %v131_v46 = vld [vmem:[%s15280_s4 + $0x48] sm:$0xff] }
 0x2a7   :  { %10908 = vmatprep.subr.bf16.mxu1 %v15407_v55  ;;  %10878 = vmatpush3.bf16.msra.mxu0 %v13721_v45  ;;  %15423 = vst [vmem:[#allocation41_spill] sm:$0xff] %v13761_v44  ;;  %15425 = vst [vmem:[#allocation43_spill] sm:$0xff] %v13775_v29 }
 0x2a8   :  { %10880 = vmatprep.subr.bf16.mxu0 %v13724_v31 }
 0x2aa   :  { %10910 = vmatpush3.bf16.msra.mxu1 %v13733_v14 }
 0x2ab   :  { %10911 = vmatprep.subr.bf16.mxu1 %v15407_v55  ;;  %10882 = vmatpush3.bf16.msra.mxu0 %v13749_v20 }
 0x2ac   :  { %10884 = vmatprep.subr.bf16.mxu0 %v13752_v11 }
 0x2ad   :  { %v13710_v54 = vpop.f32.mrb[10].mxu1 }
 0x2ae   :  { %12787 = vrcp.f32 %v13710_v54  ;;  %v9117_v38 = vpop.f32.mrb[11].mxu1  ;;  %10913 = vmatpush3.bf16.msra.mxu1 %v13761_v44 }
 0x2af   :  { %v130_v38 = vld [vmem:[%s15280_s4 + $0x40] sm:$0xff]  ;;  %10914 = vmatprep.subr.bf16.mxu1 %v15407_v55  ;;  %12789 = vtanh.f32 %v13532_v7 }
 0x2b0   :  { %v13771_v41 = vpack.c.bf16 %v131_v46, %v130_v38  ;;  %v148_v46 = vld [vmem:[%s15280_s4 + $0xd0] sm:$0xff]  ;;  %v149_v38 = vld [vmem:[%s15280_s4 + $0xd8] sm:$0xff] }
 0x2b1   :  { %v13791_v59 = vpack.c.bf16 %v149_v38, %v148_v46  ;;  %v150_v46 = vld [vmem:[%s15280_s4 + $0xe0] sm:$0xff]  ;;  %v151_v38 = vld [vmem:[%s15280_s4 + $0xe8] sm:$0xff] }
 0x2b2   :  { %15424 = vst [vmem:[#allocation42_spill] sm:$0xff] %v13771_v41  ;;  %10886 = vmatpush3.bf16.msra.mxu0 %v13771_v41  ;;  %10916 = vmatpush3.bf16.msra.mxu1 %v13775_v29 }
 0x2b3   :  { %10917 = vmatprep.subr.bf16.mxu1 %v15407_v55  ;;  %15426 = vst [vmem:[#allocation44_spill] sm:$0xff] %v13791_v59  ;;  %10888 = vmatprep.subr.bf16.mxu0 %v13791_v59 }
 0x2b8   :  { %v12788_v36 = vpop.eup %12787 }
 0x2b9   :  { %v988_v3 = vmul.f32 %v12788_v36, %v13710_v54  ;;  %v12790_v45 = vpop.eup %12789 }
 0x2bb   :  { %v989_v14 = vsub.f32 2.0, %v988_v3  ;;  %v133_v3 = vld [vmem:[%s15280_s4 + $0x58] sm:$0xff] }
 0x2bd   :  { %v990_v31 = vmul.f32 %v12788_v36, %v989_v14  ;;  %v167_v14 = vld [vmem:[%s15280_s4 + $0x168] sm:$0xff]  ;;  %v132_v36 = vld [vmem:[%s15280_s4 + $0x50] sm:$0xff] }
 0x2be   :  { %v13802_v29 = vpack.c.bf16 %v167_v14, %v166_v21  ;;  %v13804_v41 = vpack.c.bf16 %v133_v3, %v132_v36  ;;  %v13819_v21 = vpack.c.bf16 %v151_v38, %v150_v46  ;;  %v169_v14 = vld [vmem:[%s15280_s4 + $0x178] sm:$0xff]  ;;  %v134_v36 = vld [vmem:[%s15280_s4 + $0x60] sm:$0xff]  ;;  %v135_v3 = vld [vmem:[%s15280_s4 + $0x68] sm:$0xff] }
 0x2bf   :  { %993 = vperm.xlu1 %12772, %v990_v31   ;;  %v168_v31 = vld [vmem:[%s15280_s4 + $0x170] sm:$0xff]  ;;  %v153_v38 = vld [vmem:[%s15280_s4 + $0xf8] sm:$0xff] }
 0x2c0   :  { %15427 = vst [vmem:[#allocation45_spill] sm:$0xff] %v13802_v29  ;;  %15428 = vst [vmem:[#allocation46_spill] sm:$0xff] %v13804_v41  ;;  %10919 = vmatpush3.bf16.msra.mxu1 %v13802_v29  ;;  %10890 = vmatpush3.bf16.msra.mxu0 %v13804_v41  ;;  %v13830_v29 = vpack.c.bf16 %v169_v14, %v168_v31  ;;  %v13832_v41 = vpack.c.bf16 %v135_v3, %v134_v36  ;;  %v152_v46 = vld [vmem:[%s15280_s4 + $0xf0] sm:$0xff]  ;;  %v137_v14 = vld [vmem:[%s15280_s4 + $0x78] sm:$0xff] }
 0x2c1   :  { %10920 = vmatprep.subr.bf16.mxu1 %v15407_v55  ;;  %15429 = vst [vmem:[#allocation47_spill] sm:$0xff] %v13819_v21  ;;  %10892 = vmatprep.subr.bf16.mxu0 %v13819_v21  ;;  %v13843_v59 = vpack.c.bf16 %v153_v38, %v152_v46  ;;  %v136_v31 = vld [vmem:[%s15280_s4 + $0x70] sm:$0xff] }
 0x2c2   :  { %15430 = vst [vmem:[#allocation48_spill] sm:$0xff] %v13830_v29  ;;  %15431 = vst [vmem:[#allocation49_spill] sm:$0xff] %v13832_v41  ;;  %v13852_v36 = vpack.c.bf16 %v137_v14, %v136_v31 }
 0x2c3   :  { %15432 = vst [vmem:[#allocation50_spill] sm:$0xff] %v13843_v59 }
 0x2c4   :  { %10922 = vmatpush3.bf16.msra.mxu1 %v13830_v29  ;;  %10894 = vmatpush3.bf16.msra.mxu0 %v13832_v41  ;;  %15433 = vst [vmem:[#allocation51_spill] sm:$0xff] %v13852_v36 }
 0x2c5   :  { %11022 = vmatprep.subr.bf16.mxu1 %v15407_v55  ;;  %10896 = vmatprep.subr.bf16.mxu0 %v13843_v59 }
 0x2c8   :  { %10898 = vmatpush3.bf16.msra.mxu0 %v13852_v36 }
 0x2c9   :  { %10924 = vmatprep.subr.bf16.mxu0 %v13037_v4 }
 0x2fe   :  { %v739_v3 = vpop.permute.xlu0 %738 }
 0x2ff   :  { %v741_v38 = vmul.f32 %v739_v3, %v13616_v57 }
 0x301   :  { %v997_v41 = vsub.f32 1.0, %v741_v38 }
 0x309   :  { %v909_v46 = vpop.permute.xlu1 %908 }
 0x30a   :  { %v911_v31 = vmul.f32 %v909_v46, %v13619_v28 }
 0x30c   :  { %v998_v59 = vsub.f32 1.0, %v911_v31 }
 0x31e   :  { %v824_v29 = vpop.permute.xlu1 %823 }
 0x31f   :  { %v826_v21 = vmul.f32 %v824_v29, %v13624_v2 }
 0x321   :  { %v1002_v44 = vmul.f32 %v997_v41, %v826_v21 }
 0x323   :  { %v1003_v11 = vsub.f32 %v826_v21, %v1002_v44  ;;  %v1004_v20 = vsub.f32 %v997_v41, %v1002_v44  ;;  %v1005_v10 = vmul.f32 0.0, %v1002_v44 }
 0x325   :  { %v1008_v38 = vmul.f32 0.0, %v1003_v11  ;;  %v1012_v60 = vmul.f32 0.0, %v1004_v20  ;;  %v13925_v11 = vld [vmem:[%s15282_s5] ss:$0 sm:$0xff] }
 0x33e   :  { %v994_v14 = vpop.permute.xlu1 %993 }
 0x33f   :  { %v996_v36 = vmul.f32 %v994_v14, %v13710_v54 }
 0x341   :  { %v999_v4 = vmul.f32 %v998_v59, %v996_v36 }
 0x343   :  { %v1000_v1 = vsub.f32 %v996_v36, %v999_v4  ;;  %v1001_v57 = vsub.f32 %v998_v59, %v999_v4  ;;  %v1006_v3 = vmul.f32 %v12790_v45, %v999_v4  ;;  %v7767_v4 = vld [vmem:[%s15277_s0 + $0x8] sm:$0xff] }
 0x345   :  { %v1009_v2 = vmul.f32 %v12790_v45, %v1000_v1  ;;  %v1013_v29 = vmul.f32 %v12790_v45, %v1001_v57  ;;  %v1007_v21 = vadd.f32 %v1006_v3, %v1005_v10  ;;  %v15434_v57 = vld [vmem:[#allocation10_spill] sm:$0xff]  ;;  %v15435_v3 = vld [vmem:[#allocation12_spill] sm:$0xff] }
 0x347   :  { %12791 = vtanh.f32 %v1007_v21  ;;  %9151 = vmatmul.mubr.f32.vlgmr.msra.gmra.mrb[12].mxu1 %v1007_v21  ;;  %v1010_v7 = vadd.f32 %v1009_v2, %v1008_v38  ;;  %v1014_v41 = vadd.f32 %v1013_v29, %v1012_v60  ;;  %v15436_v38 = vld [vmem:[#allocation13_spill] sm:$0xff]  ;;  %v15437_v2 = vld [vmem:[#allocation15_spill] sm:$0xff]  ;;  %v15438_v29 = vld [vmem:[#allocation16_spill] sm:$0xff] }
 0x348   :  { %11024 = vmatpush3.bf16.msra.mxu1 %v13472_v23  ;;  %9227 = vmatprep.mubr.msk.f32.mxu1 %vm12984_vm1, %v15409_v61 }
 0x349   :  { %v1011_v28 = vadd.f32 %v1010_v7, %v1007_v21  ;;  %v1015_v54 = vadd.f32 %v1014_v41, %v1007_v21  ;;  %11025 = vmatprep.subr.bf16.mxu1 %v15407_v55  ;;  %v15439_v21 = vld [vmem:[#allocation11_spill] sm:$0xff]  ;;  %v15440_v7 = vld [vmem:[#allocation14_spill] sm:$0xff]  ;;  %v15441_v41 = vld [vmem:[#allocation17_spill] sm:$0xff] }
 0x34b   :  { %12793 = vtanh.f32 %v1011_v28  ;;  %1086 = vmatprep.mubr.f32.mxu0 %v1011_v28  ;;  %v15442_v28 = vld [vmem:[#allocation18_spill] sm:$0xff] }
 0x34c   :  { %12795 = vtanh.f32 %v1015_v54  ;;  %1087 = vmatmul.mubr.f32.vlgmr.msra.gmra.mrb[6].mxu0 %v1015_v54  ;;  %11027 = vmatpush3.bf16.msra.mxu1 %v13478_v27  ;;  %v15443_v54 = vld [vmem:[#allocation19_spill] sm:$0xff] }
 0x34d   :  { %10926 = vmatpush1.bf16.msra.mxu0 %v13050_v9  ;;  %1232 = vmatprep.mubr.f32.mxu0 %v15409_v61 }
 0x34e   :  { %10928 = vmatprep.subr.bf16.mxu0 %v13075_v17  ;;  %11028 = vmatprep.subr.bf16.mxu1 %v15407_v55 }
 0x350   :  { %7768 = vmatmul.mubr.msk.f32.vlgmr.msra.gmra.mrb[8].mxu0 %vm223_vm0, %v7767_v4  ;;  %11030 = vmatpush3.bf16.msra.mxu1 %v13490_v37 }
 0x351   :  { %v12792_v60 = vpop.eup %12791  ;;  %10930 = vmatpush1.bf16.msra.mxu0 %v13089_v22  ;;  %1303 = vmatprep.mubr.f32.mxu0 %v15409_v61 }
 0x352   :  { %1021 = vst [vmem:[%s15281_s7 + $0x10] sm:$0xff] %v12792_v60  ;;  %10931 = vmatprep.subr.bf16.mxu0 %v15407_v55  ;;  %11031 = vmatprep.subr.bf16.mxu1 %v15407_v55  ;;  %v15445_v60 = vld [vmem:[#allocation21_spill] sm:$0xff] }
 0x354   :  { %7769 = vmatmul.mubr.msk.f32.vlgmr.msra.gmra.mrb[10].mxu0 %vm223_vm0, %v7767_v4  ;;  %11033 = vmatpush3.bf16.msra.mxu1 %v13502_v53 }
 0x355   :  { %v12794_v1 = vpop.eup %12793  ;;  %10933 = vmatpush3.bf16.msra.mxu0 %v13127_v34  ;;  %9157 = vmatprep.mubr.msk.f32.mxu0 %vm12984_vm1, %v15409_v61 }
 0x356   :  { %v12796_v45 = vpop.eup %12795  ;;  %1020 = vst [vmem:[%s15281_s7 + $0x8] sm:$0xff] %v12794_v1  ;;  %10935 = vmatprep.subr.bf16.mxu0 %v13048_v8  ;;  %11034 = vmatprep.subr.bf16.mxu1 %v15407_v55  ;;  %v15446_v1 = vld [vmem:[#allocation22_spill] sm:$0xff] }
 0x357   :  { %1019 = vst [vmem:[%s15281_s7] sm:$0xff] %v12796_v45 }
 0x358   :  { %9158 = vmatmul.mubr.msk.f32.vlgmr.msra.gmra.mrb[12].mxu0 %vm223_vm0, %v7767_v4  ;;  %11036 = vmatpush3.bf16.msra.mxu1 %v13514_v58  ;;  %v15444_v4 = vld [vmem:[#allocation20_spill] sm:$0xff] }
 0x359   :  { %10937 = vmatpush1.bf16.msra.mxu0 %v13062_v13  ;;  %1444 = vmatprep.mubr.f32.mxu0 %v15409_v61 }
 0x35a   :  { %10939 = vmatprep.subr.bf16.mxu0 %v13077_v18  ;;  %11037 = vmatprep.subr.bf16.mxu1 %v15407_v55 }
 0x35c   :  { %11039 = vmatpush3.bf16.msra.mxu1 %v13546_v5 }
 0x35d   :  { %10941 = vmatpush1.bf16.msra.mxu0 %v13102_v26  ;;  %11040 = vmatprep.subr.bf16.mxu1 %v15407_v55 }
 0x35e   :  { %10943 = vmatprep.subr.bf16.mxu0 %v13114_v30 }
 0x360   :  { %11042 = vmatpush3.bf16.msra.mxu1 %v13558_v12 }
 0x361   :  { %10945 = vmatpush1.bf16.msra.mxu0 %v13140_v39  ;;  %11043 = vmatprep.subr.bf16.mxu1 %v15407_v55 }
 0x362   :  { %10947 = vmatprep.subr.bf16.mxu0 %v13151_v43 }
 0x364   :  { %11045 = vmatpush3.bf16.msra.mxu1 %v13572_v25 }
 0x365   :  { %10949 = vmatpush1.bf16.msra.mxu0 %v13179_v51  ;;  %11046 = vmatprep.subr.bf16.mxu1 %v15407_v55 }
 0x366   :  { %10951 = vmatprep.subr.bf16.mxu0 %v13193_v56 }
 0x369   :  { %10953 = vmatpush1.bf16.msra.mxu0 %v13217_v63 }
 0x36a   :  { %10955 = vmatprep.subr.bf16.mxu0 %v13231_v6 }
 0x36d   :  { %10957 = vmatpush1.bf16.msra.mxu0 %v13253_v16 }
 0x36e   :  { %10959 = vmatprep.subr.bf16.mxu0 %v13267_v24 }
 0x371   :  { %10961 = vmatpush1.bf16.msra.mxu0 %v13289_v33 }
 0x372   :  { %10963 = vmatprep.subr.bf16.mxu0 %v13303_v42 }
 0x375   :  { %10965 = vmatpush1.bf16.msra.mxu0 %v13319_v48 }
 0x376   :  { %10967 = vmatprep.subr.bf16.mxu0 %v13142_v40 }
 0x41a   :  { %v1158_v10 = vpop.f32.mrb[12].mxu1 }
 0x41b   :  { %v9152_v44 = vpop.f32.mrb[13].mxu1 }
 0x41c   :  { %v15447_v44 = vld [vmem:[#allocation24_spill] sm:$0xff] }
 0x41f   :  { %v7936_v20 = vpop.f32.mrb[6].mxu0 }
 0x420   :  { %v7937_v59 = vpop.f32.mrb[7].mxu0 }
 0x421   :  { %v7938_v36 = vadd.f32 %v7937_v59, %v7936_v20 }
 0x423   :  { %v1089_v46 = vadd.f32 %v7938_v36, %v13925_v11  ;;  %v15448_v36 = vld [vmem:[#allocation25_spill] sm:$0xff] }
 0x425   :  { %v13928_v31 = vadd.f32 %v1158_v10, %v1089_v46 }
 0x427   :  { %12797 = vtanh.f32 %v13928_v31 }
 0x431   :  { %v12798_v14 = vpop.eup %12797 }
 0x432   :  { %1445 = vmatmul.mubr.f32.vlgmr.msra.gmra.mrb[8].mxu0 %v12798_v14 }
 0x433   :  { %10969 = vmatpush1.bf16.msra.mxu0 %v13175_v50  ;;  %1515 = vmatprep.mubr.f32.mxu0 %v15409_v61 }
 0x434   :  { %10971 = vmatprep.subr.bf16.mxu0 %v13181_v52 }
 0x437   :  { %10973 = vmatpush1.bf16.msra.mxu0 %v13212_v62 }
 0x438   :  { %10975 = vmatprep.subr.bf16.mxu0 %v13219_v0 }
 0x43b   :  { %10977 = vmatpush1.bf16.msra.mxu0 %v13249_v15 }
 0x43c   :  { %10979 = vmatprep.subr.bf16.mxu0 %v13255_v19 }
 0x43f   :  { %10981 = vmatpush1.bf16.msra.mxu0 %v13285_v32 }
 0x440   :  { %10983 = vmatprep.subr.bf16.mxu0 %v13291_v35 }
 0x443   :  { %10985 = vmatpush1.bf16.msra.mxu0 %v13315_v47  ;;  %v15476_v47 = vld [vmem:[#allocation23_spill] sm:$0xff] }
 0x444   :  { %10987 = vmatprep.subr.bf16.mxu0 %v13321_v49 }
 0x447   :  { %10989 = vmatpush1.bf16.msra.mxu0 %v15434_v57 }
 0x448   :  { %10991 = vmatprep.subr.bf16.mxu0 %v15435_v3 }
 0x44b   :  { %10993 = vmatpush1.bf16.msra.mxu0 %v15436_v38 }
 0x44c   :  { %10995 = vmatprep.subr.bf16.mxu0 %v15437_v2 }
 0x44f   :  { %10997 = vmatpush1.bf16.msra.mxu0 %v15438_v29 }
 0x450   :  { %10998 = vmatprep.subr.bf16.mxu0 %v15407_v55 }
 0x452   :  { %1516 = vmatmul.mubr.f32.vlgmr.msra.gmra.mrb[10].mxu0 %v12798_v14 }
 0x453   :  { %11000 = vmatpush3.bf16.msra.mxu0 %v15439_v21  ;;  %9192 = vmatprep.mubr.msk.f32.mxu0 %vm12984_vm1, %v15409_v61 }
 0x454   :  { %11001 = vmatprep.subr.bf16.mxu0 %v15407_v55 }
 0x457   :  { %11003 = vmatpush3.bf16.msra.mxu0 %v15440_v7 }
 0x458   :  { %11004 = vmatprep.subr.bf16.mxu0 %v15407_v55 }
 0x45b   :  { %11006 = vmatpush3.bf16.msra.mxu0 %v15441_v41 }
 0x45c   :  { %11007 = vmatprep.subr.bf16.mxu0 %v15407_v55 }
 0x45f   :  { %11009 = vmatpush3.bf16.msra.mxu0 %v15442_v28 }
 0x460   :  { %11010 = vmatprep.subr.bf16.mxu0 %v15407_v55 }
 0x463   :  { %11012 = vmatpush3.bf16.msra.mxu0 %v15443_v54  ;;  %v15450_v54 = vld [vmem:[#allocation27_spill] sm:$0xff] }
 0x464   :  { %11013 = vmatprep.subr.bf16.mxu0 %v15407_v55 }
 0x467   :  { %11015 = vmatpush3.bf16.msra.mxu0 %v15444_v4 }
 0x468   :  { %11016 = vmatprep.subr.bf16.mxu0 %v15407_v55 }
 0x46b   :  { %11018 = vmatpush3.bf16.msra.mxu0 %v15445_v60 }
 0x46c   :  { %11019 = vmatprep.subr.bf16.mxu0 %v15407_v55 }
 0x46f   :  { %11021 = vmatpush3.bf16.msra.mxu0 %v15446_v1  ;;  %v15449_v1 = vld [vmem:[#allocation26_spill] sm:$0xff] }
 0x470   :  { %11094 = vmatprep.subr.bf16.mxu0 %v15407_v55 }
 0x472   :  { %9193 = vmatmul.mubr.f32.vlgmr.msra.gmra.mrb[12].mxu0 %v12798_v14 }
 0x473   :  { %11096 = vmatpush3.bf16.msra.mxu0 %v13472_v23  ;;  %9332 = vmatprep.mubr.msk.f32.mxu0 %vm12984_vm1, %v15409_v61 }
 0x474   :  { %11097 = vmatprep.subr.bf16.mxu0 %v15407_v55 }
 0x477   :  { %11099 = vmatpush3.bf16.msra.mxu0 %v13478_v27 }
 0x478   :  { %11100 = vmatprep.subr.bf16.mxu0 %v15407_v55 }
 0x47b   :  { %11102 = vmatpush3.bf16.msra.mxu0 %v13490_v37 }
 0x47c   :  { %11103 = vmatprep.subr.bf16.mxu0 %v15407_v55 }
 0x47f   :  { %11105 = vmatpush3.bf16.msra.mxu0 %v13502_v53 }
 0x480   :  { %11106 = vmatprep.subr.bf16.mxu0 %v15407_v55 }
 0x483   :  { %11108 = vmatpush3.bf16.msra.mxu0 %v13514_v58 }
 0x484   :  { %11109 = vmatprep.subr.bf16.mxu0 %v15407_v55 }
 0x487   :  { %11111 = vmatpush3.bf16.msra.mxu0 %v13546_v5 }
 0x488   :  { %11112 = vmatprep.subr.bf16.mxu0 %v15407_v55 }
 0x48b   :  { %11114 = vmatpush3.bf16.msra.mxu0 %v13558_v12 }
 0x48c   :  { %11115 = vmatprep.subr.bf16.mxu0 %v15407_v55 }
 0x48f   :  { %11117 = vmatpush3.bf16.msra.mxu0 %v13572_v25 }
 0x490   :  { %11150 = vmatprep.subr.bf16.mxu0 %v15407_v55 }
 0x505   :  { %v13984_v45 = vpop.f32.mrb[8].mxu0 }
 0x506   :  { %v1448_v10 = vpop.f32.mrb[9].mxu0 }
 0x507   :  { %v12689_v20 = vadd.f32 %v1448_v10, %v15447_v44 }
 0x509   :  { %1598 = vmax.xlane.f32.xlu1 %v12689_v20 }
 0x525   :  { %v1517_v59 = vpop.f32.mrb[10].mxu0 }
 0x526   :  { %v12690_v46 = vadd.f32 %v1517_v59, %v15448_v36  ;;  %v1519_v14 = vpop.f32.mrb[11].mxu0 }
 0x527   :  { %v12691_v60 = vadd.f32 %v1519_v14, %v15449_v1 }
 0x528   :  { %1683 = vmax.xlane.f32.xlu0 %v12690_v46 }
 0x529   :  { %1768 = vmax.xlane.f32.xlu1 %v12691_v60 }
 0x545   :  { %v1588_v4 = vpop.f32.mrb[12].mxu0 }
 0x546   :  { %v12692_v28 = vadd.f32 %v1588_v4, %v15450_v54  ;;  %v9194_v41 = vpop.f32.mrb[13].mxu0 }
 0x548   :  { %1853 = vmax.xlane.f32.xlu1 %v12692_v28 }
 0x596   :  { %v1599_v7 = vpop.xlane.xlu1 %1598 }
 0x597   :  { %v1600_v21 = vsub.f32 %v12689_v20, %v1599_v7 }
 0x599   :  { %v1601_v29 = vmul.f32 1.442695, %v1600_v21 }
 0x59b   :  { %12799 = vpow2.f32 %v1601_v29 }
 0x5a5   :  { %v12800_v2 = vpop.eup %12799 }
 0x5a6   :  { %9228 = vmatmul.mubr.f32.vlgmr.msra.gmra.mrb[14].mxu1 %v12800_v2 }
 0x5a7   :  { %11048 = vmatpush3.bf16.msra.mxu1 %v13472_v23  ;;  %9262 = vmatprep.mubr.msk.f32.mxu1 %vm12984_vm1, %v15409_v61 }
 0x5a8   :  { %11049 = vmatprep.subr.bf16.mxu1 %v15407_v55 }
 0x5ab   :  { %11051 = vmatpush3.bf16.msra.mxu1 %v13478_v27 }
 0x5ac   :  { %11052 = vmatprep.subr.bf16.mxu1 %v15407_v55 }
 0x5af   :  { %11054 = vmatpush3.bf16.msra.mxu1 %v13490_v37 }
 0x5b0   :  { %11055 = vmatprep.subr.bf16.mxu1 %v15407_v55 }
 0x5b3   :  { %11057 = vmatpush3.bf16.msra.mxu1 %v13502_v53 }
 0x5b4   :  { %11058 = vmatprep.subr.bf16.mxu1 %v15407_v55 }
 0x5b5   :  { %v1684_v2 = vpop.xlane.xlu0 %1683 }
 0x5b6   :  { %v1685_v29 = vsub.f32 %v12690_v46, %v1684_v2  ;;  %v1769_v41 = vpop.xlane.xlu1 %1768  ;;  %v15452_v2 = vld [vmem:[#allocation28_spill] sm:$0xff] }
 0x5b7   :  { %11060 = vmatpush3.bf16.msra.mxu1 %v13514_v58  ;;  %v1770_v4 = vsub.f32 %v12691_v60, %v1769_v41  ;;  %v15456_v41 = vld [vmem:[#allocation33_spill] sm:$0xff] }
 0x5b8   :  { %v1686_v21 = vmul.f32 1.442695, %v1685_v29  ;;  %11061 = vmatprep.subr.bf16.mxu1 %v15407_v55  ;;  %v15453_v29 = vld [vmem:[#allocation31_spill] sm:$0xff] }
 0x5b9   :  { %v1771_v59 = vmul.f32 1.442695, %v1770_v4  ;;  %v15457_v4 = vld [vmem:[#allocation34_spill] sm:$0xff] }
 0x5ba   :  { %12801 = vpow2.f32 %v1686_v21  ;;  %v15454_v21 = vld [vmem:[#allocation32_spill] sm:$0xff] }
 0x5bb   :  { %11063 = vmatpush3.bf16.msra.mxu1 %v13546_v5 }
 0x5bc   :  { %11064 = vmatprep.subr.bf16.mxu1 %v15407_v55 }
 0x5bf   :  { %11066 = vmatpush3.bf16.msra.mxu1 %v13558_v12 }
 0x5c0   :  { %11067 = vmatprep.subr.bf16.mxu1 %v15407_v55 }
 0x5c3   :  { %11069 = vmatpush3.bf16.msra.mxu1 %v13572_v25 }
 0x5c4   :  { %v12802_v7 = vpop.eup %12801  ;;  %11070 = vmatprep.subr.bf16.mxu1 %v15407_v55 }
 0x5c6   :  { %9263 = vmatmul.mubr.f32.vlgmr.msra.gmra.mrb[16].mxu1 %v12802_v7  ;;  %v15455_v7 = vld [vmem:[#allocation30_spill] sm:$0xff] }
 0x5c7   :  { %11072 = vmatpush3.bf16.msra.mxu1 %v13472_v23  ;;  %9297 = vmatprep.mubr.msk.f32.mxu1 %vm12984_vm1, %v15409_v61 }
 0x5c8   :  { %11073 = vmatprep.subr.bf16.mxu1 %v15407_v55 }
 0x5cb   :  { %11075 = vmatpush3.bf16.msra.mxu1 %v13478_v27 }
 0x5cc   :  { %11076 = vmatprep.subr.bf16.mxu1 %v15407_v55 }
 0x5cf   :  { %11078 = vmatpush3.bf16.msra.mxu1 %v13490_v37 }
 0x5d0   :  { %11079 = vmatprep.subr.bf16.mxu1 %v15407_v55 }
 0x5d3   :  { %11081 = vmatpush3.bf16.msra.mxu1 %v13502_v53 }
 0x5d4   :  { %11082 = vmatprep.subr.bf16.mxu1 %v15407_v55 }
 0x5d5   :  { %v1854_v10 = vpop.xlane.xlu1 %1853 }
 0x5d6   :  { %v1855_v20 = vsub.f32 %v12692_v28, %v1854_v10  ;;  %v15451_v28 = vld [vmem:[#allocation29_spill] sm:$0xff]  ;;  %v15458_v10 = vld [vmem:[#allocation35_spill] sm:$0xff] }
 0x5d7   :  { %11084 = vmatpush3.bf16.msra.mxu1 %v13514_v58 }
 0x5d8   :  { %v1856_v46 = vmul.f32 1.442695, %v1855_v20  ;;  %11085 = vmatprep.subr.bf16.mxu1 %v15407_v55  ;;  %v15459_v20 = vld [vmem:[#allocation36_spill] sm:$0xff] }
 0x5da   :  { %12803 = vpow2.f32 %v1856_v46  ;;  %v15461_v46 = vld [vmem:[#allocation38_spill] sm:$0xff] }
 0x5db   :  { %12805 = vpow2.f32 %v1771_v59  ;;  %11087 = vmatpush3.bf16.msra.mxu1 %v13546_v5  ;;  %v15460_v59 = vld [vmem:[#allocation37_spill] sm:$0xff] }
 0x5dc   :  { %11088 = vmatprep.subr.bf16.mxu1 %v15407_v55 }
 0x5df   :  { %11090 = vmatpush3.bf16.msra.mxu1 %v13558_v12 }
 0x5e0   :  { %11091 = vmatprep.subr.bf16.mxu1 %v15407_v55 }
 0x5e3   :  { %11093 = vmatpush3.bf16.msra.mxu1 %v13572_v25 }
 0x5e4   :  { %v12804_v60 = vpop.eup %12803  ;;  %11119 = vmatprep.subr.bf16.mxu1 %v15451_v28 }
 0x5e5   :  { %v12806_v14 = vpop.eup %12805  ;;  %9333 = vmatmul.mubr.f32.vlgmr.msra.gmra.mrb[14].mxu0 %v12804_v60  ;;  %v15462_v60 = vld [vmem:[#allocation39_spill] sm:$0xff] }
 0x5e6   :  { %9298 = vmatmul.mubr.f32.vlgmr.msra.gmra.mrb[18].mxu1 %v12806_v14  ;;  %11152 = vmatpush3.bf16.msra.mxu0 %v15452_v2  ;;  %v15463_v14 = vld [vmem:[#allocation40_spill] sm:$0xff] }
 0x5e7   :  { %11153 = vmatprep.subr.bf16.mxu0 %v15407_v55  ;;  %11121 = vmatpush3.bf16.msra.mxu1 %v15453_v29 }
 0x5e8   :  { %11123 = vmatprep.subr.bf16.mxu1 %v15454_v21  ;;  %9367 = vmatprep.mubr.msk.f32.mxu0 %vm12984_vm1, %v15409_v61 }
 0x5ea   :  { %11155 = vmatpush3.bf16.msra.mxu0 %v15455_v7  ;;  %v15464_v7 = vld [vmem:[#allocation41_spill] sm:$0xff] }
 0x5eb   :  { %11156 = vmatprep.subr.bf16.mxu0 %v15407_v55  ;;  %11125 = vmatpush3.bf16.msra.mxu1 %v15456_v41  ;;  %v15467_v41 = vld [vmem:[#allocation43_spill] sm:$0xff] }
 0x5ec   :  { %11127 = vmatprep.subr.bf16.mxu1 %v15457_v4  ;;  %v15465_v4 = vld [vmem:[#allocation42_spill] sm:$0xff] }
 0x5ee   :  { %11158 = vmatpush3.bf16.msra.mxu0 %v15458_v10  ;;  %v15466_v10 = vld [vmem:[#allocation44_spill] sm:$0xff] }
 0x5ef   :  { %11159 = vmatprep.subr.bf16.mxu0 %v15407_v55  ;;  %11129 = vmatpush3.bf16.msra.mxu1 %v15459_v20  ;;  %v15470_v20 = vld [vmem:[#allocation45_spill] sm:$0xff] }
 0x5f0   :  { %11131 = vmatprep.subr.bf16.mxu1 %v15460_v59  ;;  %v15468_v59 = vld [vmem:[#allocation46_spill] sm:$0xff] }
 0x5f2   :  { %11161 = vmatpush3.bf16.msra.mxu0 %v15461_v46  ;;  %v15469_v46 = vld [vmem:[#allocation47_spill] sm:$0xff] }
 0x5f3   :  { %11162 = vmatprep.subr.bf16.mxu0 %v15407_v55  ;;  %11133 = vmatpush3.bf16.msra.mxu1 %v15462_v60  ;;  %v15473_v60 = vld [vmem:[#allocation48_spill] sm:$0xff] }
 0x5f4   :  { %11135 = vmatprep.subr.bf16.mxu1 %v15463_v14  ;;  %v15471_v14 = vld [vmem:[#allocation49_spill] sm:$0xff] }
 0x5f6   :  { %11164 = vmatpush3.bf16.msra.mxu0 %v15464_v7  ;;  %v15472_v7 = vld [vmem:[#allocation50_spill] sm:$0xff] }
 0x5f7   :  { %11165 = vmatprep.subr.bf16.mxu0 %v15407_v55  ;;  %11137 = vmatpush3.bf16.msra.mxu1 %v15465_v4  ;;  %v15474_v4 = vld [vmem:[#allocation51_spill] sm:$0xff] }
 0x5f8   :  { %11139 = vmatprep.subr.bf16.mxu1 %v15466_v10 }
 0x5fa   :  { %11167 = vmatpush3.bf16.msra.mxu0 %v15467_v41  ;;  %v15475_v41 = vld [vmem:[#allocation4_spill] sm:$0xff] }
 0x5fb   :  { %11168 = vmatprep.subr.bf16.mxu0 %v15407_v55  ;;  %11141 = vmatpush3.bf16.msra.mxu1 %v15468_v59 }
 0x5fc   :  { %11143 = vmatprep.subr.bf16.mxu1 %v15469_v46 }
 0x5fe   :  { %11170 = vmatpush3.bf16.msra.mxu0 %v15470_v20 }
 0x5ff   :  { %11171 = vmatprep.subr.bf16.mxu0 %v15407_v55  ;;  %11145 = vmatpush3.bf16.msra.mxu1 %v15471_v14 }
 0x600   :  { %11147 = vmatprep.subr.bf16.mxu1 %v15472_v7 }
 0x602   :  { %11173 = vmatpush3.bf16.msra.mxu0 %v15473_v60 }
 0x603   :  { %11149 = vmatpush3.bf16.msra.mxu1 %v15474_v4  ;;  %11273 = vmatprep.subr.bf16.mxu0 %v15407_v55 }
 0x604   :  { %11175 = vmatprep.subr.bf16.mxu1 %v15475_v41 }
 0x679   :  { %v1669_v10 = vpop.f32.mrb[14].mxu1 }
 0x67a   :  { %12807 = vrcp.f32 %v1669_v10  ;;  %v9229_v59 = vpop.f32.mrb[15].mxu1 }
 0x684   :  { %v12808_v46 = vpop.eup %12807 }
 0x685   :  { %v1674_v21 = vmul.f32 %v12808_v46, %v1669_v10 }
 0x687   :  { %v1675_v20 = vsub.f32 2.0, %v1674_v21 }
 0x689   :  { %v1676_v29 = vmul.f32 %v12808_v46, %v1675_v20 }
 0x68b   :  { %1679 = vperm.xlu1 %12772, %v1676_v29  }
 0x699   :  { %v1754_v2 = vpop.f32.mrb[16].mxu1 }
 0x69a   :  { %12809 = vrcp.f32 %v1754_v2  ;;  %v9264_v14 = vpop.f32.mrb[17].mxu1 }
 0x6a4   :  { %v12810_v7 = vpop.eup %12809 }
 0x6a5   :  { %v1759_v28 = vmul.f32 %v12810_v7, %v1754_v2 }
 0x6a7   :  { %v1760_v60 = vsub.f32 2.0, %v1759_v28 }
 0x6a9   :  { %v1761_v54 = vmul.f32 %v12810_v7, %v1760_v60 }
 0x6ab   :  { %1764 = vperm.xlu1 %12772, %v1761_v54  }
 0x6b8   :  { %v1924_v4 = vpop.f32.mrb[14].mxu0 }
 0x6b9   :  { %12811 = vrcp.f32 %v1924_v4  ;;  %v1839_v1 = vpop.f32.mrb[18].mxu1  ;;  %v9334_v41 = vpop.f32.mrb[15].mxu0 }
 0x6ba   :  { %12813 = vrcp.f32 %v1839_v1  ;;  %v9299_v36 = vpop.f32.mrb[19].mxu1 }
 0x6bb   :  { %v12688_v36 = vadd.f32 %v13984_v45, %v15476_v47 }
 0x6bd   :  { %12815 = vtanh.f32 %v12688_v36 }
 0x6c3   :  { %v12812_v59 = vpop.eup %12811 }
 0x6c4   :  { %v12814_v44 = vpop.eup %12813  ;;  %v1929_v38 = vmul.f32 %v12812_v59, %v1924_v4 }
 0x6c5   :  { %v1844_v21 = vmul.f32 %v12814_v44, %v1839_v1 }
 0x6c6   :  { %v1930_v20 = vsub.f32 2.0, %v1929_v38 }
 0x6c7   :  { %v1845_v29 = vsub.f32 2.0, %v1844_v21 }
 0x6c8   :  { %v1931_v46 = vmul.f32 %v12812_v59, %v1930_v20  ;;  %v12816_v20 = vpop.eup %12815 }
 0x6c9   :  { %v1846_v3 = vmul.f32 %v12814_v44, %v1845_v29 }
 0x6ca   :  { %1934 = vperm.xlu1 %12772, %v1931_v46  }
 0x6cb   :  { %1849 = vperm.xlu0 %12771, %v1846_v3  }
 0x70a   :  { %v1680_v14 = vpop.permute.xlu1 %1679 }
 0x70b   :  { %v1682_v28 = vmul.f32 %v1680_v14, %v1669_v10 }
 0x70d   :  { %v1938_v54 = vsub.f32 1.0, %v1682_v28 }
 0x72a   :  { %v1765_v7 = vpop.permute.xlu1 %1764 }
 0x72b   :  { %v1767_v60 = vmul.f32 %v1765_v7, %v1754_v2 }
 0x72d   :  { %v1943_v57 = vmul.f32 %v1938_v54, %v1767_v60 }
 0x72f   :  { %v1944_v49 = vsub.f32 %v1767_v60, %v1943_v57  ;;  %v1945_v41 = vsub.f32 %v1938_v54, %v1943_v57  ;;  %v1946_v3 = vmul.f32 %v1943_v57, %v13928_v31 }
 0x731   :  { %v1949_v2 = vmul.f32 %v1944_v49, %v13928_v31  ;;  %v1953_v14 = vmul.f32 %v1945_v41, %v13928_v31  ;;  %v7774_v49 = vld [vmem:[%s15277_s0 + $0x10] sm:$0xff] }
 0x749   :  { %v1935_v35 = vpop.permute.xlu1 %1934 }
 0x74a   :  { %v1850_v32 = vpop.permute.xlu0 %1849  ;;  %v1937_v21 = vmul.f32 %v1935_v35, %v1924_v4 }
 0x74b   :  { %v1852_v38 = vmul.f32 %v1850_v32, %v1839_v1 }
 0x74d   :  { %v1939_v59 = vsub.f32 1.0, %v1852_v38 }
 0x74f   :  { %v1940_v44 = vmul.f32 %v1939_v59, %v1937_v21 }
 0x751   :  { %v1941_v10 = vsub.f32 %v1937_v21, %v1940_v44  ;;  %v1942_v29 = vsub.f32 %v1939_v59, %v1940_v44  ;;  %v1947_v46 = vmul.f32 %v12816_v20, %v1940_v44 }
 0x753   :  { %v1954_v28 = vmul.f32 %v12816_v20, %v1942_v29  ;;  %v1948_v7 = vadd.f32 %v1947_v46, %v1946_v3  ;;  %v1950_v45 = vmul.f32 %v12816_v20, %v1941_v10  ;;  %v15478_v3 = vld [vmem:[#allocation7_spill] sm:$0xff]  ;;  %v15479_v10 = vld [vmem:[#allocation8_spill] sm:$0xff]  ;;  %v15480_v29 = vld [vmem:[#allocation9_spill] sm:$0xff] }
 0x754   :  { %v15481_v46 = vld [vmem:[#allocation10_spill] sm:$0xff] }
 0x755   :  { %v1955_v54 = vadd.f32 %v1954_v28, %v1953_v14  ;;  %12817 = vtanh.f32 %v1948_v7  ;;  %9368 = vmatmul.mubr.f32.vlgmr.msra.gmra.mrb[16].mxu0 %v1948_v7  ;;  %v1951_v32 = vadd.f32 %v1950_v45, %v1949_v2  ;;  %v15482_v2 = vld [vmem:[#allocation12_spill] sm:$0xff]  ;;  %v15483_v14 = vld [vmem:[#allocation13_spill] sm:$0xff]  ;;  %v15484_v28 = vld [vmem:[#allocation15_spill] sm:$0xff] }
 0x756   :  { %11275 = vmatpush3.bf16.msra.mxu0 %v13472_v23  ;;  %9444 = vmatprep.mubr.msk.f32.mxu0 %vm12984_vm1, %v15409_v61  ;;  %v15486_v45 = vld [vmem:[#allocation11_spill] sm:$0xff] }
 0x757   :  { %v1952_v35 = vadd.f32 %v1951_v32, %v1948_v7  ;;  %v1956_v57 = vadd.f32 %v1955_v54, %v1948_v7  ;;  %11276 = vmatprep.subr.bf16.mxu0 %v15407_v55  ;;  %v15485_v7 = vld [vmem:[#allocation16_spill] sm:$0xff]  ;;  %v15487_v54 = vld [vmem:[#allocation14_spill] sm:$0xff]  ;;  %v15488_v32 = vld [vmem:[#allocation17_spill] sm:$0xff] }
 0x759   :  { %12819 = vtanh.f32 %v1952_v35  ;;  %2028 = vmatprep.mubr.f32.mxu1 %v1952_v35  ;;  %v15489_v35 = vld [vmem:[#allocation18_spill] sm:$0xff] }
 0x75a   :  { %12821 = vtanh.f32 %v1956_v57  ;;  %2029 = vmatmul.mubr.f32.vlgmr.msra.gmra.mrb[20].mxu1 %v1956_v57  ;;  %11278 = vmatpush3.bf16.msra.mxu0 %v13478_v27  ;;  %v15490_v57 = vld [vmem:[#allocation19_spill] sm:$0xff] }
 0x75b   :  { %11177 = vmatpush1.bf16.msra.mxu1 %v13050_v9  ;;  %2174 = vmatprep.mubr.f32.mxu1 %v15409_v61 }
 0x75c   :  { %11179 = vmatprep.subr.bf16.mxu1 %v13075_v17  ;;  %11279 = vmatprep.subr.bf16.mxu0 %v15407_v55 }
 0x75e   :  { %7775 = vmatmul.mubr.msk.f32.vlgmr.msra.gmra.mrb[22].mxu1 %vm223_vm0, %v7774_v49  ;;  %11281 = vmatpush3.bf16.msra.mxu0 %v13490_v37 }
 0x75f   :  { %v12818_v31 = vpop.eup %12817  ;;  %11181 = vmatpush1.bf16.msra.mxu1 %v13089_v22  ;;  %2245 = vmatprep.mubr.f32.mxu1 %v15409_v61 }
 0x760   :  { %7773 = vst [vmem:[%s15281_s7 + $0x28] sm:$0xff] %v12818_v31  ;;  %11182 = vmatprep.subr.bf16.mxu1 %v15407_v55  ;;  %11282 = vmatprep.subr.bf16.mxu0 %v15407_v55  ;;  %v15492_v31 = vld [vmem:[#allocation21_spill] sm:$0xff] }
 0x762   :  { %7776 = vmatmul.mubr.msk.f32.vlgmr.msra.gmra.mrb[24].mxu1 %vm223_vm0, %v7774_v49  ;;  %11284 = vmatpush3.bf16.msra.mxu0 %v13502_v53 }
 0x763   :  { %v12820_v1 = vpop.eup %12819  ;;  %11184 = vmatpush3.bf16.msra.mxu1 %v13127_v34  ;;  %9374 = vmatprep.mubr.msk.f32.mxu1 %vm12984_vm1, %v15409_v61 }
 0x764   :  { %v12822_v4 = vpop.eup %12821  ;;  %7772 = vst [vmem:[%s15281_s7 + $0x20] sm:$0xff] %v12820_v1  ;;  %11186 = vmatprep.subr.bf16.mxu1 %v13048_v8  ;;  %11285 = vmatprep.subr.bf16.mxu0 %v15407_v55  ;;  %v15493_v1 = vld [vmem:[#allocation22_spill] sm:$0xff] }
 0x765   :  { %7771 = vst [vmem:[%s15281_s7 + $0x18] sm:$0xff] %v12822_v4 }
 0x766   :  { %9375 = vmatmul.mubr.msk.f32.vlgmr.msra.gmra.mrb[26].mxu1 %vm223_vm0, %v7774_v49  ;;  %11287 = vmatpush3.bf16.msra.mxu0 %v13514_v58  ;;  %v15491_v49 = vld [vmem:[#allocation20_spill] sm:$0xff] }
 0x767   :  { %11188 = vmatpush1.bf16.msra.mxu1 %v13062_v13  ;;  %2386 = vmatprep.mubr.f32.mxu1 %v15409_v61 }
 0x768   :  { %11190 = vmatprep.subr.bf16.mxu1 %v13077_v18  ;;  %11288 = vmatprep.subr.bf16.mxu0 %v15407_v55 }
 0x76a   :  { %11290 = vmatpush3.bf16.msra.mxu0 %v13546_v5 }
 0x76b   :  { %11192 = vmatpush1.bf16.msra.mxu1 %v13102_v26  ;;  %11291 = vmatprep.subr.bf16.mxu0 %v15407_v55 }
 0x76c   :  { %11194 = vmatprep.subr.bf16.mxu1 %v13114_v30 }
 0x76e   :  { %11293 = vmatpush3.bf16.msra.mxu0 %v13558_v12 }
 0x76f   :  { %11196 = vmatpush1.bf16.msra.mxu1 %v13140_v39  ;;  %11294 = vmatprep.subr.bf16.mxu0 %v15407_v55 }
 0x770   :  { %11198 = vmatprep.subr.bf16.mxu1 %v13151_v43 }
 0x772   :  { %11296 = vmatpush3.bf16.msra.mxu0 %v13572_v25 }
 0x773   :  { %11200 = vmatpush1.bf16.msra.mxu1 %v13179_v51  ;;  %11297 = vmatprep.subr.bf16.mxu0 %v15407_v55 }
 0x774   :  { %11202 = vmatprep.subr.bf16.mxu1 %v13193_v56 }
 0x777   :  { %11204 = vmatpush1.bf16.msra.mxu1 %v13217_v63 }
 0x778   :  { %11206 = vmatprep.subr.bf16.mxu1 %v13231_v6 }
 0x77b   :  { %11208 = vmatpush1.bf16.msra.mxu1 %v13253_v16 }
 0x77c   :  { %11210 = vmatprep.subr.bf16.mxu1 %v13267_v24 }
 0x77f   :  { %11212 = vmatpush1.bf16.msra.mxu1 %v13289_v33 }
 0x780   :  { %11214 = vmatprep.subr.bf16.mxu1 %v13303_v42 }
 0x783   :  { %11216 = vmatpush1.bf16.msra.mxu1 %v13319_v48 }
 0x784   :  { %11218 = vmatprep.subr.bf16.mxu1 %v13142_v40 }
 0x828   :  { %v2100_v60 = vpop.f32.mrb[16].mxu0 }
 0x829   :  { %v9369_v41 = vpop.f32.mrb[17].mxu0 }
 0x82a   :  { %v15494_v41 = vld [vmem:[#allocation24_spill] sm:$0xff] }
 0x82d   :  { %v8076_v36 = vpop.f32.mrb[20].mxu1 }
 0x82e   :  { %v8077_v38 = vpop.f32.mrb[21].mxu1 }
 0x82f   :  { %v8078_v21 = vadd.f32 %v8077_v38, %v8076_v36 }
 0x831   :  { %v2031_v59 = vadd.f32 %v8078_v21, %v13925_v11  ;;  %v15477_v11 = vld [vmem:[#allocation6_spill] sm:$0xff]  ;;  %v15495_v21 = vld [vmem:[#allocation25_spill] sm:$0xff] }
 0x833   :  { %v14126_v44 = vadd.f32 %v2100_v60, %v2031_v59 }
 0x835   :  { %12823 = vtanh.f32 %v14126_v44 }
 0x83f   :  { %v12824_v20 = vpop.eup %12823 }
 0x840   :  { %2387 = vmatmul.mubr.f32.vlgmr.msra.gmra.mrb[22].mxu1 %v12824_v20 }
 0x841   :  { %11220 = vmatpush1.bf16.msra.mxu1 %v13175_v50  ;;  %2457 = vmatprep.mubr.f32.mxu1 %v15409_v61 }
 0x842   :  { %11222 = vmatprep.subr.bf16.mxu1 %v13181_v52 }
 0x845   :  { %11224 = vmatpush1.bf16.msra.mxu1 %v13212_v62 }
 0x846   :  { %11226 = vmatprep.subr.bf16.mxu1 %v13219_v0 }
 0x849   :  { %11228 = vmatpush1.bf16.msra.mxu1 %v13249_v15 }
 0x84a   :  { %11230 = vmatprep.subr.bf16.mxu1 %v13255_v19 }
 0x84d   :  { %11232 = vmatpush1.bf16.msra.mxu1 %v15477_v11 }
 0x84e   :  { %11234 = vmatprep.subr.bf16.mxu1 %v15478_v3 }
 0x851   :  { %11236 = vmatpush1.bf16.msra.mxu1 %v15479_v10 }
 0x852   :  { %11238 = vmatprep.subr.bf16.mxu1 %v15480_v29 }
 0x855   :  { %11240 = vmatpush1.bf16.msra.mxu1 %v15481_v46 }
 0x856   :  { %11242 = vmatprep.subr.bf16.mxu1 %v15482_v2 }
 0x859   :  { %11244 = vmatpush1.bf16.msra.mxu1 %v15483_v14 }
 0x85a   :  { %11246 = vmatprep.subr.bf16.mxu1 %v15484_v28 }
 0x85d   :  { %11248 = vmatpush1.bf16.msra.mxu1 %v15485_v7 }
 0x85e   :  { %11249 = vmatprep.subr.bf16.mxu1 %v15407_v55 }
 0x860   :  { %2458 = vmatmul.mubr.f32.vlgmr.msra.gmra.mrb[24].mxu1 %v12824_v20 }
 0x861   :  { %11251 = vmatpush3.bf16.msra.mxu1 %v15486_v45  ;;  %9409 = vmatprep.mubr.msk.f32.mxu1 %vm12984_vm1, %v15409_v61 }
 0x862   :  { %11252 = vmatprep.subr.bf16.mxu1 %v15407_v55 }
 0x865   :  { %11254 = vmatpush3.bf16.msra.mxu1 %v15487_v54 }
 0x866   :  { %11255 = vmatprep.subr.bf16.mxu1 %v15407_v55 }
 0x869   :  { %11257 = vmatpush3.bf16.msra.mxu1 %v15488_v32 }
 0x86a   :  { %11258 = vmatprep.subr.bf16.mxu1 %v15407_v55 }
 0x86d   :  { %11260 = vmatpush3.bf16.msra.mxu1 %v15489_v35 }
 0x86e   :  { %11261 = vmatprep.subr.bf16.mxu1 %v15407_v55 }
 0x871   :  { %11263 = vmatpush3.bf16.msra.mxu1 %v15490_v57  ;;  %v15497_v57 = vld [vmem:[#allocation27_spill] sm:$0xff] }
 0x872   :  { %11264 = vmatprep.subr.bf16.mxu1 %v15407_v55 }
 0x875   :  { %11266 = vmatpush3.bf16.msra.mxu1 %v15491_v49 }
 0x876   :  { %11267 = vmatprep.subr.bf16.mxu1 %v15407_v55 }
 0x879   :  { %11269 = vmatpush3.bf16.msra.mxu1 %v15492_v31 }
 0x87a   :  { %11270 = vmatprep.subr.bf16.mxu1 %v15407_v55 }
 0x87d   :  { %11272 = vmatpush3.bf16.msra.mxu1 %v15493_v1  ;;  %v15496_v1 = vld [vmem:[#allocation26_spill] sm:$0xff] }
 0x87e   :  { %11345 = vmatprep.subr.bf16.mxu1 %v15407_v55 }
 0x880   :  { %9410 = vmatmul.mubr.f32.vlgmr.msra.gmra.mrb[26].mxu1 %v12824_v20 }
 0x881   :  { %11347 = vmatpush3.bf16.msra.mxu1 %v13472_v23  ;;  %9549 = vmatprep.mubr.msk.f32.mxu1 %vm12984_vm1, %v15409_v61 }
 0x882   :  { %11348 = vmatprep.subr.bf16.mxu1 %v15407_v55 }
 0x885   :  { %11350 = vmatpush3.bf16.msra.mxu1 %v13478_v27 }
 0x886   :  { %11351 = vmatprep.subr.bf16.mxu1 %v15407_v55 }
 0x889   :  { %11353 = vmatpush3.bf16.msra.mxu1 %v13490_v37 }
 0x88a   :  { %11354 = vmatprep.subr.bf16.mxu1 %v15407_v55 }
 0x88d   :  { %11356 = vmatpush3.bf16.msra.mxu1 %v13502_v53 }
 0x88e   :  { %11357 = vmatprep.subr.bf16.mxu1 %v15407_v55 }
 0x891   :  { %11359 = vmatpush3.bf16.msra.mxu1 %v13514_v58 }
 0x892   :  { %11360 = vmatprep.subr.bf16.mxu1 %v15407_v55 }
 0x895   :  { %11362 = vmatpush3.bf16.msra.mxu1 %v13546_v5 }
 0x896   :  { %11363 = vmatprep.subr.bf16.mxu1 %v15407_v55 }
 0x899   :  { %11365 = vmatpush3.bf16.msra.mxu1 %v13558_v12 }
 0x89a   :  { %11366 = vmatprep.subr.bf16.mxu1 %v15407_v55 }
 0x89d   :  { %11368 = vmatpush3.bf16.msra.mxu1 %v13572_v25 }
 0x89e   :  { %11401 = vmatprep.subr.bf16.mxu1 %v15407_v55 }
 0x913   :  { %v14182_v4 = vpop.f32.mrb[22].mxu1 }
 0x914   :  { %v2390_v60 = vpop.f32.mrb[23].mxu1 }
 0x915   :  { %v12694_v36 = vadd.f32 %v2390_v60, %v15494_v41 }
 0x917   :  { %2540 = vmax.xlane.f32.xlu1 %v12694_v36 }
 0x933   :  { %v2459_v38 = vpop.f32.mrb[24].mxu1 }
 0x934   :  { %v12695_v59 = vadd.f32 %v2459_v38, %v15495_v21  ;;  %v2461_v20 = vpop.f32.mrb[25].mxu1 }
 0x935   :  { %v12696_v31 = vadd.f32 %v2461_v20, %v15496_v1 }
 0x936   :  { %2625 = vmax.xlane.f32.xlu0 %v12695_v59 }
 0x93a   :  { %2710 = vmax.xlane.f32.xlu0 %v12696_v31 }
 0x953   :  { %v2530_v49 = vpop.f32.mrb[26].mxu1 }
 0x954   :  { %v12697_v35 = vadd.f32 %v2530_v49, %v15497_v57  ;;  %v9411_v32 = vpop.f32.mrb[27].mxu1 }
 0x956   :  { %2795 = vmax.xlane.f32.xlu1 %v12697_v35 }
 0x9a4   :  { %v2541_v54 = vpop.xlane.xlu1 %2540 }
 0x9a5   :  { %v2542_v45 = vsub.f32 %v12694_v36, %v2541_v54 }
 0x9a7   :  { %v2543_v7 = vmul.f32 1.442695, %v2542_v45 }
 0x9a9   :  { %12825 = vpow2.f32 %v2543_v7 }
 0x9b3   :  { %v12826_v28 = vpop.eup %12825 }
 0x9b4   :  { %9445 = vmatmul.mubr.f32.vlgmr.msra.gmra.mrb[18].mxu0 %v12826_v28 }
 0x9b5   :  { %11299 = vmatpush3.bf16.msra.mxu0 %v13472_v23  ;;  %9479 = vmatprep.mubr.msk.f32.mxu0 %vm12984_vm1, %v15409_v61 }
 0x9b6   :  { %11300 = vmatprep.subr.bf16.mxu0 %v15407_v55 }
 0x9b9   :  { %11302 = vmatpush3.bf16.msra.mxu0 %v13478_v27 }
 0x9ba   :  { %11303 = vmatprep.subr.bf16.mxu0 %v15407_v55 }
 0x9bd   :  { %11305 = vmatpush3.bf16.msra.mxu0 %v13490_v37 }
 0x9be   :  { %11306 = vmatprep.subr.bf16.mxu0 %v15407_v55 }
 0x9c1   :  { %11308 = vmatpush3.bf16.msra.mxu0 %v13502_v53 }
 0x9c2   :  { %11309 = vmatprep.subr.bf16.mxu0 %v15407_v55 }
 0x9c3   :  { %v2626_v28 = vpop.xlane.xlu0 %2625 }
 0x9c4   :  { %v2627_v7 = vsub.f32 %v12695_v59, %v2626_v28  ;;  %v15499_v28 = vld [vmem:[#allocation28_spill] sm:$0xff] }
 0x9c5   :  { %11311 = vmatpush3.bf16.msra.mxu0 %v13514_v58 }
 0x9c6   :  { %v2628_v45 = vmul.f32 1.442695, %v2627_v7  ;;  %11312 = vmatprep.subr.bf16.mxu0 %v15407_v55  ;;  %v15500_v7 = vld [vmem:[#allocation31_spill] sm:$0xff] }
 0x9c7   :  { %v2711_v32 = vpop.xlane.xlu0 %2710 }
 0x9c8   :  { %12827 = vpow2.f32 %v2628_v45  ;;  %v2712_v49 = vsub.f32 %v12696_v31, %v2711_v32  ;;  %v15501_v45 = vld [vmem:[#allocation32_spill] sm:$0xff]  ;;  %v15503_v32 = vld [vmem:[#allocation33_spill] sm:$0xff] }
 0x9c9   :  { %11314 = vmatpush3.bf16.msra.mxu0 %v13546_v5 }
 0x9ca   :  { %11315 = vmatprep.subr.bf16.mxu0 %v15407_v55  ;;  %v2713_v38 = vmul.f32 1.442695, %v2712_v49  ;;  %v15504_v49 = vld [vmem:[#allocation34_spill] sm:$0xff] }
 0x9cd   :  { %11317 = vmatpush3.bf16.msra.mxu0 %v13558_v12 }
 0x9ce   :  { %11318 = vmatprep.subr.bf16.mxu0 %v15407_v55 }
 0x9d1   :  { %11320 = vmatpush3.bf16.msra.mxu0 %v13572_v25 }
 0x9d2   :  { %v12828_v54 = vpop.eup %12827  ;;  %11321 = vmatprep.subr.bf16.mxu0 %v15407_v55 }
 0x9d4   :  { %9480 = vmatmul.mubr.f32.vlgmr.msra.gmra.mrb[20].mxu0 %v12828_v54  ;;  %v15502_v54 = vld [vmem:[#allocation30_spill] sm:$0xff] }
 0x9d5   :  { %11323 = vmatpush3.bf16.msra.mxu0 %v13472_v23  ;;  %9514 = vmatprep.mubr.msk.f32.mxu0 %vm12984_vm1, %v15409_v61 }
 0x9d6   :  { %11324 = vmatprep.subr.bf16.mxu0 %v15407_v55 }
 0x9d9   :  { %11326 = vmatpush3.bf16.msra.mxu0 %v13478_v27 }
 0x9da   :  { %11327 = vmatprep.subr.bf16.mxu0 %v15407_v55 }
 0x9dd   :  { %11329 = vmatpush3.bf16.msra.mxu0 %v13490_v37 }
 0x9de   :  { %11330 = vmatprep.subr.bf16.mxu0 %v15407_v55 }
 0x9e1   :  { %11332 = vmatpush3.bf16.msra.mxu0 %v13502_v53 }
 0x9e2   :  { %11333 = vmatprep.subr.bf16.mxu0 %v15407_v55 }
 0x9e3   :  { %v2796_v60 = vpop.xlane.xlu1 %2795 }
 0x9e4   :  { %v2797_v36 = vsub.f32 %v12697_v35, %v2796_v60  ;;  %v15498_v35 = vld [vmem:[#allocation29_spill] sm:$0xff]  ;;  %v15505_v60 = vld [vmem:[#allocation35_spill] sm:$0xff] }
 0x9e5   :  { %11335 = vmatpush3.bf16.msra.mxu0 %v13514_v58 }
 0x9e6   :  { %v2798_v59 = vmul.f32 1.442695, %v2797_v36  ;;  %11336 = vmatprep.subr.bf16.mxu0 %v15407_v55  ;;  %v15506_v36 = vld [vmem:[#allocation36_spill] sm:$0xff] }
 0x9e8   :  { %12829 = vpow2.f32 %v2798_v59  ;;  %v15508_v59 = vld [vmem:[#allocation38_spill] sm:$0xff] }
 0x9e9   :  { %12831 = vpow2.f32 %v2713_v38  ;;  %11338 = vmatpush3.bf16.msra.mxu0 %v13546_v5  ;;  %v15507_v38 = vld [vmem:[#allocation37_spill] sm:$0xff] }
 0x9ea   :  { %11339 = vmatprep.subr.bf16.mxu0 %v15407_v55 }
 0x9ed   :  { %11341 = vmatpush3.bf16.msra.mxu0 %v13558_v12 }
 0x9ee   :  { %11342 = vmatprep.subr.bf16.mxu0 %v15407_v55 }
 0x9f1   :  { %11344 = vmatpush3.bf16.msra.mxu0 %v13572_v25 }
 0x9f2   :  { %v12830_v31 = vpop.eup %12829  ;;  %11370 = vmatprep.subr.bf16.mxu0 %v15498_v35 }
 0x9f3   :  { %v12832_v20 = vpop.eup %12831  ;;  %9550 = vmatmul.mubr.f32.vlgmr.msra.gmra.mrb[28].mxu1 %v12830_v31  ;;  %v15509_v31 = vld [vmem:[#allocation39_spill] sm:$0xff] }
 0x9f4   :  { %9515 = vmatmul.mubr.f32.vlgmr.msra.gmra.mrb[22].mxu0 %v12832_v20  ;;  %11403 = vmatpush3.bf16.msra.mxu1 %v15499_v28  ;;  %v15510_v20 = vld [vmem:[#allocation40_spill] sm:$0xff] }
 0x9f5   :  { %11404 = vmatprep.subr.bf16.mxu1 %v15407_v55  ;;  %11372 = vmatpush3.bf16.msra.mxu0 %v15500_v7 }
 0x9f6   :  { %11374 = vmatprep.subr.bf16.mxu0 %v15501_v45  ;;  %9584 = vmatprep.mubr.msk.f32.mxu1 %vm12984_vm1, %v15409_v61 }
 0x9f8   :  { %11406 = vmatpush3.bf16.msra.mxu1 %v15502_v54  ;;  %v15511_v54 = vld [vmem:[#allocation41_spill] sm:$0xff] }
 0x9f9   :  { %11407 = vmatprep.subr.bf16.mxu1 %v15407_v55  ;;  %11376 = vmatpush3.bf16.msra.mxu0 %v15503_v32  ;;  %v15514_v32 = vld [vmem:[#allocation43_spill] sm:$0xff] }
 0x9fa   :  { %11378 = vmatprep.subr.bf16.mxu0 %v15504_v49  ;;  %v15512_v49 = vld [vmem:[#allocation42_spill] sm:$0xff] }
 0x9fc   :  { %11409 = vmatpush3.bf16.msra.mxu1 %v15505_v60  ;;  %v15513_v60 = vld [vmem:[#allocation44_spill] sm:$0xff] }
 0x9fd   :  { %11410 = vmatprep.subr.bf16.mxu1 %v15407_v55  ;;  %11380 = vmatpush3.bf16.msra.mxu0 %v15506_v36  ;;  %v15517_v36 = vld [vmem:[#allocation45_spill] sm:$0xff] }
 0x9fe   :  { %11382 = vmatprep.subr.bf16.mxu0 %v15507_v38  ;;  %v15515_v38 = vld [vmem:[#allocation46_spill] sm:$0xff] }
 0xa00   :  { %11412 = vmatpush3.bf16.msra.mxu1 %v15508_v59  ;;  %v15516_v59 = vld [vmem:[#allocation47_spill] sm:$0xff] }
 0xa01   :  { %11413 = vmatprep.subr.bf16.mxu1 %v15407_v55  ;;  %11384 = vmatpush3.bf16.msra.mxu0 %v15509_v31  ;;  %v15520_v31 = vld [vmem:[#allocation48_spill] sm:$0xff] }
 0xa02   :  { %11386 = vmatprep.subr.bf16.mxu0 %v15510_v20  ;;  %v15518_v20 = vld [vmem:[#allocation49_spill] sm:$0xff] }
 0xa04   :  { %11415 = vmatpush3.bf16.msra.mxu1 %v15511_v54  ;;  %v15519_v54 = vld [vmem:[#allocation50_spill] sm:$0xff] }
 0xa05   :  { %11416 = vmatprep.subr.bf16.mxu1 %v15407_v55  ;;  %11388 = vmatpush3.bf16.msra.mxu0 %v15512_v49  ;;  %v15521_v49 = vld [vmem:[#allocation51_spill] sm:$0xff] }
 0xa06   :  { %11390 = vmatprep.subr.bf16.mxu0 %v15513_v60 }
 0xa08   :  { %11418 = vmatpush3.bf16.msra.mxu1 %v15514_v32  ;;  %v15522_v32 = vld [vmem:[#allocation4_spill] sm:$0xff] }
 0xa09   :  { %11419 = vmatprep.subr.bf16.mxu1 %v15407_v55  ;;  %11392 = vmatpush3.bf16.msra.mxu0 %v15515_v38 }
 0xa0a   :  { %11394 = vmatprep.subr.bf16.mxu0 %v15516_v59 }
 0xa0c   :  { %11421 = vmatpush3.bf16.msra.mxu1 %v15517_v36 }
 0xa0d   :  { %11422 = vmatprep.subr.bf16.mxu1 %v15407_v55  ;;  %11396 = vmatpush3.bf16.msra.mxu0 %v15518_v20 }
 0xa0e   :  { %11398 = vmatprep.subr.bf16.mxu0 %v15519_v54 }
 0xa10   :  { %11424 = vmatpush3.bf16.msra.mxu1 %v15520_v31 }
 0xa11   :  { %11400 = vmatpush3.bf16.msra.mxu0 %v15521_v49  ;;  %11524 = vmatprep.subr.bf16.mxu1 %v15407_v55 }
 0xa12   :  { %11426 = vmatprep.subr.bf16.mxu0 %v15522_v32 }
 0xa87   :  { %v2611_v60 = vpop.f32.mrb[18].mxu0 }
 0xa88   :  { %12833 = vrcp.f32 %v2611_v60  ;;  %v9446_v38 = vpop.f32.mrb[19].mxu0 }
 0xa92   :  { %v12834_v59 = vpop.eup %12833 }
 0xa93   :  { %v2616_v45 = vmul.f32 %v12834_v59, %v2611_v60 }
 0xa95   :  { %v2617_v36 = vsub.f32 2.0, %v2616_v45 }
 0xa97   :  { %v2618_v7 = vmul.f32 %v12834_v59, %v2617_v36 }
 0xa99   :  { %2621 = vperm.xlu0 %12771, %v2618_v7  }
 0xaa7   :  { %v2696_v28 = vpop.f32.mrb[20].mxu0 }
 0xaa8   :  { %v9481_v20 = vpop.f32.mrb[21].mxu0  ;;  %12835 = vrcp.f32 %v2696_v28 }
 0xab2   :  { %v12836_v57 = vpop.eup %12835 }
 0xab3   :  { %v2701_v41 = vmul.f32 %v12836_v57, %v2696_v28 }
 0xab5   :  { %v2702_v36 = vsub.f32 2.0, %v2701_v41 }
 0xab7   :  { %v2703_v59 = vmul.f32 %v12836_v57, %v2702_v36 }
 0xac6   :  { %v2866_v54 = vpop.f32.mrb[28].mxu1 }
 0xac7   :  { %12837 = vrcp.f32 %v2866_v54  ;;  %v2781_v31 = vpop.f32.mrb[22].mxu0  ;;  %v9551_v35 = vpop.f32.mrb[29].mxu1 }
 0xac8   :  { %12839 = vrcp.f32 %v2781_v31  ;;  %v9516_v49 = vpop.f32.mrb[23].mxu0  ;;  %v12693_v35 = vadd.f32 %v14182_v4, %v15476_v47 }
 0xaca   :  { %12841 = vtanh.f32 %v12693_v35 }
 0xad1   :  { %v12838_v1 = vpop.eup %12837 }
 0xad2   :  { %v12840_v32 = vpop.eup %12839  ;;  %v2871_v21 = vmul.f32 %v12838_v1, %v2866_v54 }
 0xad3   :  { %v2786_v38 = vmul.f32 %v12840_v32, %v2781_v31 }
 0xad4   :  { %v2872_v14 = vsub.f32 2.0, %v2871_v21 }
 0xad5   :  { %v2787_v2 = vsub.f32 2.0, %v2786_v38 }
 0xad6   :  { %v2873_v45 = vmul.f32 %v12838_v1, %v2872_v14 }
 0xad7   :  { %v2788_v7 = vmul.f32 %v12840_v32, %v2787_v2  ;;  %v12842_v2 = vpop.eup %12841 }
 0xad8   :  { %2876 = vperm.xlu0 %12771, %v2873_v45  }
 0xad9   :  { %2791 = vperm.xlu1 %12772, %v2788_v7  }
 0xadd   :  { %2706 = vperm.xlu1 %12772, %v2703_v59  }
 0xb18   :  { %v2622_v49 = vpop.permute.xlu0 %2621 }
 0xb19   :  { %v2624_v29 = vmul.f32 %v2622_v49, %v2611_v60 }
 0xb1b   :  { %v2880_v38 = vsub.f32 1.0, %v2624_v29 }
 0xb57   :  { %v2877_v20 = vpop.permute.xlu0 %2876 }
 0xb58   :  { %v2792_v46 = vpop.permute.xlu1 %2791  ;;  %v2879_v3 = vmul.f32 %v2877_v20, %v2866_v54 }
 0xb59   :  { %v2794_v10 = vmul.f32 %v2792_v46, %v2781_v31 }
 0xb5b   :  { %v2881_v11 = vsub.f32 1.0, %v2794_v10 }
 0xb5c   :  { %v2707_v21 = vpop.permute.xlu1 %2706 }
 0xb5d   :  { %v2882_v14 = vmul.f32 %v2881_v11, %v2879_v3  ;;  %v2709_v1 = vmul.f32 %v2707_v21, %v2696_v28 }
 0xb5f   :  { %v2883_v41 = vsub.f32 %v2879_v3, %v2882_v14  ;;  %v2884_v32 = vsub.f32 %v2881_v11, %v2882_v14  ;;  %v2889_v57 = vmul.f32 %v12842_v2, %v2882_v14  ;;  %v2885_v45 = vmul.f32 %v2880_v38, %v2709_v1 }
 0xb61   :  { %v2896_v36 = vmul.f32 %v12842_v2, %v2884_v32  ;;  %v2886_v7 = vsub.f32 %v2709_v1, %v2885_v45  ;;  %v2887_v4 = vsub.f32 %v2880_v38, %v2885_v45  ;;  %v2888_v59 = vmul.f32 %v2885_v45, %v14126_v44  ;;  %v15523_v45 = vld [vmem:[#allocation6_spill] sm:$0xff] }
 0xb62   :  { %v2892_v35 = vmul.f32 %v12842_v2, %v2883_v41  ;;  %v14326_v2 = vld [vmem:[%s15282_s5] ss:$0 sm:$0xff] }
 0xb63   :  { %v2891_v60 = vmul.f32 %v2886_v7, %v14126_v44  ;;  %v2895_v46 = vmul.f32 %v2887_v4, %v14126_v44  ;;  %v2890_v10 = vadd.f32 %v2889_v57, %v2888_v59  ;;  %v7781_v44 = vld [vmem:[%s15277_s0 + $0x18] sm:$0xff]  ;;  %v15525_v7 = vld [vmem:[#allocation8_spill] sm:$0xff]  ;;  %v15526_v4 = vld [vmem:[#allocation9_spill] sm:$0xff] }
 0xb64   :  { %v15527_v59 = vld [vmem:[#allocation10_spill] sm:$0xff] }
 0xb65   :  { %12843 = vtanh.f32 %v2890_v10  ;;  %9585 = vmatmul.mubr.f32.vlgmr.msra.gmra.mrb[30].mxu1 %v2890_v10  ;;  %v2893_v29 = vadd.f32 %v2892_v35, %v2891_v60  ;;  %v2897_v28 = vadd.f32 %v2896_v36, %v2895_v46  ;;  %v15524_v36 = vld [vmem:[#allocation7_spill] sm:$0xff]  ;;  %v15528_v35 = vld [vmem:[#allocation12_spill] sm:$0xff]  ;;  %v15529_v60 = vld [vmem:[#allocation13_spill] sm:$0xff] }
 0xb66   :  { %11526 = vmatpush3.bf16.msra.mxu1 %v13472_v23  ;;  %9661 = vmatprep.mubr.msk.f32.mxu1 %vm12984_vm1, %v15409_v61  ;;  %v15530_v46 = vld [vmem:[#allocation15_spill] sm:$0xff] }
 0xb67   :  { %v2894_v11 = vadd.f32 %v2893_v29, %v2890_v10  ;;  %v2898_v3 = vadd.f32 %v2897_v28, %v2890_v10  ;;  %11527 = vmatprep.subr.bf16.mxu1 %v15407_v55  ;;  %v15531_v10 = vld [vmem:[#allocation16_spill] sm:$0xff]  ;;  %v15532_v29 = vld [vmem:[#allocation11_spill] sm:$0xff]  ;;  %v15533_v28 = vld [vmem:[#allocation14_spill] sm:$0xff] }
 0xb69   :  { %12845 = vtanh.f32 %v2894_v11  ;;  %2970 = vmatprep.mubr.f32.mxu0 %v2894_v11  ;;  %v15534_v11 = vld [vmem:[#allocation17_spill] sm:$0xff] }
 0xb6a   :  { %12847 = vtanh.f32 %v2898_v3  ;;  %2971 = vmatmul.mubr.f32.vlgmr.msra.gmra.mrb[24].mxu0 %v2898_v3  ;;  %11529 = vmatpush3.bf16.msra.mxu1 %v13478_v27  ;;  %v15535_v3 = vld [vmem:[#allocation18_spill] sm:$0xff] }
 0xb6b   :  { %11428 = vmatpush1.bf16.msra.mxu0 %v13050_v9  ;;  %3116 = vmatprep.mubr.f32.mxu0 %v15409_v61 }
 0xb6c   :  { %11430 = vmatprep.subr.bf16.mxu0 %v13075_v17  ;;  %11530 = vmatprep.subr.bf16.mxu1 %v15407_v55 }
 0xb6e   :  { %7782 = vmatmul.mubr.msk.f32.vlgmr.msra.gmra.mrb[26].mxu0 %vm223_vm0, %v7781_v44  ;;  %11532 = vmatpush3.bf16.msra.mxu1 %v13490_v37 }
 0xb6f   :  { %v12844_v54 = vpop.eup %12843  ;;  %11432 = vmatpush1.bf16.msra.mxu0 %v13089_v22  ;;  %3187 = vmatprep.mubr.f32.mxu0 %v15409_v61 }
 0xb70   :  { %7780 = vst [vmem:[%s15281_s7 + $0x40] sm:$0xff] %v12844_v54  ;;  %11433 = vmatprep.subr.bf16.mxu0 %v15407_v55  ;;  %11533 = vmatprep.subr.bf16.mxu1 %v15407_v55  ;;  %v15537_v54 = vld [vmem:[#allocation20_spill] sm:$0xff] }
 0xb72   :  { %7783 = vmatmul.mubr.msk.f32.vlgmr.msra.gmra.mrb[28].mxu0 %vm223_vm0, %v7781_v44  ;;  %11535 = vmatpush3.bf16.msra.mxu1 %v13502_v53 }
 0xb73   :  { %v12846_v31 = vpop.eup %12845  ;;  %11435 = vmatpush3.bf16.msra.mxu0 %v13127_v34  ;;  %9591 = vmatprep.mubr.msk.f32.mxu0 %vm12984_vm1, %v15409_v61 }
 0xb74   :  { %v12848_v49 = vpop.eup %12847  ;;  %7779 = vst [vmem:[%s15281_s7 + $0x38] sm:$0xff] %v12846_v31  ;;  %11437 = vmatprep.subr.bf16.mxu0 %v13048_v8  ;;  %11536 = vmatprep.subr.bf16.mxu1 %v15407_v55  ;;  %v15538_v31 = vld [vmem:[#allocation21_spill] sm:$0xff] }
 0xb75   :  { %7778 = vst [vmem:[%s15281_s7 + $0x30] sm:$0xff] %v12848_v49  ;;  %v15539_v49 = vld [vmem:[#allocation22_spill] sm:$0xff] }
 0xb76   :  { %9592 = vmatmul.mubr.msk.f32.vlgmr.msra.gmra.mrb[30].mxu0 %vm223_vm0, %v7781_v44  ;;  %11538 = vmatpush3.bf16.msra.mxu1 %v13514_v58  ;;  %v15536_v44 = vld [vmem:[#allocation19_spill] sm:$0xff] }
 0xb77   :  { %11439 = vmatpush1.bf16.msra.mxu0 %v13062_v13  ;;  %3328 = vmatprep.mubr.f32.mxu0 %v15409_v61 }
 0xb78   :  { %11441 = vmatprep.subr.bf16.mxu0 %v13077_v18  ;;  %11539 = vmatprep.subr.bf16.mxu1 %v15407_v55 }
 0xb7a   :  { %11541 = vmatpush3.bf16.msra.mxu1 %v13546_v5 }
 0xb7b   :  { %11443 = vmatpush1.bf16.msra.mxu0 %v13102_v26  ;;  %11542 = vmatprep.subr.bf16.mxu1 %v15407_v55 }
 0xb7c   :  { %11445 = vmatprep.subr.bf16.mxu0 %v13114_v30 }
 0xb7e   :  { %11544 = vmatpush3.bf16.msra.mxu1 %v13558_v12 }
 0xb7f   :  { %11447 = vmatpush1.bf16.msra.mxu0 %v13140_v39  ;;  %11545 = vmatprep.subr.bf16.mxu1 %v15407_v55 }
 0xb80   :  { %11449 = vmatprep.subr.bf16.mxu0 %v13151_v43 }
 0xb82   :  { %11547 = vmatpush3.bf16.msra.mxu1 %v13572_v25 }
 0xb83   :  { %11451 = vmatpush1.bf16.msra.mxu0 %v13179_v51  ;;  %11548 = vmatprep.subr.bf16.mxu1 %v15407_v55 }
 0xb84   :  { %11453 = vmatprep.subr.bf16.mxu0 %v13193_v56 }
 0xb87   :  { %11455 = vmatpush1.bf16.msra.mxu0 %v13217_v63 }
 0xb88   :  { %11457 = vmatprep.subr.bf16.mxu0 %v13231_v6 }
 0xb8b   :  { %11459 = vmatpush1.bf16.msra.mxu0 %v13253_v16 }
 0xb8c   :  { %11461 = vmatprep.subr.bf16.mxu0 %v13267_v24 }
 0xb8f   :  { %11463 = vmatpush1.bf16.msra.mxu0 %v13289_v33 }
 0xb90   :  { %11465 = vmatprep.subr.bf16.mxu0 %v13303_v42 }
 0xb93   :  { %11467 = vmatpush1.bf16.msra.mxu0 %v13319_v48 }
 0xb94   :  { %11469 = vmatprep.subr.bf16.mxu0 %v13142_v40 }
 0xc38   :  { %v3042_v20 = vpop.f32.mrb[30].mxu1 }
 0xc39   :  { %v9586_v21 = vpop.f32.mrb[31].mxu1 }
 0xc3d   :  { %v8216_v38 = vpop.f32.mrb[24].mxu0 }
 0xc3e   :  { %v8217_v14 = vpop.f32.mrb[25].mxu0 }
 0xc3f   :  { %v8218_v1 = vadd.f32 %v8217_v14, %v8216_v38  ;;  %v15540_v38 = vld [vmem:[#allocation24_spill] sm:$0xff] }
 0xc41   :  { %v2973_v41 = vadd.f32 %v14326_v2, %v8218_v1 }
 0xc43   :  { %v14329_v32 = vadd.f32 %v3042_v20, %v2973_v41  ;;  %v15541_v41 = vld [vmem:[#allocation25_spill] sm:$0xff] }
 0xc45   :  { %12849 = vtanh.f32 %v14329_v32 }
 0xc4f   :  { %v12850_v57 = vpop.eup %12849 }
 0xc50   :  { %3329 = vmatmul.mubr.f32.vlgmr.msra.gmra.mrb[26].mxu0 %v12850_v57 }
 0xc51   :  { %11471 = vmatpush1.bf16.msra.mxu0 %v13175_v50  ;;  %3399 = vmatprep.mubr.f32.mxu0 %v15409_v61 }
 0xc52   :  { %11473 = vmatprep.subr.bf16.mxu0 %v13181_v52 }
 0xc55   :  { %11475 = vmatpush1.bf16.msra.mxu0 %v13212_v62 }
 0xc56   :  { %11477 = vmatprep.subr.bf16.mxu0 %v13219_v0 }
 0xc59   :  { %11479 = vmatpush1.bf16.msra.mxu0 %v13249_v15 }
 0xc5a   :  { %11481 = vmatprep.subr.bf16.mxu0 %v13255_v19 }
 0xc5d   :  { %11483 = vmatpush1.bf16.msra.mxu0 %v15523_v45 }
 0xc5e   :  { %11485 = vmatprep.subr.bf16.mxu0 %v15524_v36 }
 0xc61   :  { %11487 = vmatpush1.bf16.msra.mxu0 %v15525_v7 }
 0xc62   :  { %11489 = vmatprep.subr.bf16.mxu0 %v15526_v4 }
 0xc65   :  { %11491 = vmatpush1.bf16.msra.mxu0 %v15527_v59 }
 0xc66   :  { %11493 = vmatprep.subr.bf16.mxu0 %v15528_v35 }
 0xc69   :  { %11495 = vmatpush1.bf16.msra.mxu0 %v15529_v60 }
 0xc6a   :  { %11497 = vmatprep.subr.bf16.mxu0 %v15530_v46 }
 0xc6d   :  { %11499 = vmatpush1.bf16.msra.mxu0 %v15531_v10 }
 0xc6e   :  { %11500 = vmatprep.subr.bf16.mxu0 %v15407_v55 }
 0xc70   :  { %3400 = vmatmul.mubr.f32.vlgmr.msra.gmra.mrb[28].mxu0 %v12850_v57 }
 0xc71   :  { %11502 = vmatpush3.bf16.msra.mxu0 %v15532_v29  ;;  %9626 = vmatprep.mubr.msk.f32.mxu0 %vm12984_vm1, %v15409_v61 }
 0xc72   :  { %11503 = vmatprep.subr.bf16.mxu0 %v15407_v55 }
 0xc75   :  { %11505 = vmatpush3.bf16.msra.mxu0 %v15533_v28 }
 0xc76   :  { %11506 = vmatprep.subr.bf16.mxu0 %v15407_v55 }
 0xc79   :  { %11508 = vmatpush3.bf16.msra.mxu0 %v15534_v11 }
 0xc7a   :  { %11509 = vmatprep.subr.bf16.mxu0 %v15407_v55 }
 0xc7d   :  { %11511 = vmatpush3.bf16.msra.mxu0 %v15535_v3  ;;  %v15543_v3 = vld [vmem:[#allocation27_spill] sm:$0xff] }
 0xc7e   :  { %11512 = vmatprep.subr.bf16.mxu0 %v15407_v55 }
 0xc81   :  { %11514 = vmatpush3.bf16.msra.mxu0 %v15536_v44 }
 0xc82   :  { %11515 = vmatprep.subr.bf16.mxu0 %v15407_v55 }
 0xc85   :  { %11517 = vmatpush3.bf16.msra.mxu0 %v15537_v54 }
 0xc86   :  { %11518 = vmatprep.subr.bf16.mxu0 %v15407_v55 }
 0xc89   :  { %11520 = vmatpush3.bf16.msra.mxu0 %v15538_v31  ;;  %v15542_v31 = vld [vmem:[#allocation26_spill] sm:$0xff] }
 0xc8a   :  { %11521 = vmatprep.subr.bf16.mxu0 %v15407_v55 }
 0xc8d   :  { %11523 = vmatpush3.bf16.msra.mxu0 %v15539_v49 }
 0xc8e   :  { %11596 = vmatprep.subr.bf16.mxu0 %v15407_v55 }
 0xc90   :  { %9627 = vmatmul.mubr.f32.vlgmr.msra.gmra.mrb[30].mxu0 %v12850_v57 }
 0xc91   :  { %11598 = vmatpush3.bf16.msra.mxu0 %v13472_v23  ;;  %9766 = vmatprep.mubr.msk.f32.mxu0 %vm12984_vm1, %v15409_v61 }
 0xc92   :  { %11599 = vmatprep.subr.bf16.mxu0 %v15407_v55 }
 0xc95   :  { %11601 = vmatpush3.bf16.msra.mxu0 %v13478_v27 }
 0xc96   :  { %11602 = vmatprep.subr.bf16.mxu0 %v15407_v55 }
 0xc99   :  { %11604 = vmatpush3.bf16.msra.mxu0 %v13490_v37 }
 0xc9a   :  { %11605 = vmatprep.subr.bf16.mxu0 %v15407_v55 }
 0xc9d   :  { %11607 = vmatpush3.bf16.msra.mxu0 %v13502_v53 }
 0xc9e   :  { %11608 = vmatprep.subr.bf16.mxu0 %v15407_v55 }
 0xca1   :  { %11610 = vmatpush3.bf16.msra.mxu0 %v13514_v58 }
 0xca2   :  { %11611 = vmatprep.subr.bf16.mxu0 %v15407_v55 }
 0xca5   :  { %11613 = vmatpush3.bf16.msra.mxu0 %v13546_v5 }
 0xca6   :  { %11614 = vmatprep.subr.bf16.mxu0 %v15407_v55 }
 0xca9   :  { %11616 = vmatpush3.bf16.msra.mxu0 %v13558_v12 }
 0xcaa   :  { %11617 = vmatprep.subr.bf16.mxu0 %v15407_v55 }
 0xcad   :  { %11619 = vmatpush3.bf16.msra.mxu0 %v13572_v25 }
 0xcae   :  { %11652 = vmatprep.subr.bf16.mxu0 %v15407_v55 }
 0xd23   :  { %v14385_v20 = vpop.f32.mrb[26].mxu0 }
 0xd24   :  { %v3332_v21 = vpop.f32.mrb[27].mxu0 }
 0xd25   :  { %v12699_v14 = vadd.f32 %v3332_v21, %v15540_v38 }
 0xd27   :  { %3482 = vmax.xlane.f32.xlu1 %v12699_v14 }
 0xd43   :  { %v3401_v1 = vpop.f32.mrb[28].mxu0 }
 0xd44   :  { %v12700_v57 = vadd.f32 %v3401_v1, %v15541_v41  ;;  %v3403_v49 = vpop.f32.mrb[29].mxu0 }
 0xd45   :  { %v12701_v54 = vadd.f32 %v3403_v49, %v15542_v31 }
 0xd46   :  { %3567 = vmax.xlane.f32.xlu0 %v12700_v57 }
 0xd4a   :  { %3652 = vmax.xlane.f32.xlu0 %v12701_v54 }
 0xd63   :  { %v3472_v44 = vpop.f32.mrb[30].mxu0 }
 0xd64   :  { %v12702_v11 = vadd.f32 %v3472_v44, %v15543_v3  ;;  %v9628_v28 = vpop.f32.mrb[31].mxu0 }
 0xd66   :  { %3737 = vmax.xlane.f32.xlu1 %v12702_v11 }
 0xdb4   :  { %v3483_v29 = vpop.xlane.xlu1 %3482 }
 0xdb5   :  { %v3484_v10 = vsub.f32 %v12699_v14, %v3483_v29 }
 0xdb7   :  { %v3485_v46 = vmul.f32 1.442695, %v3484_v10 }
 0xdb9   :  { %12851 = vpow2.f32 %v3485_v46 }
 0xdc3   :  { %v12852_v60 = vpop.eup %12851 }
 0xdc4   :  { %9662 = vmatmul.mubr.f32.vlgmr.msra.gmra.mrb[32].mxu1 %v12852_v60 }
 0xdc5   :  { %11550 = vmatpush3.bf16.msra.mxu1 %v13472_v23  ;;  %9696 = vmatprep.mubr.msk.f32.mxu1 %vm12984_vm1, %v15409_v61 }
 0xdc6   :  { %11551 = vmatprep.subr.bf16.mxu1 %v15407_v55 }
 0xdc9   :  { %11553 = vmatpush3.bf16.msra.mxu1 %v13478_v27 }
 0xdca   :  { %11554 = vmatprep.subr.bf16.mxu1 %v15407_v55 }
 0xdcd   :  { %11556 = vmatpush3.bf16.msra.mxu1 %v13490_v37 }
 0xdce   :  { %11557 = vmatprep.subr.bf16.mxu1 %v15407_v55 }
 0xdd1   :  { %11559 = vmatpush3.bf16.msra.mxu1 %v13502_v53 }
 0xdd2   :  { %11560 = vmatprep.subr.bf16.mxu1 %v15407_v55 }
 0xdd3   :  { %v3568_v60 = vpop.xlane.xlu0 %3567 }
 0xdd4   :  { %v3569_v46 = vsub.f32 %v12700_v57, %v3568_v60  ;;  %v15545_v60 = vld [vmem:[#allocation28_spill] sm:$0xff] }
 0xdd5   :  { %11562 = vmatpush3.bf16.msra.mxu1 %v13514_v58 }
 0xdd6   :  { %v3570_v10 = vmul.f32 1.442695, %v3569_v46  ;;  %11563 = vmatprep.subr.bf16.mxu1 %v15407_v55  ;;  %v15546_v46 = vld [vmem:[#allocation31_spill] sm:$0xff] }
 0xdd7   :  { %v3653_v28 = vpop.xlane.xlu0 %3652 }
 0xdd8   :  { %12853 = vpow2.f32 %v3570_v10  ;;  %v3654_v44 = vsub.f32 %v12701_v54, %v3653_v28  ;;  %v15547_v10 = vld [vmem:[#allocation32_spill] sm:$0xff]  ;;  %v15549_v28 = vld [vmem:[#allocation33_spill] sm:$0xff] }
 0xdd9   :  { %11565 = vmatpush3.bf16.msra.mxu1 %v13546_v5 }
 0xdda   :  { %11566 = vmatprep.subr.bf16.mxu1 %v15407_v55  ;;  %v3655_v14 = vmul.f32 1.442695, %v3654_v44  ;;  %v15550_v44 = vld [vmem:[#allocation34_spill] sm:$0xff] }
 0xddd   :  { %11568 = vmatpush3.bf16.msra.mxu1 %v13558_v12 }
 0xdde   :  { %11569 = vmatprep.subr.bf16.mxu1 %v15407_v55 }
 0xde1   :  { %11571 = vmatpush3.bf16.msra.mxu1 %v13572_v25 }
 0xde2   :  { %v12854_v29 = vpop.eup %12853  ;;  %11572 = vmatprep.subr.bf16.mxu1 %v15407_v55 }
 0xde4   :  { %9697 = vmatmul.mubr.f32.vlgmr.msra.gmra.mrb[34].mxu1 %v12854_v29  ;;  %v15548_v29 = vld [vmem:[#allocation30_spill] sm:$0xff] }
 0xde5   :  { %11574 = vmatpush3.bf16.msra.mxu1 %v13472_v23  ;;  %9731 = vmatprep.mubr.msk.f32.mxu1 %vm12984_vm1, %v15409_v61 }
 0xde6   :  { %11575 = vmatprep.subr.bf16.mxu1 %v15407_v55 }
 0xde9   :  { %11577 = vmatpush3.bf16.msra.mxu1 %v13478_v27 }
 0xdea   :  { %11578 = vmatprep.subr.bf16.mxu1 %v15407_v55 }
 0xded   :  { %11580 = vmatpush3.bf16.msra.mxu1 %v13490_v37 }
 0xdee   :  { %11581 = vmatprep.subr.bf16.mxu1 %v15407_v55 }
 0xdf1   :  { %11583 = vmatpush3.bf16.msra.mxu1 %v13502_v53 }
 0xdf2   :  { %11584 = vmatprep.subr.bf16.mxu1 %v15407_v55 }
 0xdf3   :  { %v3738_v49 = vpop.xlane.xlu1 %3737 }
 0xdf4   :  { %v3739_v21 = vsub.f32 %v12702_v11, %v3738_v49  ;;  %v15544_v11 = vld [vmem:[#allocation29_spill] sm:$0xff]  ;;  %v15551_v49 = vld [vmem:[#allocation35_spill] sm:$0xff] }
 0xdf5   :  { %11586 = vmatpush3.bf16.msra.mxu1 %v13514_v58 }
 0xdf6   :  { %v3740_v1 = vmul.f32 1.442695, %v3739_v21  ;;  %11587 = vmatprep.subr.bf16.mxu1 %v15407_v55  ;;  %v15552_v21 = vld [vmem:[#allocation36_spill] sm:$0xff] }
 0xdf8   :  { %12855 = vpow2.f32 %v3740_v1  ;;  %v15554_v1 = vld [vmem:[#allocation38_spill] sm:$0xff] }
 0xdf9   :  { %12857 = vpow2.f32 %v3655_v14  ;;  %11589 = vmatpush3.bf16.msra.mxu1 %v13546_v5  ;;  %v15553_v14 = vld [vmem:[#allocation37_spill] sm:$0xff] }
 0xdfa   :  { %11590 = vmatprep.subr.bf16.mxu1 %v15407_v55 }
 0xdfd   :  { %11592 = vmatpush3.bf16.msra.mxu1 %v13558_v12 }
 0xdfe   :  { %11593 = vmatprep.subr.bf16.mxu1 %v15407_v55 }
 0xe01   :  { %11595 = vmatpush3.bf16.msra.mxu1 %v13572_v25 }
 0xe02   :  { %v12856_v54 = vpop.eup %12855  ;;  %11621 = vmatprep.subr.bf16.mxu1 %v15544_v11 }
 0xe03   :  { %v12858_v57 = vpop.eup %12857  ;;  %9767 = vmatmul.mubr.f32.vlgmr.msra.gmra.mrb[32].mxu0 %v12856_v54  ;;  %v15555_v54 = vld [vmem:[#allocation39_spill] sm:$0xff] }
 0xe04   :  { %9732 = vmatmul.mubr.f32.vlgmr.msra.gmra.mrb[36].mxu1 %v12858_v57  ;;  %11654 = vmatpush3.bf16.msra.mxu0 %v15545_v60  ;;  %v15556_v57 = vld [vmem:[#allocation40_spill] sm:$0xff] }
 0xe05   :  { %11655 = vmatprep.subr.bf16.mxu0 %v15407_v55  ;;  %11623 = vmatpush3.bf16.msra.mxu1 %v15546_v46 }
 0xe06   :  { %11625 = vmatprep.subr.bf16.mxu1 %v15547_v10  ;;  %9801 = vmatprep.mubr.msk.f32.mxu0 %vm12984_vm1, %v15409_v61 }
 0xe08   :  { %11657 = vmatpush3.bf16.msra.mxu0 %v15548_v29  ;;  %v15557_v29 = vld [vmem:[#allocation41_spill] sm:$0xff] }
 0xe09   :  { %11658 = vmatprep.subr.bf16.mxu0 %v15407_v55  ;;  %11627 = vmatpush3.bf16.msra.mxu1 %v15549_v28  ;;  %v15560_v28 = vld [vmem:[#allocation43_spill] sm:$0xff] }
 0xe0a   :  { %11629 = vmatprep.subr.bf16.mxu1 %v15550_v44  ;;  %v15558_v44 = vld [vmem:[#allocation42_spill] sm:$0xff] }
 0xe0c   :  { %11660 = vmatpush3.bf16.msra.mxu0 %v15551_v49  ;;  %v15559_v49 = vld [vmem:[#allocation44_spill] sm:$0xff] }
 0xe0d   :  { %11661 = vmatprep.subr.bf16.mxu0 %v15407_v55  ;;  %11631 = vmatpush3.bf16.msra.mxu1 %v15552_v21  ;;  %v15563_v21 = vld [vmem:[#allocation45_spill] sm:$0xff] }
 0xe0e   :  { %11633 = vmatprep.subr.bf16.mxu1 %v15553_v14  ;;  %v15561_v14 = vld [vmem:[#allocation46_spill] sm:$0xff] }
 0xe10   :  { %11663 = vmatpush3.bf16.msra.mxu0 %v15554_v1  ;;  %v15562_v1 = vld [vmem:[#allocation47_spill] sm:$0xff] }
 0xe11   :  { %11664 = vmatprep.subr.bf16.mxu0 %v15407_v55  ;;  %11635 = vmatpush3.bf16.msra.mxu1 %v15555_v54  ;;  %v15566_v54 = vld [vmem:[#allocation48_spill] sm:$0xff] }
 0xe12   :  { %11637 = vmatprep.subr.bf16.mxu1 %v15556_v57  ;;  %v15564_v57 = vld [vmem:[#allocation49_spill] sm:$0xff] }
 0xe14   :  { %11666 = vmatpush3.bf16.msra.mxu0 %v15557_v29  ;;  %v15565_v29 = vld [vmem:[#allocation50_spill] sm:$0xff] }
 0xe15   :  { %11667 = vmatprep.subr.bf16.mxu0 %v15407_v55  ;;  %11639 = vmatpush3.bf16.msra.mxu1 %v15558_v44  ;;  %v15567_v44 = vld [vmem:[#allocation51_spill] sm:$0xff] }
 0xe16   :  { %11641 = vmatprep.subr.bf16.mxu1 %v15559_v49 }
 0xe18   :  { %11669 = vmatpush3.bf16.msra.mxu0 %v15560_v28  ;;  %v15568_v28 = vld [vmem:[#allocation4_spill] sm:$0xff] }
 0xe19   :  { %11670 = vmatprep.subr.bf16.mxu0 %v15407_v55  ;;  %11643 = vmatpush3.bf16.msra.mxu1 %v15561_v14 }
 0xe1a   :  { %11645 = vmatprep.subr.bf16.mxu1 %v15562_v1 }
 0xe1c   :  { %11672 = vmatpush3.bf16.msra.mxu0 %v15563_v21 }
 0xe1d   :  { %11673 = vmatprep.subr.bf16.mxu0 %v15407_v55  ;;  %11647 = vmatpush3.bf16.msra.mxu1 %v15564_v57 }
 0xe1e   :  { %11649 = vmatprep.subr.bf16.mxu1 %v15565_v29 }
 0xe20   :  { %11675 = vmatpush3.bf16.msra.mxu0 %v15566_v54 }
 0xe21   :  { %11651 = vmatpush3.bf16.msra.mxu1 %v15567_v44  ;;  %11775 = vmatprep.subr.bf16.mxu0 %v15407_v55 }
 0xe22   :  { %11677 = vmatprep.subr.bf16.mxu1 %v15568_v28 }
 0xe97   :  { %v3553_v49 = vpop.f32.mrb[32].mxu1 }
 0xe98   :  { %12859 = vrcp.f32 %v3553_v49  ;;  %v9663_v14 = vpop.f32.mrb[33].mxu1 }
 0xea2   :  { %v12860_v1 = vpop.eup %12859 }
 0xea3   :  { %v3558_v10 = vmul.f32 %v12860_v1, %v3553_v49 }
 0xea5   :  { %v3559_v21 = vsub.f32 2.0, %v3558_v10 }
 0xea7   :  { %v3560_v46 = vmul.f32 %v12860_v1, %v3559_v21 }
 0xea9   :  { %3563 = vperm.xlu0 %12771, %v3560_v46  }
 0xeb7   :  { %v3638_v60 = vpop.f32.mrb[34].mxu1 }
 0xeb8   :  { %v9698_v57 = vpop.f32.mrb[35].mxu1  ;;  %12861 = vrcp.f32 %v3638_v60 }
 0xec2   :  { %v12862_v3 = vpop.eup %12861 }
 0xec3   :  { %v3643_v38 = vmul.f32 %v12862_v3, %v3638_v60 }
 0xec5   :  { %v3644_v21 = vsub.f32 2.0, %v3643_v38 }
 0xec7   :  { %v3645_v1 = vmul.f32 %v12862_v3, %v3644_v21 }
 0xed6   :  { %v3808_v29 = vpop.f32.mrb[32].mxu0 }
 0xed7   :  { %12863 = vrcp.f32 %v3808_v29  ;;  %v3723_v54 = vpop.f32.mrb[36].mxu1  ;;  %v9768_v11 = vpop.f32.mrb[33].mxu0 }
 0xed8   :  { %12865 = vrcp.f32 %v3723_v54  ;;  %v9733_v44 = vpop.f32.mrb[37].mxu1  ;;  %v12698_v11 = vadd.f32 %v14385_v20, %v15476_v47 }
 0xeda   :  { %12867 = vtanh.f32 %v12698_v11 }
 0xee1   :  { %v12864_v31 = vpop.eup %12863 }
 0xee2   :  { %v12866_v28 = vpop.eup %12865  ;;  %v3813_v41 = vmul.f32 %v12864_v31, %v3808_v29 }
 0xee3   :  { %v3728_v14 = vmul.f32 %v12866_v28, %v3723_v54 }
 0xee4   :  { %v3814_v35 = vsub.f32 2.0, %v3813_v41 }
 0xee5   :  { %v3729_v59 = vsub.f32 2.0, %v3728_v14 }
 0xee6   :  { %v3815_v10 = vmul.f32 %v12864_v31, %v3814_v35 }
 0xee7   :  { %v3730_v46 = vmul.f32 %v12866_v28, %v3729_v59  ;;  %v12868_v59 = vpop.eup %12867 }
 0xee8   :  { %3818 = vperm.xlu0 %12771, %v3815_v10  }
 0xee9   :  { %3733 = vperm.xlu1 %12772, %v3730_v46  }
 0xeed   :  { %3648 = vperm.xlu1 %12772, %v3645_v1  }
 0xf28   :  { %v3564_v44 = vpop.permute.xlu0 %3563 }
 0xf29   :  { %v3566_v7 = vmul.f32 %v3564_v44, %v3553_v49 }
 0xf2b   :  { %v3822_v14 = vsub.f32 1.0, %v3566_v7 }
 0xf67   :  { %v3819_v57 = vpop.permute.xlu0 %3818 }
 0xf68   :  { %v3734_v4 = vpop.permute.xlu1 %3733  ;;  %v3821_v45 = vmul.f32 %v3819_v57, %v3808_v29 }
 0xf69   :  { %v3736_v36 = vmul.f32 %v3734_v4, %v3723_v54 }
 0xf6b   :  { %v3823_v19 = vsub.f32 1.0, %v3736_v36 }
 0xf6c   :  { %v3649_v41 = vpop.permute.xlu1 %3648 }
 0xf6d   :  { %v3824_v35 = vmul.f32 %v3823_v19, %v3821_v45  ;;  %v3651_v31 = vmul.f32 %v3649_v41, %v3638_v60 }
 0xf6f   :  { %v3825_v38 = vsub.f32 %v3821_v45, %v3824_v35  ;;  %v3826_v28 = vsub.f32 %v3823_v19, %v3824_v35  ;;  %v3831_v3 = vmul.f32 %v12868_v59, %v3824_v35  ;;  %v3827_v10 = vmul.f32 %v3822_v14, %v3651_v31 }
 0xf71   :  { %v3838_v21 = vmul.f32 %v12868_v59, %v3826_v28  ;;  %v3828_v46 = vsub.f32 %v3651_v31, %v3827_v10  ;;  %v3829_v20 = vsub.f32 %v3822_v14, %v3827_v10  ;;  %v3830_v1 = vmul.f32 %v3827_v10, %v14329_v32  ;;  %v15571_v10 = vld [vmem:[#allocation7_spill] sm:$0xff] }
 0xf72   :  { %v3834_v11 = vmul.f32 %v12868_v59, %v3825_v38 }
 0xf73   :  { %v3833_v49 = vmul.f32 %v3828_v46, %v14329_v32  ;;  %v3837_v4 = vmul.f32 %v3829_v20, %v14329_v32  ;;  %v3832_v36 = vadd.f32 %v3831_v3, %v3830_v1  ;;  %v7788_v32 = vld [vmem:[%s15277_s0 + $0x20] sm:$0xff]  ;;  %v15569_v3 = vld [vmem:[#allocation5_spill] sm:$0xff]  ;;  %v15574_v20 = vld [vmem:[#allocation10_spill] sm:$0xff] }
 0xf74   :  { %v15573_v46 = vld [vmem:[#allocation9_spill] sm:$0xff]  ;;  %v15575_v1 = vld [vmem:[#allocation12_spill] sm:$0xff] }
 0xf75   :  { %12869 = vtanh.f32 %v3832_v36  ;;  %9802 = vmatmul.mubr.f32.vlgmr.msra.gmra.mrb[34].mxu0 %v3832_v36  ;;  %v3835_v7 = vadd.f32 %v3834_v11, %v3833_v49  ;;  %v3839_v60 = vadd.f32 %v3838_v21, %v3837_v4  ;;  %v15572_v21 = vld [vmem:[#allocation8_spill] sm:$0xff]  ;;  %v15576_v11 = vld [vmem:[#allocation13_spill] sm:$0xff]  ;;  %v15577_v49 = vld [vmem:[#allocation15_spill] sm:$0xff] }
 0xf76   :  { %11777 = vmatpush3.bf16.msra.mxu0 %v13472_v23  ;;  %9878 = vmatprep.mubr.msk.f32.mxu0 %vm12984_vm1, %v15409_v61  ;;  %v15578_v4 = vld [vmem:[#allocation16_spill] sm:$0xff] }
 0xf77   :  { %v3836_v19 = vadd.f32 %v3835_v7, %v3832_v36  ;;  %v3840_v45 = vadd.f32 %v3839_v60, %v3832_v36  ;;  %11778 = vmatprep.subr.bf16.mxu0 %v15407_v55  ;;  %v15579_v36 = vld [vmem:[#allocation11_spill] sm:$0xff]  ;;  %v15580_v7 = vld [vmem:[#allocation14_spill] sm:$0xff]  ;;  %v15581_v60 = vld [vmem:[#allocation17_spill] sm:$0xff] }
 0xf79   :  { %12871 = vtanh.f32 %v3836_v19  ;;  %3912 = vmatprep.mubr.f32.mxu1 %v3836_v19  ;;  %v15582_v19 = vld [vmem:[#allocation18_spill] sm:$0xff] }
 0xf7a   :  { %12873 = vtanh.f32 %v3840_v45  ;;  %3913 = vmatmul.mubr.f32.vlgmr.msra.gmra.mrb[38].mxu1 %v3840_v45  ;;  %11780 = vmatpush3.bf16.msra.mxu0 %v13478_v27  ;;  %v15583_v45 = vld [vmem:[#allocation19_spill] sm:$0xff] }
 0xf7b   :  { %11679 = vmatpush1.bf16.msra.mxu1 %v13050_v9  ;;  %4058 = vmatprep.mubr.f32.mxu1 %v15409_v61 }
 0xf7c   :  { %11681 = vmatprep.subr.bf16.mxu1 %v13075_v17  ;;  %11781 = vmatprep.subr.bf16.mxu0 %v15407_v55 }
 0xf7e   :  { %7789 = vmatmul.mubr.msk.f32.vlgmr.msra.gmra.mrb[40].mxu1 %vm223_vm0, %v7788_v32  ;;  %11783 = vmatpush3.bf16.msra.mxu0 %v13490_v37 }
 0xf7f   :  { %v12870_v29 = vpop.eup %12869  ;;  %11683 = vmatpush1.bf16.msra.mxu1 %v13089_v22  ;;  %4129 = vmatprep.mubr.f32.mxu1 %v15409_v61 }
 0xf80   :  { %7787 = vst [vmem:[%s15281_s7 + $0x58] sm:$0xff] %v12870_v29  ;;  %11684 = vmatprep.subr.bf16.mxu1 %v15407_v55  ;;  %11784 = vmatprep.subr.bf16.mxu0 %v15407_v55  ;;  %v15585_v29 = vld [vmem:[#allocation21_spill] sm:$0xff] }
 0xf82   :  { %7790 = vmatmul.mubr.msk.f32.vlgmr.msra.gmra.mrb[42].mxu1 %vm223_vm0, %v7788_v32  ;;  %11786 = vmatpush3.bf16.msra.mxu0 %v13502_v53 }
 0xf83   :  { %v12872_v54 = vpop.eup %12871  ;;  %11686 = vmatpush3.bf16.msra.mxu1 %v13127_v34  ;;  %9808 = vmatprep.mubr.msk.f32.mxu1 %vm12984_vm1, %v15409_v61 }
 0xf84   :  { %v12874_v44 = vpop.eup %12873  ;;  %7786 = vst [vmem:[%s15281_s7 + $0x50] sm:$0xff] %v12872_v54  ;;  %11688 = vmatprep.subr.bf16.mxu1 %v13048_v8  ;;  %11787 = vmatprep.subr.bf16.mxu0 %v15407_v55  ;;  %v15586_v54 = vld [vmem:[#allocation22_spill] sm:$0xff] }
 0xf85   :  { %7785 = vst [vmem:[%s15281_s7 + $0x48] sm:$0xff] %v12874_v44 }
 0xf86   :  { %9809 = vmatmul.mubr.msk.f32.vlgmr.msra.gmra.mrb[44].mxu1 %vm223_vm0, %v7788_v32  ;;  %11789 = vmatpush3.bf16.msra.mxu0 %v13514_v58  ;;  %v15584_v32 = vld [vmem:[#allocation20_spill] sm:$0xff] }
 0xf87   :  { %11690 = vmatpush1.bf16.msra.mxu1 %v13062_v13  ;;  %4270 = vmatprep.mubr.f32.mxu1 %v15409_v61 }
 0xf88   :  { %11692 = vmatprep.subr.bf16.mxu1 %v13077_v18  ;;  %11790 = vmatprep.subr.bf16.mxu0 %v15407_v55 }
 0xf8a   :  { %11792 = vmatpush3.bf16.msra.mxu0 %v13546_v5 }
 0xf8b   :  { %11694 = vmatpush1.bf16.msra.mxu1 %v13102_v26  ;;  %11793 = vmatprep.subr.bf16.mxu0 %v15407_v55 }
 0xf8c   :  { %11696 = vmatprep.subr.bf16.mxu1 %v13114_v30 }
 0xf8e   :  { %11795 = vmatpush3.bf16.msra.mxu0 %v13558_v12 }
 0xf8f   :  { %11698 = vmatpush1.bf16.msra.mxu1 %v13140_v39  ;;  %11796 = vmatprep.subr.bf16.mxu0 %v15407_v55 }
 0xf90   :  { %11700 = vmatprep.subr.bf16.mxu1 %v13151_v43 }
 0xf92   :  { %11798 = vmatpush3.bf16.msra.mxu0 %v13572_v25 }
 0xf93   :  { %11702 = vmatpush1.bf16.msra.mxu1 %v13179_v51  ;;  %11799 = vmatprep.subr.bf16.mxu0 %v15407_v55 }
 0xf94   :  { %11704 = vmatprep.subr.bf16.mxu1 %v13193_v56 }
 0xf97   :  { %11706 = vmatpush1.bf16.msra.mxu1 %v13217_v63 }
 0xf98   :  { %11708 = vmatprep.subr.bf16.mxu1 %v13231_v6 }
 0xf9b   :  { %11710 = vmatpush1.bf16.msra.mxu1 %v13253_v16 }
 0xf9c   :  { %11712 = vmatprep.subr.bf16.mxu1 %v13267_v24 }
 0xf9f   :  { %11714 = vmatpush1.bf16.msra.mxu1 %v13289_v33 }
 0xfa0   :  { %11716 = vmatprep.subr.bf16.mxu1 %v13303_v42 }
 0xfa3   :  { %11718 = vmatpush1.bf16.msra.mxu1 %v13319_v48 }
 0xfa4   :  { %11720 = vmatprep.subr.bf16.mxu1 %v13142_v40 }
0x1048   :  { %v3984_v57 = vpop.f32.mrb[34].mxu0 }
0x1049   :  { %v9803_v41 = vpop.f32.mrb[35].mxu0 }
0x104a   :  { %v15587_v41 = vld [vmem:[#allocation24_spill] sm:$0xff] }
0x104d   :  { %v8356_v14 = vpop.f32.mrb[38].mxu1 }
0x104e   :  { %v8357_v35 = vpop.f32.mrb[39].mxu1 }
0x104f   :  { %v8358_v31 = vadd.f32 %v8357_v35, %v8356_v14 }
0x1051   :  { %v3915_v59 = vadd.f32 %v14326_v2, %v8358_v31  ;;  %v15570_v2 = vld [vmem:[#allocation6_spill] sm:$0xff]  ;;  %v15588_v31 = vld [vmem:[#allocation25_spill] sm:$0xff] }
0x1053   :  { %v14527_v38 = vadd.f32 %v3984_v57, %v3915_v59 }
0x1055   :  { %12875 = vtanh.f32 %v14527_v38 }
0x105f   :  { %v12876_v28 = vpop.eup %12875 }
0x1060   :  { %4271 = vmatmul.mubr.f32.vlgmr.msra.gmra.mrb[40].mxu1 %v12876_v28 }
0x1061   :  { %11722 = vmatpush1.bf16.msra.mxu1 %v13175_v50  ;;  %4341 = vmatprep.mubr.f32.mxu1 %v15409_v61 }
0x1062   :  { %11724 = vmatprep.subr.bf16.mxu1 %v13181_v52 }
0x1065   :  { %11726 = vmatpush1.bf16.msra.mxu1 %v13212_v62 }
0x1066   :  { %11728 = vmatprep.subr.bf16.mxu1 %v13219_v0 }
0x1069   :  { %11730 = vmatpush1.bf16.msra.mxu1 %v13249_v15 }
0x106a   :  { %11732 = vmatprep.subr.bf16.mxu1 %v15569_v3 }
0x106d   :  { %11734 = vmatpush1.bf16.msra.mxu1 %v15570_v2 }
0x106e   :  { %11736 = vmatprep.subr.bf16.mxu1 %v15571_v10 }
0x1071   :  { %11738 = vmatpush1.bf16.msra.mxu1 %v15572_v21 }
0x1072   :  { %11740 = vmatprep.subr.bf16.mxu1 %v15573_v46 }
0x1075   :  { %11742 = vmatpush1.bf16.msra.mxu1 %v15574_v20 }
0x1076   :  { %11744 = vmatprep.subr.bf16.mxu1 %v15575_v1 }
0x1079   :  { %11746 = vmatpush1.bf16.msra.mxu1 %v15576_v11 }
0x107a   :  { %11748 = vmatprep.subr.bf16.mxu1 %v15577_v49 }
0x107d   :  { %11750 = vmatpush1.bf16.msra.mxu1 %v15578_v4 }
0x107e   :  { %11751 = vmatprep.subr.bf16.mxu1 %v15407_v55 }
0x1080   :  { %4342 = vmatmul.mubr.f32.vlgmr.msra.gmra.mrb[42].mxu1 %v12876_v28 }
0x1081   :  { %11753 = vmatpush3.bf16.msra.mxu1 %v15579_v36  ;;  %9843 = vmatprep.mubr.msk.f32.mxu1 %vm12984_vm1, %v15409_v61 }
0x1082   :  { %11754 = vmatprep.subr.bf16.mxu1 %v15407_v55 }
0x1085   :  { %11756 = vmatpush3.bf16.msra.mxu1 %v15580_v7 }
0x1086   :  { %11757 = vmatprep.subr.bf16.mxu1 %v15407_v55 }
0x1089   :  { %11759 = vmatpush3.bf16.msra.mxu1 %v15581_v60 }
0x108a   :  { %11760 = vmatprep.subr.bf16.mxu1 %v15407_v55 }
0x108d   :  { %11762 = vmatpush3.bf16.msra.mxu1 %v15582_v19 }
0x108e   :  { %11763 = vmatprep.subr.bf16.mxu1 %v15407_v55 }
0x1091   :  { %11765 = vmatpush3.bf16.msra.mxu1 %v15583_v45  ;;  %v15590_v45 = vld [vmem:[#allocation27_spill] sm:$0xff] }
0x1092   :  { %11766 = vmatprep.subr.bf16.mxu1 %v15407_v55 }
0x1095   :  { %11768 = vmatpush3.bf16.msra.mxu1 %v15584_v32 }
0x1096   :  { %11769 = vmatprep.subr.bf16.mxu1 %v15407_v55 }
0x1099   :  { %11771 = vmatpush3.bf16.msra.mxu1 %v15585_v29 }
0x109a   :  { %11772 = vmatprep.subr.bf16.mxu1 %v15407_v55 }
0x109d   :  { %11774 = vmatpush3.bf16.msra.mxu1 %v15586_v54  ;;  %v15589_v54 = vld [vmem:[#allocation26_spill] sm:$0xff] }
0x109e   :  { %11847 = vmatprep.subr.bf16.mxu1 %v15407_v55 }
0x10a0   :  { %9844 = vmatmul.mubr.f32.vlgmr.msra.gmra.mrb[44].mxu1 %v12876_v28 }
0x10a1   :  { %11849 = vmatpush3.bf16.msra.mxu1 %v13472_v23  ;;  %9983 = vmatprep.mubr.msk.f32.mxu1 %vm12984_vm1, %v15409_v61 }
0x10a2   :  { %11850 = vmatprep.subr.bf16.mxu1 %v15407_v55 }
0x10a5   :  { %11852 = vmatpush3.bf16.msra.mxu1 %v13478_v27 }
0x10a6   :  { %11853 = vmatprep.subr.bf16.mxu1 %v15407_v55 }
0x10a9   :  { %11855 = vmatpush3.bf16.msra.mxu1 %v13490_v37 }
0x10aa   :  { %11856 = vmatprep.subr.bf16.mxu1 %v15407_v55 }
0x10ad   :  { %11858 = vmatpush3.bf16.msra.mxu1 %v13502_v53 }
0x10ae   :  { %11859 = vmatprep.subr.bf16.mxu1 %v15407_v55 }
0x10b1   :  { %11861 = vmatpush3.bf16.msra.mxu1 %v13514_v58 }
0x10b2   :  { %11862 = vmatprep.subr.bf16.mxu1 %v15407_v55 }
0x10b5   :  { %11864 = vmatpush3.bf16.msra.mxu1 %v13546_v5 }
0x10b6   :  { %11865 = vmatprep.subr.bf16.mxu1 %v15407_v55 }
0x10b9   :  { %11867 = vmatpush3.bf16.msra.mxu1 %v13558_v12 }
0x10ba   :  { %11868 = vmatprep.subr.bf16.mxu1 %v15407_v55 }
0x10bd   :  { %11870 = vmatpush3.bf16.msra.mxu1 %v13572_v25 }
0x10be   :  { %11903 = vmatprep.subr.bf16.mxu1 %v15407_v55 }
0x1133   :  { %v14583_v44 = vpop.f32.mrb[40].mxu1 }
0x1134   :  { %v4274_v57 = vpop.f32.mrb[41].mxu1 }
0x1135   :  { %v12704_v14 = vadd.f32 %v4274_v57, %v15587_v41 }
0x1137   :  { %4424 = vmax.xlane.f32.xlu1 %v12704_v14 }
0x1153   :  { %v4343_v35 = vpop.f32.mrb[42].mxu1 }
0x1154   :  { %v12705_v59 = vadd.f32 %v4343_v35, %v15588_v31  ;;  %v4345_v28 = vpop.f32.mrb[43].mxu1 }
0x1155   :  { %v12706_v29 = vadd.f32 %v4345_v28, %v15589_v54 }
0x1156   :  { %4509 = vmax.xlane.f32.xlu0 %v12705_v59 }
0x115a   :  { %4594 = vmax.xlane.f32.xlu0 %v12706_v29 }
0x1173   :  { %v4414_v32 = vpop.f32.mrb[44].mxu1 }
0x1174   :  { %v12707_v19 = vadd.f32 %v4414_v32, %v15590_v45  ;;  %v9845_v60 = vpop.f32.mrb[45].mxu1 }
0x1176   :  { %4679 = vmax.xlane.f32.xlu1 %v12707_v19 }
0x11c4   :  { %v4425_v7 = vpop.xlane.xlu1 %4424 }
0x11c5   :  { %v4426_v36 = vsub.f32 %v12704_v14, %v4425_v7 }
0x11c7   :  { %v4427_v4 = vmul.f32 1.442695, %v4426_v36 }
0x11c9   :  { %12877 = vpow2.f32 %v4427_v4 }
0x11d3   :  { %v12878_v49 = vpop.eup %12877 }
0x11d4   :  { %9879 = vmatmul.mubr.f32.vlgmr.msra.gmra.mrb[36].mxu0 %v12878_v49 }
0x11d5   :  { %11801 = vmatpush3.bf16.msra.mxu0 %v13472_v23  ;;  %9913 = vmatprep.mubr.msk.f32.mxu0 %vm12984_vm1, %v15409_v61 }
0x11d6   :  { %11802 = vmatprep.subr.bf16.mxu0 %v15407_v55 }
0x11d9   :  { %11804 = vmatpush3.bf16.msra.mxu0 %v13478_v27 }
0x11da   :  { %11805 = vmatprep.subr.bf16.mxu0 %v15407_v55 }
0x11dd   :  { %11807 = vmatpush3.bf16.msra.mxu0 %v13490_v37 }
0x11de   :  { %11808 = vmatprep.subr.bf16.mxu0 %v15407_v55 }
0x11e1   :  { %11810 = vmatpush3.bf16.msra.mxu0 %v13502_v53 }
0x11e2   :  { %11811 = vmatprep.subr.bf16.mxu0 %v15407_v55 }
0x11e3   :  { %v4510_v49 = vpop.xlane.xlu0 %4509 }
0x11e4   :  { %v4511_v4 = vsub.f32 %v12705_v59, %v4510_v49  ;;  %v15592_v49 = vld [vmem:[#allocation28_spill] sm:$0xff] }
0x11e5   :  { %11813 = vmatpush3.bf16.msra.mxu0 %v13514_v58 }
0x11e6   :  { %v4512_v36 = vmul.f32 1.442695, %v4511_v4  ;;  %11814 = vmatprep.subr.bf16.mxu0 %v15407_v55  ;;  %v15593_v4 = vld [vmem:[#allocation31_spill] sm:$0xff] }
0x11e7   :  { %v4595_v60 = vpop.xlane.xlu0 %4594 }
0x11e8   :  { %12879 = vpow2.f32 %v4512_v36  ;;  %v4596_v32 = vsub.f32 %v12706_v29, %v4595_v60  ;;  %v15594_v36 = vld [vmem:[#allocation32_spill] sm:$0xff]  ;;  %v15596_v60 = vld [vmem:[#allocation33_spill] sm:$0xff] }
0x11e9   :  { %11816 = vmatpush3.bf16.msra.mxu0 %v13546_v5 }
0x11ea   :  { %11817 = vmatprep.subr.bf16.mxu0 %v15407_v55  ;;  %v4597_v35 = vmul.f32 1.442695, %v4596_v32  ;;  %v15597_v32 = vld [vmem:[#allocation34_spill] sm:$0xff] }
0x11ed   :  { %11819 = vmatpush3.bf16.msra.mxu0 %v13558_v12 }
0x11ee   :  { %11820 = vmatprep.subr.bf16.mxu0 %v15407_v55 }
0x11f1   :  { %11822 = vmatpush3.bf16.msra.mxu0 %v13572_v25 }
0x11f2   :  { %v12880_v7 = vpop.eup %12879  ;;  %11823 = vmatprep.subr.bf16.mxu0 %v15407_v55 }
0x11f4   :  { %9914 = vmatmul.mubr.f32.vlgmr.msra.gmra.mrb[38].mxu0 %v12880_v7  ;;  %v15595_v7 = vld [vmem:[#allocation30_spill] sm:$0xff] }
0x11f5   :  { %11825 = vmatpush3.bf16.msra.mxu0 %v13472_v23  ;;  %9948 = vmatprep.mubr.msk.f32.mxu0 %vm12984_vm1, %v15409_v61 }
0x11f6   :  { %11826 = vmatprep.subr.bf16.mxu0 %v15407_v55 }
0x11f9   :  { %11828 = vmatpush3.bf16.msra.mxu0 %v13478_v27 }
0x11fa   :  { %11829 = vmatprep.subr.bf16.mxu0 %v15407_v55 }
0x11fd   :  { %11831 = vmatpush3.bf16.msra.mxu0 %v13490_v37 }
0x11fe   :  { %11832 = vmatprep.subr.bf16.mxu0 %v15407_v55 }
0x1201   :  { %11834 = vmatpush3.bf16.msra.mxu0 %v13502_v53 }
0x1202   :  { %11835 = vmatprep.subr.bf16.mxu0 %v15407_v55 }
0x1203   :  { %v4680_v57 = vpop.xlane.xlu1 %4679 }
0x1204   :  { %v4681_v14 = vsub.f32 %v12707_v19, %v4680_v57  ;;  %v15591_v19 = vld [vmem:[#allocation29_spill] sm:$0xff]  ;;  %v15598_v57 = vld [vmem:[#allocation35_spill] sm:$0xff] }
0x1205   :  { %11837 = vmatpush3.bf16.msra.mxu0 %v13514_v58 }
0x1206   :  { %v4682_v59 = vmul.f32 1.442695, %v4681_v14  ;;  %11838 = vmatprep.subr.bf16.mxu0 %v15407_v55  ;;  %v15599_v14 = vld [vmem:[#allocation36_spill] sm:$0xff] }
0x1208   :  { %12881 = vpow2.f32 %v4682_v59  ;;  %v15601_v59 = vld [vmem:[#allocation38_spill] sm:$0xff] }
0x1209   :  { %12883 = vpow2.f32 %v4597_v35  ;;  %11840 = vmatpush3.bf16.msra.mxu0 %v13546_v5  ;;  %v15600_v35 = vld [vmem:[#allocation37_spill] sm:$0xff] }
0x120a   :  { %11841 = vmatprep.subr.bf16.mxu0 %v15407_v55 }
0x120d   :  { %11843 = vmatpush3.bf16.msra.mxu0 %v13558_v12 }
0x120e   :  { %11844 = vmatprep.subr.bf16.mxu0 %v15407_v55 }
0x1211   :  { %11846 = vmatpush3.bf16.msra.mxu0 %v13572_v25 }
0x1212   :  { %v12882_v29 = vpop.eup %12881  ;;  %11872 = vmatprep.subr.bf16.mxu0 %v15591_v19 }
0x1213   :  { %v12884_v28 = vpop.eup %12883  ;;  %9984 = vmatmul.mubr.f32.vlgmr.msra.gmra.mrb[46].mxu1 %v12882_v29  ;;  %v15602_v29 = vld [vmem:[#allocation39_spill] sm:$0xff] }
0x1214   :  { %9949 = vmatmul.mubr.f32.vlgmr.msra.gmra.mrb[40].mxu0 %v12884_v28  ;;  %11905 = vmatpush3.bf16.msra.mxu1 %v15592_v49  ;;  %v15603_v28 = vld [vmem:[#allocation40_spill] sm:$0xff] }
0x1215   :  { %11906 = vmatprep.subr.bf16.mxu1 %v15407_v55  ;;  %11874 = vmatpush3.bf16.msra.mxu0 %v15593_v4 }
0x1216   :  { %11876 = vmatprep.subr.bf16.mxu0 %v15594_v36  ;;  %10018 = vmatprep.mubr.msk.f32.mxu1 %vm12984_vm1, %v15409_v61 }
0x1218   :  { %11908 = vmatpush3.bf16.msra.mxu1 %v15595_v7  ;;  %v15604_v7 = vld [vmem:[#allocation41_spill] sm:$0xff] }
0x1219   :  { %11909 = vmatprep.subr.bf16.mxu1 %v15407_v55  ;;  %11878 = vmatpush3.bf16.msra.mxu0 %v15596_v60  ;;  %v15607_v60 = vld [vmem:[#allocation43_spill] sm:$0xff] }
0x121a   :  { %11880 = vmatprep.subr.bf16.mxu0 %v15597_v32  ;;  %v15605_v32 = vld [vmem:[#allocation42_spill] sm:$0xff] }
0x121c   :  { %11911 = vmatpush3.bf16.msra.mxu1 %v15598_v57  ;;  %v15606_v57 = vld [vmem:[#allocation44_spill] sm:$0xff] }
0x121d   :  { %11912 = vmatprep.subr.bf16.mxu1 %v15407_v55  ;;  %11882 = vmatpush3.bf16.msra.mxu0 %v15599_v14  ;;  %v15610_v14 = vld [vmem:[#allocation45_spill] sm:$0xff] }
0x121e   :  { %11884 = vmatprep.subr.bf16.mxu0 %v15600_v35  ;;  %v15608_v35 = vld [vmem:[#allocation46_spill] sm:$0xff] }
0x1220   :  { %11914 = vmatpush3.bf16.msra.mxu1 %v15601_v59  ;;  %v15609_v59 = vld [vmem:[#allocation47_spill] sm:$0xff] }
0x1221   :  { %11915 = vmatprep.subr.bf16.mxu1 %v15407_v55  ;;  %11886 = vmatpush3.bf16.msra.mxu0 %v15602_v29  ;;  %v15613_v29 = vld [vmem:[#allocation48_spill] sm:$0xff] }
0x1222   :  { %11888 = vmatprep.subr.bf16.mxu0 %v15603_v28  ;;  %v15611_v28 = vld [vmem:[#allocation49_spill] sm:$0xff] }
0x1224   :  { %11917 = vmatpush3.bf16.msra.mxu1 %v15604_v7  ;;  %v15612_v7 = vld [vmem:[#allocation50_spill] sm:$0xff] }
0x1225   :  { %11918 = vmatprep.subr.bf16.mxu1 %v15407_v55  ;;  %11890 = vmatpush3.bf16.msra.mxu0 %v15605_v32  ;;  %v15614_v32 = vld [vmem:[#allocation51_spill] sm:$0xff] }
0x1226   :  { %11892 = vmatprep.subr.bf16.mxu0 %v15606_v57 }
0x1228   :  { %11920 = vmatpush3.bf16.msra.mxu1 %v15607_v60  ;;  %v15615_v60 = vld [vmem:[#allocation4_spill] sm:$0xff] }
0x1229   :  { %11921 = vmatprep.subr.bf16.mxu1 %v15407_v55  ;;  %11894 = vmatpush3.bf16.msra.mxu0 %v15608_v35 }
0x122a   :  { %11896 = vmatprep.subr.bf16.mxu0 %v15609_v59 }
0x122c   :  { %11923 = vmatpush3.bf16.msra.mxu1 %v15610_v14 }
0x122d   :  { %11924 = vmatprep.subr.bf16.mxu1 %v15407_v55  ;;  %11898 = vmatpush3.bf16.msra.mxu0 %v15611_v28 }
0x122e   :  { %11900 = vmatprep.subr.bf16.mxu0 %v15612_v7 }
0x1230   :  { %11926 = vmatpush3.bf16.msra.mxu1 %v15613_v29 }
0x1231   :  { %11902 = vmatpush3.bf16.msra.mxu0 %v15614_v32  ;;  %12026 = vmatprep.subr.bf16.mxu1 %v15407_v55 }
0x1232   :  { %11928 = vmatprep.subr.bf16.mxu0 %v15615_v60 }
0x12a7   :  { %v4495_v57 = vpop.f32.mrb[36].mxu0 }
0x12a8   :  { %12885 = vrcp.f32 %v4495_v57  ;;  %v9880_v35 = vpop.f32.mrb[37].mxu0 }
0x12b2   :  { %v12886_v59 = vpop.eup %12885 }
0x12b3   :  { %v4500_v36 = vmul.f32 %v12886_v59, %v4495_v57 }
0x12b5   :  { %v4501_v14 = vsub.f32 2.0, %v4500_v36 }
0x12b7   :  { %v4502_v4 = vmul.f32 %v12886_v59, %v4501_v14 }
0x12b9   :  { %4505 = vperm.xlu0 %12771, %v4502_v4  }
0x12c7   :  { %v4580_v49 = vpop.f32.mrb[38].mxu0 }
0x12c8   :  { %v9915_v28 = vpop.f32.mrb[39].mxu0  ;;  %12887 = vrcp.f32 %v4580_v49 }
0x12d2   :  { %v12888_v45 = vpop.eup %12887 }
0x12d3   :  { %v4585_v41 = vmul.f32 %v12888_v45, %v4580_v49 }
0x12d5   :  { %v4586_v14 = vsub.f32 2.0, %v4585_v41 }
0x12d7   :  { %v4587_v59 = vmul.f32 %v12888_v45, %v4586_v14 }
0x12e6   :  { %v4750_v7 = vpop.f32.mrb[46].mxu1 }
0x12e7   :  { %12889 = vrcp.f32 %v4750_v7  ;;  %v4665_v29 = vpop.f32.mrb[40].mxu0  ;;  %v9985_v19 = vpop.f32.mrb[47].mxu1 }
0x12e8   :  { %12891 = vrcp.f32 %v4665_v29  ;;  %v9950_v32 = vpop.f32.mrb[41].mxu0  ;;  %v12703_v19 = vadd.f32 %v14583_v44, %v15476_v47 }
0x12ea   :  { %12893 = vtanh.f32 %v12703_v19 }
0x12f1   :  { %v12890_v54 = vpop.eup %12889 }
0x12f2   :  { %v12892_v60 = vpop.eup %12891  ;;  %v4755_v31 = vmul.f32 %v12890_v54, %v4750_v7 }
0x12f3   :  { %v4670_v35 = vmul.f32 %v12892_v60, %v4665_v29 }
0x12f4   :  { %v4756_v11 = vsub.f32 2.0, %v4755_v31 }
0x12f5   :  { %v4671_v1 = vsub.f32 2.0, %v4670_v35 }
0x12f6   :  { %v4757_v36 = vmul.f32 %v12890_v54, %v4756_v11 }
0x12f7   :  { %v4672_v4 = vmul.f32 %v12892_v60, %v4671_v1  ;;  %v12894_v1 = vpop.eup %12893 }
0x12f8   :  { %4760 = vperm.xlu0 %12771, %v4757_v36  }
0x12f9   :  { %4675 = vperm.xlu1 %12772, %v4672_v4  }
0x12fd   :  { %4590 = vperm.xlu1 %12772, %v4587_v59  }
0x1338   :  { %v4506_v32 = vpop.permute.xlu0 %4505 }
0x1339   :  { %v4508_v46 = vmul.f32 %v4506_v32, %v4495_v57 }
0x133b   :  { %v4764_v35 = vsub.f32 1.0, %v4508_v46 }
0x1377   :  { %v4761_v28 = vpop.permute.xlu0 %4760 }
0x1378   :  { %v4676_v20 = vpop.permute.xlu1 %4675  ;;  %v4763_v10 = vmul.f32 %v4761_v28, %v4750_v7 }
0x1379   :  { %v4678_v21 = vmul.f32 %v4676_v20, %v4665_v29 }
0x137b   :  { %v4765_v2 = vsub.f32 1.0, %v4678_v21 }
0x137c   :  { %v4591_v31 = vpop.permute.xlu1 %4590 }
0x137d   :  { %v4766_v11 = vmul.f32 %v4765_v2, %v4763_v10  ;;  %v4593_v54 = vmul.f32 %v4591_v31, %v4580_v49 }
0x137f   :  { %v4767_v41 = vsub.f32 %v4763_v10, %v4766_v11  ;;  %v4768_v60 = vsub.f32 %v4765_v2, %v4766_v11  ;;  %v4773_v45 = vmul.f32 %v12894_v1, %v4766_v11  ;;  %v4769_v36 = vmul.f32 %v4764_v35, %v4593_v54 }
0x1381   :  { %v4780_v14 = vmul.f32 %v12894_v1, %v4768_v60  ;;  %v4770_v4 = vsub.f32 %v4593_v54, %v4769_v36  ;;  %v4771_v44 = vsub.f32 %v4764_v35, %v4769_v36  ;;  %v4772_v59 = vmul.f32 %v4769_v36, %v14527_v38  ;;  %v15616_v36 = vld [vmem:[#allocation6_spill] sm:$0xff] }
0x1382   :  { %v4776_v19 = vmul.f32 %v12894_v1, %v4767_v41  ;;  %v14727_v1 = vld [vmem:[%s15282_s5] ss:$0 sm:$0xff] }
0x1383   :  { %v4775_v57 = vmul.f32 %v4770_v4, %v14527_v38  ;;  %v4779_v20 = vmul.f32 %v4771_v44, %v14527_v38  ;;  %v4774_v21 = vadd.f32 %v4773_v45, %v4772_v59  ;;  %v7795_v38 = vld [vmem:[%s15277_s0 + $0x28] sm:$0xff]  ;;  %v15618_v4 = vld [vmem:[#allocation8_spill] sm:$0xff]  ;;  %v15620_v59 = vld [vmem:[#allocation10_spill] sm:$0xff] }
0x1384   :  { %v15619_v44 = vld [vmem:[#allocation9_spill] sm:$0xff] }
0x1385   :  { %12895 = vtanh.f32 %v4774_v21  ;;  %10019 = vmatmul.mubr.f32.vlgmr.msra.gmra.mrb[48].mxu1 %v4774_v21  ;;  %v4777_v46 = vadd.f32 %v4776_v19, %v4775_v57  ;;  %v4781_v49 = vadd.f32 %v4780_v14, %v4779_v20  ;;  %v15617_v14 = vld [vmem:[#allocation7_spill] sm:$0xff]  ;;  %v15621_v19 = vld [vmem:[#allocation12_spill] sm:$0xff]  ;;  %v15622_v57 = vld [vmem:[#allocation13_spill] sm:$0xff] }
0x1386   :  { %12028 = vmatpush3.bf16.msra.mxu1 %v13472_v23  ;;  %10095 = vmatprep.mubr.msk.f32.mxu1 %vm12984_vm1, %v15409_v61  ;;  %v15623_v20 = vld [vmem:[#allocation15_spill] sm:$0xff] }
0x1387   :  { %v4778_v2 = vadd.f32 %v4777_v46, %v4774_v21  ;;  %v4782_v10 = vadd.f32 %v4781_v49, %v4774_v21  ;;  %12029 = vmatprep.subr.bf16.mxu1 %v15407_v55  ;;  %v15624_v21 = vld [vmem:[#allocation16_spill] sm:$0xff]  ;;  %v15625_v46 = vld [vmem:[#allocation11_spill] sm:$0xff]  ;;  %v15626_v49 = vld [vmem:[#allocation14_spill] sm:$0xff] }
0x1389   :  { %12897 = vtanh.f32 %v4778_v2  ;;  %4854 = vmatprep.mubr.f32.mxu0 %v4778_v2  ;;  %v15627_v2 = vld [vmem:[#allocation17_spill] sm:$0xff] }
0x138a   :  { %12899 = vtanh.f32 %v4782_v10  ;;  %4855 = vmatmul.mubr.f32.vlgmr.msra.gmra.mrb[42].mxu0 %v4782_v10  ;;  %12031 = vmatpush3.bf16.msra.mxu1 %v13478_v27  ;;  %v15628_v10 = vld [vmem:[#allocation18_spill] sm:$0xff] }
0x138b   :  { %11930 = vmatpush1.bf16.msra.mxu0 %v13050_v9  ;;  %5000 = vmatprep.mubr.f32.mxu0 %v15409_v61 }
0x138c   :  { %11932 = vmatprep.subr.bf16.mxu0 %v13075_v17  ;;  %12032 = vmatprep.subr.bf16.mxu1 %v15407_v55 }
0x138e   :  { %7796 = vmatmul.mubr.msk.f32.vlgmr.msra.gmra.mrb[44].mxu0 %vm223_vm0, %v7795_v38  ;;  %12034 = vmatpush3.bf16.msra.mxu1 %v13490_v37 }
0x138f   :  { %v12896_v7 = vpop.eup %12895  ;;  %11934 = vmatpush1.bf16.msra.mxu0 %v13089_v22  ;;  %5071 = vmatprep.mubr.f32.mxu0 %v15409_v61 }
0x1390   :  { %7794 = vst [vmem:[%s15281_s7 + $0x70] sm:$0xff] %v12896_v7  ;;  %11935 = vmatprep.subr.bf16.mxu0 %v15407_v55  ;;  %12035 = vmatprep.subr.bf16.mxu1 %v15407_v55  ;;  %v15630_v7 = vld [vmem:[#allocation20_spill] sm:$0xff] }
0x1392   :  { %7797 = vmatmul.mubr.msk.f32.vlgmr.msra.gmra.mrb[46].mxu0 %vm223_vm0, %v7795_v38  ;;  %12037 = vmatpush3.bf16.msra.mxu1 %v13502_v53 }
0x1393   :  { %v12898_v29 = vpop.eup %12897  ;;  %11937 = vmatpush3.bf16.msra.mxu0 %v13127_v34  ;;  %10025 = vmatprep.mubr.msk.f32.mxu0 %vm12984_vm1, %v15409_v61 }
0x1394   :  { %v12900_v32 = vpop.eup %12899  ;;  %7793 = vst [vmem:[%s15281_s7 + $0x68] sm:$0xff] %v12898_v29  ;;  %11939 = vmatprep.subr.bf16.mxu0 %v13048_v8  ;;  %12038 = vmatprep.subr.bf16.mxu1 %v15407_v55  ;;  %v15631_v29 = vld [vmem:[#allocation21_spill] sm:$0xff] }
0x1395   :  { %7792 = vst [vmem:[%s15281_s7 + $0x60] sm:$0xff] %v12900_v32  ;;  %v15632_v32 = vld [vmem:[#allocation22_spill] sm:$0xff] }
0x1396   :  { %10026 = vmatmul.mubr.msk.f32.vlgmr.msra.gmra.mrb[48].mxu0 %vm223_vm0, %v7795_v38  ;;  %12040 = vmatpush3.bf16.msra.mxu1 %v13514_v58  ;;  %v15629_v38 = vld [vmem:[#allocation19_spill] sm:$0xff] }
0x1397   :  { %11941 = vmatpush1.bf16.msra.mxu0 %v13062_v13  ;;  %5212 = vmatprep.mubr.f32.mxu0 %v15409_v61 }
0x1398   :  { %11943 = vmatprep.subr.bf16.mxu0 %v13077_v18  ;;  %12041 = vmatprep.subr.bf16.mxu1 %v15407_v55 }
0x139a   :  { %12043 = vmatpush3.bf16.msra.mxu1 %v13546_v5 }
0x139b   :  { %11945 = vmatpush1.bf16.msra.mxu0 %v13102_v26  ;;  %12044 = vmatprep.subr.bf16.mxu1 %v15407_v55 }
0x139c   :  { %11947 = vmatprep.subr.bf16.mxu0 %v13114_v30 }
0x139e   :  { %12046 = vmatpush3.bf16.msra.mxu1 %v13558_v12 }
0x139f   :  { %11949 = vmatpush1.bf16.msra.mxu0 %v13140_v39  ;;  %12047 = vmatprep.subr.bf16.mxu1 %v15407_v55 }
0x13a0   :  { %11951 = vmatprep.subr.bf16.mxu0 %v13151_v43 }
0x13a2   :  { %12049 = vmatpush3.bf16.msra.mxu1 %v13572_v25 }
0x13a3   :  { %11953 = vmatpush1.bf16.msra.mxu0 %v13179_v51  ;;  %12050 = vmatprep.subr.bf16.mxu1 %v15407_v55 }
0x13a4   :  { %11955 = vmatprep.subr.bf16.mxu0 %v13193_v56 }
0x13a7   :  { %11957 = vmatpush1.bf16.msra.mxu0 %v13217_v63 }
0x13a8   :  { %11959 = vmatprep.subr.bf16.mxu0 %v13231_v6 }
0x13ab   :  { %11961 = vmatpush1.bf16.msra.mxu0 %v13253_v16 }
0x13ac   :  { %11963 = vmatprep.subr.bf16.mxu0 %v13267_v24 }
0x13af   :  { %11965 = vmatpush1.bf16.msra.mxu0 %v13289_v33 }
0x13b0   :  { %11967 = vmatprep.subr.bf16.mxu0 %v13303_v42 }
0x13b3   :  { %11969 = vmatpush1.bf16.msra.mxu0 %v13319_v48 }
0x13b4   :  { %11971 = vmatprep.subr.bf16.mxu0 %v13142_v40 }
0x1458   :  { %v4926_v28 = vpop.f32.mrb[48].mxu1 }
0x1459   :  { %v10020_v31 = vpop.f32.mrb[49].mxu1 }
0x145d   :  { %v8496_v35 = vpop.f32.mrb[42].mxu0 }
0x145e   :  { %v8497_v11 = vpop.f32.mrb[43].mxu0 }
0x145f   :  { %v8498_v54 = vadd.f32 %v8497_v11, %v8496_v35  ;;  %v15633_v35 = vld [vmem:[#allocation24_spill] sm:$0xff] }
0x1461   :  { %v4857_v41 = vadd.f32 %v14727_v1, %v8498_v54 }
0x1463   :  { %v14730_v60 = vadd.f32 %v4926_v28, %v4857_v41  ;;  %v15634_v41 = vld [vmem:[#allocation25_spill] sm:$0xff] }
0x1465   :  { %12901 = vtanh.f32 %v14730_v60 }
0x146f   :  { %v12902_v45 = vpop.eup %12901 }
0x1470   :  { %5213 = vmatmul.mubr.f32.vlgmr.msra.gmra.mrb[44].mxu0 %v12902_v45 }
0x1471   :  { %11973 = vmatpush1.bf16.msra.mxu0 %v13175_v50  ;;  %5283 = vmatprep.mubr.f32.mxu0 %v15409_v61 }
0x1472   :  { %11975 = vmatprep.subr.bf16.mxu0 %v13181_v52 }
0x1475   :  { %11977 = vmatpush1.bf16.msra.mxu0 %v13212_v62 }
0x1476   :  { %11979 = vmatprep.subr.bf16.mxu0 %v13219_v0 }
0x1479   :  { %11981 = vmatpush1.bf16.msra.mxu0 %v13249_v15 }
0x147a   :  { %11983 = vmatprep.subr.bf16.mxu0 %v15569_v3 }
0x147d   :  { %11985 = vmatpush1.bf16.msra.mxu0 %v15616_v36 }
0x147e   :  { %11987 = vmatprep.subr.bf16.mxu0 %v15617_v14 }
0x1481   :  { %11989 = vmatpush1.bf16.msra.mxu0 %v15618_v4 }
0x1482   :  { %11991 = vmatprep.subr.bf16.mxu0 %v15619_v44 }
0x1485   :  { %11993 = vmatpush1.bf16.msra.mxu0 %v15620_v59 }
0x1486   :  { %11995 = vmatprep.subr.bf16.mxu0 %v15621_v19 }
0x1489   :  { %11997 = vmatpush1.bf16.msra.mxu0 %v15622_v57 }
0x148a   :  { %11999 = vmatprep.subr.bf16.mxu0 %v15623_v20 }
0x148d   :  { %12001 = vmatpush1.bf16.msra.mxu0 %v15624_v21 }
0x148e   :  { %12002 = vmatprep.subr.bf16.mxu0 %v15407_v55 }
0x1490   :  { %5284 = vmatmul.mubr.f32.vlgmr.msra.gmra.mrb[46].mxu0 %v12902_v45 }
0x1491   :  { %12004 = vmatpush3.bf16.msra.mxu0 %v15625_v46  ;;  %10060 = vmatprep.mubr.msk.f32.mxu0 %vm12984_vm1, %v15409_v61 }
0x1492   :  { %12005 = vmatprep.subr.bf16.mxu0 %v15407_v55 }
0x1495   :  { %12007 = vmatpush3.bf16.msra.mxu0 %v15626_v49 }
0x1496   :  { %12008 = vmatprep.subr.bf16.mxu0 %v15407_v55 }
0x1499   :  { %12010 = vmatpush3.bf16.msra.mxu0 %v15627_v2 }
0x149a   :  { %12011 = vmatprep.subr.bf16.mxu0 %v15407_v55 }
0x149d   :  { %12013 = vmatpush3.bf16.msra.mxu0 %v15628_v10  ;;  %v15636_v10 = vld [vmem:[#allocation27_spill] sm:$0xff] }
0x149e   :  { %12014 = vmatprep.subr.bf16.mxu0 %v15407_v55 }
0x14a1   :  { %12016 = vmatpush3.bf16.msra.mxu0 %v15629_v38 }
0x14a2   :  { %12017 = vmatprep.subr.bf16.mxu0 %v15407_v55 }
0x14a5   :  { %12019 = vmatpush3.bf16.msra.mxu0 %v15630_v7 }
0x14a6   :  { %12020 = vmatprep.subr.bf16.mxu0 %v15407_v55 }
0x14a9   :  { %12022 = vmatpush3.bf16.msra.mxu0 %v15631_v29  ;;  %v15635_v29 = vld [vmem:[#allocation26_spill] sm:$0xff] }
0x14aa   :  { %12023 = vmatprep.subr.bf16.mxu0 %v15407_v55 }
0x14ad   :  { %12025 = vmatpush3.bf16.msra.mxu0 %v15632_v32 }
0x14ae   :  { %12098 = vmatprep.subr.bf16.mxu0 %v15407_v55 }
0x14b0   :  { %10061 = vmatmul.mubr.f32.vlgmr.msra.gmra.mrb[48].mxu0 %v12902_v45 }
0x14b1   :  { %12100 = vmatpush3.bf16.msra.mxu0 %v13472_v23  ;;  %10200 = vmatprep.mubr.msk.f32.mxu0 %vm12984_vm1, %v15409_v61 }
0x14b2   :  { %12101 = vmatprep.subr.bf16.mxu0 %v15407_v55 }
0x14b5   :  { %12103 = vmatpush3.bf16.msra.mxu0 %v13478_v27 }
0x14b6   :  { %12104 = vmatprep.subr.bf16.mxu0 %v15407_v55 }
0x14b9   :  { %12106 = vmatpush3.bf16.msra.mxu0 %v13490_v37 }
0x14ba   :  { %12107 = vmatprep.subr.bf16.mxu0 %v15407_v55 }
0x14bd   :  { %12109 = vmatpush3.bf16.msra.mxu0 %v13502_v53 }
0x14be   :  { %12110 = vmatprep.subr.bf16.mxu0 %v15407_v55 }
0x14c1   :  { %12112 = vmatpush3.bf16.msra.mxu0 %v13514_v58 }
0x14c2   :  { %12113 = vmatprep.subr.bf16.mxu0 %v15407_v55 }
0x14c5   :  { %12115 = vmatpush3.bf16.msra.mxu0 %v13546_v5 }
0x14c6   :  { %12116 = vmatprep.subr.bf16.mxu0 %v15407_v55 }
0x14c9   :  { %12118 = vmatpush3.bf16.msra.mxu0 %v13558_v12 }
0x14ca   :  { %12119 = vmatprep.subr.bf16.mxu0 %v15407_v55 }
0x14cd   :  { %12121 = vmatpush3.bf16.msra.mxu0 %v13572_v25 }
0x14ce   :  { %12154 = vmatprep.subr.bf16.mxu0 %v15407_v55 }
0x1543   :  { %v14786_v28 = vpop.f32.mrb[44].mxu0 }
0x1544   :  { %v5216_v31 = vpop.f32.mrb[45].mxu0 }
0x1545   :  { %v12709_v11 = vadd.f32 %v5216_v31, %v15633_v35 }
0x1547   :  { %5366 = vmax.xlane.f32.xlu1 %v12709_v11 }
0x1563   :  { %v5285_v54 = vpop.f32.mrb[46].mxu0 }
0x1564   :  { %v12710_v45 = vadd.f32 %v5285_v54, %v15634_v41  ;;  %v5287_v32 = vpop.f32.mrb[47].mxu0 }
0x1565   :  { %v12711_v7 = vadd.f32 %v5287_v32, %v15635_v29 }
0x1566   :  { %5451 = vmax.xlane.f32.xlu0 %v12710_v45 }
0x156a   :  { %5536 = vmax.xlane.f32.xlu0 %v12711_v7 }
0x1583   :  { %v5356_v38 = vpop.f32.mrb[48].mxu0 }
0x1584   :  { %v12712_v2 = vadd.f32 %v5356_v38, %v15636_v10  ;;  %v10062_v49 = vpop.f32.mrb[49].mxu0 }
0x1586   :  { %5621 = vmax.xlane.f32.xlu1 %v12712_v2 }
0x15d4   :  { %v5367_v46 = vpop.xlane.xlu1 %5366 }
0x15d5   :  { %v5368_v21 = vsub.f32 %v12709_v11, %v5367_v46 }
0x15d7   :  { %v5369_v20 = vmul.f32 1.442695, %v5368_v21 }
0x15d9   :  { %12903 = vpow2.f32 %v5369_v20 }
0x15e3   :  { %v12904_v57 = vpop.eup %12903 }
0x15e4   :  { %10096 = vmatmul.mubr.f32.vlgmr.msra.gmra.mrb[50].mxu1 %v12904_v57 }
0x15e5   :  { %12052 = vmatpush3.bf16.msra.mxu1 %v13472_v23  ;;  %10130 = vmatprep.mubr.msk.f32.mxu1 %vm12984_vm1, %v15409_v61 }
0x15e6   :  { %12053 = vmatprep.subr.bf16.mxu1 %v15407_v55 }
0x15e9   :  { %12055 = vmatpush3.bf16.msra.mxu1 %v13478_v27 }
0x15ea   :  { %12056 = vmatprep.subr.bf16.mxu1 %v15407_v55 }
0x15ed   :  { %12058 = vmatpush3.bf16.msra.mxu1 %v13490_v37 }
0x15ee   :  { %12059 = vmatprep.subr.bf16.mxu1 %v15407_v55 }
0x15f1   :  { %12061 = vmatpush3.bf16.msra.mxu1 %v13502_v53 }
0x15f2   :  { %12062 = vmatprep.subr.bf16.mxu1 %v15407_v55 }
0x15f3   :  { %v5452_v57 = vpop.xlane.xlu0 %5451 }
0x15f4   :  { %v5453_v20 = vsub.f32 %v12710_v45, %v5452_v57  ;;  %v15638_v57 = vld [vmem:[#allocation28_spill] sm:$0xff] }
0x15f5   :  { %12064 = vmatpush3.bf16.msra.mxu1 %v13514_v58 }
0x15f6   :  { %v5454_v21 = vmul.f32 1.442695, %v5453_v20  ;;  %12065 = vmatprep.subr.bf16.mxu1 %v15407_v55  ;;  %v15639_v20 = vld [vmem:[#allocation31_spill] sm:$0xff] }
0x15f7   :  { %v5537_v49 = vpop.xlane.xlu0 %5536 }
0x15f8   :  { %12905 = vpow2.f32 %v5454_v21  ;;  %v5538_v38 = vsub.f32 %v12711_v7, %v5537_v49  ;;  %v15640_v21 = vld [vmem:[#allocation32_spill] sm:$0xff]  ;;  %v15642_v49 = vld [vmem:[#allocation33_spill] sm:$0xff] }
0x15f9   :  { %12067 = vmatpush3.bf16.msra.mxu1 %v13546_v5 }
0x15fa   :  { %12068 = vmatprep.subr.bf16.mxu1 %v15407_v55  ;;  %v5539_v11 = vmul.f32 1.442695, %v5538_v38  ;;  %v15643_v38 = vld [vmem:[#allocation34_spill] sm:$0xff] }
0x15fd   :  { %12070 = vmatpush3.bf16.msra.mxu1 %v13558_v12 }
0x15fe   :  { %12071 = vmatprep.subr.bf16.mxu1 %v15407_v55 }
0x1601   :  { %12073 = vmatpush3.bf16.msra.mxu1 %v13572_v25 }
0x1602   :  { %v12906_v46 = vpop.eup %12905  ;;  %12074 = vmatprep.subr.bf16.mxu1 %v15407_v55 }
0x1604   :  { %10131 = vmatmul.mubr.f32.vlgmr.msra.gmra.mrb[52].mxu1 %v12906_v46  ;;  %v15641_v46 = vld [vmem:[#allocation30_spill] sm:$0xff] }
0x1605   :  { %12076 = vmatpush3.bf16.msra.mxu1 %v13472_v23  ;;  %10165 = vmatprep.mubr.msk.f32.mxu1 %vm12984_vm1, %v15409_v61 }
0x1606   :  { %12077 = vmatprep.subr.bf16.mxu1 %v15407_v55 }
0x1609   :  { %12079 = vmatpush3.bf16.msra.mxu1 %v13478_v27 }
0x160a   :  { %12080 = vmatprep.subr.bf16.mxu1 %v15407_v55 }
0x160d   :  { %12082 = vmatpush3.bf16.msra.mxu1 %v13490_v37 }
0x160e   :  { %12083 = vmatprep.subr.bf16.mxu1 %v15407_v55 }
0x1611   :  { %12085 = vmatpush3.bf16.msra.mxu1 %v13502_v53 }
0x1612   :  { %12086 = vmatprep.subr.bf16.mxu1 %v15407_v55 }
0x1613   :  { %v5622_v32 = vpop.xlane.xlu1 %5621 }
0x1614   :  { %v5623_v31 = vsub.f32 %v12712_v2, %v5622_v32  ;;  %v15637_v2 = vld [vmem:[#allocation29_spill] sm:$0xff]  ;;  %v15644_v32 = vld [vmem:[#allocation35_spill] sm:$0xff] }
0x1615   :  { %12088 = vmatpush3.bf16.msra.mxu1 %v13514_v58 }
0x1616   :  { %v5624_v54 = vmul.f32 1.442695, %v5623_v31  ;;  %12089 = vmatprep.subr.bf16.mxu1 %v15407_v55  ;;  %v15645_v31 = vld [vmem:[#allocation36_spill] sm:$0xff] }
0x1618   :  { %12907 = vpow2.f32 %v5624_v54  ;;  %v15647_v54 = vld [vmem:[#allocation38_spill] sm:$0xff] }
0x1619   :  { %12909 = vpow2.f32 %v5539_v11  ;;  %12091 = vmatpush3.bf16.msra.mxu1 %v13546_v5  ;;  %v15646_v11 = vld [vmem:[#allocation37_spill] sm:$0xff] }
0x161a   :  { %12092 = vmatprep.subr.bf16.mxu1 %v15407_v55 }
0x161d   :  { %12094 = vmatpush3.bf16.msra.mxu1 %v13558_v12 }
0x161e   :  { %12095 = vmatprep.subr.bf16.mxu1 %v15407_v55 }
0x1621   :  { %12097 = vmatpush3.bf16.msra.mxu1 %v13572_v25 }
0x1622   :  { %v12908_v7 = vpop.eup %12907  ;;  %12123 = vmatprep.subr.bf16.mxu1 %v15637_v2 }
0x1623   :  { %v12910_v45 = vpop.eup %12909  ;;  %10201 = vmatmul.mubr.f32.vlgmr.msra.gmra.mrb[50].mxu0 %v12908_v7  ;;  %v15648_v7 = vld [vmem:[#allocation39_spill] sm:$0xff] }
0x1624   :  { %10166 = vmatmul.mubr.f32.vlgmr.msra.gmra.mrb[54].mxu1 %v12910_v45  ;;  %12156 = vmatpush3.bf16.msra.mxu0 %v15638_v57  ;;  %v15649_v45 = vld [vmem:[#allocation40_spill] sm:$0xff] }
0x1625   :  { %12157 = vmatprep.subr.bf16.mxu0 %v15407_v55  ;;  %12125 = vmatpush3.bf16.msra.mxu1 %v15639_v20 }
0x1626   :  { %12127 = vmatprep.subr.bf16.mxu1 %v15640_v21  ;;  %10235 = vmatprep.mubr.msk.f32.mxu0 %vm12984_vm1, %v15409_v61 }
0x1628   :  { %12159 = vmatpush3.bf16.msra.mxu0 %v15641_v46  ;;  %v15650_v46 = vld [vmem:[#allocation41_spill] sm:$0xff] }
0x1629   :  { %12160 = vmatprep.subr.bf16.mxu0 %v15407_v55  ;;  %12129 = vmatpush3.bf16.msra.mxu1 %v15642_v49  ;;  %v15653_v49 = vld [vmem:[#allocation43_spill] sm:$0xff] }
0x162a   :  { %12131 = vmatprep.subr.bf16.mxu1 %v15643_v38  ;;  %v15651_v38 = vld [vmem:[#allocation42_spill] sm:$0xff] }
0x162c   :  { %12162 = vmatpush3.bf16.msra.mxu0 %v15644_v32  ;;  %v15652_v32 = vld [vmem:[#allocation44_spill] sm:$0xff] }
0x162d   :  { %12163 = vmatprep.subr.bf16.mxu0 %v15407_v55  ;;  %12133 = vmatpush3.bf16.msra.mxu1 %v15645_v31  ;;  %v15656_v31 = vld [vmem:[#allocation45_spill] sm:$0xff] }
0x162e   :  { %12135 = vmatprep.subr.bf16.mxu1 %v15646_v11  ;;  %v15654_v11 = vld [vmem:[#allocation46_spill] sm:$0xff] }
0x1630   :  { %12165 = vmatpush3.bf16.msra.mxu0 %v15647_v54  ;;  %v15655_v54 = vld [vmem:[#allocation47_spill] sm:$0xff] }
0x1631   :  { %12166 = vmatprep.subr.bf16.mxu0 %v15407_v55  ;;  %12137 = vmatpush3.bf16.msra.mxu1 %v15648_v7  ;;  %v15659_v7 = vld [vmem:[#allocation48_spill] sm:$0xff] }
0x1632   :  { %12139 = vmatprep.subr.bf16.mxu1 %v15649_v45  ;;  %v15657_v45 = vld [vmem:[#allocation49_spill] sm:$0xff] }
0x1634   :  { %12168 = vmatpush3.bf16.msra.mxu0 %v15650_v46  ;;  %v15658_v46 = vld [vmem:[#allocation50_spill] sm:$0xff] }
0x1635   :  { %12169 = vmatprep.subr.bf16.mxu0 %v15407_v55  ;;  %12141 = vmatpush3.bf16.msra.mxu1 %v15651_v38  ;;  %v15660_v38 = vld [vmem:[#allocation51_spill] sm:$0xff] }
0x1636   :  { %12143 = vmatprep.subr.bf16.mxu1 %v15652_v32 }
0x1638   :  { %12171 = vmatpush3.bf16.msra.mxu0 %v15653_v49  ;;  %v15661_v49 = vld [vmem:[#allocation4_spill] sm:$0xff] }
0x1639   :  { %12172 = vmatprep.subr.bf16.mxu0 %v15407_v55  ;;  %12145 = vmatpush3.bf16.msra.mxu1 %v15654_v11 }
0x163a   :  { %12147 = vmatprep.subr.bf16.mxu1 %v15655_v54 }
0x163c   :  { %12174 = vmatpush3.bf16.msra.mxu0 %v15656_v31 }
0x163d   :  { %12175 = vmatprep.subr.bf16.mxu0 %v15407_v55  ;;  %12149 = vmatpush3.bf16.msra.mxu1 %v15657_v45 }
0x163e   :  { %12151 = vmatprep.subr.bf16.mxu1 %v15658_v46 }
0x1640   :  { %12177 = vmatpush3.bf16.msra.mxu0 %v15659_v7 }
0x1641   :  { %12153 = vmatpush3.bf16.msra.mxu1 %v15660_v38  ;;  %12277 = vmatprep.subr.bf16.mxu0 %v15407_v55 }
0x1642   :  { %12179 = vmatprep.subr.bf16.mxu1 %v15661_v49 }
0x16b7   :  { %v5437_v32 = vpop.f32.mrb[50].mxu1 }
0x16b8   :  { %12911 = vrcp.f32 %v5437_v32  ;;  %v10097_v11 = vpop.f32.mrb[51].mxu1 }
0x16c2   :  { %v12912_v54 = vpop.eup %12911 }
0x16c3   :  { %v5442_v21 = vmul.f32 %v12912_v54, %v5437_v32 }
0x16c5   :  { %v5443_v31 = vsub.f32 2.0, %v5442_v21 }
0x16c7   :  { %v5444_v20 = vmul.f32 %v12912_v54, %v5443_v31 }
0x16c9   :  { %5447 = vperm.xlu0 %12771, %v5444_v20  }
0x16d7   :  { %v5522_v57 = vpop.f32.mrb[52].mxu1 }
0x16d8   :  { %v10132_v45 = vpop.f32.mrb[53].mxu1  ;;  %12913 = vrcp.f32 %v5522_v57 }
0x16e2   :  { %v12914_v10 = vpop.eup %12913 }
0x16e3   :  { %v5527_v35 = vmul.f32 %v12914_v10, %v5522_v57 }
0x16e5   :  { %v5528_v31 = vsub.f32 2.0, %v5527_v35 }
0x16e7   :  { %v5529_v54 = vmul.f32 %v12914_v10, %v5528_v31 }
0x16f6   :  { %v5692_v46 = vpop.f32.mrb[50].mxu0 }
0x16f7   :  { %12915 = vrcp.f32 %v5692_v46  ;;  %v5607_v7 = vpop.f32.mrb[54].mxu1  ;;  %v10202_v2 = vpop.f32.mrb[51].mxu0 }
0x16f8   :  { %12917 = vrcp.f32 %v5607_v7  ;;  %v10167_v38 = vpop.f32.mrb[55].mxu1  ;;  %v12708_v2 = vadd.f32 %v14786_v28, %v15476_v47 }
0x16fa   :  { %12919 = vtanh.f32 %v12708_v2 }
0x1701   :  { %v12916_v29 = vpop.eup %12915 }
0x1702   :  { %v12918_v49 = vpop.eup %12917  ;;  %v5697_v41 = vmul.f32 %v12916_v29, %v5692_v46 }
0x1703   :  { %v5612_v11 = vmul.f32 %v12918_v49, %v5607_v7 }
0x1704   :  { %v5698_v19 = vsub.f32 2.0, %v5697_v41 }
0x1705   :  { %v5613_v59 = vsub.f32 2.0, %v5612_v11 }
0x1706   :  { %v5699_v21 = vmul.f32 %v12916_v29, %v5698_v19 }
0x1707   :  { %v5614_v20 = vmul.f32 %v12918_v49, %v5613_v59  ;;  %v12920_v59 = vpop.eup %12919 }
0x1708   :  { %5702 = vperm.xlu0 %12771, %v5699_v21  }
0x1709   :  { %5617 = vperm.xlu1 %12772, %v5614_v20  }
0x170d   :  { %5532 = vperm.xlu1 %12772, %v5529_v54  }
0x1748   :  { %v5448_v38 = vpop.permute.xlu0 %5447 }
0x1749   :  { %v5450_v4 = vmul.f32 %v5448_v38, %v5437_v32 }
0x174b   :  { %v5706_v11 = vsub.f32 1.0, %v5450_v4 }
0x1787   :  { %v5703_v45 = vpop.permute.xlu0 %5702 }
0x1788   :  { %v5618_v44 = vpop.permute.xlu1 %5617  ;;  %v5705_v36 = vmul.f32 %v5703_v45, %v5692_v46 }
0x1789   :  { %v5620_v14 = vmul.f32 %v5618_v44, %v5607_v7 }
0x178b   :  { %v5707_v3 = vsub.f32 1.0, %v5620_v14 }
0x178c   :  { %v5533_v41 = vpop.permute.xlu1 %5532 }
0x178d   :  { %v5708_v19 = vmul.f32 %v5707_v3, %v5705_v36  ;;  %v5535_v29 = vmul.f32 %v5533_v41, %v5522_v57 }
0x178f   :  { %v5709_v35 = vsub.f32 %v5705_v36, %v5708_v19  ;;  %v5710_v49 = vsub.f32 %v5707_v3, %v5708_v19  ;;  %v5715_v10 = vmul.f32 %v12920_v59, %v5708_v19  ;;  %v5711_v21 = vmul.f32 %v5706_v11, %v5535_v29 }
0x1791   :  { %v5722_v31 = vmul.f32 %v12920_v59, %v5710_v49  ;;  %v5712_v20 = vsub.f32 %v5535_v29, %v5711_v21  ;;  %v5713_v28 = vsub.f32 %v5706_v11, %v5711_v21  ;;  %v5714_v54 = vmul.f32 %v5711_v21, %v14730_v60  ;;  %v15664_v21 = vld [vmem:[#allocation7_spill] sm:$0xff] }
0x1792   :  { %v5718_v2 = vmul.f32 %v12920_v59, %v5709_v35 }
0x1793   :  { %v5717_v32 = vmul.f32 %v5712_v20, %v14730_v60  ;;  %v5721_v44 = vmul.f32 %v5713_v28, %v14730_v60  ;;  %v5716_v14 = vadd.f32 %v5715_v10, %v5714_v54  ;;  %v7802_v60 = vld [vmem:[%s15277_s0 + $0x30] sm:$0xff]  ;;  %v15662_v10 = vld [vmem:[#allocation5_spill] sm:$0xff]  ;;  %v15668_v54 = vld [vmem:[#allocation12_spill] sm:$0xff] }
0x1794   :  { %v15666_v20 = vld [vmem:[#allocation9_spill] sm:$0xff]  ;;  %v15667_v28 = vld [vmem:[#allocation10_spill] sm:$0xff] }
0x1795   :  { %12921 = vtanh.f32 %v5716_v14  ;;  %10236 = vmatmul.mubr.f32.vlgmr.msra.gmra.mrb[52].mxu0 %v5716_v14  ;;  %v5719_v4 = vadd.f32 %v5718_v2, %v5717_v32  ;;  %v5723_v57 = vadd.f32 %v5722_v31, %v5721_v44  ;;  %v15665_v31 = vld [vmem:[#allocation8_spill] sm:$0xff]  ;;  %v15669_v2 = vld [vmem:[#allocation13_spill] sm:$0xff]  ;;  %v15670_v32 = vld [vmem:[#allocation15_spill] sm:$0xff] }
0x1796   :  { %12279 = vmatpush3.bf16.msra.mxu0 %v13472_v23  ;;  %10312 = vmatprep.mubr.msk.f32.mxu0 %vm12984_vm1, %v15409_v61  ;;  %v15671_v44 = vld [vmem:[#allocation16_spill] sm:$0xff] }
0x1797   :  { %v5720_v3 = vadd.f32 %v5719_v4, %v5716_v14  ;;  %v5724_v36 = vadd.f32 %v5723_v57, %v5716_v14  ;;  %12280 = vmatprep.subr.bf16.mxu0 %v15407_v55  ;;  %v15672_v14 = vld [vmem:[#allocation11_spill] sm:$0xff]  ;;  %v15673_v4 = vld [vmem:[#allocation14_spill] sm:$0xff]  ;;  %v15674_v57 = vld [vmem:[#allocation17_spill] sm:$0xff] }
0x1799   :  { %12923 = vtanh.f32 %v5720_v3  ;;  %5796 = vmatprep.mubr.f32.mxu1 %v5720_v3  ;;  %v15675_v3 = vld [vmem:[#allocation18_spill] sm:$0xff] }
0x179a   :  { %12925 = vtanh.f32 %v5724_v36  ;;  %5797 = vmatmul.mubr.f32.vlgmr.msra.gmra.mrb[56].mxu1 %v5724_v36  ;;  %12282 = vmatpush3.bf16.msra.mxu0 %v13478_v27  ;;  %v15676_v36 = vld [vmem:[#allocation19_spill] sm:$0xff] }
0x179b   :  { %12181 = vmatpush1.bf16.msra.mxu1 %v13050_v9  ;;  %5942 = vmatprep.mubr.f32.mxu1 %v15409_v61 }
0x179c   :  { %12183 = vmatprep.subr.bf16.mxu1 %v13075_v17  ;;  %12283 = vmatprep.subr.bf16.mxu0 %v15407_v55 }
0x179e   :  { %7803 = vmatmul.mubr.msk.f32.vlgmr.msra.gmra.mrb[58].mxu1 %vm223_vm0, %v7802_v60  ;;  %12285 = vmatpush3.bf16.msra.mxu0 %v13490_v37 }
0x179f   :  { %v12922_v46 = vpop.eup %12921  ;;  %12185 = vmatpush1.bf16.msra.mxu1 %v13089_v22  ;;  %6013 = vmatprep.mubr.f32.mxu1 %v15409_v61 }
0x17a0   :  { %7801 = vst [vmem:[%s15281_s7 + $0x88] sm:$0xff] %v12922_v46  ;;  %12186 = vmatprep.subr.bf16.mxu1 %v15407_v55  ;;  %12286 = vmatprep.subr.bf16.mxu0 %v15407_v55  ;;  %v15678_v46 = vld [vmem:[#allocation21_spill] sm:$0xff] }
0x17a2   :  { %7804 = vmatmul.mubr.msk.f32.vlgmr.msra.gmra.mrb[60].mxu1 %vm223_vm0, %v7802_v60  ;;  %12288 = vmatpush3.bf16.msra.mxu0 %v13502_v53 }
0x17a3   :  { %v12924_v7 = vpop.eup %12923  ;;  %12188 = vmatpush3.bf16.msra.mxu1 %v13127_v34  ;;  %10242 = vmatprep.mubr.msk.f32.mxu1 %vm12984_vm1, %v15409_v61 }
0x17a4   :  { %v12926_v38 = vpop.eup %12925  ;;  %7800 = vst [vmem:[%s15281_s7 + $0x80] sm:$0xff] %v12924_v7  ;;  %12190 = vmatprep.subr.bf16.mxu1 %v13048_v8  ;;  %12289 = vmatprep.subr.bf16.mxu0 %v15407_v55  ;;  %v15679_v7 = vld [vmem:[#allocation22_spill] sm:$0xff] }
0x17a5   :  { %7799 = vst [vmem:[%s15281_s7 + $0x78] sm:$0xff] %v12926_v38 }
0x17a6   :  { %10243 = vmatmul.mubr.msk.f32.vlgmr.msra.gmra.mrb[62].mxu1 %vm223_vm0, %v7802_v60  ;;  %12291 = vmatpush3.bf16.msra.mxu0 %v13514_v58  ;;  %v15677_v60 = vld [vmem:[#allocation20_spill] sm:$0xff] }
0x17a7   :  { %12192 = vmatpush1.bf16.msra.mxu1 %v13062_v13  ;;  %6154 = vmatprep.mubr.f32.mxu1 %v15409_v61 }
0x17a8   :  { %12194 = vmatprep.subr.bf16.mxu1 %v13077_v18  ;;  %12292 = vmatprep.subr.bf16.mxu0 %v15407_v55 }
0x17aa   :  { %12294 = vmatpush3.bf16.msra.mxu0 %v13546_v5 }
0x17ab   :  { %12196 = vmatpush1.bf16.msra.mxu1 %v13102_v26  ;;  %12295 = vmatprep.subr.bf16.mxu0 %v15407_v55 }
0x17ac   :  { %12198 = vmatprep.subr.bf16.mxu1 %v13114_v30 }
0x17ae   :  { %12297 = vmatpush3.bf16.msra.mxu0 %v13558_v12 }
0x17af   :  { %12200 = vmatpush1.bf16.msra.mxu1 %v13140_v39  ;;  %12298 = vmatprep.subr.bf16.mxu0 %v15407_v55 }
0x17b0   :  { %12202 = vmatprep.subr.bf16.mxu1 %v13151_v43 }
0x17b2   :  { %12300 = vmatpush3.bf16.msra.mxu0 %v13572_v25 }
0x17b3   :  { %12204 = vmatpush1.bf16.msra.mxu1 %v13179_v51  ;;  %12301 = vmatprep.subr.bf16.mxu0 %v15407_v55 }
0x17b4   :  { %12206 = vmatprep.subr.bf16.mxu1 %v13193_v56 }
0x17b7   :  { %12208 = vmatpush1.bf16.msra.mxu1 %v13217_v63 }
0x17b8   :  { %12210 = vmatprep.subr.bf16.mxu1 %v13231_v6 }
0x17bb   :  { %12212 = vmatpush1.bf16.msra.mxu1 %v13253_v16 }
0x17bc   :  { %12214 = vmatprep.subr.bf16.mxu1 %v13267_v24 }
0x17bf   :  { %12216 = vmatpush1.bf16.msra.mxu1 %v13289_v33 }
0x17c0   :  { %12218 = vmatprep.subr.bf16.mxu1 %v13303_v42 }
0x17c3   :  { %12220 = vmatpush1.bf16.msra.mxu1 %v13319_v48 }
0x17c4   :  { %12222 = vmatprep.subr.bf16.mxu1 %v13142_v40 }
0x1868   :  { %v5868_v45 = vpop.f32.mrb[52].mxu0 }
0x1869   :  { %v10237_v41 = vpop.f32.mrb[53].mxu0 }
0x186a   :  { %v15680_v41 = vld [vmem:[#allocation24_spill] sm:$0xff] }
0x186d   :  { %v8636_v11 = vpop.f32.mrb[56].mxu1 }
0x186e   :  { %v8637_v19 = vpop.f32.mrb[57].mxu1 }
0x186f   :  { %v8638_v29 = vadd.f32 %v8637_v19, %v8636_v11 }
0x1871   :  { %v5799_v59 = vadd.f32 %v14727_v1, %v8638_v29  ;;  %v15663_v1 = vld [vmem:[#allocation6_spill] sm:$0xff]  ;;  %v15681_v29 = vld [vmem:[#allocation25_spill] sm:$0xff] }
0x1873   :  { %v14928_v35 = vadd.f32 %v5868_v45, %v5799_v59 }
0x1875   :  { %12927 = vtanh.f32 %v14928_v35 }
0x187f   :  { %v12928_v49 = vpop.eup %12927 }
0x1880   :  { %6155 = vmatmul.mubr.f32.vlgmr.msra.gmra.mrb[58].mxu1 %v12928_v49 }
0x1881   :  { %12224 = vmatpush1.bf16.msra.mxu1 %v13175_v50  ;;  %6225 = vmatprep.mubr.f32.mxu1 %v15409_v61 }
0x1882   :  { %12226 = vmatprep.subr.bf16.mxu1 %v13181_v52 }
0x1885   :  { %12228 = vmatpush1.bf16.msra.mxu1 %v13212_v62 }
0x1886   :  { %12230 = vmatprep.subr.bf16.mxu1 %v13219_v0 }
0x1889   :  { %12232 = vmatpush1.bf16.msra.mxu1 %v13249_v15 }
0x188a   :  { %12234 = vmatprep.subr.bf16.mxu1 %v15662_v10 }
0x188d   :  { %12236 = vmatpush1.bf16.msra.mxu1 %v15663_v1 }
0x188e   :  { %12238 = vmatprep.subr.bf16.mxu1 %v15664_v21 }
0x1891   :  { %12240 = vmatpush1.bf16.msra.mxu1 %v15665_v31 }
0x1892   :  { %12242 = vmatprep.subr.bf16.mxu1 %v15666_v20 }
0x1895   :  { %12244 = vmatpush1.bf16.msra.mxu1 %v15667_v28 }
0x1896   :  { %12246 = vmatprep.subr.bf16.mxu1 %v15668_v54 }
0x1899   :  { %12248 = vmatpush1.bf16.msra.mxu1 %v15669_v2 }
0x189a   :  { %12250 = vmatprep.subr.bf16.mxu1 %v15670_v32 }
0x189d   :  { %12252 = vmatpush1.bf16.msra.mxu1 %v15671_v44 }
0x189e   :  { %12253 = vmatprep.subr.bf16.mxu1 %v15407_v55 }
0x18a0   :  { %6226 = vmatmul.mubr.f32.vlgmr.msra.gmra.mrb[60].mxu1 %v12928_v49 }
0x18a1   :  { %12255 = vmatpush3.bf16.msra.mxu1 %v15672_v14  ;;  %10277 = vmatprep.mubr.msk.f32.mxu1 %vm12984_vm1, %v15409_v61 }
0x18a2   :  { %12256 = vmatprep.subr.bf16.mxu1 %v15407_v55 }
0x18a5   :  { %12258 = vmatpush3.bf16.msra.mxu1 %v15673_v4 }
0x18a6   :  { %12259 = vmatprep.subr.bf16.mxu1 %v15407_v55 }
0x18a9   :  { %12261 = vmatpush3.bf16.msra.mxu1 %v15674_v57 }
0x18aa   :  { %12262 = vmatprep.subr.bf16.mxu1 %v15407_v55 }
0x18ad   :  { %12264 = vmatpush3.bf16.msra.mxu1 %v15675_v3 }
0x18ae   :  { %12265 = vmatprep.subr.bf16.mxu1 %v15407_v55 }
0x18b1   :  { %12267 = vmatpush3.bf16.msra.mxu1 %v15676_v36  ;;  %v15683_v36 = vld [vmem:[#allocation27_spill] sm:$0xff] }
0x18b2   :  { %12268 = vmatprep.subr.bf16.mxu1 %v15407_v55 }
0x18b5   :  { %12270 = vmatpush3.bf16.msra.mxu1 %v15677_v60 }
0x18b6   :  { %12271 = vmatprep.subr.bf16.mxu1 %v15407_v55 }
0x18b9   :  { %12273 = vmatpush3.bf16.msra.mxu1 %v15678_v46 }
0x18ba   :  { %12274 = vmatprep.subr.bf16.mxu1 %v15407_v55 }
0x18bd   :  { %12276 = vmatpush3.bf16.msra.mxu1 %v15679_v7  ;;  %v15682_v7 = vld [vmem:[#allocation26_spill] sm:$0xff] }
0x18be   :  { %12349 = vmatprep.subr.bf16.mxu1 %v15407_v55 }
0x18c0   :  { %10278 = vmatmul.mubr.f32.vlgmr.msra.gmra.mrb[62].mxu1 %v12928_v49 }
0x18c1   :  { %12351 = vmatpush3.bf16.msra.mxu1 %v13472_v23  ;;  %10417 = vmatprep.mubr.msk.f32.mxu1 %vm12984_vm1, %v15409_v61 }
0x18c2   :  { %12352 = vmatprep.subr.bf16.mxu1 %v15407_v55 }
0x18c5   :  { %12354 = vmatpush3.bf16.msra.mxu1 %v13478_v27 }
0x18c6   :  { %12355 = vmatprep.subr.bf16.mxu1 %v15407_v55 }
0x18c9   :  { %12357 = vmatpush3.bf16.msra.mxu1 %v13490_v37 }
0x18ca   :  { %12358 = vmatprep.subr.bf16.mxu1 %v15407_v55 }
0x18cd   :  { %12360 = vmatpush3.bf16.msra.mxu1 %v13502_v53 }
0x18ce   :  { %12361 = vmatprep.subr.bf16.mxu1 %v15407_v55 }
0x18d1   :  { %12363 = vmatpush3.bf16.msra.mxu1 %v13514_v58 }
0x18d2   :  { %12364 = vmatprep.subr.bf16.mxu1 %v15407_v55 }
0x18d5   :  { %12366 = vmatpush3.bf16.msra.mxu1 %v13546_v5 }
0x18d6   :  { %12367 = vmatprep.subr.bf16.mxu1 %v15407_v55 }
0x18d9   :  { %12369 = vmatpush3.bf16.msra.mxu1 %v13558_v12 }
0x18da   :  { %12370 = vmatprep.subr.bf16.mxu1 %v15407_v55 }
0x18dd   :  { %12372 = vmatpush3.bf16.msra.mxu1 %v13572_v25 }
0x18de   :  { %12405 = vmatprep.subr.bf16.mxu1 %v15407_v55 }
0x1953   :  { %v14984_v38 = vpop.f32.mrb[58].mxu1 }
0x1954   :  { %v6158_v45 = vpop.f32.mrb[59].mxu1 }
0x1955   :  { %v12714_v11 = vadd.f32 %v6158_v45, %v15680_v41 }
0x1957   :  { %6308 = vmax.xlane.f32.xlu1 %v12714_v11 }
0x1973   :  { %v6227_v19 = vpop.f32.mrb[60].mxu1 }
0x1974   :  { %v12715_v59 = vadd.f32 %v6227_v19, %v15681_v29  ;;  %v6229_v49 = vpop.f32.mrb[61].mxu1 }
0x1975   :  { %v12716_v46 = vadd.f32 %v6229_v49, %v15682_v7 }
0x1976   :  { %6393 = vmax.xlane.f32.xlu0 %v12715_v59 }
0x197a   :  { %6478 = vmax.xlane.f32.xlu0 %v12716_v46 }
0x1993   :  { %v6298_v60 = vpop.f32.mrb[62].mxu1 }
0x1994   :  { %v12717_v3 = vadd.f32 %v6298_v60, %v15683_v36  ;;  %v10279_v57 = vpop.f32.mrb[63].mxu1  ;;  %v15700_v36 = vld [vmem:[#allocation43_spill] sm:$0xff] }
0x1996   :  { %6563 = vmax.xlane.f32.xlu1 %v12717_v3 }
0x19e4   :  { %v6309_v4 = vpop.xlane.xlu1 %6308 }
0x19e5   :  { %v6310_v14 = vsub.f32 %v12714_v11, %v6309_v4 }
0x19e7   :  { %v6311_v44 = vmul.f32 1.442695, %v6310_v14 }
0x19e9   :  { %12929 = vpow2.f32 %v6311_v44 }
0x19f3   :  { %v12930_v32 = vpop.eup %12929 }
0x19f4   :  { %10313 = vmatmul.mubr.f32.vlgmr.msra.gmra.mrb[54].mxu0 %v12930_v32 }
0x19f5   :  { %12303 = vmatpush3.bf16.msra.mxu0 %v13472_v23  ;;  %10347 = vmatprep.mubr.msk.f32.mxu0 %vm12984_vm1, %v15409_v61 }
0x19f6   :  { %12304 = vmatprep.subr.bf16.mxu0 %v15407_v55 }
0x19f9   :  { %12306 = vmatpush3.bf16.msra.mxu0 %v13478_v27 }
0x19fa   :  { %12307 = vmatprep.subr.bf16.mxu0 %v15407_v55 }
0x19fd   :  { %12309 = vmatpush3.bf16.msra.mxu0 %v13490_v37 }
0x19fe   :  { %12310 = vmatprep.subr.bf16.mxu0 %v15407_v55 }
0x1a01   :  { %12312 = vmatpush3.bf16.msra.mxu0 %v13502_v53 }
0x1a02   :  { %12313 = vmatprep.subr.bf16.mxu0 %v15407_v55 }
0x1a03   :  { %v6394_v32 = vpop.xlane.xlu0 %6393 }
0x1a04   :  { %v6395_v44 = vsub.f32 %v12715_v59, %v6394_v32  ;;  %v15685_v32 = vld [vmem:[#allocation28_spill] sm:$0xff] }
0x1a05   :  { %12315 = vmatpush3.bf16.msra.mxu0 %v13514_v58 }
0x1a06   :  { %v6396_v14 = vmul.f32 1.442695, %v6395_v44  ;;  %12316 = vmatprep.subr.bf16.mxu0 %v15407_v55  ;;  %v15686_v44 = vld [vmem:[#allocation31_spill] sm:$0xff] }
0x1a07   :  { %v6479_v57 = vpop.xlane.xlu0 %6478 }
0x1a08   :  { %12931 = vpow2.f32 %v6396_v14  ;;  %v6480_v60 = vsub.f32 %v12716_v46, %v6479_v57  ;;  %v15687_v14 = vld [vmem:[#allocation32_spill] sm:$0xff]  ;;  %v15689_v57 = vld [vmem:[#allocation33_spill] sm:$0xff] }
0x1a09   :  { %12318 = vmatpush3.bf16.msra.mxu0 %v13546_v5 }
0x1a0a   :  { %12319 = vmatprep.subr.bf16.mxu0 %v15407_v55  ;;  %v6481_v19 = vmul.f32 1.442695, %v6480_v60  ;;  %v15690_v60 = vld [vmem:[#allocation34_spill] sm:$0xff] }
0x1a0d   :  { %12321 = vmatpush3.bf16.msra.mxu0 %v13558_v12 }
0x1a0e   :  { %12322 = vmatprep.subr.bf16.mxu0 %v15407_v55 }
0x1a11   :  { %12324 = vmatpush3.bf16.msra.mxu0 %v13572_v25 }
0x1a12   :  { %v12932_v4 = vpop.eup %12931  ;;  %12325 = vmatprep.subr.bf16.mxu0 %v15407_v55 }
0x1a14   :  { %10348 = vmatmul.mubr.f32.vlgmr.msra.gmra.mrb[56].mxu0 %v12932_v4  ;;  %v15688_v4 = vld [vmem:[#allocation30_spill] sm:$0xff] }
0x1a15   :  { %12327 = vmatpush3.bf16.msra.mxu0 %v13472_v23  ;;  %10382 = vmatprep.mubr.msk.f32.mxu0 %vm12984_vm1, %v15409_v61 }
0x1a16   :  { %12328 = vmatprep.subr.bf16.mxu0 %v15407_v55 }
0x1a19   :  { %12330 = vmatpush3.bf16.msra.mxu0 %v13478_v27 }
0x1a1a   :  { %12331 = vmatprep.subr.bf16.mxu0 %v15407_v55 }
0x1a1d   :  { %12333 = vmatpush3.bf16.msra.mxu0 %v13490_v37 }
0x1a1e   :  { %12334 = vmatprep.subr.bf16.mxu0 %v15407_v55 }
0x1a21   :  { %12336 = vmatpush3.bf16.msra.mxu0 %v13502_v53 }
0x1a22   :  { %12337 = vmatprep.subr.bf16.mxu0 %v15407_v55 }
0x1a23   :  { %v6564_v45 = vpop.xlane.xlu1 %6563 }
0x1a24   :  { %v6565_v11 = vsub.f32 %v12717_v3, %v6564_v45  ;;  %v15684_v3 = vld [vmem:[#allocation29_spill] sm:$0xff]  ;;  %v15691_v45 = vld [vmem:[#allocation35_spill] sm:$0xff] }
0x1a25   :  { %12339 = vmatpush3.bf16.msra.mxu0 %v13514_v58 }
0x1a26   :  { %v6566_v59 = vmul.f32 1.442695, %v6565_v11  ;;  %12340 = vmatprep.subr.bf16.mxu0 %v15407_v55  ;;  %v15692_v11 = vld [vmem:[#allocation36_spill] sm:$0xff] }
0x1a28   :  { %12933 = vpow2.f32 %v6566_v59  ;;  %v15694_v59 = vld [vmem:[#allocation38_spill] sm:$0xff] }
0x1a29   :  { %12935 = vpow2.f32 %v6481_v19  ;;  %12342 = vmatpush3.bf16.msra.mxu0 %v13546_v5  ;;  %v15693_v19 = vld [vmem:[#allocation37_spill] sm:$0xff] }
0x1a2a   :  { %12343 = vmatprep.subr.bf16.mxu0 %v15407_v55 }
0x1a2d   :  { %12345 = vmatpush3.bf16.msra.mxu0 %v13558_v12 }
0x1a2e   :  { %12346 = vmatprep.subr.bf16.mxu0 %v15407_v55 }
0x1a31   :  { %12348 = vmatpush3.bf16.msra.mxu0 %v13572_v25 }
0x1a32   :  { %v12934_v46 = vpop.eup %12933  ;;  %12374 = vmatprep.subr.bf16.mxu0 %v15684_v3 }
0x1a33   :  { %v12936_v49 = vpop.eup %12935  ;;  %10418 = vmatmul.mubr.f32.vlgmr.msra.gmra.mrb[64].mxu1 %v12934_v46  ;;  %v15695_v46 = vld [vmem:[#allocation39_spill] sm:$0xff] }
0x1a34   :  { %10383 = vmatmul.mubr.f32.vlgmr.msra.gmra.mrb[58].mxu0 %v12936_v49  ;;  %12407 = vmatpush3.bf16.msra.mxu1 %v15685_v32  ;;  %v15696_v49 = vld [vmem:[#allocation40_spill] sm:$0xff]  ;;  %v15698_v32 = vld [vmem:[#allocation42_spill] sm:$0xff] }
0x1a35   :  { %12408 = vmatprep.subr.bf16.mxu1 %v15407_v55  ;;  %12376 = vmatpush3.bf16.msra.mxu0 %v15686_v44 }
0x1a36   :  { %12378 = vmatprep.subr.bf16.mxu0 %v15687_v14  ;;  %10452 = vmatprep.mubr.msk.f32.mxu1 %vm12984_vm1, %v15409_v61 }
0x1a38   :  { %12410 = vmatpush3.bf16.msra.mxu1 %v15688_v4  ;;  %v15697_v4 = vld [vmem:[#allocation41_spill] sm:$0xff] }
0x1a39   :  { %12411 = vmatprep.subr.bf16.mxu1 %v15407_v55  ;;  %12380 = vmatpush3.bf16.msra.mxu0 %v15689_v57 }
0x1a3a   :  { %12382 = vmatprep.subr.bf16.mxu0 %v15690_v60 }
0x1a3c   :  { %12413 = vmatpush3.bf16.msra.mxu1 %v15691_v45  ;;  %v15699_v45 = vld [vmem:[#allocation44_spill] sm:$0xff] }
0x1a3d   :  { %12414 = vmatprep.subr.bf16.mxu1 %v15407_v55  ;;  %12384 = vmatpush3.bf16.msra.mxu0 %v15692_v11  ;;  %v15703_v11 = vld [vmem:[#allocation45_spill] sm:$0xff] }
0x1a3e   :  { %12386 = vmatprep.subr.bf16.mxu0 %v15693_v19  ;;  %v15701_v19 = vld [vmem:[#allocation46_spill] sm:$0xff] }
0x1a40   :  { %12416 = vmatpush3.bf16.msra.mxu1 %v15694_v59  ;;  %v15702_v59 = vld [vmem:[#allocation47_spill] sm:$0xff] }
0x1a41   :  { %12417 = vmatprep.subr.bf16.mxu1 %v15407_v55  ;;  %12388 = vmatpush3.bf16.msra.mxu0 %v15695_v46  ;;  %v15706_v46 = vld [vmem:[#allocation48_spill] sm:$0xff] }
0x1a42   :  { %12390 = vmatprep.subr.bf16.mxu0 %v15696_v49  ;;  %v15704_v49 = vld [vmem:[#allocation49_spill] sm:$0xff] }
0x1a44   :  { %12419 = vmatpush3.bf16.msra.mxu1 %v15697_v4  ;;  %v15705_v4 = vld [vmem:[#allocation50_spill] sm:$0xff] }
0x1a45   :  { %12420 = vmatprep.subr.bf16.mxu1 %v15407_v55  ;;  %12392 = vmatpush3.bf16.msra.mxu0 %v15698_v32  ;;  %v15707_v32 = vld [vmem:[#allocation51_spill] sm:$0xff] }
0x1a46   :  { %12394 = vmatprep.subr.bf16.mxu0 %v15699_v45 }
0x1a48   :  { %12422 = vmatpush3.bf16.msra.mxu1 %v15700_v36  ;;  %v15708_v36 = vld [vmem:[#allocation4_spill] sm:$0xff] }
0x1a49   :  { %12423 = vmatprep.subr.bf16.mxu1 %v15407_v55  ;;  %12396 = vmatpush3.bf16.msra.mxu0 %v15701_v19 }
0x1a4a   :  { %12398 = vmatprep.subr.bf16.mxu0 %v15702_v59 }
0x1a4c   :  { %12425 = vmatpush3.bf16.msra.mxu1 %v15703_v11 }
0x1a4d   :  { %12426 = vmatprep.subr.bf16.mxu1 %v15407_v55  ;;  %12400 = vmatpush3.bf16.msra.mxu0 %v15704_v49 }
0x1a4e   :  { %12402 = vmatprep.subr.bf16.mxu0 %v15705_v4 }
0x1a50   :  { %12428 = vmatpush3.bf16.msra.mxu1 %v15706_v46 }
0x1a51   :  { %12404 = vmatpush3.bf16.msra.mxu0 %v15707_v32  ;;  %12528 = vmatprep.subr.bf16.mxu1 %v15407_v55 }
0x1a52   :  { %12430 = vmatprep.subr.bf16.mxu0 %v15708_v36 }
0x1ac7   :  { %v6379_v45 = vpop.f32.mrb[54].mxu0 }
0x1ac8   :  { %12937 = vrcp.f32 %v6379_v45  ;;  %v10314_v19 = vpop.f32.mrb[55].mxu0 }
0x1ad2   :  { %v12938_v59 = vpop.eup %12937 }
0x1ad3   :  { %v6384_v60 = vmul.f32 %v12938_v59, %v6379_v45 }
0x1ad5   :  { %v6385_v11 = vsub.f32 2.0, %v6384_v60 }
0x1ad7   :  { %v6386_v57 = vmul.f32 %v12938_v59, %v6385_v11 }
0x1ad9   :  { %6389 = vperm.xlu0 %12771, %v6386_v57  }
0x1ae7   :  { %v6464_v14 = vpop.f32.mrb[56].mxu0 }
0x1ae8   :  { %v10349_v49 = vpop.f32.mrb[57].mxu0  ;;  %12939 = vrcp.f32 %v6464_v14 }
0x1af2   :  { %v12940_v3 = vpop.eup %12939 }
0x1af3   :  { %v6469_v41 = vmul.f32 %v12940_v3, %v6464_v14 }
0x1af5   :  { %v6470_v11 = vsub.f32 2.0, %v6469_v41 }
0x1af7   :  { %v6471_v59 = vmul.f32 %v12940_v3, %v6470_v11 }
0x1b06   :  { %v6634_v4 = vpop.f32.mrb[64].mxu1 }
0x1b07   :  { %12941 = vrcp.f32 %v6634_v4  ;;  %v6549_v46 = vpop.f32.mrb[58].mxu0  ;;  %v10419_v44 = vpop.f32.mrb[65].mxu1 }
0x1b08   :  { %12943 = vrcp.f32 %v6549_v46  ;;  %v10384_v32 = vpop.f32.mrb[59].mxu0  ;;  %v12713_v44 = vadd.f32 %v14984_v38, %v15476_v47 }
0x1b0a   :  { %12945 = vtanh.f32 %v12713_v44 }
0x1b11   :  { %v12942_v7 = vpop.eup %12941 }
0x1b12   :  { %v12944_v36 = vpop.eup %12943  ;;  %v6639_v29 = vmul.f32 %v12942_v7, %v6634_v4 }
0x1b13   :  { %v6554_v19 = vmul.f32 %v12944_v36, %v6549_v46 }
0x1b14   :  { %v6640_v2 = vsub.f32 2.0, %v6639_v29 }
0x1b15   :  { %v6555_v54 = vsub.f32 2.0, %v6554_v19 }
0x1b16   :  { %v6641_v60 = vmul.f32 %v12942_v7, %v6640_v2 }
0x1b17   :  { %v6556_v57 = vmul.f32 %v12944_v36, %v6555_v54  ;;  %v12946_v54 = vpop.eup %12945 }
0x1b18   :  { %6644 = vperm.xlu0 %12771, %v6641_v60  }
0x1b19   :  { %6559 = vperm.xlu1 %12772, %v6556_v57  }
0x1b1d   :  { %6474 = vperm.xlu1 %12772, %v6471_v59  }
0x1b58   :  { %v6390_v32 = vpop.permute.xlu0 %6389 }
0x1b59   :  { %v6392_v20 = vmul.f32 %v6390_v32, %v6379_v45 }
0x1b5b   :  { %v6648_v19 = vsub.f32 1.0, %v6392_v20 }
0x1b97   :  { %v6645_v49 = vpop.permute.xlu0 %6644 }
0x1b98   :  { %v6560_v28 = vpop.permute.xlu1 %6559  ;;  %v6647_v21 = vmul.f32 %v6645_v49, %v6634_v4 }
0x1b99   :  { %v6562_v31 = vmul.f32 %v6560_v28, %v6549_v46  ;;  %v15725_v46 = vld [vmem:[#allocation22_spill] sm:$0xff] }
0x1b9b   :  { %v6649_v1 = vsub.f32 1.0, %v6562_v31 }
0x1b9c   :  { %v6475_v29 = vpop.permute.xlu1 %6474 }
0x1b9d   :  { %v6650_v2 = vmul.f32 %v6649_v1, %v6647_v21  ;;  %v6477_v7 = vmul.f32 %v6475_v29, %v6464_v14  ;;  %v15726_v29 = vld [vmem:[#allocation24_spill] sm:$0xff] }
0x1b9f   :  { %v6651_v41 = vsub.f32 %v6647_v21, %v6650_v2  ;;  %v6652_v36 = vsub.f32 %v6649_v1, %v6650_v2  ;;  %v6657_v3 = vmul.f32 %v12946_v54, %v6650_v2  ;;  %v6653_v60 = vmul.f32 %v6648_v19, %v6477_v7 }
0x1ba1   :  { %v6664_v11 = vmul.f32 %v12946_v54, %v6652_v36  ;;  %v6654_v57 = vsub.f32 %v6477_v7, %v6653_v60  ;;  %v6655_v38 = vsub.f32 %v6648_v19, %v6653_v60  ;;  %v6656_v59 = vmul.f32 %v6653_v60, %v14928_v35  ;;  %v15727_v7 = vld [vmem:[#allocation25_spill] sm:$0xff]  ;;  %v15728_v36 = vld [vmem:[#allocation26_spill] sm:$0xff] }
0x1ba2   :  { %v6660_v44 = vmul.f32 %v12946_v54, %v6651_v41 }
0x1ba3   :  { %v6659_v45 = vmul.f32 %v6654_v57, %v14928_v35  ;;  %v6663_v28 = vmul.f32 %v6655_v38, %v14928_v35  ;;  %v6658_v31 = vadd.f32 %v6657_v3, %v6656_v59  ;;  %v7809_v35 = vld [vmem:[%s15277_s0 + $0x38] sm:$0xff] }
0x1ba5   :  { %12947 = vtanh.f32 %v6658_v31  ;;  %10453 = vmatmul.mubr.f32.vlgmr.msra.gmra.mrb[66].mxu1 %v6658_v31  ;;  %v6661_v20 = vadd.f32 %v6660_v44, %v6659_v45  ;;  %v6665_v14 = vadd.f32 %v6664_v11, %v6663_v28 }
0x1ba6   :  { %12530 = vmatpush3.bf16.msra.mxu1 %v13472_v23  ;;  %10529 = vmatprep.mubr.msk.f32.mxu1 %vm12984_vm1, %v15409_v61 }
0x1ba7   :  { %v6662_v1 = vadd.f32 %v6661_v20, %v6658_v31  ;;  %v6666_v21 = vadd.f32 %v6665_v14, %v6658_v31  ;;  %12531 = vmatprep.subr.bf16.mxu1 %v15407_v55 }
0x1ba9   :  { %12949 = vtanh.f32 %v6662_v1  ;;  %6738 = vmatprep.mubr.f32.mxu0 %v6662_v1 }
0x1baa   :  { %12951 = vtanh.f32 %v6666_v21  ;;  %6739 = vmatmul.mubr.f32.vlgmr.msra.gmra.mrb[60].mxu0 %v6666_v21  ;;  %12533 = vmatpush3.bf16.msra.mxu1 %v13478_v27  ;;  %v15732_v21 = vld [vmem:[#allocation33_spill] sm:$0xff] }
0x1bab   :  { %12432 = vmatpush1.bf16.msra.mxu0 %v13050_v9  ;;  %6884 = vmatprep.mubr.f32.mxu0 %v15409_v61 }
0x1bac   :  { %12434 = vmatprep.subr.bf16.mxu0 %v13075_v17  ;;  %12534 = vmatprep.subr.bf16.mxu1 %v15407_v55 }
0x1bae   :  { %7810 = vmatmul.mubr.msk.f32.vlgmr.msra.gmra.mrb[62].mxu0 %vm223_vm0, %v7809_v35  ;;  %12536 = vmatpush3.bf16.msra.mxu1 %v13490_v37 }
0x1baf   :  { %v12948_v4 = vpop.eup %12947  ;;  %12436 = vmatpush1.bf16.msra.mxu0 %v13089_v22  ;;  %6955 = vmatprep.mubr.f32.mxu0 %v15409_v61 }
0x1bb0   :  { %7808 = vst [vmem:[%s15281_s7 + $0xa0] sm:$0xff] %v12948_v4  ;;  %12437 = vmatprep.subr.bf16.mxu0 %v15407_v55  ;;  %12537 = vmatprep.subr.bf16.mxu1 %v15407_v55  ;;  %v15735_v4 = vld [vmem:[#allocation37_spill] sm:$0xff] }
0x1bb2   :  { %7811 = vmatmul.mubr.msk.f32.vlgmr.msra.gmra.mrb[64].mxu0 %vm223_vm0, %v7809_v35  ;;  %12539 = vmatpush3.bf16.msra.mxu1 %v13502_v53 }
0x1bb3   :  { %v12950_v9 = vpop.eup %12949  ;;  %12439 = vmatpush3.bf16.msra.mxu0 %v13127_v34  ;;  %10459 = vmatprep.mubr.msk.f32.mxu0 %vm12984_vm1, %v15409_v61 }
0x1bb4   :  { %v12952_v17 = vpop.eup %12951  ;;  %7807 = vst [vmem:[%s15281_s7 + $0x98] sm:$0xff] %v12950_v9  ;;  %12441 = vmatprep.subr.bf16.mxu0 %v13048_v8  ;;  %12540 = vmatprep.subr.bf16.mxu1 %v15407_v55  ;;  %v15737_v9 = vld [vmem:[#allocation40_spill] sm:$0xff] }
0x1bb5   :  { %7806 = vst [vmem:[%s15281_s7 + $0x90] sm:$0xff] %v12952_v17  ;;  %v15739_v17 = vld [vmem:[#allocation44_spill] sm:$0xff] }
0x1bb6   :  { %10460 = vmatmul.mubr.msk.f32.vlgmr.msra.gmra.mrb[66].mxu0 %vm223_vm0, %v7809_v35  ;;  %12542 = vmatpush3.bf16.msra.mxu1 %v13514_v58  ;;  %v15733_v35 = vld [vmem:[#allocation34_spill] sm:$0xff] }
0x1bb7   :  { %12443 = vmatpush1.bf16.msra.mxu0 %v13062_v13  ;;  %7096 = vmatprep.mubr.f32.mxu0 %v15409_v61 }
0x1bb8   :  { %12445 = vmatprep.subr.bf16.mxu0 %v13077_v18  ;;  %12543 = vmatprep.subr.bf16.mxu1 %v15407_v55 }
0x1bba   :  { %12545 = vmatpush3.bf16.msra.mxu1 %v13546_v5 }
0x1bbb   :  { %12447 = vmatpush1.bf16.msra.mxu0 %v13102_v26  ;;  %12546 = vmatprep.subr.bf16.mxu1 %v15407_v55 }
0x1bbc   :  { %12449 = vmatprep.subr.bf16.mxu0 %v13114_v30  ;;  %v12981_v30 = vld [vmem:[%s15282_s5] ss:$0 sm:$0xff] }
0x1bbe   :  { %12548 = vmatpush3.bf16.msra.mxu1 %v13558_v12 }
0x1bbf   :  { %12451 = vmatpush1.bf16.msra.mxu0 %v13140_v39  ;;  %12549 = vmatprep.subr.bf16.mxu1 %v15407_v55 }
0x1bc0   :  { %12453 = vmatprep.subr.bf16.mxu0 %v13151_v43 }
0x1bc2   :  { %12551 = vmatpush3.bf16.msra.mxu1 %v13572_v25 }
0x1bc3   :  { %12455 = vmatpush1.bf16.msra.mxu0 %v13179_v51  ;;  %12552 = vmatprep.subr.bf16.mxu1 %v15407_v55  ;;  %v15710_v51 = vld [vmem:[#allocation7_spill] sm:$0xff] }
0x1bc4   :  { %12457 = vmatprep.subr.bf16.mxu0 %v13193_v56  ;;  %v15711_v56 = vld [vmem:[#allocation8_spill] sm:$0xff] }
0x1bc7   :  { %12459 = vmatpush1.bf16.msra.mxu0 %v13217_v63  ;;  %v15712_v63 = vld [vmem:[#allocation9_spill] sm:$0xff] }
0x1bc8   :  { %12461 = vmatprep.subr.bf16.mxu0 %v13231_v6  ;;  %v15714_v6 = vld [vmem:[#allocation12_spill] sm:$0xff] }
0x1bcb   :  { %12463 = vmatpush1.bf16.msra.mxu0 %v13253_v16  ;;  %v15719_v16 = vld [vmem:[#allocation14_spill] sm:$0xff] }
0x1bcc   :  { %12465 = vmatprep.subr.bf16.mxu0 %v13267_v24  ;;  %v15720_v24 = vld [vmem:[#allocation17_spill] sm:$0xff] }
0x1bcf   :  { %12467 = vmatpush1.bf16.msra.mxu0 %v13289_v33  ;;  %v15721_v33 = vld [vmem:[#allocation18_spill] sm:$0xff] }
0x1bd0   :  { %12469 = vmatprep.subr.bf16.mxu0 %v13303_v42  ;;  %v15722_v42 = vld [vmem:[#allocation19_spill] sm:$0xff] }
0x1bd3   :  { %12471 = vmatpush1.bf16.msra.mxu0 %v13319_v48  ;;  %v15723_v48 = vld [vmem:[#allocation20_spill] sm:$0xff] }
0x1bd4   :  { %12473 = vmatprep.subr.bf16.mxu0 %v13142_v40  ;;  %v15709_v40 = vld [vmem:[#allocation6_spill] sm:$0xff] }
0x1c78   :  { %v6810_v8 = vpop.f32.mrb[66].mxu1 }
0x1c79   :  { %v10454_v13 = vpop.f32.mrb[67].mxu1 }
0x1c7a   :  { %v15741_v13 = vld [vmem:[#allocation47_spill] sm:$0xff] }
0x1c7d   :  { %v8776_v18 = vpop.f32.mrb[60].mxu0 }
0x1c7e   :  { %v8777_v22 = vpop.f32.mrb[61].mxu0 }
0x1c7f   :  { %v8778_v26 = vadd.f32 %v8777_v22, %v8776_v18  ;;  %v15742_v18 = vld [vmem:[#allocation49_spill] sm:$0xff]  ;;  %v15743_v22 = vld [vmem:[#allocation50_spill] sm:$0xff] }
0x1c81   :  { %v6741_v34 = vadd.f32 %v12981_v30, %v8778_v26  ;;  %v15744_v26 = vld [vmem:[#allocation51_spill] sm:$0xff] }
0x1c83   :  { %v15128_v39 = vadd.f32 %v6810_v8, %v6741_v34  ;;  %v15740_v8 = vld [vmem:[#allocation46_spill] sm:$0xff] }
0x1c85   :  { %12953 = vtanh.f32 %v15128_v39 }
0x1c8f   :  { %v12954_v43 = vpop.eup %12953 }
0x1c90   :  { %7097 = vmatmul.mubr.f32.vlgmr.msra.gmra.mrb[62].mxu0 %v12954_v43 }
0x1c91   :  { %12475 = vmatpush1.bf16.msra.mxu0 %v13175_v50  ;;  %7167 = vmatprep.mubr.f32.mxu0 %v15409_v61  ;;  %v15713_v50 = vld [vmem:[#allocation10_spill] sm:$0xff] }
0x1c92   :  { %12477 = vmatprep.subr.bf16.mxu0 %v13181_v52  ;;  %v15715_v52 = vld [vmem:[#allocation13_spill] sm:$0xff] }
0x1c95   :  { %12479 = vmatpush1.bf16.msra.mxu0 %v13212_v62  ;;  %v15716_v62 = vld [vmem:[#allocation15_spill] sm:$0xff] }
0x1c96   :  { %12481 = vmatprep.subr.bf16.mxu0 %v13219_v0  ;;  %v15717_v0 = vld [vmem:[#allocation16_spill] sm:$0xff] }
0x1c99   :  { %12483 = vmatpush1.bf16.msra.mxu0 %v13249_v15  ;;  %v15718_v15 = vld [vmem:[#allocation11_spill] sm:$0xff] }
0x1c9a   :  { %12485 = vmatprep.subr.bf16.mxu0 %v15662_v10  ;;  %v15724_v10 = vld [vmem:[#allocation21_spill] sm:$0xff] }
0x1c9d   :  { %12487 = vmatpush1.bf16.msra.mxu0 %v15709_v40 }
0x1c9e   :  { %12489 = vmatprep.subr.bf16.mxu0 %v15710_v51 }
0x1ca1   :  { %12491 = vmatpush1.bf16.msra.mxu0 %v15711_v56 }
0x1ca2   :  { %12493 = vmatprep.subr.bf16.mxu0 %v15712_v63 }
0x1ca5   :  { %12495 = vmatpush1.bf16.msra.mxu0 %v15713_v50 }
0x1ca6   :  { %12497 = vmatprep.subr.bf16.mxu0 %v15714_v6 }
0x1ca9   :  { %12499 = vmatpush1.bf16.msra.mxu0 %v15715_v52 }
0x1caa   :  { %12501 = vmatprep.subr.bf16.mxu0 %v15716_v62 }
0x1cad   :  { %12503 = vmatpush1.bf16.msra.mxu0 %v15717_v0 }
0x1cae   :  { %12504 = vmatprep.subr.bf16.mxu0 %v15407_v55 }
0x1cb0   :  { %7168 = vmatmul.mubr.f32.vlgmr.msra.gmra.mrb[64].mxu0 %v12954_v43 }
0x1cb1   :  { %12506 = vmatpush3.bf16.msra.mxu0 %v15718_v15  ;;  %10494 = vmatprep.mubr.msk.f32.mxu0 %vm12984_vm1, %v15409_v61 }
0x1cb2   :  { %12507 = vmatprep.subr.bf16.mxu0 %v15407_v55 }
0x1cb5   :  { %12509 = vmatpush3.bf16.msra.mxu0 %v15719_v16 }
0x1cb6   :  { %12510 = vmatprep.subr.bf16.mxu0 %v15407_v55 }
0x1cb9   :  { %12512 = vmatpush3.bf16.msra.mxu0 %v15720_v24 }
0x1cba   :  { %12513 = vmatprep.subr.bf16.mxu0 %v15407_v55 }
0x1cbd   :  { %12515 = vmatpush3.bf16.msra.mxu0 %v15721_v33 }
0x1cbe   :  { %12516 = vmatprep.subr.bf16.mxu0 %v15407_v55 }
0x1cc1   :  { %12518 = vmatpush3.bf16.msra.mxu0 %v15722_v42 }
0x1cc2   :  { %12519 = vmatprep.subr.bf16.mxu0 %v15407_v55 }
0x1cc5   :  { %12521 = vmatpush3.bf16.msra.mxu0 %v15723_v48 }
0x1cc6   :  { %12522 = vmatprep.subr.bf16.mxu0 %v15407_v55 }
0x1cc9   :  { %12524 = vmatpush3.bf16.msra.mxu0 %v15724_v10  ;;  %v15745_v10 = vld [vmem:[#allocation27_spill] sm:$0xff] }
0x1cca   :  { %12525 = vmatprep.subr.bf16.mxu0 %v15407_v55 }
0x1ccd   :  { %12527 = vmatpush3.bf16.msra.mxu0 %v15725_v46 }
0x1cce   :  { %12600 = vmatprep.subr.bf16.mxu0 %v15407_v55 }
0x1cd0   :  { %10495 = vmatmul.mubr.f32.vlgmr.msra.gmra.mrb[66].mxu0 %v12954_v43 }
0x1cd1   :  { %12602 = vmatpush3.bf16.msra.mxu0 %v13472_v23  ;;  %10634 = vmatprep.mubr.msk.f32.mxu0 %vm12984_vm1, %v15409_v61 }
0x1cd2   :  { %12603 = vmatprep.subr.bf16.mxu0 %v15407_v55 }
0x1cd5   :  { %12605 = vmatpush3.bf16.msra.mxu0 %v13478_v27 }
0x1cd6   :  { %12606 = vmatprep.subr.bf16.mxu0 %v15407_v55 }
0x1cd9   :  { %12608 = vmatpush3.bf16.msra.mxu0 %v13490_v37 }
0x1cda   :  { %12609 = vmatprep.subr.bf16.mxu0 %v15407_v55 }
0x1cdd   :  { %12611 = vmatpush3.bf16.msra.mxu0 %v13502_v53 }
0x1cde   :  { %12612 = vmatprep.subr.bf16.mxu0 %v15407_v55 }
0x1ce1   :  { %12614 = vmatpush3.bf16.msra.mxu0 %v13514_v58 }
0x1ce2   :  { %12615 = vmatprep.subr.bf16.mxu0 %v15407_v55 }
0x1ce5   :  { %12617 = vmatpush3.bf16.msra.mxu0 %v13546_v5 }
0x1ce6   :  { %12618 = vmatprep.subr.bf16.mxu0 %v15407_v55 }
0x1ce9   :  { %12620 = vmatpush3.bf16.msra.mxu0 %v13558_v12 }
0x1cea   :  { %12621 = vmatprep.subr.bf16.mxu0 %v15407_v55 }
0x1ced   :  { %12623 = vmatpush3.bf16.msra.mxu0 %v13572_v25 }
0x1cee   :  { %12656 = vmatprep.subr.bf16.mxu0 %v15407_v55 }
0x1d63   :  { %v15184_v32 = vpop.f32.mrb[62].mxu0 }
0x1d64   :  { %v7100_v49 = vpop.f32.mrb[63].mxu0 }
0x1d65   :  { %v12719_v19 = vadd.f32 %v7100_v49, %v15726_v29 }
0x1d67   :  { %7250 = vmax.xlane.f32.xlu1 %v12719_v19 }
0x1d83   :  { %v7169_v2 = vpop.f32.mrb[64].mxu0 }
0x1d84   :  { %v12720_v54 = vadd.f32 %v7169_v2, %v15727_v7  ;;  %v7171_v41 = vpop.f32.mrb[65].mxu0 }
0x1d85   :  { %v12721_v3 = vadd.f32 %v7171_v41, %v15728_v36 }
0x1d86   :  { %7335 = vmax.xlane.f32.xlu0 %v12720_v54 }
0x1d8a   :  { %7420 = vmax.xlane.f32.xlu0 %v12721_v3 }
0x1da3   :  { %v15189_v60 = vpop.f32.mrb[66].mxu0 }
0x1da4   :  { %v10496_v11 = vpop.f32.mrb[67].mxu0  ;;  %v12722_v46 = vadd.f32 %v15189_v60, %v15745_v10  ;;  %v15747_v60 = vld [vmem:[#allocation30_spill] sm:$0xff] }
0x1df4   :  { %v7251_v57 = vpop.xlane.xlu1 %7250 }
0x1df5   :  { %v7252_v38 = vsub.f32 %v12719_v19, %v7251_v57 }
0x1df7   :  { %v7253_v59 = vmul.f32 1.442695, %v7252_v38 }
0x1df9   :  { %12955 = vpow2.f32 %v7253_v59  ;;  %v15746_v59 = vld [vmem:[#allocation28_spill] sm:$0xff] }
0x1e03   :  { %v12956_v44 = vpop.eup %12955 }
0x1e04   :  { %10530 = vmatmul.mubr.f32.vlgmr.msra.gmra.mrb[68].mxu1 %v12956_v44  ;;  %v15748_v44 = vld [vmem:[#allocation35_spill] sm:$0xff] }
0x1e05   :  { %12554 = vmatpush3.bf16.msra.mxu1 %v13472_v23  ;;  %10564 = vmatprep.mubr.msk.f32.mxu1 %vm12984_vm1, %v15409_v61 }
0x1e06   :  { %12555 = vmatprep.subr.bf16.mxu1 %v15407_v55 }
0x1e09   :  { %12557 = vmatpush3.bf16.msra.mxu1 %v13478_v27 }
0x1e0a   :  { %12558 = vmatprep.subr.bf16.mxu1 %v15407_v55 }
0x1e0d   :  { %12560 = vmatpush3.bf16.msra.mxu1 %v13490_v37 }
0x1e0e   :  { %12561 = vmatprep.subr.bf16.mxu1 %v15407_v55 }
0x1e11   :  { %12563 = vmatpush3.bf16.msra.mxu1 %v13502_v53 }
0x1e12   :  { %12564 = vmatprep.subr.bf16.mxu1 %v15407_v55 }
0x1e13   :  { %v7336_v45 = vpop.xlane.xlu0 %7335 }
0x1e14   :  { %v7337_v28 = vsub.f32 %v12720_v54, %v7336_v45  ;;  %v15749_v45 = vld [vmem:[#allocation38_spill] sm:$0xff] }
0x1e15   :  { %12566 = vmatpush3.bf16.msra.mxu1 %v13514_v58 }
0x1e16   :  { %v7338_v31 = vmul.f32 1.442695, %v7337_v28  ;;  %12567 = vmatprep.subr.bf16.mxu1 %v15407_v55  ;;  %v15750_v28 = vld [vmem:[#allocation41_spill] sm:$0xff] }
0x1e17   :  { %v7421_v14 = vpop.xlane.xlu0 %7420 }
0x1e18   :  { %12957 = vpow2.f32 %v7338_v31  ;;  %v7422_v1 = vsub.f32 %v12721_v3, %v7421_v14  ;;  %v15751_v31 = vld [vmem:[#allocation43_spill] sm:$0xff] }
0x1e19   :  { %12569 = vmatpush3.bf16.msra.mxu1 %v13546_v5 }
0x1e1a   :  { %12570 = vmatprep.subr.bf16.mxu1 %v15407_v55 }
0x1e1d   :  { %12572 = vmatpush3.bf16.msra.mxu1 %v13558_v12 }
0x1e1e   :  { %12573 = vmatprep.subr.bf16.mxu1 %v15407_v55 }
0x1e21   :  { %12575 = vmatpush3.bf16.msra.mxu1 %v13572_v25 }
0x1e22   :  { %v12958_v20 = vpop.eup %12957  ;;  %12576 = vmatprep.subr.bf16.mxu1 %v15407_v55 }
0x1e24   :  { %10565 = vmatmul.mubr.f32.vlgmr.msra.gmra.mrb[70].mxu1 %v12958_v20  ;;  %v15753_v20 = vld [vmem:[#allocation48_spill] sm:$0xff] }
0x1e25   :  { %12578 = vmatpush3.bf16.msra.mxu1 %v13472_v23  ;;  %10599 = vmatprep.mubr.msk.f32.mxu1 %vm12984_vm1, %v15409_v61  ;;  %v7423_v23 = vmul.f32 1.442695, %v7422_v1 }
0x1e26   :  { %12579 = vmatprep.subr.bf16.mxu1 %v15407_v55 }
0x1e27   :  { %12959 = vpow2.f32 %v7423_v23 }
0x1e29   :  { %12581 = vmatpush3.bf16.msra.mxu1 %v13478_v27  ;;  %v15729_v27 = vld [vmem:[#allocation29_spill] sm:$0xff] }
0x1e2a   :  { %12582 = vmatprep.subr.bf16.mxu1 %v15407_v55 }
0x1e2d   :  { %12584 = vmatpush3.bf16.msra.mxu1 %v13490_v37 }
0x1e2e   :  { %12585 = vmatprep.subr.bf16.mxu1 %v15407_v55 }
0x1e31   :  { %12587 = vmatpush3.bf16.msra.mxu1 %v13502_v53  ;;  %v12960_v37 = vpop.eup %12959  ;;  %v15730_v53 = vld [vmem:[#allocation31_spill] sm:$0xff] }
0x1e32   :  { %12588 = vmatprep.subr.bf16.mxu1 %v15407_v55 }
0x1e35   :  { %12590 = vmatpush3.bf16.msra.mxu1 %v13514_v58  ;;  %v15731_v58 = vld [vmem:[#allocation32_spill] sm:$0xff] }
0x1e36   :  { %12591 = vmatprep.subr.bf16.mxu1 %v15407_v55 }
0x1e39   :  { %12593 = vmatpush3.bf16.msra.mxu1 %v13546_v5  ;;  %v15734_v5 = vld [vmem:[#allocation36_spill] sm:$0xff] }
0x1e3a   :  { %12594 = vmatprep.subr.bf16.mxu1 %v15407_v55 }
0x1e3d   :  { %12596 = vmatpush3.bf16.msra.mxu1 %v13558_v12  ;;  %v15736_v12 = vld [vmem:[#allocation39_spill] sm:$0xff] }
0x1e3e   :  { %12597 = vmatprep.subr.bf16.mxu1 %v15407_v55 }
0x1e41   :  { %12599 = vmatpush3.bf16.msra.mxu1 %v13572_v25  ;;  %v15738_v25 = vld [vmem:[#allocation42_spill] sm:$0xff] }
0x1e42   :  { %12625 = vmatprep.subr.bf16.mxu1 %v15729_v27 }
0x1e44   :  { %10600 = vmatmul.mubr.f32.vlgmr.msra.gmra.mrb[72].mxu1 %v12960_v37 }
0x1e45   :  { %12627 = vmatpush3.bf16.msra.mxu1 %v15730_v53 }
0x1e46   :  { %12629 = vmatprep.subr.bf16.mxu1 %v15731_v58  ;;  %v12718_v58 = vadd.f32 %v15184_v32, %v15476_v47 }
0x1e49   :  { %12631 = vmatpush3.bf16.msra.mxu1 %v15732_v21 }
0x1e4a   :  { %12633 = vmatprep.subr.bf16.mxu1 %v15733_v35 }
0x1e4d   :  { %12635 = vmatpush3.bf16.msra.mxu1 %v15734_v5 }
0x1e4e   :  { %12637 = vmatprep.subr.bf16.mxu1 %v15735_v4 }
0x1e51   :  { %12639 = vmatpush3.bf16.msra.mxu1 %v15736_v12 }
0x1e52   :  { %12641 = vmatprep.subr.bf16.mxu1 %v15737_v9 }
0x1e55   :  { %12643 = vmatpush3.bf16.msra.mxu1 %v15738_v25 }
0x1e56   :  { %12645 = vmatprep.subr.bf16.mxu1 %v15739_v17 }
0x1e59   :  { %12647 = vmatpush3.bf16.msra.mxu1 %v15740_v8 }
0x1e5a   :  { %12649 = vmatprep.subr.bf16.mxu1 %v15741_v13 }
0x1e5d   :  { %12651 = vmatpush3.bf16.msra.mxu1 %v15742_v18 }
0x1e5e   :  { %12653 = vmatprep.subr.bf16.mxu1 %v15743_v22 }
0x1e61   :  { %12655 = vmatpush3.bf16.msra.mxu1 %v15744_v26 }
0x1ed7   :  { %v7321_v30 = vpop.f32.mrb[68].mxu1 }
0x1ed8   :  { %12961 = vrcp.f32 %v7321_v30  ;;  %v10531_v34 = vpop.f32.mrb[69].mxu1 }
0x1ee2   :  { %v12962_v43 = vpop.eup %12961 }
0x1ee3   :  { %v7326_v40 = vmul.f32 %v12962_v43, %v7321_v30 }
0x1ee5   :  { %v7327_v51 = vsub.f32 2.0, %v7326_v40 }
0x1ee7   :  { %v7328_v56 = vmul.f32 %v12962_v43, %v7327_v51 }
0x1ee9   :  { %7331 = vperm.xlu0 %12771, %v7328_v56  }
0x1ef7   :  { %v7406_v63 = vpop.f32.mrb[70].mxu1 }
0x1ef8   :  { %12963 = vrcp.f32 %v7406_v63  ;;  %v10566_v50 = vpop.f32.mrb[71].mxu1 }
0x1f02   :  { %v12964_v6 = vpop.eup %12963 }
0x1f03   :  { %v7411_v52 = vmul.f32 %v12964_v6, %v7406_v63 }
0x1f05   :  { %v7412_v62 = vsub.f32 2.0, %v7411_v52 }
0x1f07   :  { %v7413_v0 = vmul.f32 %v12964_v6, %v7412_v62 }
0x1f09   :  { %7416 = vperm.xlu1 %12772, %v7413_v0  }
0x1f17   :  { %v7491_v15 = vpop.f32.mrb[72].mxu1 }
0x1f18   :  { %12965 = vrcp.f32 %v7491_v15  ;;  %v10601_v16 = vpop.f32.mrb[73].mxu1 }
0x1f22   :  { %v12966_v24 = vpop.eup %12965 }
0x1f23   :  { %v7496_v33 = vmul.f32 %v12966_v24, %v7491_v15 }
0x1f25   :  { %v7497_v42 = vsub.f32 2.0, %v7496_v33 }
0x1f27   :  { %v7498_v48 = vmul.f32 %v12966_v24, %v7497_v42 }
0x1f29   :  { %7501 = vperm.xlu0 %12771, %v7498_v48  }
0x1f2d   :  { %7505 = vmax.xlane.f32.xlu1 %v12722_v46 }
0x1f68   :  { %v7332_v49 = vpop.permute.xlu0 %7331 }
0x1f69   :  { %v7334_v29 = vmul.f32 %v7332_v49, %v7321_v30 }
0x1f6b   :  { %v7590_v2 = vsub.f32 1.0, %v7334_v29 }
0x1f88   :  { %v7417_v19 = vpop.permute.xlu1 %7416 }
0x1f89   :  { %v7419_v7 = vmul.f32 %v7417_v19, %v7406_v63 }
0x1f8b   :  { %v7595_v54 = vmul.f32 %v7590_v2, %v7419_v7 }
0x1f8d   :  { %v7596_v41 = vsub.f32 %v7419_v7, %v7595_v54  ;;  %v7597_v36 = vsub.f32 %v7590_v2, %v7595_v54  ;;  %v7598_v25 = vmul.f32 %v7595_v54, %v15128_v39 }
0x1f8f   :  { %v7601_v18 = vmul.f32 %v7596_v41, %v15128_v39  ;;  %v7605_v22 = vmul.f32 %v7597_v36, %v15128_v39 }
0x1fa8   :  { %v7502_v21 = vpop.permute.xlu0 %7501 }
0x1fa9   :  { %v7504_v35 = vmul.f32 %v7502_v21, %v7491_v15 }
0x1fab   :  { %v7591_v4 = vsub.f32 1.0, %v7504_v35 }
0x1fba   :  { %v7506_v3 = vpop.xlane.xlu1 %7505 }
0x1fbb   :  { %v7507_v11 = vsub.f32 %v12722_v46, %v7506_v3 }
0x1fbd   :  { %v7508_v57 = vmul.f32 1.442695, %v7507_v11 }
0x1fbf   :  { %12967 = vpow2.f32 %v7508_v57 }
0x1fc9   :  { %v12968_v38 = vpop.eup %12967 }
0x1fca   :  { %10635 = vmatmul.mubr.f32.vlgmr.msra.gmra.mrb[68].mxu0 %v12968_v38 }
0x1fcb   :  { %12658 = vmatpush3.bf16.msra.mxu0 %v15746_v59  ;;  %10669 = vmatprep.mubr.msk.f32.mxu0 %vm12984_vm1, %v15409_v61  ;;  %v15752_v61 = vld [vmem:[#allocation45_spill] sm:$0xff] }
0x1fcc   :  { %12659 = vmatprep.subr.bf16.mxu0 %v15407_v55 }
0x1fcf   :  { %12661 = vmatpush3.bf16.msra.mxu0 %v15747_v60 }
0x1fd0   :  { %12662 = vmatprep.subr.bf16.mxu0 %v15407_v55 }
0x1fd3   :  { %12664 = vmatpush3.bf16.msra.mxu0 %v15748_v44 }
0x1fd4   :  { %12665 = vmatprep.subr.bf16.mxu0 %v15407_v55 }
0x1fd7   :  { %12667 = vmatpush3.bf16.msra.mxu0 %v15749_v45 }
0x1fd8   :  { %12668 = vmatprep.subr.bf16.mxu0 %v15407_v55 }
0x1fdb   :  { %12670 = vmatpush3.bf16.msra.mxu0 %v15750_v28 }
0x1fdc   :  { %12671 = vmatprep.subr.bf16.mxu0 %v15407_v55 }
0x1fdf   :  { %12673 = vmatpush3.bf16.msra.mxu0 %v15751_v31 }
0x1fe0   :  { %12674 = vmatprep.subr.bf16.mxu0 %v15407_v55 }
0x1fe3   :  { %12676 = vmatpush3.bf16.msra.mxu0 %v15752_v61 }
0x1fe4   :  { %12677 = vmatprep.subr.bf16.mxu0 %v15407_v55 }
0x1fe7   :  { %12679 = vmatpush3.bf16.msra.mxu0 %v15753_v20 }
0x209d   :  { %v7576_v14 = vpop.f32.mrb[68].mxu0 }
0x209e   :  { %12969 = vrcp.f32 %v7576_v14  ;;  %v10636_v1 = vpop.f32.mrb[69].mxu0 }
0x209f   :  { %12971 = vtanh.f32 %v12718_v58 }
0x20a8   :  { %v12970_v23 = vpop.eup %12969 }
0x20a9   :  { %v7581_v27 = vmul.f32 %v12970_v23, %v7576_v14  ;;  %v12972_v9 = vpop.eup %12971 }
0x20ab   :  { %v7582_v37 = vsub.f32 2.0, %v7581_v27 }
0x20ad   :  { %v7583_v53 = vmul.f32 %v12970_v23, %v7582_v37 }
0x20af   :  { %7586 = vperm.xlu0 %12771, %v7583_v53  }
0x212e   :  { %v7587_v5 = vpop.permute.xlu0 %7586 }
0x212f   :  { %v7589_v12 = vmul.f32 %v7587_v5, %v7576_v14 }
0x2131   :  { %v7592_v55 = vmul.f32 %v7591_v4, %v7589_v12 }
0x2133   :  { %v7593_v17 = vsub.f32 %v7589_v12, %v7592_v55  ;;  %v7594_v8 = vsub.f32 %v7591_v4, %v7592_v55  ;;  %v7599_v13 = vmul.f32 %v12972_v9, %v7592_v55 }
0x2135   :  { %v7602_v26 = vmul.f32 %v12972_v9, %v7593_v17  ;;  %v7606_v30 = vmul.f32 %v12972_v9, %v7594_v8  ;;  %v7600_v47 = vadd.f32 %v7599_v13, %v7598_v25 }
0x2137   :  { %12973 = vtanh.f32 %v7600_v47  ;;  %10670 = vmatmul.mubr.f32.vlgmr.msra.gmra.mrb[70].mxu0 %v7600_v47  ;;  %v7603_v32 = vadd.f32 %v7602_v26, %v7601_v18  ;;  %v7607_v34 = vadd.f32 %v7606_v30, %v7605_v22 }
0x2139   :  { %v7604_v43 = vadd.f32 %v7603_v32, %v7600_v47  ;;  %v7608_v40 = vadd.f32 %v7607_v34, %v7600_v47 }
0x213b   :  { %12975 = vtanh.f32 %v7604_v43  ;;  %7680 = vmatprep.mubr.f32.mxu1 %v7604_v43 }
0x213c   :  { %12977 = vtanh.f32 %v7608_v40  ;;  %7681 = vmatmul.mubr.f32.vlgmr.msra.gmra.mrb[74].mxu1 %v7608_v40 }
0x2141   :  { %v12974_v51 = vpop.eup %12973 }
0x2142   :  { %7815 = vst [vmem:[%s15281_s7 + $0xb8] sm:$0xff] %v12974_v51 }
0x2145   :  { %v12976_v56 = vpop.eup %12975 }
0x2146   :  { %v12978_v39 = vpop.eup %12977  ;;  %7814 = vst [vmem:[%s15281_s7 + $0xb0] sm:$0xff] %v12976_v56 }
0x2147   :  { %7813 = vst [vmem:[%s15281_s7 + $0xa8] sm:$0xff] %v12978_v39 }
0x220a   :  { %v7752_v63 = vpop.f32.mrb[70].mxu0 }
0x220b   :  { %v10671_v50 = vpop.f32.mrb[71].mxu0 }
0x220f   :  { %v8916_v6 = vpop.f32.mrb[74].mxu1 }
0x2210   :  { %v8917_v52 = vpop.f32.mrb[75].mxu1 }

</bundles_post_ra>
